<compile_context>
chip_gen: v5e
topology: v5e:2x2
jax: 0.10.0
libtpu: 0.0.40
codegen_flags: <defaults>
</compile_context>

<pallas_src>
import functools

import numpy as np
import jax
import jax.numpy as jnp
from jax import lax
from jax.experimental import pallas as pl
from jax.experimental.pallas import tpu as pltpu

EPS = 1e-5
KS = 3  # Conv3d kernel size (kernel_size=3, stride=1, padding=1)


# ----------------------------- Pallas kernel -------------------------------


def _conv_stage_kernel(x_ref, scale_ref, shift_ref, w_ref, bias_ref, *rest,
                       D, HWC, has_residual):
    """One fused BN(affine)+ReLU+Conv3d(+bias)(+residual) stage for one sample."""
    if has_residual:
        res_ref, y_ref, st_ref, pad_ref = rest
    else:
        y_ref, st_ref, pad_ref = rest

    # 1) Fused BatchNorm affine + ReLU on the (D, H*W*C) tile; write it into a
    #    depth-padded VMEM scratch (rows 0 and D+1 are the conv's depth zero
    #    padding — spatial H/W padding is baked into the Toeplitz weights).
    act = jnp.maximum(x_ref[0] * scale_ref[...] + shift_ref[...], 0.0)
    pad_ref[0:1, :] = jnp.zeros((1, HWC), jnp.float32)
    pad_ref[D + 1:D + 2, :] = jnp.zeros((1, HWC), jnp.float32)
    pad_ref[1:D + 1, :] = act

    # 2) Conv: kh, kw, Cin folded into the contraction (K = H*W*C) through
    #    Toeplitz bf16 weights; only 3 depth taps.  f32 accumulate on the MXU.
    acc = jnp.dot(pad_ref[0:D, :].astype(jnp.bfloat16), w_ref[0],
                  preferred_element_type=jnp.float32)
    for kd in range(1, KS):
        acc = acc + jnp.dot(pad_ref[kd:kd + D, :].astype(jnp.bfloat16),
                            w_ref[kd], preferred_element_type=jnp.float32)

    y = acc + bias_ref[...]
    if has_residual:
        y = y + res_ref[0]
    y_ref[0] = y

    # 3) Fused partial statistics for the *next* BatchNorm (sum / sum-of-squares
    #    over depth, per lane); finalized by a tiny JAX reduction.
    st_ref[0, 0:1, :] = jnp.sum(y, axis=0, keepdims=True)
    st_ref[0, 1:2, :] = jnp.sum(y * y, axis=0, keepdims=True)


def conv_stage(x, scale_t, shift_t, wt_bf16, bias_t, residual,
               *, N, D, H, W, C):
    """One fused BN+ReLU+Conv3d(+residual) stage.  Returns (y, stats_partials)."""
    HWC = H * W * C

    in_specs = [
        pl.BlockSpec((1, D, HWC), lambda n: (n, 0, 0)),           # activation
        pl.BlockSpec((1, HWC), lambda n: (0, 0)),                 # bn scale
        pl.BlockSpec((1, HWC), lambda n: (0, 0)),                 # bn shift
        pl.BlockSpec((KS, HWC, HWC), lambda n: (0, 0, 0)),        # Toeplitz W
        pl.BlockSpec((1, HWC), lambda n: (0, 0)),                 # conv bias
    ]
    args = [x, scale_t, shift_t, wt_bf16, bias_t]
    has_residual = residual is not None
    if has_residual:
        in_specs.append(pl.BlockSpec((1, D, HWC), lambda n: (n, 0, 0)))
        args.append(residual)

    out_shape = (
        jax.ShapeDtypeStruct((N, D, HWC), jnp.float32),   # conv output
        jax.ShapeDtypeStruct((N, 2, HWC), jnp.float32),   # BN stat partials
    )
    out_specs = (
        pl.BlockSpec((1, D, HWC), lambda n: (n, 0, 0)),
        pl.BlockSpec((1, 2, HWC), lambda n: (n, 0, 0)),
    )

    flops = 2 * N * KS * D * HWC * HWC
    bytes_accessed = (4 * x.size + 2 * wt_bf16.size
                      + 4 * (scale_t.size + shift_t.size + bias_t.size)
                      + 4 * N * D * HWC + 4 * N * 2 * HWC
                      + (4 * residual.size if has_residual else 0))

    kernel = functools.partial(_conv_stage_kernel, D=D, HWC=HWC,
                               has_residual=has_residual)
    return pl.pallas_call(
        kernel,
        out_shape=out_shape,
        grid=(N,),
        in_specs=in_specs,
        out_specs=out_specs,
        scratch_shapes=[pltpu.VMEM((D + 2, HWC), jnp.float32)],   # depth-padded act
        compiler_params=pltpu.CompilerParams(
            dimension_semantics=("parallel",)),
        cost_estimate=pl.CostEstimate(flops=int(flops), transcendentals=0,
                                      bytes_accessed=int(bytes_accessed)),
    )(*args)


# ------------------------------- JAX glue ----------------------------------


def _toeplitz_weights(w, H, W):
    """torch Conv3d weight (Cout,Cin,kd,kh,kw) -> (kd, H*W*Cin, H*W*Cout) bf16.

    kh/kw taps and the spatial zero padding are folded into the matrix, so the
    conv becomes 3 dense matmuls over the unpadded channels-last activation.
    """
    Cout, Cin = int(w.shape[0]), int(w.shape[1])
    wt = jnp.transpose(w, (2, 3, 4, 1, 0))            # (kd, kh, kw, ci, co)
    ind = np.zeros((KS, KS, H, W, H, W), np.float32)  # (kh, kw, hi, wi, ho, wo)
    for kh in range(KS):
        for kw in range(KS):
            for ho in range(H):
                hi = ho + kh - 1
                if hi < 0 or hi >= H:
                    continue
                for wo in range(W):
                    wi = wo + kw - 1
                    if 0 <= wi < W:
                        ind[kh, kw, hi, wi, ho, wo] = 1.0
    big = jnp.einsum("khwio,hwABCD->kABiCDo", wt, jnp.asarray(ind))
    return big.reshape(KS, H * W * Cin, H * W * Cout).astype(jnp.bfloat16)


def prepare_params(params, H, W):
    """Hoist Toeplitz weight construction and bias tiling out of the hot path."""
    prepped = []
    for blk in params:
        prepped.append(dict(
            g1=blk["g1"], b1=blk["b1"],
            w1t=_toeplitz_weights(blk["w1"], H, W),
            c1bt=jnp.tile(blk["c1b"], H * W)[None, :].astype(jnp.float32),
            g2=blk["g2"], b2=blk["b2"],
            w2t=_toeplitz_weights(blk["w2"], H, W),
            c2bt=jnp.tile(blk["c2b"], H * W)[None, :].astype(jnp.float32),
        ))
    return prepped


def _affine_from_stats(s, q, count, gamma, beta, HW):
    """Training-mode BN: per-channel scale/shift, tiled across H*W lane groups."""
    mean = s / count
    # NOTE: E[x^2]-E[x]^2 in f32; fine at these scales, but a centered two-pass
    # formulation would be safer for very deep stacks / large means.
    var = q / count - mean * mean
    scale = gamma * lax.rsqrt(var + EPS)
    shift = beta - mean * scale
    return (jnp.tile(scale, HW)[None, :].astype(jnp.float32),
            jnp.tile(shift, HW)[None, :].astype(jnp.float32))


def _finalize_stats(st, H, W, C):
    s = st[:, 0, :].sum(axis=0).reshape(H * W, C).sum(axis=0)
    q = st[:, 1, :].sum(axis=0).reshape(H * W, C).sum(axis=0)
    return s, q


def cleaning_backbone_forward(x_ncdhw, prepped):
    N, C, D, H, W = x_ncdhw.shape
    HWC = H * W * C
    x = jnp.transpose(x_ncdhw, (0, 2, 3, 4, 1)).reshape(N, D, HWC)
    x = x.astype(jnp.float32)
    count = float(N * D * H * W)

    # BN stats of the raw network input: one tiny plain-JAX reduction.  Every
    # subsequent BN gets its stats for free from the previous conv epilogue.
    s = x.sum(axis=(0, 1)).reshape(H * W, C).sum(axis=0)
    q = (x * x).sum(axis=(0, 1)).reshape(H * W, C).sum(axis=0)

    for blk in prepped:
        residual = x
        # --- bn1 + relu + conv1 (+ bn2 partial stats), one fused kernel ---
        sc1, sh1 = _affine_from_stats(s, q, count, blk["g1"], blk["b1"], H * W)
        y1, st1 = conv_stage(x, sc1, sh1, blk["w1t"], blk["c1bt"], None,
                             N=N, D=D, H=H, W=W, C=C)
        s, q = _finalize_stats(st1, H, W, C)
        # --- bn2 + relu + conv2 + residual (+ next bn1 partial stats), fused ---
        sc2, sh2 = _affine_from_stats(s, q, count, blk["g2"], blk["b2"], H * W)
        y2, st2 = conv_stage(y1, sc2, sh2, blk["w2t"], blk["c2bt"], residual,
                             N=N, D=D, H=H, W=W, C=C)
        x = y2
        s, q = _finalize_stats(st2, H, W, C)

    return x.reshape(N, D, H, W, C).transpose(0, 4, 1, 2, 3)  # back to NCDHW


# ------------------------- deterministic parameters -------------------------


def init_params(key, num_blocks, C):
    params = []
    fan_in = C * KS ** 3
    bound = 1.0 / (fan_in ** 0.5)
    for _ in range(num_blocks):
        key, k1, k2, k3, k4 = jax.random.split(key, 5)
        params.append(dict(
            g1=jnp.ones((C,), jnp.float32),
            b1=jnp.zeros((C,), jnp.float32),
            w1=jax.random.uniform(k1, (C, C, KS, KS, KS), jnp.float32,
                                  -bound, bound),
            c1b=jax.random.uniform(k2, (C,), jnp.float32, -bound, bound),
            g2=jnp.ones((C,), jnp.float32),
            b2=jnp.zeros((C,), jnp.float32),
            w2=jax.random.uniform(k3, (C, C, KS, KS, KS), jnp.float32,
                                  -bound, bound),
            c2b=jax.random.uniform(k4, (C,), jnp.float32, -bound, bound),
        ))
    return params


# -------------------------- pure-JAX reference ------------------------------


def _reference_forward(x, params):
    def bn(t, g, b):
        mean = t.mean(axis=(0, 2, 3, 4), keepdims=True)
        var = ((t - mean) ** 2).mean(axis=(0, 2, 3, 4), keepdims=True)
        return ((t - mean) * lax.rsqrt(var + EPS)
                * g.reshape(1, -1, 1, 1, 1) + b.reshape(1, -1, 1, 1, 1))

    def conv(t, w, b):
        y = lax.conv_general_dilated(
            t, w, (1, 1, 1), [(1, 1)] * 3,
            dimension_numbers=("NCDHW", "OIDHW", "NCDHW"),
            precision=lax.Precision.HIGHEST)
        return y + b.reshape(1, -1, 1, 1, 1)

    for blk in params:
        r = x
        y = jnp.maximum(bn(x, blk["g1"], blk["b1"]), 0.0)
        y = conv(y, blk["w1"], blk["c1b"])
        y = jnp.maximum(bn(y, blk["g2"], blk["b2"]), 0.0)
        y = conv(y, blk["w2"], blk["c2b"])
        x = y + r
    return x


# --------------------------------- main --------------------------------------


if __name__ == "__main__":
    num_cleaning_blocks = 2
    N, C, D, H, W = 2, 8, 8, 8, 8  # NCDHW (torch Conv3d convention)

    key = jax.random.PRNGKey(0)
    key, kx, kp = jax.random.split(key, 3)
    x = jax.random.normal(kx, (N, C, D, H, W), jnp.float32)
    params = init_params(kp, num_cleaning_blocks, C)

    # Toeplitz weights / tiled biases built once, outside the jitted forward.
    prepped = prepare_params(params, H, W)

    fwd = jax.jit(cleaning_backbone_forward)
    out = jax.block_until_ready(fwd(x, prepped))

    assert out.shape == (N, C, D, H, W), out.shape
    ref = _reference_forward(x, params)
    # bf16 MXU operands (f32 accumulate) => slightly looser tolerance than pure f32.
    assert jnp.allclose(out, ref, rtol=2e-2, atol=2e-2), (
        float(jnp.max(jnp.abs(out - ref))))

    print("KERNEL_OK")
</pallas_src>

<mosaic_0001>
module attributes {stable_mosaic.version = 11 : i64} {
  func.func @_conv_stage_kernel(%arg0: i32, %arg1: memref<1x8x512xf32, #tpu.memory_space<vmem>>, %arg2: memref<1x512xf32, #tpu.memory_space<vmem>>, %arg3: memref<1x512xf32, #tpu.memory_space<vmem>>, %arg4: memref<3x512x512xbf16, #tpu.memory_space<vmem>>, %arg5: memref<1x512xf32, #tpu.memory_space<vmem>>, %arg6: memref<1x8x512xf32, #tpu.memory_space<vmem>>, %arg7: memref<1x2x512xf32, #tpu.memory_space<vmem>>, %arg8: memref<10x512xf32, #tpu.memory_space<vmem>>) attributes {dimension_semantics = [#tpu.dimension_semantics<parallel>], iteration_bounds = array<i64: 2>, scalar_prefetch = 0 : i64, scratch_operands = 1 : i64, tpu.core_type = #tpu.core_type<tc>, window_params = [{transform_indices = @transform_0, window_bounds = array<i64: 1, 8, 512>}, {pipeline_mode = #tpu.pipeline_mode<synchronous>, transform_indices = @transform_1, window_bounds = array<i64: 1, 512>}, {pipeline_mode = #tpu.pipeline_mode<synchronous>, transform_indices = @transform_2, window_bounds = array<i64: 1, 512>}, {pipeline_mode = #tpu.pipeline_mode<synchronous>, transform_indices = @transform_3, window_bounds = array<i64: 3, 512, 512>}, {pipeline_mode = #tpu.pipeline_mode<synchronous>, transform_indices = @transform_4, window_bounds = array<i64: 1, 512>}, {transform_indices = @transform_5, window_bounds = array<i64: 1, 8, 512>}, {transform_indices = @transform_6, window_bounds = array<i64: 1, 2, 512>}]} {
    %c0 = arith.constant 0 : index
    %c0_0 = arith.constant 0 : index
    %c0_1 = arith.constant 0 : index
    %0 = vector.load %arg1[%c0, %c0_0, %c0_1] : memref<1x8x512xf32, #tpu.memory_space<vmem>>, vector<1x8x512xf32>
    %1 = vector.shape_cast %0 : vector<1x8x512xf32> to vector<8x512xf32>
    %c0_2 = arith.constant 0 : index
    %c0_3 = arith.constant 0 : index
    %2 = vector.load %arg2[%c0_2, %c0_3] : memref<1x512xf32, #tpu.memory_space<vmem>>, vector<1x512xf32>
    %3 = vector.broadcast %2 : vector<1x512xf32> to vector<8x512xf32>
    %4 = arith.mulf %1, %3 : vector<8x512xf32>
    %c0_4 = arith.constant 0 : index
    %c0_5 = arith.constant 0 : index
    %5 = vector.load %arg3[%c0_4, %c0_5] : memref<1x512xf32, #tpu.memory_space<vmem>>, vector<1x512xf32>
    %6 = vector.broadcast %5 : vector<1x512xf32> to vector<8x512xf32>
    %7 = arith.addf %4, %6 : vector<8x512xf32>
    %cst = arith.constant 0.000000e+00 : f32
    %8 = vector.broadcast %cst : f32 to vector<8x512xf32>
    %9 = arith.maximumf %7, %8 : vector<8x512xf32>
    %cst_6 = arith.constant 0.000000e+00 : f32
    %10 = vector.broadcast %cst_6 : f32 to vector<1x512xf32>
    %c0_7 = arith.constant 0 : index
    %c0_8 = arith.constant 0 : index
    %11 = vector.load %arg8[%c0_7, %c0_8] : memref<10x512xf32, #tpu.memory_space<vmem>>, vector<1x512xf32>
    tpu.vector_store %arg8[%c0_7, %c0_8], %10 {strides = array<i32>} : memref<10x512xf32, #tpu.memory_space<vmem>>, vector<1x512xf32>,
    %cst_9 = arith.constant 0.000000e+00 : f32
    %12 = vector.broadcast %cst_9 : f32 to vector<1x512xf32>
    %c9 = arith.constant 9 : index
    %c0_10 = arith.constant 0 : index
    %13 = vector.load %arg8[%c9, %c0_10] : memref<10x512xf32, #tpu.memory_space<vmem>>, vector<1x512xf32>
    tpu.vector_store %arg8[%c9, %c0_10], %12 {strides = array<i32>} : memref<10x512xf32, #tpu.memory_space<vmem>>, vector<1x512xf32>,
    %c1 = arith.constant 1 : index
    %c0_11 = arith.constant 0 : index
    %14 = vector.load %arg8[%c1, %c0_11] : memref<10x512xf32, #tpu.memory_space<vmem>>, vector<8x512xf32>
    tpu.vector_store %arg8[%c1, %c0_11], %9 {strides = array<i32>} : memref<10x512xf32, #tpu.memory_space<vmem>>, vector<8x512xf32>,
    %c0_12 = arith.constant 0 : index
    %c0_13 = arith.constant 0 : index
    %15 = vector.load %arg8[%c0_12, %c0_13] : memref<10x512xf32, #tpu.memory_space<vmem>>, vector<8x512xf32>
    %16 = arith.truncf %15 : vector<8x512xf32> to vector<8x512xbf16>
    %c0_14 = arith.constant 0 : index
    %c0_15 = arith.constant 0 : index
    %c0_16 = arith.constant 0 : index
    %17 = vector.load %arg4[%c0_14, %c0_15, %c0_16] : memref<3x512x512xbf16, #tpu.memory_space<vmem>>, vector<1x512x512xbf16>
    %18 = vector.shape_cast %17 : vector<1x512x512xbf16> to vector<512x512xbf16>
    %cst_17 = arith.constant dense<0.000000e+00> : vector<8x512xf32>
    %19 = tpu.matmul %16, %18, %cst_17 {dimension_numbers = #tpu.dot_dimension_numbers<[1], [0], [0], [1], [0, 0, 1, 1], [], []>} : vector<8x512xbf16>, vector<512x512xbf16>, vector<8x512xf32> -> vector<8x512xf32>
    %c1_18 = arith.constant 1 : index
    %c0_19 = arith.constant 0 : index
    %20 = vector.load %arg8[%c1_18, %c0_19] : memref<10x512xf32, #tpu.memory_space<vmem>>, vector<8x512xf32>
    %21 = arith.truncf %20 : vector<8x512xf32> to vector<8x512xbf16>
    %c1_20 = arith.constant 1 : index
    %c0_21 = arith.constant 0 : index
    %c0_22 = arith.constant 0 : index
    %22 = vector.load %arg4[%c1_20, %c0_21, %c0_22] : memref<3x512x512xbf16, #tpu.memory_space<vmem>>, vector<1x512x512xbf16>
    %23 = vector.shape_cast %22 : vector<1x512x512xbf16> to vector<512x512xbf16>
    %cst_23 = arith.constant dense<0.000000e+00> : vector<8x512xf32>
    %24 = tpu.matmul %21, %23, %cst_23 {dimension_numbers = #tpu.dot_dimension_numbers<[1], [0], [0], [1], [0, 0, 1, 1], [], []>} : vector<8x512xbf16>, vector<512x512xbf16>, vector<8x512xf32> -> vector<8x512xf32>
    %25 = arith.addf %19, %24 : vector<8x512xf32>
    %c2 = arith.constant 2 : index
    %c0_24 = arith.constant 0 : index
    %26 = vector.load %arg8[%c2, %c0_24] : memref<10x512xf32, #tpu.memory_space<vmem>>, vector<8x512xf32>
    %27 = arith.truncf %26 : vector<8x512xf32> to vector<8x512xbf16>
    %c2_25 = arith.constant 2 : index
    %c0_26 = arith.constant 0 : index
    %c0_27 = arith.constant 0 : index
    %28 = vector.load %arg4[%c2_25, %c0_26, %c0_27] : memref<3x512x512xbf16, #tpu.memory_space<vmem>>, vector<1x512x512xbf16>
    %29 = vector.shape_cast %28 : vector<1x512x512xbf16> to vector<512x512xbf16>
    %cst_28 = arith.constant dense<0.000000e+00> : vector<8x512xf32>
    %30 = tpu.matmul %27, %29, %cst_28 {dimension_numbers = #tpu.dot_dimension_numbers<[1], [0], [0], [1], [0, 0, 1, 1], [], []>} : vector<8x512xbf16>, vector<512x512xbf16>, vector<8x512xf32> -> vector<8x512xf32>
    %31 = arith.addf %25, %30 : vector<8x512xf32>
    %c0_29 = arith.constant 0 : index
    %c0_30 = arith.constant 0 : index
    %32 = vector.load %arg5[%c0_29, %c0_30] : memref<1x512xf32, #tpu.memory_space<vmem>>, vector<1x512xf32>
    %33 = vector.broadcast %32 : vector<1x512xf32> to vector<8x512xf32>
    %34 = arith.addf %31, %33 : vector<8x512xf32>
    %c0_31 = arith.constant 0 : index
    %c0_32 = arith.constant 0 : index
    %c0_33 = arith.constant 0 : index
    %35 = vector.load %arg6[%c0_31, %c0_32, %c0_33] : memref<1x8x512xf32, #tpu.memory_space<vmem>>, vector<1x8x512xf32>
    %36 = vector.shape_cast %35 : vector<1x8x512xf32> to vector<8x512xf32>
    %37 = vector.shape_cast %34 : vector<8x512xf32> to vector<1x8x512xf32>
    tpu.vector_store %arg6[%c0_31, %c0_32, %c0_33], %37 {strides = array<i32>} : memref<1x8x512xf32, #tpu.memory_space<vmem>>, vector<1x8x512xf32>,
    %cst_34 = arith.constant dense<0.000000e+00> : vector<512xf32>
    %38 = vector.multi_reduction <add>, %34, %cst_34 [0] : vector<8x512xf32> to vector<512xf32>
    %39 = vector.shape_cast %38 : vector<512xf32> to vector<1x512xf32>
    %c0_35 = arith.constant 0 : index
    %c0_36 = arith.constant 0 : index
    %c0_37 = arith.constant 0 : index
    %40 = vector.load %arg7[%c0_35, %c0_36, %c0_37] : memref<1x2x512xf32, #tpu.memory_space<vmem>>, vector<1x1x512xf32>
    %41 = vector.shape_cast %40 : vector<1x1x512xf32> to vector<1x512xf32>
    %42 = vector.shape_cast %39 : vector<1x512xf32> to vector<1x1x512xf32>
    tpu.vector_store %arg7[%c0_35, %c0_36, %c0_37], %42 {strides = array<i32>} : memref<1x2x512xf32, #tpu.memory_space<vmem>>, vector<1x1x512xf32>,
    %43 = arith.mulf %34, %34 : vector<8x512xf32>
    %cst_38 = arith.constant dense<0.000000e+00> : vector<512xf32>
    %44 = vector.multi_reduction <add>, %43, %cst_38 [0] : vector<8x512xf32> to vector<512xf32>
    %45 = vector.shape_cast %44 : vector<512xf32> to vector<1x512xf32>
    %c0_39 = arith.constant 0 : index
    %c1_40 = arith.constant 1 : index
    %c0_41 = arith.constant 0 : index
    %46 = vector.load %arg7[%c0_39, %c1_40, %c0_41] : memref<1x2x512xf32, #tpu.memory_space<vmem>>, vector<1x1x512xf32>
    %47 = vector.shape_cast %46 : vector<1x1x512xf32> to vector<1x512xf32>
    %48 = vector.shape_cast %45 : vector<1x512xf32> to vector<1x1x512xf32>
    tpu.vector_store %arg7[%c0_39, %c1_40, %c0_41], %48 {strides = array<i32>} : memref<1x2x512xf32, #tpu.memory_space<vmem>>, vector<1x1x512xf32>,
    return
  }
  func.func @transform_0(%arg0: i32) -> (i32, i32, i32) {
    %c0_i32 = arith.constant 0 : i32
    %c0_i32_0 = arith.constant 0 : i32
    %c0_i32_1 = arith.constant 0 : i32
    return %arg0, %c0_i32, %c0_i32_0 : i32, i32, i32
  }
  func.func @transform_1(%arg0: i32) -> (i32, i32) {
    %c0_i32 = arith.constant 0 : i32
    %c0_i32_0 = arith.constant 0 : i32
    %c0_i32_1 = arith.constant 0 : i32
    return %c0_i32, %c0_i32_0 : i32, i32
  }
  func.func @transform_2(%arg0: i32) -> (i32, i32) {
    %c0_i32 = arith.constant 0 : i32
    %c0_i32_0 = arith.constant 0 : i32
    %c0_i32_1 = arith.constant 0 : i32
    return %c0_i32, %c0_i32_0 : i32, i32
  }
  func.func @transform_3(%arg0: i32) -> (i32, i32, i32) {
    %c0_i32 = arith.constant 0 : i32
    %c0_i32_0 = arith.constant 0 : i32
    %c0_i32_1 = arith.constant 0 : i32
    %c0_i32_2 = arith.constant 0 : i32
    return %c0_i32, %c0_i32_0, %c0_i32_1 : i32, i32, i32
  }
  func.func @transform_4(%arg0: i32) -> (i32, i32) {
    %c0_i32 = arith.constant 0 : i32
    %c0_i32_0 = arith.constant 0 : i32
    %c0_i32_1 = arith.constant 0 : i32
    return %c0_i32, %c0_i32_0 : i32, i32
  }
  func.func @transform_5(%arg0: i32) -> (i32, i32, i32) {
    %c0_i32 = arith.constant 0 : i32
    %c0_i32_0 = arith.constant 0 : i32
    %c0_i32_1 = arith.constant 0 : i32
    return %arg0, %c0_i32, %c0_i32_0 : i32, i32, i32
  }
  func.func @transform_6(%arg0: i32) -> (i32, i32, i32) {
    %c0_i32 = arith.constant 0 : i32
    %c0_i32_0 = arith.constant 0 : i32
    %c0_i32_1 = arith.constant 0 : i32
    return %arg0, %c0_i32, %c0_i32_0 : i32, i32, i32
  }
}

module attributes {stable_mosaic.version = 11 : i64} {
  func.func @_conv_stage_kernel(%arg0: i32, %arg1: memref<1x8x512xf32, #tpu.memory_space<vmem>>, %arg2: memref<1x512xf32, #tpu.memory_space<vmem>>, %arg3: memref<1x512xf32, #tpu.memory_space<vmem>>, %arg4: memref<3x512x512xbf16, #tpu.memory_space<vmem>>, %arg5: memref<1x512xf32, #tpu.memory_space<vmem>>, %arg6: memref<1x8x512xf32, #tpu.memory_space<vmem>>, %arg7: memref<1x8x512xf32, #tpu.memory_space<vmem>>, %arg8: memref<1x2x512xf32, #tpu.memory_space<vmem>>, %arg9: memref<10x512xf32, #tpu.memory_space<vmem>>) attributes {dimension_semantics = [#tpu.dimension_semantics<parallel>], iteration_bounds = array<i64: 2>, scalar_prefetch = 0 : i64, scratch_operands = 1 : i64, tpu.core_type = #tpu.core_type<tc>, window_params = [{transform_indices = @transform_0, window_bounds = array<i64: 1, 8, 512>}, {pipeline_mode = #tpu.pipeline_mode<synchronous>, transform_indices = @transform_1, window_bounds = array<i64: 1, 512>}, {pipeline_mode = #tpu.pipeline_mode<synchronous>, transform_indices = @transform_2, window_bounds = array<i64: 1, 512>}, {pipeline_mode = #tpu.pipeline_mode<synchronous>, transform_indices = @transform_3, window_bounds = array<i64: 3, 512, 512>}, {pipeline_mode = #tpu.pipeline_mode<synchronous>, transform_indices = @transform_4, window_bounds = array<i64: 1, 512>}, {transform_indices = @transform_5, window_bounds = array<i64: 1, 8, 512>}, {transform_indices = @transform_6, window_bounds = array<i64: 1, 8, 512>}, {transform_indices = @transform_7, window_bounds = array<i64: 1, 2, 512>}]} {
    %c0 = arith.constant 0 : index
    %c0_0 = arith.constant 0 : index
    %c0_1 = arith.constant 0 : index
    %0 = vector.load %arg1[%c0, %c0_0, %c0_1] : memref<1x8x512xf32, #tpu.memory_space<vmem>>, vector<1x8x512xf32>
    %1 = vector.shape_cast %0 : vector<1x8x512xf32> to vector<8x512xf32>
    %c0_2 = arith.constant 0 : index
    %c0_3 = arith.constant 0 : index
    %2 = vector.load %arg2[%c0_2, %c0_3] : memref<1x512xf32, #tpu.memory_space<vmem>>, vector<1x512xf32>
    %3 = vector.broadcast %2 : vector<1x512xf32> to vector<8x512xf32>
    %4 = arith.mulf %1, %3 : vector<8x512xf32>
    %c0_4 = arith.constant 0 : index
    %c0_5 = arith.constant 0 : index
    %5 = vector.load %arg3[%c0_4, %c0_5] : memref<1x512xf32, #tpu.memory_space<vmem>>, vector<1x512xf32>
    %6 = vector.broadcast %5 : vector<1x512xf32> to vector<8x512xf32>
    %7 = arith.addf %4, %6 : vector<8x512xf32>
    %cst = arith.constant 0.000000e+00 : f32
    %8 = vector.broadcast %cst : f32 to vector<8x512xf32>
    %9 = arith.maximumf %7, %8 : vector<8x512xf32>
    %cst_6 = arith.constant 0.000000e+00 : f32
    %10 = vector.broadcast %cst_6 : f32 to vector<1x512xf32>
    %c0_7 = arith.constant 0 : index
    %c0_8 = arith.constant 0 : index
    %11 = vector.load %arg9[%c0_7, %c0_8] : memref<10x512xf32, #tpu.memory_space<vmem>>, vector<1x512xf32>
    tpu.vector_store %arg9[%c0_7, %c0_8], %10 {strides = array<i32>} : memref<10x512xf32, #tpu.memory_space<vmem>>, vector<1x512xf32>,
    %cst_9 = arith.constant 0.000000e+00 : f32
    %12 = vector.broadcast %cst_9 : f32 to vector<1x512xf32>
    %c9 = arith.constant 9 : index
    %c0_10 = arith.constant 0 : index
    %13 = vector.load %arg9[%c9, %c0_10] : memref<10x512xf32, #tpu.memory_space<vmem>>, vector<1x512xf32>
    tpu.vector_store %arg9[%c9, %c0_10], %12 {strides = array<i32>} : memref<10x512xf32, #tpu.memory_space<vmem>>, vector<1x512xf32>,
    %c1 = arith.constant 1 : index
    %c0_11 = arith.constant 0 : index
    %14 = vector.load %arg9[%c1, %c0_11] : memref<10x512xf32, #tpu.memory_space<vmem>>, vector<8x512xf32>
    tpu.vector_store %arg9[%c1, %c0_11], %9 {strides = array<i32>} : memref<10x512xf32, #tpu.memory_space<vmem>>, vector<8x512xf32>,
    %c0_12 = arith.constant 0 : index
    %c0_13 = arith.constant 0 : index
    %15 = vector.load %arg9[%c0_12, %c0_13] : memref<10x512xf32, #tpu.memory_space<vmem>>, vector<8x512xf32>
    %16 = arith.truncf %15 : vector<8x512xf32> to vector<8x512xbf16>
    %c0_14 = arith.constant 0 : index
    %c0_15 = arith.constant 0 : index
    %c0_16 = arith.constant 0 : index
    %17 = vector.load %arg4[%c0_14, %c0_15, %c0_16] : memref<3x512x512xbf16, #tpu.memory_space<vmem>>, vector<1x512x512xbf16>
    %18 = vector.shape_cast %17 : vector<1x512x512xbf16> to vector<512x512xbf16>
    %cst_17 = arith.constant dense<0.000000e+00> : vector<8x512xf32>
    %19 = tpu.matmul %16, %18, %cst_17 {dimension_numbers = #tpu.dot_dimension_numbers<[1], [0], [0], [1], [0, 0, 1, 1], [], []>} : vector<8x512xbf16>, vector<512x512xbf16>, vector<8x512xf32> -> vector<8x512xf32>
    %c1_18 = arith.constant 1 : index
    %c0_19 = arith.constant 0 : index
    %20 = vector.load %arg9[%c1_18, %c0_19] : memref<10x512xf32, #tpu.memory_space<vmem>>, vector<8x512xf32>
    %21 = arith.truncf %20 : vector<8x512xf32> to vector<8x512xbf16>
    %c1_20 = arith.constant 1 : index
    %c0_21 = arith.constant 0 : index
    %c0_22 = arith.constant 0 : index
    %22 = vector.load %arg4[%c1_20, %c0_21, %c0_22] : memref<3x512x512xbf16, #tpu.memory_space<vmem>>, vector<1x512x512xbf16>
    %23 = vector.shape_cast %22 : vector<1x512x512xbf16> to vector<512x512xbf16>
    %cst_23 = arith.constant dense<0.000000e+00> : vector<8x512xf32>
    %24 = tpu.matmul %21, %23, %cst_23 {dimension_numbers = #tpu.dot_dimension_numbers<[1], [0], [0], [1], [0, 0, 1, 1], [], []>} : vector<8x512xbf16>, vector<512x512xbf16>, vector<8x512xf32> -> vector<8x512xf32>
    %25 = arith.addf %19, %24 : vector<8x512xf32>
    %c2 = arith.constant 2 : index
    %c0_24 = arith.constant 0 : index
    %26 = vector.load %arg9[%c2, %c0_24] : memref<10x512xf32, #tpu.memory_space<vmem>>, vector<8x512xf32>
    %27 = arith.truncf %26 : vector<8x512xf32> to vector<8x512xbf16>
    %c2_25 = arith.constant 2 : index
    %c0_26 = arith.constant 0 : index
    %c0_27 = arith.constant 0 : index
    %28 = vector.load %arg4[%c2_25, %c0_26, %c0_27] : memref<3x512x512xbf16, #tpu.memory_space<vmem>>, vector<1x512x512xbf16>
    %29 = vector.shape_cast %28 : vector<1x512x512xbf16> to vector<512x512xbf16>
    %cst_28 = arith.constant dense<0.000000e+00> : vector<8x512xf32>
    %30 = tpu.matmul %27, %29, %cst_28 {dimension_numbers = #tpu.dot_dimension_numbers<[1], [0], [0], [1], [0, 0, 1, 1], [], []>} : vector<8x512xbf16>, vector<512x512xbf16>, vector<8x512xf32> -> vector<8x512xf32>
    %31 = arith.addf %25, %30 : vector<8x512xf32>
    %c0_29 = arith.constant 0 : index
    %c0_30 = arith.constant 0 : index
    %32 = vector.load %arg5[%c0_29, %c0_30] : memref<1x512xf32, #tpu.memory_space<vmem>>, vector<1x512xf32>
    %33 = vector.broadcast %32 : vector<1x512xf32> to vector<8x512xf32>
    %34 = arith.addf %31, %33 : vector<8x512xf32>
    %c0_31 = arith.constant 0 : index
    %c0_32 = arith.constant 0 : index
    %c0_33 = arith.constant 0 : index
    %35 = vector.load %arg6[%c0_31, %c0_32, %c0_33] : memref<1x8x512xf32, #tpu.memory_space<vmem>>, vector<1x8x512xf32>
    %36 = vector.shape_cast %35 : vector<1x8x512xf32> to vector<8x512xf32>
    %37 = arith.addf %34, %36 : vector<8x512xf32>
    %c0_34 = arith.constant 0 : index
    %c0_35 = arith.constant 0 : index
    %c0_36 = arith.constant 0 : index
    %38 = vector.load %arg7[%c0_34, %c0_35, %c0_36] : memref<1x8x512xf32, #tpu.memory_space<vmem>>, vector<1x8x512xf32>
    %39 = vector.shape_cast %38 : vector<1x8x512xf32> to vector<8x512xf32>
    %40 = vector.shape_cast %37 : vector<8x512xf32> to vector<1x8x512xf32>
    tpu.vector_store %arg7[%c0_34, %c0_35, %c0_36], %40 {strides = array<i32>} : memref<1x8x512xf32, #tpu.memory_space<vmem>>, vector<1x8x512xf32>,
    %cst_37 = arith.constant dense<0.000000e+00> : vector<512xf32>
    %41 = vector.multi_reduction <add>, %37, %cst_37 [0] : vector<8x512xf32> to vector<512xf32>
    %42 = vector.shape_cast %41 : vector<512xf32> to vector<1x512xf32>
    %c0_38 = arith.constant 0 : index
    %c0_39 = arith.constant 0 : index
    %c0_40 = arith.constant 0 : index
    %43 = vector.load %arg8[%c0_38, %c0_39, %c0_40] : memref<1x2x512xf32, #tpu.memory_space<vmem>>, vector<1x1x512xf32>
    %44 = vector.shape_cast %43 : vector<1x1x512xf32> to vector<1x512xf32>
    %45 = vector.shape_cast %42 : vector<1x512xf32> to vector<1x1x512xf32>
    tpu.vector_store %arg8[%c0_38, %c0_39, %c0_40], %45 {strides = array<i32>} : memref<1x2x512xf32, #tpu.memory_space<vmem>>, vector<1x1x512xf32>,
    %46 = arith.mulf %37, %37 : vector<8x512xf32>
    %cst_41 = arith.constant dense<0.000000e+00> : vector<512xf32>
    %47 = vector.multi_reduction <add>, %46, %cst_41 [0] : vector<8x512xf32> to vector<512xf32>
    %48 = vector.shape_cast %47 : vector<512xf32> to vector<1x512xf32>
    %c0_42 = arith.constant 0 : index
    %c1_43 = arith.constant 1 : index
    %c0_44 = arith.constant 0 : index
    %49 = vector.load %arg8[%c0_42, %c1_43, %c0_44] : memref<1x2x512xf32, #tpu.memory_space<vmem>>, vector<1x1x512xf32>
    %50 = vector.shape_cast %49 : vector<1x1x512xf32> to vector<1x512xf32>
    %51 = vector.shape_cast %48 : vector<1x512xf32> to vector<1x1x512xf32>
    tpu.vector_store %arg8[%c0_42, %c1_43, %c0_44], %51 {strides = array<i32>} : memref<1x2x512xf32, #tpu.memory_space<vmem>>, vector<1x1x512xf32>,
    return
  }
  func.func @transform_0(%arg0: i32) -> (i32, i32, i32) {
    %c0_i32 = arith.constant 0 : i32
    %c0_i32_0 = arith.constant 0 : i32
    %c0_i32_1 = arith.constant 0 : i32
    return %arg0, %c0_i32, %c0_i32_0 : i32, i32, i32
  }
  func.func @transform_1(%arg0: i32) -> (i32, i32) {
    %c0_i32 = arith.constant 0 : i32
    %c0_i32_0 = arith.constant 0 : i32
    %c0_i32_1 = arith.constant 0 : i32
    return %c0_i32, %c0_i32_0 : i32, i32
  }
  func.func @transform_2(%arg0: i32) -> (i32, i32) {
    %c0_i32 = arith.constant 0 : i32
    %c0_i32_0 = arith.constant 0 : i32
    %c0_i32_1 = arith.constant 0 : i32
    return %c0_i32, %c0_i32_0 : i32, i32
  }
  func.func @transform_3(%arg0: i32) -> (i32, i32, i32) {
    %c0_i32 = arith.constant 0 : i32
    %c0_i32_0 = arith.constant 0 : i32
    %c0_i32_1 = arith.constant 0 : i32
    %c0_i32_2 = arith.constant 0 : i32
    return %c0_i32, %c0_i32_0, %c0_i32_1 : i32, i32, i32
  }
  func.func @transform_4(%arg0: i32) -> (i32, i32) {
    %c0_i32 = arith.constant 0 : i32
    %c0_i32_0 = arith.constant 0 : i32
    %c0_i32_1 = arith.constant 0 : i32
    return %c0_i32, %c0_i32_0 : i32, i32
  }
  func.func @transform_5(%arg0: i32) -> (i32, i32, i32) {
    %c0_i32 = arith.constant 0 : i32
    %c0_i32_0 = arith.constant 0 : i32
    %c0_i32_1 = arith.constant 0 : i32
    return %arg0, %c0_i32, %c0_i32_0 : i32, i32, i32
  }
  func.func @transform_6(%arg0: i32) -> (i32, i32, i32) {
    %c0_i32 = arith.constant 0 : i32
    %c0_i32_0 = arith.constant 0 : i32
    %c0_i32_1 = arith.constant 0 : i32
    return %arg0, %c0_i32, %c0_i32_0 : i32, i32, i32
  }
  func.func @transform_7(%arg0: i32) -> (i32, i32, i32) {
    %c0_i32 = arith.constant 0 : i32
    %c0_i32_0 = arith.constant 0 : i32
    %c0_i32_1 = arith.constant 0 : i32
    return %arg0, %c0_i32, %c0_i32_0 : i32, i32, i32
  }
}

module attributes {stable_mosaic.version = 11 : i64} {
  func.func @_conv_stage_kernel(%arg0: i32, %arg1: memref<1x8x512xf32, #tpu.memory_space<vmem>>, %arg2: memref<1x512xf32, #tpu.memory_space<vmem>>, %arg3: memref<1x512xf32, #tpu.memory_space<vmem>>, %arg4: memref<3x512x512xbf16, #tpu.memory_space<vmem>>, %arg5: memref<1x512xf32, #tpu.memory_space<vmem>>, %arg6: memref<1x8x512xf32, #tpu.memory_space<vmem>>, %arg7: memref<1x8x512xf32, #tpu.memory_space<vmem>>, %arg8: memref<1x2x512xf32, #tpu.memory_space<vmem>>, %arg9: memref<10x512xf32, #tpu.memory_space<vmem>>) attributes {dimension_semantics = [#tpu.dimension_semantics<parallel>], iteration_bounds = array<i64: 2>, scalar_prefetch = 0 : i64, scratch_operands = 1 : i64, tpu.core_type = #tpu.core_type<tc>, window_params = [{transform_indices = @transform_0, window_bounds = array<i64: 1, 8, 512>}, {pipeline_mode = #tpu.pipeline_mode<synchronous>, transform_indices = @transform_1, window_bounds = array<i64: 1, 512>}, {pipeline_mode = #tpu.pipeline_mode<synchronous>, transform_indices = @transform_2, window_bounds = array<i64: 1, 512>}, {pipeline_mode = #tpu.pipeline_mode<synchronous>, transform_indices = @transform_3, window_bounds = array<i64: 3, 512, 512>}, {pipeline_mode = #tpu.pipeline_mode<synchronous>, transform_indices = @transform_4, window_bounds = array<i64: 1, 512>}, {transform_indices = @transform_5, window_bounds = array<i64: 1, 8, 512>}, {transform_indices = @transform_6, window_bounds = array<i64: 1, 8, 512>}, {transform_indices = @transform_7, window_bounds = array<i64: 1, 2, 512>}]} {
    %c0 = arith.constant 0 : index
    %c0_0 = arith.constant 0 : index
    %c0_1 = arith.constant 0 : index
    %0 = vector.load %arg1[%c0, %c0_0, %c0_1] : memref<1x8x512xf32, #tpu.memory_space<vmem>>, vector<1x8x512xf32>
    %1 = vector.shape_cast %0 : vector<1x8x512xf32> to vector<8x512xf32>
    %c0_2 = arith.constant 0 : index
    %c0_3 = arith.constant 0 : index
    %2 = vector.load %arg2[%c0_2, %c0_3] : memref<1x512xf32, #tpu.memory_space<vmem>>, vector<1x512xf32>
    %3 = vector.broadcast %2 : vector<1x512xf32> to vector<8x512xf32>
    %4 = arith.mulf %1, %3 : vector<8x512xf32>
    %c0_4 = arith.constant 0 : index
    %c0_5 = arith.constant 0 : index
    %5 = vector.load %arg3[%c0_4, %c0_5] : memref<1x512xf32, #tpu.memory_space<vmem>>, vector<1x512xf32>
    %6 = vector.broadcast %5 : vector<1x512xf32> to vector<8x512xf32>
    %7 = arith.addf %4, %6 : vector<8x512xf32>
    %cst = arith.constant 0.000000e+00 : f32
    %8 = vector.broadcast %cst : f32 to vector<8x512xf32>
    %9 = arith.maximumf %7, %8 : vector<8x512xf32>
    %cst_6 = arith.constant 0.000000e+00 : f32
    %10 = vector.broadcast %cst_6 : f32 to vector<1x512xf32>
    %c0_7 = arith.constant 0 : index
    %c0_8 = arith.constant 0 : index
    %11 = vector.load %arg9[%c0_7, %c0_8] : memref<10x512xf32, #tpu.memory_space<vmem>>, vector<1x512xf32>
    tpu.vector_store %arg9[%c0_7, %c0_8], %10 {strides = array<i32>} : memref<10x512xf32, #tpu.memory_space<vmem>>, vector<1x512xf32>,
    %cst_9 = arith.constant 0.000000e+00 : f32
    %12 = vector.broadcast %cst_9 : f32 to vector<1x512xf32>
    %c9 = arith.constant 9 : index
    %c0_10 = arith.constant 0 : index
    %13 = vector.load %arg9[%c9, %c0_10] : memref<10x512xf32, #tpu.memory_space<vmem>>, vector<1x512xf32>
    tpu.vector_store %arg9[%c9, %c0_10], %12 {strides = array<i32>} : memref<10x512xf32, #tpu.memory_space<vmem>>, vector<1x512xf32>,
    %c1 = arith.constant 1 : index
    %c0_11 = arith.constant 0 : index
    %14 = vector.load %arg9[%c1, %c0_11] : memref<10x512xf32, #tpu.memory_space<vmem>>, vector<8x512xf32>
    tpu.vector_store %arg9[%c1, %c0_11], %9 {strides = array<i32>} : memref<10x512xf32, #tpu.memory_space<vmem>>, vector<8x512xf32>,
    %c0_12 = arith.constant 0 : index
    %c0_13 = arith.constant 0 : index
    %15 = vector.load %arg9[%c0_12, %c0_13] : memref<10x512xf32, #tpu.memory_space<vmem>>, vector<8x512xf32>
    %16 = arith.truncf %15 : vector<8x512xf32> to vector<8x512xbf16>
    %c0_14 = arith.constant 0 : index
    %c0_15 = arith.constant 0 : index
    %c0_16 = arith.constant 0 : index
    %17 = vector.load %arg4[%c0_14, %c0_15, %c0_16] : memref<3x512x512xbf16, #tpu.memory_space<vmem>>, vector<1x512x512xbf16>
    %18 = vector.shape_cast %17 : vector<1x512x512xbf16> to vector<512x512xbf16>
    %cst_17 = arith.constant dense<0.000000e+00> : vector<8x512xf32>
    %19 = tpu.matmul %16, %18, %cst_17 {dimension_numbers = #tpu.dot_dimension_numbers<[1], [0], [0], [1], [0, 0, 1, 1], [], []>} : vector<8x512xbf16>, vector<512x512xbf16>, vector<8x512xf32> -> vector<8x512xf32>
    %c1_18 = arith.constant 1 : index
    %c0_19 = arith.constant 0 : index
    %20 = vector.load %arg9[%c1_18, %c0_19] : memref<10x512xf32, #tpu.memory_space<vmem>>, vector<8x512xf32>
    %21 = arith.truncf %20 : vector<8x512xf32> to vector<8x512xbf16>
    %c1_20 = arith.constant 1 : index
    %c0_21 = arith.constant 0 : index
    %c0_22 = arith.constant 0 : index
    %22 = vector.load %arg4[%c1_20, %c0_21, %c0_22] : memref<3x512x512xbf16, #tpu.memory_space<vmem>>, vector<1x512x512xbf16>
    %23 = vector.shape_cast %22 : vector<1x512x512xbf16> to vector<512x512xbf16>
    %cst_23 = arith.constant dense<0.000000e+00> : vector<8x512xf32>
    %24 = tpu.matmul %21, %23, %cst_23 {dimension_numbers = #tpu.dot_dimension_numbers<[1], [0], [0], [1], [0, 0, 1, 1], [], []>} : vector<8x512xbf16>, vector<512x512xbf16>, vector<8x512xf32> -> vector<8x512xf32>
    %25 = arith.addf %19, %24 : vector<8x512xf32>
    %c2 = arith.constant 2 : index
    %c0_24 = arith.constant 0 : index
    %26 = vector.load %arg9[%c2, %c0_24] : memref<10x512xf32, #tpu.memory_space<vmem>>, vector<8x512xf32>
    %27 = arith.truncf %26 : vector<8x512xf32> to vector<8x512xbf16>
    %c2_25 = arith.constant 2 : index
    %c0_26 = arith.constant 0 : index
    %c0_27 = arith.constant 0 : index
    %28 = vector.load %arg4[%c2_25, %c0_26, %c0_27] : memref<3x512x512xbf16, #tpu.memory_space<vmem>>, vector<1x512x512xbf16>
    %29 = vector.shape_cast %28 : vector<1x512x512xbf16> to vector<512x512xbf16>
    %cst_28 = arith.constant dense<0.000000e+00> : vector<8x512xf32>
    %30 = tpu.matmul %27, %29, %cst_28 {dimension_numbers = #tpu.dot_dimension_numbers<[1], [0], [0], [1], [0, 0, 1, 1], [], []>} : vector<8x512xbf16>, vector<512x512xbf16>, vector<8x512xf32> -> vector<8x512xf32>
    %31 = arith.addf %25, %30 : vector<8x512xf32>
    %c0_29 = arith.constant 0 : index
    %c0_30 = arith.constant 0 : index
    %32 = vector.load %arg5[%c0_29, %c0_30] : memref<1x512xf32, #tpu.memory_space<vmem>>, vector<1x512xf32>
    %33 = vector.broadcast %32 : vector<1x512xf32> to vector<8x512xf32>
    %34 = arith.addf %31, %33 : vector<8x512xf32>
    %c0_31 = arith.constant 0 : index
    %c0_32 = arith.constant 0 : index
    %c0_33 = arith.constant 0 : index
    %35 = vector.load %arg6[%c0_31, %c0_32, %c0_33] : memref<1x8x512xf32, #tpu.memory_space<vmem>>, vector<1x8x512xf32>
    %36 = vector.shape_cast %35 : vector<1x8x512xf32> to vector<8x512xf32>
    %37 = arith.addf %34, %36 : vector<8x512xf32>
    %c0_34 = arith.constant 0 : index
    %c0_35 = arith.constant 0 : index
    %c0_36 = arith.constant 0 : index
    %38 = vector.load %arg7[%c0_34, %c0_35, %c0_36] : memref<1x8x512xf32, #tpu.memory_space<vmem>>, vector<1x8x512xf32>
    %39 = vector.shape_cast %38 : vector<1x8x512xf32> to vector<8x512xf32>
    %40 = vector.shape_cast %37 : vector<8x512xf32> to vector<1x8x512xf32>
    tpu.vector_store %arg7[%c0_34, %c0_35, %c0_36], %40 {strides = array<i32>} : memref<1x8x512xf32, #tpu.memory_space<vmem>>, vector<1x8x512xf32>,
    %cst_37 = arith.constant dense<0.000000e+00> : vector<512xf32>
    %41 = vector.multi_reduction <add>, %37, %cst_37 [0] : vector<8x512xf32> to vector<512xf32>
    %42 = vector.shape_cast %41 : vector<512xf32> to vector<1x512xf32>
    %c0_38 = arith.constant 0 : index
    %c0_39 = arith.constant 0 : index
    %c0_40 = arith.constant 0 : index
    %43 = vector.load %arg8[%c0_38, %c0_39, %c0_40] : memref<1x2x512xf32, #tpu.memory_space<vmem>>, vector<1x1x512xf32>
    %44 = vector.shape_cast %43 : vector<1x1x512xf32> to vector<1x512xf32>
    %45 = vector.shape_cast %42 : vector<1x512xf32> to vector<1x1x512xf32>
    tpu.vector_store %arg8[%c0_38, %c0_39, %c0_40], %45 {strides = array<i32>} : memref<1x2x512xf32, #tpu.memory_space<vmem>>, vector<1x1x512xf32>,
    %46 = arith.mulf %37, %37 : vector<8x512xf32>
    %cst_41 = arith.constant dense<0.000000e+00> : vector<512xf32>
    %47 = vector.multi_reduction <add>, %46, %cst_41 [0] : vector<8x512xf32> to vector<512xf32>
    %48 = vector.shape_cast %47 : vector<512xf32> to vector<1x512xf32>
    %c0_42 = arith.constant 0 : index
    %c1_43 = arith.constant 1 : index
    %c0_44 = arith.constant 0 : index
    %49 = vector.load %arg8[%c0_42, %c1_43, %c0_44] : memref<1x2x512xf32, #tpu.memory_space<vmem>>, vector<1x1x512xf32>
    %50 = vector.shape_cast %49 : vector<1x1x512xf32> to vector<1x512xf32>
    %51 = vector.shape_cast %48 : vector<1x512xf32> to vector<1x1x512xf32>
    tpu.vector_store %arg8[%c0_42, %c1_43, %c0_44], %51 {strides = array<i32>} : memref<1x2x512xf32, #tpu.memory_space<vmem>>, vector<1x1x512xf32>,
    return
  }
  func.func @transform_0(%arg0: i32) -> (i32, i32, i32) {
    %c0_i32 = arith.constant 0 : i32
    %c0_i32_0 = arith.constant 0 : i32
    %c0_i32_1 = arith.constant 0 : i32
    return %arg0, %c0_i32, %c0_i32_0 : i32, i32, i32
  }
  func.func @transform_1(%arg0: i32) -> (i32, i32) {
    %c0_i32 = arith.constant 0 : i32
    %c0_i32_0 = arith.constant 0 : i32
    %c0_i32_1 = arith.constant 0 : i32
    return %c0_i32, %c0_i32_0 : i32, i32
  }
  func.func @transform_2(%arg0: i32) -> (i32, i32) {
    %c0_i32 = arith.constant 0 : i32
    %c0_i32_0 = arith.constant 0 : i32
    %c0_i32_1 = arith.constant 0 : i32
    return %c0_i32, %c0_i32_0 : i32, i32
  }
  func.func @transform_3(%arg0: i32) -> (i32, i32, i32) {
    %c0_i32 = arith.constant 0 : i32
    %c0_i32_0 = arith.constant 0 : i32
    %c0_i32_1 = arith.constant 0 : i32
    %c0_i32_2 = arith.constant 0 : i32
    return %c0_i32, %c0_i32_0, %c0_i32_1 : i32, i32, i32
  }
  func.func @transform_4(%arg0: i32) -> (i32, i32) {
    %c0_i32 = arith.constant 0 : i32
    %c0_i32_0 = arith.constant 0 : i32
    %c0_i32_1 = arith.constant 0 : i32
    return %c0_i32, %c0_i32_0 : i32, i32
  }
  func.func @transform_5(%arg0: i32) -> (i32, i32, i32) {
    %c0_i32 = arith.constant 0 : i32
    %c0_i32_0 = arith.constant 0 : i32
    %c0_i32_1 = arith.constant 0 : i32
    return %arg0, %c0_i32, %c0_i32_0 : i32, i32, i32
  }
  func.func @transform_6(%arg0: i32) -> (i32, i32, i32) {
    %c0_i32 = arith.constant 0 : i32
    %c0_i32_0 = arith.constant 0 : i32
    %c0_i32_1 = arith.constant 0 : i32
    return %arg0, %c0_i32, %c0_i32_0 : i32, i32, i32
  }
  func.func @transform_7(%arg0: i32) -> (i32, i32, i32) {
    %c0_i32 = arith.constant 0 : i32
    %c0_i32_0 = arith.constant 0 : i32
    %c0_i32_1 = arith.constant 0 : i32
    return %arg0, %c0_i32, %c0_i32_0 : i32, i32, i32
  }
}

</mosaic_0001>

<bundles_post_ra>
// kernel: tile.48
= control target key start
LH: loop header
LB: loop body
LE: loop exit
PB: predicated region body
PF: predicated region fallthrough
CT: control target
= control target key end

     0   :  { %s64_s0 = inlined_call_operand.vmem [shape: f32[8], index: 0, kind: input, shape index: {}]   ;;  %s65_s1 = inlined_call_operand.vmem [shape: f32[64,8], index: 1, kind: output, shape index: {}]  }
   0x1   :  { %v4_v0 = vld [vmem:[%s64_s0] ss:$0 sm:$0xff] }
   0x2   :  { %5 = vst [vmem:[%s65_s1] sm:$0xff] %v4_v0 }
   0x3   :  { %20 = vst [vmem:[%s65_s1 + $0x8] sm:$0xff] %v4_v0 }
   0x4   :  { %21 = vst [vmem:[%s65_s1 + $0x10] sm:$0xff] %v4_v0 }
   0x5   :  { %22 = vst [vmem:[%s65_s1 + $0x18] sm:$0xff] %v4_v0 }
   0x6   :  { %23 = vst [vmem:[%s65_s1 + $0x20] sm:$0xff] %v4_v0 }
   0x7   :  { %24 = vst [vmem:[%s65_s1 + $0x28] sm:$0xff] %v4_v0 }
   0x8   :  { %25 = vst [vmem:[%s65_s1 + $0x30] sm:$0xff] %v4_v0 }
   0x9   :  { %26 = vst [vmem:[%s65_s1 + $0x38] sm:$0xff] %v4_v0 }

// kernel: tile.49
= control target key start
LH: loop header
LB: loop body
LE: loop exit
PB: predicated region body
PF: predicated region fallthrough
CT: control target
= control target key end

     0   :  { %vm6_vm0 = vcmask 1043458   ;;  %s11_s6 = smov 3  ;;  %s14_s7 = smov 12  ;;  %vm8_vm1 = vcmask 64512   ;;  %vm20_vm2 = vcmask 1048512   ;;  %vm32_vm3 = vcmask 982912   ;;  %s411_s0 = inlined_call_operand.vmem [shape: f32[64,8], index: 0, kind: input, shape index: {}]   ;;  %s412_s1 = inlined_call_operand.vmem [shape: f32[1,512], index: 1, kind: output, shape index: {}]  }
   0x1   :  { %v214_v0 = vld [vmem:[%s411_s0 + $0xf] ss:$16 sm:%s11_s6]   ;;  %s35_s12 = smov 3  ;;  %s38_s15 = smov 12  ;;  %vm44_vm4 = vcmask 917312   ;;  %vm56_vm5 = vcmask 851712  }
   0x2   :  { %v215_v1 = vld [vmem:[%s411_s0 + $0xf] ss:$16 sm:%s14_s7]   ;;  %v218_v3 = vld [vmem:[%s411_s0 + $0xd] ss:$16 sm:%s35_s12]   ;;  %s262_s16 = smov 120   ;;  %s23_s19 = smov 3 }
   0x3   :  { %v17_v2 = vsel %vm6_vm0, %v215_v1, %v214_v0  ;;  %v219_v4 = vld [vmem:[%s411_s0 + $0xd] ss:$16 sm:%s38_s15]   ;;  %s26_s20 = smov 12  ;;  %v216_v6 = vld [vmem:[%s411_s0 + $0xe] ss:$16 sm:%s23_s19]   ;;  %s47_s23 = smov 3 }
   0x4   :  { %18 = vrot.lane.b32.xlu0 %v17_v2, %s262_s16  ;;  %v41_v5 = vsel %vm6_vm0, %v219_v4, %v218_v3  ;;  %s263_s24 = smov 104   ;;  %v217_v7 = vld [vmem:[%s411_s0 + $0xe] ss:$16 sm:%s26_s20]   ;;  %s50_s27 = smov 12  ;;  %vm68_vm6 = vcmask 786112   ;;  %vm80_vm7 = vcmask 720512  }
   0x5   :  { %42 = vrot.lane.b32.xlu1 %v41_v5, %s263_s24  ;;  %v220_v8 = vld [vmem:[%s411_s0 + $0xc] ss:$16 sm:%s47_s23]   ;;  %v29_v10 = vsel %vm6_vm0, %v217_v7, %v216_v6  ;;  %s83_s3 = smov 3  ;;  %s86_s4 = smov 12  ;;  %vm92_vm8 = vcmask 654912   ;;  %vm104_vm9 = vcmask 589312  }
   0x6   :  { %v221_v9 = vld [vmem:[%s411_s0 + $0xc] ss:$16 sm:%s50_s27]   ;;  %s264_s5 = smov 112   ;;  %s95_s6 = smov 3  ;;  %v226_v12 = vld [vmem:[%s411_s0 + $0x9] ss:$16 sm:%s83_s3]  }
   0x7   :  { %v53_v11 = vsel %vm6_vm0, %v221_v9, %v220_v8  ;;  %s98_s7 = smov 12  ;;  %v227_v13 = vld [vmem:[%s411_s0 + $0x9] ss:$16 sm:%s86_s4]   ;;  %s59_s12 = smov 3  ;;  %v228_v16 = vld [vmem:[%s411_s0 + $0x8] ss:$16 sm:%s95_s6]  }
   0x8   :  { %s62_s13 = smov 12  ;;  %s265_s14 = smov 96   ;;  %v222_v14 = vld [vmem:[%s411_s0 + $0xb] ss:$16 sm:%s59_s12]   ;;  %v229_v17 = vld [vmem:[%s411_s0 + $0x8] ss:$16 sm:%s98_s7]   ;;  %v89_v19 = vsel %vm6_vm0, %v227_v13, %v226_v12 }
   0x9   :  { %v223_v15 = vld [vmem:[%s411_s0 + $0xb] ss:$16 sm:%s62_s13]   ;;  %s266_s23 = smov 88   ;;  %s71_s24 = smov 3  ;;  %v101_v20 = vsel %vm6_vm0, %v229_v17, %v228_v16  ;;  %vm116_vm10 = vcmask 523712   ;;  %vm128_vm11 = vcmask 458112  }
   0xa   :  { %v65_v18 = vsel %vm6_vm0, %v223_v15, %v222_v14  ;;  %s119_s25 = smov 3  ;;  %s74_s26 = smov 12  ;;  %v224_v21 = vld [vmem:[%s411_s0 + $0xa] ss:$16 sm:%s71_s24]   ;;  %vm140_vm12 = vcmask 392512   ;;  %vm152_vm13 = vcmask 326912  }
   0xb   :  { %66 = vrot.lane.b32.xlu2 %v65_v18, %s266_s23  ;;  %s122_s27 = smov 12  ;;  %v225_v22 = vld [vmem:[%s411_s0 + $0xa] ss:$16 sm:%s74_s26]   ;;  %s267_s3 = smov 72   ;;  %vm164_vm14 = vcmask 261312   ;;  %vm176_vm15 = vcmask 195712  }
   0xc   :  { %30 = vrot.lane.b32.xlu0 %v29_v10, %s264_s5  ;;  %v232_v23 = vld [vmem:[%s411_s0 + $0x6] ss:$16 sm:%s119_s25]   ;;  %s131_s6 = smov 3  ;;  %s134_s7 = smov 12  ;;  %v77_v25 = vsel %vm6_vm0, %v225_v22, %v224_v21 }
   0xd   :  { %54 = vrot.lane.b32.xlu1 %v53_v11, %s265_s14  ;;  %s268_s8 = smov 64   ;;  %v233_v24 = vld [vmem:[%s411_s0 + $0x6] ss:$16 sm:%s122_s27]   ;;  %s107_s15 = smov 3 }
   0xe   :  { %v234_v26 = vld [vmem:[%s411_s0 + $0x5] ss:$16 sm:%s131_s6]   ;;  %s110_s16 = smov 12  ;;  %v125_v28 = vsel %vm6_vm0, %v233_v24, %v232_v23  ;;  %s269_s17 = smov 80   ;;  %v230_v30 = vld [vmem:[%s411_s0 + $0x7] ss:$16 sm:%s107_s15]  }
   0xf   :  { %v235_v27 = vld [vmem:[%s411_s0 + $0x5] ss:$16 sm:%s134_s7]   ;;  %s155_s18 = smov 3  ;;  %s158_s19 = smov 12  ;;  %v231_v31 = vld [vmem:[%s411_s0 + $0x7] ss:$16 sm:%s110_s16]  }
  0x10   :  { %v137_v29 = vsel %vm6_vm0, %v235_v27, %v234_v26  ;;  %s270_s24 = smov 48   ;;  %v238_v32 = vld [vmem:[%s411_s0 + $0x3] ss:$16 sm:%s155_s18]   ;;  %s167_s27 = smov 3  ;;  %v113_v34 = vsel %vm6_vm0, %v231_v31, %v230_v30 }
  0x11   :  { %s170_s28 = smov 12  ;;  %s271_s29 = smov 40   ;;  %v239_v33 = vld [vmem:[%s411_s0 + $0x3] ss:$16 sm:%s158_s19]   ;;  %v240_v35 = vld [vmem:[%s411_s0 + $0x2] ss:$16 sm:%s167_s27]  }
  0x12   :  { %v241_v36 = vld [vmem:[%s411_s0 + $0x2] ss:$16 sm:%s170_s28]   ;;  %s143_s7 = smov 3  ;;  %v161_v37 = vsel %vm6_vm0, %v239_v33, %v238_v32  ;;  %s272_s9 = smov 56  }
  0x13   :  { %78 = vrot.lane.b32.xlu2 %v77_v25, %s269_s17  ;;  %v173_v38 = vsel %vm6_vm0, %v241_v36, %v240_v35  ;;  %v236_v39 = vld [vmem:[%s411_s0 + $0x4] ss:$16 sm:%s143_s7]   ;;  %s273_s14 = smov 24   ;;  %s274_s15 = smov 16  }
  0x14   :  { %90 = vrot.lane.b32.xlu0 %v89_v19, %s267_s3  ;;  %s179_s16 = smov 3  ;;  %s182_s17 = smov 12 }
  0x15   :  { %102 = vrot.lane.b32.xlu1 %v101_v20, %s268_s8  ;;  %s146_s8 = smov 12  ;;  %s275_s18 = smov 32   ;;  %v242_v42 = vld [vmem:[%s411_s0 + $0x1] ss:$16 sm:%s179_s16]  }
  0x16   :  { %v237_v40 = vld [vmem:[%s411_s0 + $0x4] ss:$16 sm:%s146_s8]   ;;  %v243_v43 = vld [vmem:[%s411_s0 + $0x1] ss:$16 sm:%s182_s17]   ;;  %s276_s23 = smov 8   ;;  %s4_s25 = smov 12 }
  0x17   :  { %v149_v41 = vsel %vm6_vm0, %v237_v40, %v236_v39  ;;  %v185_v44 = vsel %vm6_vm0, %v243_v43, %v242_v42  ;;  %v5_v46 = vld [vmem:[%s411_s0] ss:$16 sm:%s4_s25]  }
  0x1b   :  { %114 = vrot.lane.b32.xlu2 %v113_v34, %s272_s9 }
  0x1c   :  { %126 = vrot.lane.b32.xlu0 %v125_v28, %s270_s24  ;;  %s2_s24 = smov 3 }
  0x1d   :  { %138 = vrot.lane.b32.xlu1 %v137_v29, %s271_s29  ;;  %v3_v45 = vld [vmem:[%s411_s0] ss:$16 sm:%s2_s24]  }
  0x1e   :  { %v7_v47 = vsel %vm6_vm0, %v5_v46, %v3_v45  ;;  %vm188_vm0 = vcmask 130112  }
  0x1f   :  { %9 = vst.msk [vmem:[#allocation0] ss:$8 sm:$0xf] %vm8_vm1, %v7_v47  }
  0x23   :  { %150 = vrot.lane.b32.xlu2 %v149_v41, %s275_s18 }
  0x24   :  { %162 = vrot.lane.b32.xlu0 %v161_v37, %s273_s14 }
  0x25   :  { %174 = vrot.lane.b32.xlu1 %v173_v38, %s274_s15 }
  0x2b   :  { %186 = vrot.lane.b32.xlu2 %v185_v44, %s276_s23 }
  0x65   :  { %v67_v48 = vpop.permute.xlu2 %66  }
  0x6d   :  { %v79_v49 = vpop.permute.xlu2 %78  }
  0x75   :  { %v115_v52 = vpop.permute.xlu2 %114  }
  0x76   :  { %v19_v50 = vpop.permute.xlu0 %18  }
  0x77   :  { %21 = vst.msk [vmem:[#allocation0] ss:$8 sm:$0xf] %vm20_vm2, %v19_v50   ;;  %v43_v51 = vpop.permute.xlu1 %42  }
  0x7d   :  { %v151_v55 = vpop.permute.xlu2 %150  }
  0x7e   :  { %v31_v53 = vpop.permute.xlu0 %30  }
  0x7f   :  { %33 = vst.msk [vmem:[#allocation0] ss:$8 sm:$0xf] %vm32_vm3, %v31_v53   ;;  %v55_v54 = vpop.permute.xlu1 %54  }
  0x80   :  { %45 = vst.msk [vmem:[#allocation0] ss:$8 sm:$0xf] %vm44_vm4, %v43_v51  }
  0x81   :  { %57 = vst.msk [vmem:[#allocation0] ss:$8 sm:$0xf] %vm56_vm5, %v55_v54  }
  0x82   :  { %69 = vst.msk [vmem:[#allocation0] ss:$8 sm:$0xf] %vm68_vm6, %v67_v48  }
  0x83   :  { %81 = vst.msk [vmem:[#allocation0] ss:$8 sm:$0xf] %vm80_vm7, %v79_v49  }
  0x85   :  { %v187_v58 = vpop.permute.xlu2 %186  }
  0x86   :  { %v91_v56 = vpop.permute.xlu0 %90  }
  0x87   :  { %93 = vst.msk [vmem:[#allocation0] ss:$8 sm:$0xf] %vm92_vm8, %v91_v56   ;;  %v103_v57 = vpop.permute.xlu1 %102  }
  0x88   :  { %105 = vst.msk [vmem:[#allocation0] ss:$8 sm:$0xf] %vm104_vm9, %v103_v57  }
  0x89   :  { %117 = vst.msk [vmem:[#allocation0] ss:$8 sm:$0xf] %vm116_vm10, %v115_v52  }
  0x8e   :  { %v127_v59 = vpop.permute.xlu0 %126  }
  0x8f   :  { %129 = vst.msk [vmem:[#allocation0] ss:$8 sm:$0xf] %vm128_vm11, %v127_v59   ;;  %v139_v60 = vpop.permute.xlu1 %138  }
  0x90   :  { %141 = vst.msk [vmem:[#allocation0] ss:$8 sm:$0xf] %vm140_vm12, %v139_v60  }
  0x91   :  { %153 = vst.msk [vmem:[#allocation0] ss:$8 sm:$0xf] %vm152_vm13, %v151_v55  }
  0x96   :  { %v163_v61 = vpop.permute.xlu0 %162  }
  0x97   :  { %165 = vst.msk [vmem:[#allocation0] ss:$8 sm:$0xf] %vm164_vm14, %v163_v61   ;;  %v175_v62 = vpop.permute.xlu1 %174  }
  0x98   :  { %177 = vst.msk [vmem:[#allocation0] ss:$8 sm:$0xf] %vm176_vm15, %v175_v62  }
  0x99   :  { %189 = vst.msk [vmem:[#allocation0] ss:$8 sm:$0xf] %vm188_vm0, %v187_v58  }
  0xa0   :  { %v192_v63 = vld [vmem:[#allocation0] sm:$0x1]  ;;  %v197_v0 = vld [vmem:[#allocation0 + $0x8] sm:$0x1]  ;;  %v203_v1 = vld [vmem:[#allocation0 + $0x10] sm:$0x1] }
  0xa1   :  { %195 = vst [vmem:[%s412_s1] sm:$0x1] %v192_v63  ;;  %v209_v2 = vld [vmem:[#allocation0 + $0x18] sm:$0x1] }
  0xa2   :  { %244 = vst [vmem:[%s412_s1 + $0x1] sm:$0x1] %v197_v0 }
  0xa3   :  { %245 = vst [vmem:[%s412_s1 + $0x2] sm:$0x1] %v203_v1 }
  0xa4   :  { %246 = vst [vmem:[%s412_s1 + $0x3] sm:$0x1] %v209_v2 }

// kernel: cleaning_backbone_forward.4
= control target key start
LH: loop header
LB: loop body
LE: loop exit
PB: predicated region body
PF: predicated region fallthrough
CT: control target
= control target key end

     0   :  { %s5772_s21 = smov 0   ;;  %s8243_s0 = inlined_call_operand.vmem [shape: f32[2,8,512], index: 0, kind: input, shape index: {}]   ;;  %s8244_s1 = inlined_call_operand.vmem [shape: f32[1,512], index: 1, kind: input, shape index: {}]   ;;  %s8245_s2 = inlined_call_operand.vmem [shape: f32[1,512], index: 2, kind: input, shape index: {}]   ;;  %s8246_s3 = inlined_call_operand.vmem [shape: bf16[3,512,512], index: 3, kind: input, shape index: {}]   ;;  %s8247_s4 = inlined_call_operand.vmem [shape: f32[1,512], index: 4, kind: input, shape index: {}]   ;;  %s8248_s5 = inlined_call_operand.vmem [shape: f32[2,8,512], index: 5, kind: output, shape index: {0}]   ;;  %s8249_s6 = inlined_call_operand.vmem [shape: f32[2,2,512], index: 6, kind: output, shape index: {1}]  }
   0x1 LB: > { %s3526_s22 = sadd.s32 4294967295, %s5734_s21   ;;  %p3530_p0 = scmp.ge.s32.totalorder %s5734_s21, 1  ;;  %s5734_s21 = sphi %s5772_s21, %s17_s21  }
   0x2   : > { %p215_p1 = scmp.lt.s32.totalorder %s5734_s21, 3 }
   0x4   : > { %p216_p2 = pnand %p3530_p0, %p215_p1 }
   0x5   : > { %p250_p3 = scmp.lt.s32.totalorder (!%p216_p2), %s3526_s22, 1 }
   0x6   : > { %219 = sbr.rel (%p216_p2) target bundleno = 559 (0x22f), region = 40 }
   0xb   : > { %v3779_v0 = vld [vmem:[%s8246_s3 + $0x4e0] sm:$0xf]  ;;  %v5493_v1 = vld [vmem:[%s8246_s3 + $0x4ec] sm:$0xf0]  ;;  %s8253_s22 = smov (!%p250_p3, %s3526_s22), 1  ;;  %vm3389_vm1 = vcmask 1040384  }
   0xc   : > { %v3907_v2 = vld [vmem:[%s8246_s3 + $0x5e0] sm:$0xf]  ;;  %v3780_v3 = vor.u32 %v5493_v1, %v3779_v0  ;;  %v5525_v4 = vld [vmem:[%s8246_s3 + $0x5ec] sm:$0xf0]  ;;  %s5332_s7 = sshll.u32 %s8253_s22, 5  ;;  %vm3391_vm2 = vcmask 1042434  }
   0xd   : > { %v4035_v5 = vld [vmem:[%s8246_s3 + $0x6e0] sm:$0xf]  ;;  %v5557_v6 = vld [vmem:[%s8246_s3 + $0x6ec] sm:$0xf0]  ;;  %v3908_v7 = vor.u32 %v5525_v4, %v3907_v2  ;;  %s254_s12 = scalar_lea.vmem %s8243_s0, %s5332_s7  ;;  %s8214_s28 = scalar_lea.vmem %s8248_s5, %s5332_s7  ;;  %vm3393_vm3 = vcmask 1041408  }
   0xe   : > { %v4036_v8 = vor.u32 %v5557_v6, %v4035_v5  ;;  %v4163_v9 = vld [vmem:[%s8246_s3 + $0x7e0] sm:$0xf]  ;;  %v5589_v10 = vld [vmem:[%s8246_s3 + $0x7ec] sm:$0xf0]  ;;  %1279 = vmatpush.bf16.msra.mxu0 %v3780_v3  ;;  %s5334_s7 = sshll.u32 %s8253_s22, 3 }
   0xf   : > { %v3763_v11 = vld [vmem:[%s8246_s3 + $0x4c0] sm:$0xf]  ;;  %v4164_v12 = vor.u32 %v5589_v10, %v4163_v9  ;;  %v5489_v13 = vld [vmem:[%s8246_s3 + $0x4cc] sm:$0xf0]  ;;  %1292 = vmatpush.bf16.msra.mxu1 %v3908_v7  ;;  %s264_s8 = scalar_lea.vmem %s8249_s6, %s5334_s7 }
  0x10   : > { %v3891_v14 = vld [vmem:[%s8246_s3 + $0x5c0] sm:$0xf]  ;;  %v5521_v15 = vld [vmem:[%s8246_s3 + $0x5cc] sm:$0xf0]  ;;  %1305 = vmatpush.bf16.msra.mxu2 %v4036_v8  ;;  %v3764_v16 = vor.u32 %v5489_v13, %v3763_v11 }
  0x11   : > { %v3892_v17 = vor.u32 %v5521_v15, %v3891_v14  ;;  %v4019_v18 = vld [vmem:[%s8246_s3 + $0x6c0] sm:$0xf]  ;;  %v5553_v19 = vld [vmem:[%s8246_s3 + $0x6cc] sm:$0xf0]  ;;  %1318 = vmatpush.bf16.msra.mxu3 %v4164_v12 }
  0x12   : > { %v4147_v20 = vld [vmem:[%s8246_s3 + $0x7c0] sm:$0xf]  ;;  %v4020_v21 = vor.u32 %v5553_v19, %v4019_v18  ;;  %v5585_v22 = vld [vmem:[%s8246_s3 + $0x7cc] sm:$0xf0]  ;;  %1280 = vmatpush.bf16.msra.mxu0 %v3764_v16 }
  0x13   : > { %v3747_v23 = vld [vmem:[%s8246_s3 + $0x4a0] sm:$0xf]  ;;  %v5485_v24 = vld [vmem:[%s8246_s3 + $0x4ac] sm:$0xf0]  ;;  %v4148_v25 = vor.u32 %v5585_v22, %v4147_v20  ;;  %1293 = vmatpush.bf16.msra.mxu1 %v3892_v17 }
  0x14   : > { %v3875_v26 = vld [vmem:[%s8246_s3 + $0x5a0] sm:$0xf]  ;;  %v5517_v27 = vld [vmem:[%s8246_s3 + $0x5ac] sm:$0xf0]  ;;  %v3748_v29 = vor.u32 %v5485_v24, %v3747_v23  ;;  %1306 = vmatpush.bf16.msra.mxu2 %v4020_v21 }
  0x15   : > { %v4003_v28 = vld [vmem:[%s8246_s3 + $0x6a0] sm:$0xf]  ;;  %v5549_v30 = vld [vmem:[%s8246_s3 + $0x6ac] sm:$0xf0]  ;;  %v3876_v33 = vor.u32 %v5517_v27, %v3875_v26  ;;  %1319 = vmatpush.bf16.msra.mxu3 %v4148_v25 }
  0x16   : > { %v4131_v31 = vld [vmem:[%s8246_s3 + $0x7a0] sm:$0xf]  ;;  %v5581_v32 = vld [vmem:[%s8246_s3 + $0x7ac] sm:$0xf0]  ;;  %v4004_v34 = vor.u32 %v5549_v30, %v4003_v28  ;;  %1281 = vmatpush.bf16.msra.mxu0 %v3748_v29  ;;  %v5491_v28 = vld [vmem:[%s8246_s3 + $0x4e4] sm:$0xf] }
  0x17   : > { %v3731_v35 = vld [vmem:[%s8246_s3 + $0x480] sm:$0xf]  ;;  %v5481_v36 = vld [vmem:[%s8246_s3 + $0x48c] sm:$0xf0]  ;;  %v4132_v38 = vor.u32 %v5581_v32, %v4131_v31  ;;  %1294 = vmatpush.bf16.msra.mxu1 %v3876_v33  ;;  %v3781_v29 = vld [vmem:[%s8246_s3 + $0x4f0] sm:$0xf0] }
  0x18   : > { %v3859_v37 = vld [vmem:[%s8246_s3 + $0x580] sm:$0xf]  ;;  %v5513_v39 = vld [vmem:[%s8246_s3 + $0x58c] sm:$0xf0]  ;;  %v3732_v44 = vor.u32 %v5481_v36, %v3731_v35  ;;  %1307 = vmatpush.bf16.msra.mxu2 %v4004_v34  ;;  %v5523_v30 = vld [vmem:[%s8246_s3 + $0x5e4] sm:$0xf] }
  0x19   : > { %v3987_v40 = vld [vmem:[%s8246_s3 + $0x680] sm:$0xf]  ;;  %v5545_v41 = vld [vmem:[%s8246_s3 + $0x68c] sm:$0xf0]  ;;  %v3860_v45 = vor.u32 %v5513_v39, %v3859_v37  ;;  %1320 = vmatpush.bf16.msra.mxu3 %v4132_v38  ;;  %v3909_v32 = vld [vmem:[%s8246_s3 + $0x5f0] sm:$0xf0] }
  0x1a   : > { %v4115_v42 = vld [vmem:[%s8246_s3 + $0x780] sm:$0xf]  ;;  %v5577_v43 = vld [vmem:[%s8246_s3 + $0x78c] sm:$0xf0]  ;;  %v3988_v46 = vor.u32 %v5545_v41, %v3987_v40  ;;  %1282 = vmatpush.bf16.msra.mxu0 %v3732_v44  ;;  %v5555_v33 = vld [vmem:[%s8246_s3 + $0x6e4] sm:$0xf]  ;;  %v3784_v40 = vor.u32 %v5491_v28, %v3781_v29  ;;  %v3912_v41 = vor.u32 %v5523_v30, %v3909_v32 }
  0x1b   : > { %v3715_v47 = vld [vmem:[%s8246_s3 + $0x460] sm:$0xf]  ;;  %v5477_v48 = vld [vmem:[%s8246_s3 + $0x46c] sm:$0xf0]  ;;  %v4116_v50 = vor.u32 %v5577_v43, %v4115_v42  ;;  %1295 = vmatpush.bf16.msra.mxu1 %v3860_v45  ;;  %v4037_v34 = vld [vmem:[%s8246_s3 + $0x6f0] sm:$0xf0] }
  0x1c   : > { %v3843_v49 = vld [vmem:[%s8246_s3 + $0x560] sm:$0xf]  ;;  %v5509_v51 = vld [vmem:[%s8246_s3 + $0x56c] sm:$0xf0]  ;;  %v3716_v56 = vor.u32 %v5477_v48, %v3715_v47  ;;  %1308 = vmatpush.bf16.msra.mxu2 %v3988_v46  ;;  %v5587_v37 = vld [vmem:[%s8246_s3 + $0x7e4] sm:$0xf]  ;;  %v4040_v42 = vor.u32 %v5555_v33, %v4037_v34 }
  0x1d   : > { %v3971_v52 = vld [vmem:[%s8246_s3 + $0x660] sm:$0xf]  ;;  %v5541_v53 = vld [vmem:[%s8246_s3 + $0x66c] sm:$0xf0]  ;;  %v3844_v57 = vor.u32 %v5509_v51, %v3843_v49  ;;  %1321 = vmatpush.bf16.msra.mxu3 %v4116_v50  ;;  %v4165_v38 = vld [vmem:[%s8246_s3 + $0x7f0] sm:$0xf0] }
  0x1e   : > { %v4099_v54 = vld [vmem:[%s8246_s3 + $0x760] sm:$0xf]  ;;  %v5573_v55 = vld [vmem:[%s8246_s3 + $0x76c] sm:$0xf0]  ;;  %v3972_v58 = vor.u32 %v5541_v53, %v3971_v52  ;;  %1283 = vmatpush.bf16.msra.mxu0 %v3716_v56  ;;  %v5487_v43 = vld [vmem:[%s8246_s3 + $0x4c4] sm:$0xf]  ;;  %v4168_v46 = vor.u32 %v5587_v37, %v4165_v38 }
  0x1f   : > { %v3699_v59 = vld [vmem:[%s8246_s3 + $0x440] sm:$0xf]  ;;  %v5473_v60 = vld [vmem:[%s8246_s3 + $0x44c] sm:$0xf0]  ;;  %v4100_v62 = vor.u32 %v5573_v55, %v4099_v54  ;;  %1296 = vmatpush.bf16.msra.mxu1 %v3844_v57  ;;  %v3765_v44 = vld [vmem:[%s8246_s3 + $0x4d0] sm:$0xf0] }
  0x20   : > { %v3827_v61 = vld [vmem:[%s8246_s3 + $0x540] sm:$0xf]  ;;  %v5505_v63 = vld [vmem:[%s8246_s3 + $0x54c] sm:$0xf0]  ;;  %v3700_v4 = vor.u32 %v5473_v60, %v3699_v59  ;;  %1309 = vmatpush.bf16.msra.mxu2 %v3972_v58  ;;  %v5519_v45 = vld [vmem:[%s8246_s3 + $0x5c4] sm:$0xf]  ;;  %v3768_v52 = vor.u32 %v5487_v43, %v3765_v44 }
  0x21   : > { %v3955_v0 = vld [vmem:[%s8246_s3 + $0x640] sm:$0xf]  ;;  %v5537_v1 = vld [vmem:[%s8246_s3 + $0x64c] sm:$0xf0]  ;;  %v3828_v5 = vor.u32 %v5505_v63, %v3827_v61  ;;  %1322 = vmatpush.bf16.msra.mxu3 %v4100_v62  ;;  %v3893_v47 = vld [vmem:[%s8246_s3 + $0x5d0] sm:$0xf0] }
  0x22   : > { %v4083_v2 = vld [vmem:[%s8246_s3 + $0x740] sm:$0xf]  ;;  %v5569_v3 = vld [vmem:[%s8246_s3 + $0x74c] sm:$0xf0]  ;;  %v3956_v6 = vor.u32 %v5537_v1, %v3955_v0  ;;  %1284 = vmatpush.bf16.msra.mxu0 %v3700_v4  ;;  %v5551_v48 = vld [vmem:[%s8246_s3 + $0x6c4] sm:$0xf]  ;;  %v3896_v55 = vor.u32 %v5519_v45, %v3893_v47 }
  0x23   : > { %v3683_v7 = vld [vmem:[%s8246_s3 + $0x420] sm:$0xf]  ;;  %v5469_v8 = vld [vmem:[%s8246_s3 + $0x42c] sm:$0xf0]  ;;  %v4084_v10 = vor.u32 %v5569_v3, %v4083_v2  ;;  %1297 = vmatpush.bf16.msra.mxu1 %v3828_v5  ;;  %v4021_v49 = vld [vmem:[%s8246_s3 + $0x6d0] sm:$0xf0] }
  0x24   : > { %v3811_v9 = vld [vmem:[%s8246_s3 + $0x520] sm:$0xf]  ;;  %v5501_v11 = vld [vmem:[%s8246_s3 + $0x52c] sm:$0xf0]  ;;  %v3684_v16 = vor.u32 %v5469_v8, %v3683_v7  ;;  %1310 = vmatpush.bf16.msra.mxu2 %v3956_v6  ;;  %v5583_v50 = vld [vmem:[%s8246_s3 + $0x7c4] sm:$0xf]  ;;  %v4024_v56 = vor.u32 %v5551_v48, %v4021_v49 }
  0x25   : > { %v3939_v12 = vld [vmem:[%s8246_s3 + $0x620] sm:$0xf]  ;;  %v5533_v13 = vld [vmem:[%s8246_s3 + $0x62c] sm:$0xf0]  ;;  %v3812_v19 = vor.u32 %v5501_v11, %v3811_v9  ;;  %1323 = vmatpush.bf16.msra.mxu3 %v4084_v10  ;;  %v4149_v51 = vld [vmem:[%s8246_s3 + $0x7d0] sm:$0xf0] }
  0x26   : > { %v4067_v14 = vld [vmem:[%s8246_s3 + $0x720] sm:$0xf]  ;;  %v5565_v15 = vld [vmem:[%s8246_s3 + $0x72c] sm:$0xf0]  ;;  %v3940_v20 = vor.u32 %v5533_v13, %v3939_v12  ;;  %1285 = vmatpush.bf16.msra.mxu0 %v3684_v16  ;;  %v5483_v53 = vld [vmem:[%s8246_s3 + $0x4a4] sm:$0xf]  ;;  %v4152_v60 = vor.u32 %v5583_v50, %v4149_v51 }
  0x27   : > { %v3667_v17 = vld [vmem:[%s8246_s3 + $0x400] sm:$0xf]  ;;  %v5465_v18 = vld [vmem:[%s8246_s3 + $0x40c] sm:$0xf0]  ;;  %v4068_v24 = vor.u32 %v5565_v15, %v4067_v14  ;;  %1298 = vmatpush.bf16.msra.mxu1 %v3812_v19  ;;  %v3749_v54 = vld [vmem:[%s8246_s3 + $0x4b0] sm:$0xf0] }
  0x28   : > { %v3795_v21 = vld [vmem:[%s8246_s3 + $0x500] sm:$0xf]  ;;  %v5497_v22 = vld [vmem:[%s8246_s3 + $0x50c] sm:$0xf0]  ;;  %v3668_v31 = vor.u32 %v5465_v18, %v3667_v17  ;;  %1311 = vmatpush.bf16.msra.mxu2 %v3940_v20  ;;  %v5515_v57 = vld [vmem:[%s8246_s3 + $0x5a4] sm:$0xf]  ;;  %v3752_v3 = vor.u32 %v5483_v53, %v3749_v54 }
  0x29   : > { %v3923_v23 = vld [vmem:[%s8246_s3 + $0x600] sm:$0xf]  ;;  %v5529_v25 = vld [vmem:[%s8246_s3 + $0x60c] sm:$0xf0]  ;;  %v3796_v35 = vor.u32 %v5497_v22, %v3795_v21  ;;  %1324 = vmatpush.bf16.msra.mxu3 %v4068_v24  ;;  %v3877_v58 = vld [vmem:[%s8246_s3 + $0x5b0] sm:$0xf0] }
  0x2a   : > { %v4051_v26 = vld [vmem:[%s8246_s3 + $0x700] sm:$0xf]  ;;  %v5561_v27 = vld [vmem:[%s8246_s3 + $0x70c] sm:$0xf0]  ;;  %v3924_v36 = vor.u32 %v5529_v25, %v3923_v23  ;;  %1286 = vmatpush.bf16.msra.mxu0 %v3668_v31  ;;  %v5547_v59 = vld [vmem:[%s8246_s3 + $0x6a4] sm:$0xf]  ;;  %v3880_v6 = vor.u32 %v5515_v57, %v3877_v58 }
  0x2b   : > { %v4052_v39 = vor.u32 %v5561_v27, %v4051_v26  ;;  %1299 = vmatpush.bf16.msra.mxu1 %v3796_v35  ;;  %v4005_v61 = vld [vmem:[%s8246_s3 + $0x6b0] sm:$0xf0]  ;;  %v5579_v62 = vld [vmem:[%s8246_s3 + $0x7a4] sm:$0xf]  ;;  %v269_v5 = vld [vmem:[%s8244_s1] sm:$0xf] }
  0x2c   : > { %1312 = vmatpush.bf16.msra.mxu2 %v3924_v36  ;;  %v4133_v63 = vld [vmem:[%s8246_s3 + $0x7b0] sm:$0xf0]  ;;  %v5479_v0 = vld [vmem:[%s8246_s3 + $0x484] sm:$0xf]  ;;  %v4008_v7 = vor.u32 %v5547_v59, %v4005_v61  ;;  %v283_v13 = vld [vmem:[%s8245_s2] sm:$0xf] }
  0x2d   : > { %1325 = vmatpush.bf16.msra.mxu3 %v4052_v39  ;;  %v3733_v1 = vld [vmem:[%s8246_s3 + $0x490] sm:$0xf0]  ;;  %v5511_v2 = vld [vmem:[%s8246_s3 + $0x584] sm:$0xf]  ;;  %v4136_v11 = vor.u32 %v5579_v62, %v4133_v63  ;;  %v273_v17 = vperm.slane %v269_v5, 2  ;;  %v274_v18 = vperm.slane %v269_v5, 3 }
  0x2e   : > { %1331 = vmatpush.bf16.msrb.mxu0 %v3784_v40  ;;  %v3861_v4 = vld [vmem:[%s8246_s3 + $0x590] sm:$0xf0]  ;;  %v5543_v8 = vld [vmem:[%s8246_s3 + $0x684] sm:$0xf]  ;;  %v271_v19 = vperm.slane %v269_v5, 0  ;;  %v3736_v20 = vor.u32 %v5479_v0, %v3733_v1  ;;  %v287_v26 = vperm.slane %v283_v13, 2 }
  0x2f   : > { %1344 = vmatpush.bf16.msrb.mxu1 %v3912_v41  ;;  %v3989_v9 = vld [vmem:[%s8246_s3 + $0x690] sm:$0xf0]  ;;  %v5575_v10 = vld [vmem:[%s8246_s3 + $0x784] sm:$0xf]  ;;  %v3864_v21 = vor.u32 %v5511_v2, %v3861_v4  ;;  %v288_v27 = vperm.slane %v283_v13, 3  ;;  %v285_v28 = vperm.slane %v283_v13, 0 }
  0x30   : > { %1357 = vmatpush.bf16.msrb.mxu2 %v4040_v42  ;;  %v4117_v12 = vld [vmem:[%s8246_s3 + $0x790] sm:$0xf0]  ;;  %v5475_v14 = vld [vmem:[%s8246_s3 + $0x464] sm:$0xf]  ;;  %v3992_v22 = vor.u32 %v5543_v8, %v3989_v9  ;;  %v272_v29 = vperm.slane %v269_v5, 1  ;;  %v268_v32 = vld [vmem:[%s254_s12 + $0x18] sm:$0xff] }
  0x31   : > { %1370 = vmatpush.bf16.msrb.mxu3 %v4168_v46  ;;  %v3717_v15 = vld [vmem:[%s8246_s3 + $0x470] sm:$0xf0]  ;;  %v5507_v16 = vld [vmem:[%s8246_s3 + $0x564] sm:$0xf]  ;;  %v4120_v30 = vor.u32 %v5575_v10, %v4117_v12  ;;  %v286_v34 = vperm.slane %v283_v13, 1  ;;  %v282_v38 = vmul.f32 %v274_v18, %v268_v32  ;;  %v266_v40 = vld [vmem:[%s254_s12 + $0x8] sm:$0xff] }
  0x32   : > { %1332 = vmatpush.bf16.msrb.mxu0 %v3768_v52  ;;  %v3845_v23 = vld [vmem:[%s8246_s3 + $0x570] sm:$0xf0]  ;;  %v5539_v24 = vld [vmem:[%s8246_s3 + $0x664] sm:$0xf]  ;;  %v3720_v41 = vor.u32 %v5475_v14, %v3717_v15  ;;  %v280_v46 = vmul.f32 %v272_v29, %v266_v40  ;;  %v5558_v40 = vld [vmem:[%s8246_s3 + $0x6f4] sm:$0xf0] }
  0x33   : > { %1345 = vmatpush.bf16.msrb.mxu1 %v3896_v55  ;;  %v3973_v25 = vld [vmem:[%s8246_s3 + $0x670] sm:$0xf0]  ;;  %v265_v33 = vld [vmem:[%s254_s12] sm:$0xff]  ;;  %v3848_v42 = vor.u32 %v5507_v16, %v3845_v23  ;;  %v296_v51 = vadd.f32 %v288_v27, %v282_v38 }
  0x34   : > { %1358 = vmatpush.bf16.msrb.mxu2 %v4024_v56  ;;  %v267_v31 = vld [vmem:[%s254_s12 + $0x10] sm:$0xff]  ;;  %v5571_v35 = vld [vmem:[%s8246_s3 + $0x764] sm:$0xf]  ;;  %v279_v39 = vmul.f32 %v271_v19, %v265_v33  ;;  %v3976_v43 = vor.u32 %v5539_v24, %v3973_v25  ;;  %v294_v57 = vadd.f32 %v286_v34, %v280_v46 }
  0x35   : > { %1371 = vmatpush.bf16.msrb.mxu3 %v4152_v60  ;;  %v4101_v36 = vld [vmem:[%s8246_s3 + $0x770] sm:$0xf0]  ;;  %v281_v37 = vmul.f32 %v273_v17, %v267_v31  ;;  %v5471_v44 = vld [vmem:[%s8246_s3 + $0x444] sm:$0xf]  ;;  %v300_v59 = vmax.f32 %v296_v51, 0.0 }
  0x36   : > { %1333 = vmatpush.bf16.msrb.mxu0 %v3752_v3  ;;  %v3701_v45 = vld [vmem:[%s8246_s3 + $0x450] sm:$0xf0]  ;;  %v5503_v47 = vld [vmem:[%s8246_s3 + $0x544] sm:$0xf]  ;;  %v293_v52 = vadd.f32 %v285_v28, %v279_v39  ;;  %v4104_v53 = vor.u32 %v5571_v35, %v4101_v36  ;;  %v4043_v35 = vld [vmem:[%s8246_s3 + $0x6e8] sm:$0xf] }
  0x37   : > { %1346 = vmatpush.bf16.msrb.mxu1 %v3880_v6  ;;  %v3829_v48 = vld [vmem:[%s8246_s3 + $0x550] sm:$0xf0]  ;;  %v5535_v49 = vld [vmem:[%s8246_s3 + $0x644] sm:$0xf]  ;;  %v295_v50 = vadd.f32 %v287_v26, %v281_v37  ;;  %v3704_v62 = vor.u32 %v5471_v44, %v3701_v45  ;;  %v317_v5 = vrot.slane %v300_v59, 7 }
  0x38   : > { %1359 = vmatpush.bf16.msrb.mxu2 %v4008_v7  ;;  %v3957_v54 = vld [vmem:[%s8246_s3 + $0x650] sm:$0xf0]  ;;  %v5567_v55 = vld [vmem:[%s8246_s3 + $0x744] sm:$0xf]  ;;  %v297_v61 = vmax.f32 %v293_v52, 0.0  ;;  %v3832_v63 = vor.u32 %v5503_v47, %v3829_v48  ;;  %v298_v7 = vmax.f32 %v294_v57, 0.0  ;;  %v4044_v52 = vor.u32 %v5558_v40, %v4043_v35 }
  0x39   : > { %1372 = vmatpush.bf16.msrb.mxu3 %v4136_v11  ;;  %v4085_v56 = vld [vmem:[%s8246_s3 + $0x750] sm:$0xf0]  ;;  %v299_v58 = vmax.f32 %v295_v50, 0.0  ;;  %v5467_v60 = vld [vmem:[%s8246_s3 + $0x424] sm:$0xf]  ;;  %v3960_v3 = vor.u32 %v5535_v49, %v3957_v54 }
  0x3a   : > { %1334 = vmatpush.bf16.msrb.mxu0 %v3736_v20  ;;  %v3685_v0 = vld [vmem:[%s8246_s3 + $0x430] sm:$0xf0]  ;;  %v5499_v1 = vld [vmem:[%s8246_s3 + $0x524] sm:$0xf]  ;;  %v4088_v8 = vor.u32 %v5567_v55, %v4085_v56  ;;  %v314_v12 = vrot.slane %v297_v61, 7  ;;  %v315_v19 = vrot.slane %v298_v7, 7 }
  0x3b   : > { %1347 = vmatpush.bf16.msrb.mxu1 %v3864_v21  ;;  %v3813_v2 = vld [vmem:[%s8246_s3 + $0x530] sm:$0xf0]  ;;  %v316_v4 = vrot.slane %v299_v58, 7  ;;  %v5531_v6 = vld [vmem:[%s8246_s3 + $0x624] sm:$0xf]  ;;  %v3688_v14 = vor.u32 %v5467_v60, %v3685_v0 }
  0x3c   : > { %1360 = vmatpush.bf16.msrb.mxu2 %v3992_v22  ;;  %v3941_v9 = vld [vmem:[%s8246_s3 + $0x630] sm:$0xf0]  ;;  %v5563_v10 = vld [vmem:[%s8246_s3 + $0x724] sm:$0xf]  ;;  %325 = vst [vmem:[#allocation2 + $0x18] sm:$0xfe] %v317_v5  ;;  %v3816_v17 = vor.u32 %v5499_v1, %v3813_v2 }
  0x3d   : > { %1373 = vmatpush.bf16.msrb.mxu3 %v4120_v30  ;;  %v4069_v11 = vld [vmem:[%s8246_s3 + $0x730] sm:$0xf0]  ;;  %324 = vst [vmem:[#allocation2 + $0x10] sm:$0xfe] %v316_v4  ;;  %v5463_v13 = vld [vmem:[%s8246_s3 + $0x404] sm:$0xf]  ;;  %v3944_v18 = vor.u32 %v5531_v6, %v3941_v9 }
  0x3e   : > { %1335 = vmatpush.bf16.msrb.mxu0 %v3720_v41  ;;  %328 = vst [vmem:[#allocation2 + $0x30] sm:$0x1] %v316_v4  ;;  %v3669_v15 = vld [vmem:[%s8246_s3 + $0x410] sm:$0xf0]  ;;  %v5495_v16 = vld [vmem:[%s8246_s3 + $0x504] sm:$0xf]  ;;  %v4072_v21 = vor.u32 %v5563_v10, %v4069_v11 }
  0x3f   : > { %1348 = vmatpush.bf16.msrb.mxu1 %v3848_v42  ;;  %v3797_v20 = vld [vmem:[%s8246_s3 + $0x510] sm:$0xf0]  ;;  %329 = vst [vmem:[#allocation2 + $0x38] sm:$0x1] %v317_v5  ;;  %v5527_v22 = vld [vmem:[%s8246_s3 + $0x604] sm:$0xf]  ;;  %v3672_v26 = vor.u32 %v5463_v13, %v3669_v15 }
  0x40   : > { %1361 = vmatpush.bf16.msrb.mxu2 %v3976_v43  ;;  %v3925_v23 = vld [vmem:[%s8246_s3 + $0x610] sm:$0xf0]  ;;  %322 = vst [vmem:[#allocation2] sm:$0xfe] %v314_v12  ;;  %v5559_v24 = vld [vmem:[%s8246_s3 + $0x704] sm:$0xf]  ;;  %v3800_v27 = vor.u32 %v5495_v16, %v3797_v20 }
  0x41   : > { %1374 = vmatpush.bf16.msrb.mxu3 %v4104_v53  ;;  %v4053_v25 = vld [vmem:[%s8246_s3 + $0x710] sm:$0xf0]  ;;  %326 = vst [vmem:[#allocation2 + $0x20] sm:$0x1] %v314_v12  ;;  %v3928_v28 = vor.u32 %v5527_v22, %v3925_v23  ;;  %v4171_v42 = vld [vmem:[%s8246_s3 + $0x7e8] sm:$0xf] }
  0x42   : > { %1336 = vmatpush.bf16.msrb.mxu0 %v3704_v62  ;;  %323 = vst [vmem:[#allocation2 + $0x8] sm:$0xfe] %v315_v19  ;;  %v4056_v30 = vor.u32 %v5559_v24, %v4053_v25  ;;  %v5590_v43 = vld [vmem:[%s8246_s3 + $0x7f4] sm:$0xf0]  ;;  %v3787_v49 = vld [vmem:[%s8246_s3 + $0x4e8] sm:$0xf] }
  0x43   : > { %1349 = vmatpush.bf16.msrb.mxu1 %v3832_v63  ;;  %327 = vst [vmem:[#allocation2 + $0x28] sm:$0x1] %v315_v19  ;;  %v469_v33 = vld [vmem:[#allocation2 + $0x18] sm:$0xfe]  ;;  %v4027_v53 = vld [vmem:[%s8246_s3 + $0x6c8] sm:$0xf]  ;;  %v4172_v61 = vor.u32 %v5590_v43, %v4171_v42 }
  0x44   : > { %1362 = vmatpush.bf16.msrb.mxu2 %v3960_v3  ;;  %v468_v29 = vld [vmem:[#allocation2 + $0x10] sm:$0xfe]  ;;  %v5494_v51 = vld [vmem:[%s8246_s3 + $0x4f4] sm:$0xf0]  ;;  %v3915_v60 = vld [vmem:[%s8246_s3 + $0x5e8] sm:$0xf] }
  0x45   : > { %1375 = vmatpush.bf16.msrb.mxu3 %v4088_v8  ;;  %v472_v31 = vld [vmem:[#allocation2 + $0x30] sm:$0x1]  ;;  %v5554_v58 = vld [vmem:[%s8246_s3 + $0x6d4] sm:$0xf0]  ;;  %v4155_v0 = vld [vmem:[%s8246_s3 + $0x7c8] sm:$0xf]  ;;  %v3788_v4 = vor.u32 %v5494_v51, %v3787_v49 }
  0x46   : > { %1337 = vmatpush.bf16.msrb.mxu0 %v3688_v14  ;;  %v476_v32 = vpack.c.bf16 %v472_v31, %v468_v29  ;;  %v473_v34 = vld [vmem:[#allocation2 + $0x38] sm:$0x1]  ;;  %v3771_v6 = vld [vmem:[%s8246_s3 + $0x4c8] sm:$0xf]  ;;  %v4028_v7 = vor.u32 %v5554_v58, %v4027_v53 }
  0x47   : > { %1350 = vmatpush.bf16.msrb.mxu1 %v3816_v17  ;;  %v477_v38 = vpack.c.bf16 %v473_v34, %v469_v33  ;;  %v466_v39 = vld [vmem:[#allocation2] sm:$0xfe]  ;;  %v5586_v1 = vld [vmem:[%s8246_s3 + $0x7d4] sm:$0xf0]  ;;  %v4011_v10 = vld [vmem:[%s8246_s3 + $0x6a8] sm:$0xf] }
  0x48   : > { %1363 = vmatpush.bf16.msrb.mxu2 %v3944_v18  ;;  %v622_v36 = vshrl.u32 %v476_v32, 16  ;;  %v624_v37 = vshll.u32 %v476_v32, 16  ;;  %v470_v41 = vld [vmem:[#allocation2 + $0x20] sm:$0x1]  ;;  %v5526_v5 = vld [vmem:[%s8246_s3 + $0x5f4] sm:$0xf0]  ;;  %v4156_v13 = vor.u32 %v5586_v1, %v4155_v0 }
  0x49   : > { %1376 = vmatpush.bf16.msrb.mxu3 %v4072_v21  ;;  %v629_v45 = vshrl.u32 %v477_v38, 16  ;;  %v631_v46 = vshll.u32 %v477_v38, 16  ;;  %v474_v47 = vpack.c.bf16 %v470_v41, %v466_v39  ;;  %v467_v48 = vld [vmem:[#allocation2 + $0x8] sm:$0xfe]  ;;  %v5490_v9 = vld [vmem:[%s8246_s3 + $0x4d4] sm:$0xf0]  ;;  %v3916_v14 = vor.u32 %v5526_v5, %v3915_v60 }
  0x4a   : > { %1338 = vmatpush.bf16.msrb.mxu0 %v3672_v26  ;;  %v626_v44 = vrot.slane %v624_v37, 1  ;;  %v471_v50 = vld [vmem:[#allocation2 + $0x28] sm:$0x1]  ;;  %v5550_v11 = vld [vmem:[%s8246_s3 + $0x6b4] sm:$0xf0]  ;;  %v3772_v18 = vor.u32 %v5490_v9, %v3771_v6 }
  0x4b   : > { %1351 = vmatpush.bf16.msrb.mxu1 %v3800_v27  ;;  %v633_v55 = vrot.slane %v631_v46, 1  ;;  %v608_v56 = vshrl.u32 %v474_v47, 16  ;;  %v610_v57 = vshll.u32 %v474_v47, 16  ;;  %v475_v59 = vpack.c.bf16 %v471_v50, %v467_v48  ;;  %v4139_v15 = vld [vmem:[%s8246_s3 + $0x7a8] sm:$0xf] }
  0x4c   : > { %1364 = vmatpush.bf16.msrb.mxu2 %v3928_v28  ;;  %v6203_v54 = vor.u32 %v626_v44, %v622_v36  ;;  %v5582_v16 = vld [vmem:[%s8246_s3 + $0x7b4] sm:$0xf0]  ;;  %v3899_v19 = vld [vmem:[%s8246_s3 + $0x5c8] sm:$0xf]  ;;  %v4012_v22 = vor.u32 %v5550_v11, %v4011_v10 }
  0x4d   : > { %1377 = vmatpush.bf16.msrb.mxu3 %v4056_v30  ;;  %v6212_v62 = vor.u32 %v633_v55, %v629_v45  ;;  %v612_v63 = vrot.slane %v610_v57, 1  ;;  %v615_v2 = vshrl.u32 %v475_v59, 16  ;;  %v617_v3 = vshll.u32 %v475_v59, 16  ;;  %v5522_v20 = vld [vmem:[%s8246_s3 + $0x5d4] sm:$0xf0] }
  0x4e   : > { %1313 = vmatmul.bf16.vlgmr.msra.gmra.mxu2 %v6203_v54  ;;  %v3755_v21 = vld [vmem:[%s8246_s3 + $0x4a8] sm:$0xf]  ;;  %v5486_v23 = vld [vmem:[%s8246_s3 + $0x4b4] sm:$0xf0]  ;;  %v4140_v26 = vor.u32 %v5582_v16, %v4139_v15  ;;  %v3900_v27 = vor.u32 %v5522_v20, %v3899_v19  ;;  %v4045_v15 = vld [vmem:[%s8246_s3 + $0x6f8] sm:$0xf0] }
  0x4f   : > { %1326 = vmatmul.bf16.vlgmr.msra.gmra.mxu3 %v6212_v62  ;;  %v6227_v8 = vor.u32 %v612_v63, %v608_v56  ;;  %v619_v12 = vrot.slane %v617_v3, 1  ;;  %v3995_v24 = vld [vmem:[%s8246_s3 + $0x688] sm:$0xf]  ;;  %v5546_v25 = vld [vmem:[%s8246_s3 + $0x694] sm:$0xf0]  ;;  %v3756_v30 = vor.u32 %v5486_v23, %v3755_v21 }
  0x50   : > { %1409 = vmatpush.bf16.msra.mxu2 %v4044_v52  ;;  %v4123_v28 = vld [vmem:[%s8246_s3 + $0x788] sm:$0xf]  ;;  %v5578_v29 = vld [vmem:[%s8246_s3 + $0x794] sm:$0xf0]  ;;  %v3996_v34 = vor.u32 %v5546_v25, %v3995_v24  ;;  %v5588_v24 = vld [vmem:[%s8246_s3 + $0x7ec] sm:$0xf] }
  0x51   : > { %1422 = vmatpush.bf16.msra.mxu3 %v4172_v61  ;;  %1287 = vmatmul.bf16.vlgmr.msra.gmra.mxu0 %v6227_v8  ;;  %v6245_v17 = vor.u32 %v619_v12, %v615_v2  ;;  %v3883_v31 = vld [vmem:[%s8246_s3 + $0x5a8] sm:$0xf]  ;;  %v5518_v32 = vld [vmem:[%s8246_s3 + $0x5b4] sm:$0xf0]  ;;  %v4124_v38 = vor.u32 %v5578_v29, %v4123_v28  ;;  %v4173_v25 = vld [vmem:[%s8246_s3 + $0x7f8] sm:$0xf0] }
  0x52   : > { %1383 = vmatpush.bf16.msra.mxu0 %v3788_v4  ;;  %v3739_v33 = vld [vmem:[%s8246_s3 + $0x488] sm:$0xf]  ;;  %v5482_v35 = vld [vmem:[%s8246_s3 + $0x494] sm:$0xf0]  ;;  %v3884_v39 = vor.u32 %v5518_v32, %v3883_v31  ;;  %v5492_v28 = vld [vmem:[%s8246_s3 + $0x4ec] sm:$0xf] }
  0x53   : > { %1300 = vmatmul.bf16.vlgmr.msra.gmra.mxu1 %v6245_v17  ;;  %v3979_v36 = vld [vmem:[%s8246_s3 + $0x668] sm:$0xf]  ;;  %v5542_v37 = vld [vmem:[%s8246_s3 + $0x674] sm:$0xf0]  ;;  %v3740_v42 = vor.u32 %v5482_v35, %v3739_v33  ;;  %v3789_v31 = vld [vmem:[%s8246_s3 + $0x4f8] sm:$0xf0] }
  0x54   : > { %1410 = vmatpush.bf16.msra.mxu2 %v4028_v7  ;;  %1396 = vmatpush.bf16.msra.mxu1 %v3916_v14  ;;  %v4107_v40 = vld [vmem:[%s8246_s3 + $0x768] sm:$0xf]  ;;  %v5574_v41 = vld [vmem:[%s8246_s3 + $0x774] sm:$0xf0]  ;;  %v3980_v46 = vor.u32 %v5542_v37, %v3979_v36  ;;  %v5556_v14 = vld [vmem:[%s8246_s3 + $0x6ec] sm:$0xf]  ;;  %v4176_v36 = vor.u32 %v5588_v24, %v4173_v25 }
  0x55   : > { %1423 = vmatpush.bf16.msra.mxu3 %v4156_v13  ;;  %v3867_v43 = vld [vmem:[%s8246_s3 + $0x588] sm:$0xf]  ;;  %v5514_v44 = vld [vmem:[%s8246_s3 + $0x594] sm:$0xf0]  ;;  %v4108_v50 = vor.u32 %v5574_v41, %v4107_v40  ;;  %v4048_v29 = vor.u32 %v5556_v14, %v4045_v15  ;;  %v5552_v32 = vld [vmem:[%s8246_s3 + $0x6cc] sm:$0xf]  ;;  %v3792_v41 = vor.u32 %v5492_v28, %v3789_v31 }
  0x56   : > { %1384 = vmatpush.bf16.msra.mxu0 %v3772_v18  ;;  %v3723_v45 = vld [vmem:[%s8246_s3 + $0x468] sm:$0xf]  ;;  %v5478_v47 = vld [vmem:[%s8246_s3 + $0x474] sm:$0xf0]  ;;  %v3868_v51 = vor.u32 %v5514_v44, %v3867_v43  ;;  %v4029_v33 = vld [vmem:[%s8246_s3 + $0x6d8] sm:$0xf0] }
  0x57   : > { %v3963_v48 = vld [vmem:[%s8246_s3 + $0x648] sm:$0xf]  ;;  %v5538_v49 = vld [vmem:[%s8246_s3 + $0x654] sm:$0xf0]  ;;  %v3724_v55 = vor.u32 %v5478_v47, %v3723_v45  ;;  %v4157_v40 = vld [vmem:[%s8246_s3 + $0x7d8] sm:$0xf0]  ;;  %v4032_v45 = vor.u32 %v5552_v32, %v4029_v33 }
  0x58   : > { %1411 = vmatpush.bf16.msra.mxu2 %v4012_v22  ;;  %1397 = vmatpush.bf16.msra.mxu1 %v3900_v27  ;;  %v4091_v52 = vld [vmem:[%s8246_s3 + $0x748] sm:$0xf]  ;;  %v5570_v53 = vld [vmem:[%s8246_s3 + $0x754] sm:$0xf0]  ;;  %v3964_v59 = vor.u32 %v5538_v49, %v3963_v48  ;;  %v3917_v43 = vld [vmem:[%s8246_s3 + $0x5f8] sm:$0xf0] }
  0x59   : > { %1424 = vmatpush.bf16.msra.mxu3 %v4140_v26  ;;  %v3851_v56 = vld [vmem:[%s8246_s3 + $0x568] sm:$0xf]  ;;  %v5510_v57 = vld [vmem:[%s8246_s3 + $0x574] sm:$0xf0]  ;;  %v4092_v0 = vor.u32 %v5570_v53, %v4091_v52  ;;  %v5488_v44 = vld [vmem:[%s8246_s3 + $0x4cc] sm:$0xf] }
  0x5a   : > { %1385 = vmatpush.bf16.msra.mxu0 %v3756_v30  ;;  %v3707_v58 = vld [vmem:[%s8246_s3 + $0x448] sm:$0xf]  ;;  %v5474_v60 = vld [vmem:[%s8246_s3 + $0x454] sm:$0xf0]  ;;  %v3852_v1 = vor.u32 %v5510_v57, %v3851_v56  ;;  %v5548_v47 = vld [vmem:[%s8246_s3 + $0x6ac] sm:$0xf] }
  0x5b   : > { %v3947_v61 = vld [vmem:[%s8246_s3 + $0x628] sm:$0xf]  ;;  %v5534_v63 = vld [vmem:[%s8246_s3 + $0x634] sm:$0xf0]  ;;  %v3708_v4 = vor.u32 %v5474_v60, %v3707_v58  ;;  %v4013_v48 = vld [vmem:[%s8246_s3 + $0x6b8] sm:$0xf0] }
  0x5c   : > { %1412 = vmatpush.bf16.msra.mxu2 %v3996_v34  ;;  %1398 = vmatpush.bf16.msra.mxu1 %v3884_v39  ;;  %v4075_v2 = vld [vmem:[%s8246_s3 + $0x728] sm:$0xf]  ;;  %v5566_v3 = vld [vmem:[%s8246_s3 + $0x734] sm:$0xf0]  ;;  %v3948_v9 = vor.u32 %v5534_v63, %v3947_v61  ;;  %v5584_v39 = vld [vmem:[%s8246_s3 + $0x7cc] sm:$0xf] }
  0x5d   : > { %1425 = vmatpush.bf16.msra.mxu3 %v4124_v38  ;;  %v3835_v5 = vld [vmem:[%s8246_s3 + $0x548] sm:$0xf]  ;;  %v5506_v6 = vld [vmem:[%s8246_s3 + $0x554] sm:$0xf0]  ;;  %v4076_v13 = vor.u32 %v5566_v3, %v4075_v2  ;;  %v5580_v52 = vld [vmem:[%s8246_s3 + $0x7ac] sm:$0xf] }
  0x5e   : > { %1365 = vmatmul.bf16.vlgmr.msrb.gmra.mxu2 %v6203_v54  ;;  %1386 = vmatpush.bf16.msra.mxu0 %v3740_v42  ;;  %v3691_v7 = vld [vmem:[%s8246_s3 + $0x428] sm:$0xf]  ;;  %v5470_v10 = vld [vmem:[%s8246_s3 + $0x434] sm:$0xf0]  ;;  %v3836_v16 = vor.u32 %v5506_v6, %v3835_v5  ;;  %v5524_v42 = vld [vmem:[%s8246_s3 + $0x5ec] sm:$0xf] }
  0x5f   : > { %1378 = vmatmul.bf16.vlgmr.msrb.gmra.mxu3 %v6212_v62  ;;  %v3931_v11 = vld [vmem:[%s8246_s3 + $0x608] sm:$0xf]  ;;  %v5530_v12 = vld [vmem:[%s8246_s3 + $0x614] sm:$0xf0]  ;;  %v3692_v21 = vor.u32 %v5470_v10, %v3691_v7  ;;  %v4141_v53 = vld [vmem:[%s8246_s3 + $0x7b8] sm:$0xf0] }
  0x60   : > { %1413 = vmatpush.bf16.msra.mxu2 %v3980_v46  ;;  %1399 = vmatpush.bf16.msra.mxu1 %v3868_v51  ;;  %v3819_v18 = vld [vmem:[%s8246_s3 + $0x528] sm:$0xf]  ;;  %v5562_v20 = vld [vmem:[%s8246_s3 + $0x714] sm:$0xf0]  ;;  %v3932_v23 = vor.u32 %v5530_v12, %v3931_v11  ;;  %v3773_v46 = vld [vmem:[%s8246_s3 + $0x4d8] sm:$0xf0]  ;;  %v3920_v51 = vor.u32 %v5524_v42, %v3917_v43 }
  0x61   : > { %1426 = vmatpush.bf16.msra.mxu3 %v4108_v50  ;;  %1339 = vmatmul.bf16.vlgmr.msrb.gmra.mxu0 %v6227_v8  ;;  %v4059_v19 = vld [vmem:[%s8246_s3 + $0x708] sm:$0xf]  ;;  %v5502_v22 = vld [vmem:[%s8246_s3 + $0x534] sm:$0xf0]  ;;  %v4160_v50 = vor.u32 %v5584_v39, %v4157_v40  ;;  %v5520_v56 = vld [vmem:[%s8246_s3 + $0x5cc] sm:$0xf] }
  0x62   : > { %1387 = vmatpush.bf16.msra.mxu0 %v3724_v55  ;;  %v3675_v26 = vld [vmem:[%s8246_s3 + $0x408] sm:$0xf]  ;;  %v5466_v27 = vld [vmem:[%s8246_s3 + $0x414] sm:$0xf0]  ;;  %v4060_v30 = vor.u32 %v5562_v20, %v4059_v19  ;;  %v3820_v34 = vor.u32 %v5502_v22, %v3819_v18  ;;  %v3776_v55 = vor.u32 %v5488_v44, %v3773_v46  ;;  %v3901_v57 = vld [vmem:[%s8246_s3 + $0x5d8] sm:$0xf0] }
  0x63   : > { %1352 = vmatmul.bf16.vlgmr.msrb.gmra.mxu1 %v6245_v17  ;;  %v3803_v35 = vld [vmem:[%s8246_s3 + $0x508] sm:$0xf]  ;;  %v3676_v37 = vor.u32 %v5466_v27, %v3675_v26  ;;  %v5498_v38 = vld [vmem:[%s8246_s3 + $0x514] sm:$0xf0]  ;;  %v5484_v58 = vld [vmem:[%s8246_s3 + $0x4ac] sm:$0xf] }
  0x64   : > { %1414 = vmatpush.bf16.msra.mxu2 %v3964_v59  ;;  %1400 = vmatpush.bf16.msra.mxu1 %v3852_v1  ;;  %v3804_v49 = vor.u32 %v5498_v38, %v3803_v35  ;;  %v4016_v59 = vor.u32 %v5548_v47, %v4013_v48  ;;  %v3757_v60 = vld [vmem:[%s8246_s3 + $0x4b8] sm:$0xf0]  ;;  %v5544_v61 = vld [vmem:[%s8246_s3 + $0x68c] sm:$0xf]  ;;  %v3904_v1 = vor.u32 %v5520_v56, %v3901_v57 }
  0x65   : > { %1427 = vmatpush.bf16.msra.mxu3 %v4092_v0  ;;  %v3997_v63 = vld [vmem:[%s8246_s3 + $0x698] sm:$0xf0]  ;;  %v4144_v0 = vor.u32 %v5580_v52, %v4141_v53  ;;  %v5576_v2 = vld [vmem:[%s8246_s3 + $0x78c] sm:$0xf]  ;;  %v5429_v52 = vld [vmem:[%s8246_s3 + $0x2ec] sm:$0xf0] }
  0x66   : > { %1388 = vmatpush.bf16.msra.mxu0 %v3708_v4  ;;  %v4125_v3 = vld [vmem:[%s8246_s3 + $0x798] sm:$0xf0]  ;;  %v3760_v4 = vor.u32 %v5484_v58, %v3757_v60  ;;  %v5516_v5 = vld [vmem:[%s8246_s3 + $0x5ac] sm:$0xf] }
  0x67   : > { %v3885_v6 = vld [vmem:[%s8246_s3 + $0x5b8] sm:$0xf0]  ;;  %v5480_v7 = vld [vmem:[%s8246_s3 + $0x48c] sm:$0xf] }
  0x68   : > { %1415 = vmatpush.bf16.msra.mxu2 %v3948_v9  ;;  %1401 = vmatpush.bf16.msra.mxu1 %v3836_v16  ;;  %v4000_v9 = vor.u32 %v5544_v61, %v3997_v63  ;;  %v3741_v10 = vld [vmem:[%s8246_s3 + $0x498] sm:$0xf0]  ;;  %v5540_v11 = vld [vmem:[%s8246_s3 + $0x66c] sm:$0xf]  ;;  %v3888_v14 = vor.u32 %v5516_v5, %v3885_v6  ;;  %v4675_v61 = vld [vmem:[%s8246_s3 + $0x3e0] sm:$0xf] }
  0x69   : > { %1428 = vmatpush.bf16.msra.mxu3 %v4076_v13  ;;  %v3981_v12 = vld [vmem:[%s8246_s3 + $0x678] sm:$0xf0]  ;;  %v4128_v13 = vor.u32 %v5576_v2, %v4125_v3  ;;  %v5572_v15 = vld [vmem:[%s8246_s3 + $0x76c] sm:$0xf]  ;;  %v3744_v18 = vor.u32 %v5480_v7, %v3741_v10  ;;  %v5461_v63 = vld [vmem:[%s8246_s3 + $0x3ec] sm:$0xf0] }
  0x6a   : > { %1389 = vmatpush.bf16.msra.mxu0 %v3692_v21  ;;  %v4109_v16 = vld [vmem:[%s8246_s3 + $0x778] sm:$0xf0]  ;;  %v5512_v19 = vld [vmem:[%s8246_s3 + $0x58c] sm:$0xf]  ;;  %v3984_v22 = vor.u32 %v5540_v11, %v3981_v12  ;;  %v4291_v2 = vld [vmem:[%s8246_s3 + $0xe0] sm:$0xf] }
  0x6b   : > { %v3869_v20 = vld [vmem:[%s8246_s3 + $0x598] sm:$0xf0]  ;;  %v5476_v21 = vld [vmem:[%s8246_s3 + $0x46c] sm:$0xf]  ;;  %v4112_v26 = vor.u32 %v5572_v15, %v4109_v16  ;;  %v5365_v6 = vld [vmem:[%s8246_s3 + $0xec] sm:$0xf0] }
  0x6c   : > { %1416 = vmatpush.bf16.msra.mxu2 %v3932_v23  ;;  %1402 = vmatpush.bf16.msra.mxu1 %v3820_v34  ;;  %v3725_v23 = vld [vmem:[%s8246_s3 + $0x478] sm:$0xf0]  ;;  %v5536_v24 = vld [vmem:[%s8246_s3 + $0x64c] sm:$0xf]  ;;  %v3872_v27 = vor.u32 %v5512_v19, %v3869_v20  ;;  %v4531_v7 = vld [vmem:[%s8246_s3 + $0x2c0] sm:$0xf]  ;;  %v4292_v19 = vor.u32 %v5365_v6, %v4291_v2 }
  0x6d   : > { %1429 = vmatpush.bf16.msra.mxu3 %v4060_v30  ;;  %v3965_v25 = vld [vmem:[%s8246_s3 + $0x658] sm:$0xf0]  ;;  %v5568_v28 = vld [vmem:[%s8246_s3 + $0x74c] sm:$0xf]  ;;  %v3728_v30 = vor.u32 %v5476_v21, %v3725_v23  ;;  %v4659_v15 = vld [vmem:[%s8246_s3 + $0x3c0] sm:$0xf] }
  0x6e   : > { %1390 = vmatpush.bf16.msra.mxu0 %v3676_v37  ;;  %v5508_v31 = vld [vmem:[%s8246_s3 + $0x56c] sm:$0xf]  ;;  %v3853_v32 = vld [vmem:[%s8246_s3 + $0x578] sm:$0xf0]  ;;  %v3968_v34 = vor.u32 %v5536_v24, %v3965_v25  ;;  %v5457_v16 = vld [vmem:[%s8246_s3 + $0x3cc] sm:$0xf0] }
  0x6f   : > { %1417 = vmatmul.bf16.vlgmr.msra.gmra.mxu2 %v6203_v54  ;;  %v5472_v33 = vld [vmem:[%s8246_s3 + $0x44c] sm:$0xf]  ;;  %v3709_v35 = vld [vmem:[%s8246_s3 + $0x458] sm:$0xf0]  ;;  %v3856_v39 = vor.u32 %v5508_v31, %v3853_v32  ;;  %v4419_v20 = vld [vmem:[%s8246_s3 + $0x1e0] sm:$0xf] }
  0x70   : > { %1461 = vmatpush.bf16.msrb.mxu2 %v4048_v29  ;;  %1430 = vmatmul.bf16.vlgmr.msra.gmra.mxu3 %v6212_v62  ;;  %v4093_v29 = vld [vmem:[%s8246_s3 + $0x758] sm:$0xf0]  ;;  %v5564_v40 = vld [vmem:[%s8246_s3 + $0x72c] sm:$0xf]  ;;  %v3712_v42 = vor.u32 %v5472_v33, %v3709_v35  ;;  %v5397_v21 = vld [vmem:[%s8246_s3 + $0x1ec] sm:$0xf0] }
  0x71   : > { %1474 = vmatpush.bf16.msrb.mxu3 %v4176_v36  ;;  %1403 = vmatpush.bf16.msra.mxu1 %v3804_v49  ;;  %v5532_v36 = vld [vmem:[%s8246_s3 + $0x62c] sm:$0xf]  ;;  %v3949_v37 = vld [vmem:[%s8246_s3 + $0x638] sm:$0xf0]  ;;  %v4096_v38 = vor.u32 %v5568_v28, %v4093_v29  ;;  %v5361_v24 = vld [vmem:[%s8246_s3 + $0xcc] sm:$0xf0]  ;;  %v4660_v28 = vor.u32 %v5457_v16, %v4659_v15 }
  0x72   : > { %1435 = vmatpush.bf16.msrb.mxu0 %v3792_v41  ;;  %v4077_v41 = vld [vmem:[%s8246_s3 + $0x738] sm:$0xf0]  ;;  %v5504_v43 = vld [vmem:[%s8246_s3 + $0x54c] sm:$0xf]  ;;  %v3952_v46 = vor.u32 %v5532_v36, %v3949_v37  ;;  %v4515_v25 = vld [vmem:[%s8246_s3 + $0x2a0] sm:$0xf] }
  0x73   : > { %1391 = vmatmul.bf16.vlgmr.msra.gmra.mxu0 %v6227_v8  ;;  %v3837_v44 = vld [vmem:[%s8246_s3 + $0x558] sm:$0xf0]  ;;  %v5528_v48 = vld [vmem:[%s8246_s3 + $0x60c] sm:$0xf]  ;;  %v5736_v29 = vmov 0.0  }
  0x74   : > { %1462 = vmatpush.bf16.msrb.mxu2 %v4032_v45  ;;  %1404 = vmatmul.bf16.vlgmr.msra.gmra.mxu1 %v6245_v17  ;;  %v5468_v45 = vld [vmem:[%s8246_s3 + $0x42c] sm:$0xf]  ;;  %v3693_v47 = vld [vmem:[%s8246_s3 + $0x438] sm:$0xf0]  ;;  %v3840_v53 = vor.u32 %v5504_v43, %v3837_v44  ;;  %v4643_v31 = vld [vmem:[%s8246_s3 + $0x3a0] sm:$0xf] }
  0x75   : > { %1475 = vmatpush.bf16.msrb.mxu3 %v4160_v50  ;;  %1448 = vmatpush.bf16.msrb.mxu1 %v3920_v51  ;;  %v3933_v49 = vld [vmem:[%s8246_s3 + $0x618] sm:$0xf0]  ;;  %v4080_v50 = vor.u32 %v5564_v40, %v4077_v41  ;;  %v4547_v51 = vld [vmem:[%s8246_s3 + $0x2e0] sm:$0xf]  ;;  %v5560_v56 = vld [vmem:[%s8246_s3 + $0x70c] sm:$0xf]  ;;  %v3696_v58 = vor.u32 %v5468_v45, %v3693_v47 }
  0x76   : > { %1436 = vmatpush.bf16.msrb.mxu0 %v3776_v55  ;;  %v5500_v55 = vld [vmem:[%s8246_s3 + $0x52c] sm:$0xf]  ;;  %v4061_v57 = vld [vmem:[%s8246_s3 + $0x718] sm:$0xf0]  ;;  %v3936_v60 = vor.u32 %v5528_v48, %v3933_v49  ;;  %v4548_v3 = vor.u32 %v5429_v52, %v4547_v51  ;;  %v5453_v32 = vld [vmem:[%s8246_s3 + $0x3ac] sm:$0xf0] }
  0x77   : > { %v4064_v5 = vor.u32 %v5560_v56, %v4061_v57  ;;  %v5496_v11 = vld [vmem:[%s8246_s3 + $0x50c] sm:$0xf]  ;;  %v3805_v12 = vld [vmem:[%s8246_s3 + $0x518] sm:$0xf0]  ;;  %v5393_v35 = vld [vmem:[%s8246_s3 + $0x1cc] sm:$0xf0]  ;;  %v4644_v40 = vor.u32 %v5453_v32, %v4643_v31 }
  0x78   : > { %1463 = vmatpush.bf16.msrb.mxu2 %v4016_v59  ;;  %v3821_v59 = vld [vmem:[%s8246_s3 + $0x538] sm:$0xf0]  ;;  %v4259_v36 = vld [vmem:[%s8246_s3 + $0xa0] sm:$0xf]  ;;  %v5449_v43 = vld [vmem:[%s8246_s3 + $0x38c] sm:$0xf0] }
  0x79   : > { %1476 = vmatpush.bf16.msrb.mxu3 %v4144_v0  ;;  %1449 = vmatpush.bf16.msrb.mxu1 %v3904_v1  ;;  %v5464_v0 = vld [vmem:[%s8246_s3 + $0x40c] sm:$0xf]  ;;  %v3677_v1 = vld [vmem:[%s8246_s3 + $0x418] sm:$0xf0]  ;;  %v3824_v10 = vor.u32 %v5500_v55, %v3821_v59  ;;  %v4627_v41 = vld [vmem:[%s8246_s3 + $0x380] sm:$0xf] }
  0x7a   : > { %1437 = vmatpush.bf16.msrb.mxu0 %v3760_v4  ;;  %v301_v4 = vlaneseq  ;;  %v4387_v44 = vld [vmem:[%s8246_s3 + $0x1a0] sm:$0xf]  ;;  %v5389_v45 = vld [vmem:[%s8246_s3 + $0x1ac] sm:$0xf0] }
  0x7b   : > { %v4483_v48 = vld [vmem:[%s8246_s3 + $0x260] sm:$0xf]  ;;  %v5413_v49 = vld [vmem:[%s8246_s3 + $0x26c] sm:$0xf0]  ;;  %v4388_v51 = vor.u32 %v5389_v45, %v4387_v44 }
  0x7c   : > { %1464 = vmatpush.bf16.msrb.mxu2 %v4000_v9  ;;  %v5425_v9 = vld [vmem:[%s8246_s3 + $0x2cc] sm:$0xf0]  ;;  %vm6616_vm0 = vcmp.lt.s32.totalorder %v301_v4, 512  ;;  %v4611_v52 = vld [vmem:[%s8246_s3 + $0x360] sm:$0xf] }
  0x7d   : > { %1477 = vmatpush.bf16.msrb.mxu3 %v4128_v13  ;;  %1450 = vmatpush.bf16.msrb.mxu1 %v3888_v14  ;;  %v4676_v13 = vor.u32 %v5461_v63, %v4675_v61  ;;  %v3680_v14 = vor.u32 %v5464_v0, %v3677_v1  ;;  %v4532_v23 = vor.u32 %v5425_v9, %v4531_v7  ;;  %v4371_v56 = vld [vmem:[%s8246_s3 + $0x180] sm:$0xf]  ;;  %v5349_v59 = vld [vmem:[%s8246_s3 + $0x6c] sm:$0xf0] }
  0x7e   : > { %1438 = vmatpush.bf16.msrb.mxu0 %v3744_v18  ;;  %305 = vst.msk [vmem:[#allocation2] ss:$8 sm:$0xf] %vm6616_vm0, %v5736_v29  ;;  %v4227_v57 = vld [vmem:[%s8246_s3 + $0x60] sm:$0xf] }
  0x7f   : > { %308 = vst.msk [vmem:[#allocation2 + $0x21] ss:$8 sm:$0xf] %vm6616_vm0, %v5736_v29  ;;  %v5409_v61 = vld [vmem:[%s8246_s3 + $0x24c] sm:$0xf0] }
  0x80   : > { %1465 = vmatpush.bf16.msrb.mxu2 %v3984_v22  ;;  %v4275_v22 = vld [vmem:[%s8246_s3 + $0xc0] sm:$0xf]  ;;  %v5441_v2 = vld [vmem:[%s8246_s3 + $0x34c] sm:$0xf0] }
  0x81   : > { %1478 = vmatpush.bf16.msrb.mxu3 %v4112_v26  ;;  %1451 = vmatpush.bf16.msrb.mxu1 %v3872_v27  ;;  %v5421_v26 = vld [vmem:[%s8246_s3 + $0x2ac] sm:$0xf0]  ;;  %v3808_v27 = vor.u32 %v5496_v11, %v3805_v12  ;;  %v4276_v33 = vor.u32 %v5361_v24, %v4275_v22  ;;  %v4595_v1 = vld [vmem:[%s8246_s3 + $0x340] sm:$0xf] }
  0x82   : > { %1439 = vmatpush.bf16.msrb.mxu0 %v3728_v30  ;;  %v4420_v30 = vor.u32 %v5397_v21, %v4419_v20  ;;  %v4516_v37 = vor.u32 %v5421_v26, %v4515_v25  ;;  %v4355_v4 = vld [vmem:[%s8246_s3 + $0x160] sm:$0xf]  ;;  %v5345_v9 = vld [vmem:[%s8246_s3 + $0x4c] sm:$0xf0]  ;;  %v4596_v12 = vor.u32 %v5441_v2, %v4595_v1  ;;  %v5419_v1 = vld [vmem:[%s8246_s3 + $0x2a4] sm:$0xf] }
  0x83   : > { %v4211_v6 = vld [vmem:[%s8246_s3 + $0x40] sm:$0xf]  ;;  %v5405_v11 = vld [vmem:[%s8246_s3 + $0x22c] sm:$0xf0]  ;;  %v4517_v2 = vld [vmem:[%s8246_s3 + $0x2b0] sm:$0xf0] }
  0x84   : > { %1466 = vmatpush.bf16.msrb.mxu2 %v3968_v34  ;;  %v4403_v34 = vld [vmem:[%s8246_s3 + $0x1c0] sm:$0xf]  ;;  %v5437_v15 = vld [vmem:[%s8246_s3 + $0x32c] sm:$0xf0]  ;;  %v4212_v16 = vor.u32 %v5345_v9, %v4211_v6  ;;  %v5451_v9 = vld [vmem:[%s8246_s3 + $0x3a4] sm:$0xf] }
  0x85   : > { %1479 = vmatpush.bf16.msrb.mxu3 %v4096_v38  ;;  %1452 = vmatpush.bf16.msrb.mxu1 %v3856_v39  ;;  %v4499_v38 = vld [vmem:[%s8246_s3 + $0x280] sm:$0xf]  ;;  %v5417_v39 = vld [vmem:[%s8246_s3 + $0x28c] sm:$0xf0] }
  0x86   : > { %1440 = vmatpush.bf16.msrb.mxu0 %v3712_v42  ;;  %v4404_v42 = vor.u32 %v5393_v35, %v4403_v34  ;;  %v4500_v47 = vor.u32 %v5417_v39, %v4499_v38  ;;  %v5377_v20 = vld [vmem:[%s8246_s3 + $0x14c] sm:$0xf0]  ;;  %v4195_v21 = vld [vmem:[%s8246_s3 + $0x20] sm:$0xf] }
  0x87   : > { %v4435_v24 = vld [vmem:[%s8246_s3 + $0x200] sm:$0xf]  ;;  %v5401_v25 = vld [vmem:[%s8246_s3 + $0x20c] sm:$0xf0] }
  0x88   : > { %1467 = vmatpush.bf16.msrb.mxu2 %v3952_v46  ;;  %v4243_v46 = vld [vmem:[%s8246_s3 + $0x80] sm:$0xf]  ;;  %v5433_v32 = vld [vmem:[%s8246_s3 + $0x30c] sm:$0xf0]  ;;  %v4436_v35 = vor.u32 %v5401_v25, %v4435_v24  ;;  %v5447_v24 = vld [vmem:[%s8246_s3 + $0x384] sm:$0xf] }
  0x89   : > { %1480 = vmatpush.bf16.msrb.mxu3 %v4080_v50  ;;  %1453 = vmatpush.bf16.msrb.mxu1 %v3840_v53  ;;  %v4628_v50 = vor.u32 %v5449_v43, %v4627_v41  ;;  %v5445_v53 = vld [vmem:[%s8246_s3 + $0x36c] sm:$0xf0]  ;;  %v4563_v31 = vld [vmem:[%s8246_s3 + $0x300] sm:$0xf]  ;;  %v4293_v43 = vld [vmem:[%s8246_s3 + $0xf0] sm:$0xf0] }
  0x8a   : > { %1441 = vmatpush.bf16.msrb.mxu0 %v3696_v58  ;;  %v4484_v58 = vor.u32 %v5413_v49, %v4483_v48  ;;  %v4612_v63 = vor.u32 %v5445_v53, %v4611_v52  ;;  %v5373_v34 = vld [vmem:[%s8246_s3 + $0x12c] sm:$0xf0]  ;;  %v4564_v41 = vor.u32 %v5433_v32, %v4563_v31  ;;  %v4307_v45 = vld [vmem:[%s8246_s3 + $0x100] sm:$0xf]  ;;  %v4629_v25 = vld [vmem:[%s8246_s3 + $0x390] sm:$0xf0] }
  0x8b   : > { %v5337_v38 = vld [vmem:[%s8246_s3 + $0xc] sm:$0xf0]  ;;  %v5383_v32 = vld [vmem:[%s8246_s3 + $0x184] sm:$0xf] }
  0x8c   : > { %1468 = vmatpush.bf16.msrb.mxu2 %v3936_v60  ;;  %v4467_v60 = vld [vmem:[%s8246_s3 + $0x240] sm:$0xf]  ;;  %v5369_v49 = vld [vmem:[%s8246_s3 + $0x10c] sm:$0xf0] }
  0x8d   : > { %1481 = vmatpush.bf16.msrb.mxu3 %v4064_v5  ;;  %1454 = vmatpush.bf16.msrb.mxu1 %v3824_v10  ;;  %v5381_v5 = vld [vmem:[%s8246_s3 + $0x16c] sm:$0xf0]  ;;  %v4468_v7 = vor.u32 %v5409_v61, %v4467_v60  ;;  %v4451_v10 = vld [vmem:[%s8246_s3 + $0x220] sm:$0xf]  ;;  %v4308_v61 = vor.u32 %v5369_v49, %v4307_v45  ;;  %v4357_v45 = vld [vmem:[%s8246_s3 + $0x170] sm:$0xf0] }
  0x8e   : > { %1442 = vmatpush.bf16.msrb.mxu0 %v3680_v14  ;;  %v4579_v14 = vld [vmem:[%s8246_s3 + $0x320] sm:$0xf]  ;;  %v4452_v22 = vor.u32 %v5405_v11, %v4451_v10  ;;  %v4645_v10 = vld [vmem:[%s8246_s3 + $0x3b0] sm:$0xf0] }
  0x8f   : > { %1469 = vmatmul.bf16.vlgmr.msrb.gmra.mxu2 %v6203_v54  ;;  %v5357_v54 = vld [vmem:[%s8246_s3 + $0xac] sm:$0xf0]  ;;  %v4580_v26 = vor.u32 %v5437_v15, %v4579_v14  ;;  %v4520_v14 = vor.u32 %v5419_v1, %v4517_v2  ;;  %v5415_v15 = vld [vmem:[%s8246_s3 + $0x284] sm:$0xf] }
  0x90   : > { %2153 = vmatpush.bf16.msra.mxu2 %v4548_v3  ;;  %1482 = vmatmul.bf16.vlgmr.msrb.gmra.mxu3 %v6212_v62  ;;  %v4260_v62 = vor.u32 %v5357_v54, %v4259_v36  ;;  %v4228_v3 = vor.u32 %v5349_v59, %v4227_v57  ;;  %v5459_v36 = vld [vmem:[%s8246_s3 + $0x3e4] sm:$0xf]  ;;  %v4179_v54 = vld [vmem:[%s8246_s3] sm:$0xf]  ;;  %v4661_v57 = vld [vmem:[%s8246_s3 + $0x3d0] sm:$0xf0] }
  0x91   : > { %2166 = vmatpush.bf16.msra.mxu3 %v4676_v13  ;;  %1455 = vmatpush.bf16.msrb.mxu1 %v3808_v27  ;;  %v4356_v13 = vor.u32 %v5381_v5, %v4355_v4  ;;  %v5427_v27 = vld [vmem:[%s8246_s3 + $0x2e4] sm:$0xf]  ;;  %v4180_v48 = vor.u32 %v5337_v38, %v4179_v54  ;;  %v4277_v59 = vld [vmem:[%s8246_s3 + $0xd0] sm:$0xf0] }
  0x92   : > { %2127 = vmatpush.bf16.msra.mxu0 %v4292_v19  ;;  %v4339_v19 = vld [vmem:[%s8246_s3 + $0x140] sm:$0xf]  ;;  %v5391_v4 = vld [vmem:[%s8246_s3 + $0x1c4] sm:$0xf]  ;;  %v4229_v38 = vld [vmem:[%s8246_s3 + $0x70] sm:$0xf0] }
  0x93   : > { %1443 = vmatmul.bf16.vlgmr.msrb.gmra.mxu0 %v6227_v8  ;;  %v5353_v8 = vld [vmem:[%s8246_s3 + $0x8c] sm:$0xf0]  ;;  %v4340_v29 = vor.u32 %v5377_v20, %v4339_v19  ;;  %v5387_v20 = vld [vmem:[%s8246_s3 + $0x1a4] sm:$0xf] }
  0x94   : > { %2154 = vmatpush.bf16.msra.mxu2 %v4532_v23  ;;  %1456 = vmatmul.bf16.vlgmr.msrb.gmra.mxu1 %v6245_v17  ;;  %v4244_v55 = vor.u32 %v5353_v8, %v4243_v46  ;;  %v5385_v17 = vld [vmem:[%s8246_s3 + $0x18c] sm:$0xf0]  ;;  %v4533_v8 = vld [vmem:[%s8246_s3 + $0x2d0] sm:$0xf0]  ;;  %v5347_v54 = vld [vmem:[%s8246_s3 + $0x64] sm:$0xf] }
  0x95   : > { %2167 = vmatpush.bf16.msra.mxu3 %v4660_v28  ;;  %2140 = vmatpush.bf16.msra.mxu1 %v4420_v30  ;;  %v4372_v0 = vor.u32 %v5385_v17, %v4371_v56  ;;  %v5341_v23 = vld [vmem:[%s8246_s3 + $0x2c] sm:$0xf0]  ;;  %v4549_v28 = vld [vmem:[%s8246_s3 + $0x2f0] sm:$0xf0]  ;;  %v4323_v30 = vld [vmem:[%s8246_s3 + $0x120] sm:$0xf] }
  0x96   : > { %2128 = vmatpush.bf16.msra.mxu0 %v4276_v33  ;;  %v4196_v33 = vor.u32 %v5341_v23, %v4195_v21  ;;  %v4552_v39 = vor.u32 %v5427_v27, %v4549_v28  ;;  %v4324_v44 = vor.u32 %v5373_v34, %v4323_v30  ;;  %v5455_v17 = vld [vmem:[%s8246_s3 + $0x3c4] sm:$0xf]  ;;  %v4648_v21 = vor.u32 %v5451_v9, %v4645_v10  ;;  %v4389_v23 = vld [vmem:[%s8246_s3 + $0x1b0] sm:$0xf0]  ;;  %v4555_v9 = vld [vmem:[%s8246_s3 + $0x2e8] sm:$0xf] }
  0x97   : > { %v4664_v5 = vor.u32 %v5455_v17, %v4661_v57  ;;  %v4245_v27 = vld [vmem:[%s8246_s3 + $0x90] sm:$0xf0]  ;;  %v4392_v31 = vor.u32 %v5387_v20, %v4389_v23  ;;  %v5371_v2 = vld [vmem:[%s8246_s3 + $0x124] sm:$0xf]  ;;  %v5430_v10 = vld [vmem:[%s8246_s3 + $0x2f4] sm:$0xf0] }
  0x98   : > { %2155 = vmatpush.bf16.msra.mxu2 %v4516_v37  ;;  %v4677_v37 = vld [vmem:[%s8246_s3 + $0x3f0] sm:$0xf0]  ;;  %v4683_v20 = vld [vmem:[%s8246_s3 + $0x3e8] sm:$0xf]  ;;  %v5366_v23 = vld [vmem:[%s8246_s3 + $0xf4] sm:$0xf0] }
  0x99   : > { %2168 = vmatpush.bf16.msra.mxu3 %v4644_v40  ;;  %2141 = vmatpush.bf16.msra.mxu1 %v4404_v42  ;;  %v332_v40 = vld [vmem:[#allocation2 + $0x10] sm:$0xff]  ;;  %v5363_v42 = vld [vmem:[%s8246_s3 + $0xe4] sm:$0xf]  ;;  %v4680_v46 = vor.u32 %v5459_v36, %v4677_v37 }
  0x9a   : > { %2129 = vmatpush.bf16.msra.mxu0 %v4260_v62  ;;  %v333_v62 = vld [vmem:[#allocation2 + $0x18] sm:$0xff]  ;;  %v6817_v52 = vpack.c.bf16 %v332_v40, %v332_v40  ;;  %v4296_v53 = vor.u32 %v5363_v42, %v4293_v43  ;;  %v4485_v30 = vld [vmem:[%s8246_s3 + $0x270] sm:$0xf0]  ;;  %v5443_v36 = vld [vmem:[%s8246_s3 + $0x364] sm:$0xf] }
  0x9b   : > { %v6822_v56 = vpack.c.bf16 %v333_v62, %v333_v62  ;;  %v4613_v37 = vld [vmem:[%s8246_s3 + $0x370] sm:$0xf0]  ;;  %v5407_v40 = vld [vmem:[%s8246_s3 + $0x244] sm:$0xf] }
  0x9c   : > { %2156 = vmatpush.bf16.msra.mxu2 %v4500_v47  ;;  %v5423_v47 = vld [vmem:[%s8246_s3 + $0x2c4] sm:$0xf]  ;;  %v4616_v62 = vor.u32 %v5443_v36, %v4613_v37  ;;  %v4667_v36 = vld [vmem:[%s8246_s3 + $0x3c8] sm:$0xf]  ;;  %v5458_v37 = vld [vmem:[%s8246_s3 + $0x3d4] sm:$0xf0] }
  0x9d   : > { %2169 = vmatpush.bf16.msra.mxu3 %v4628_v50  ;;  %2142 = vmatpush.bf16.msra.mxu1 %v4388_v51  ;;  %v5395_v50 = vld [vmem:[%s8246_s3 + $0x1e4] sm:$0xf]  ;;  %v4536_v60 = vor.u32 %v5423_v47, %v4533_v8  ;;  %v4597_v47 = vld [vmem:[%s8246_s3 + $0x350] sm:$0xf0] }
  0x9e   : > { %2130 = vmatpush.bf16.msra.mxu0 %v4244_v55  ;;  %v330_v51 = vld [vmem:[#allocation2] sm:$0xff]  ;;  %v4421_v55 = vld [vmem:[%s8246_s3 + $0x1f0] sm:$0xf0] }
  0x9f   : > { %v5379_v43 = vld [vmem:[%s8246_s3 + $0x164] sm:$0xf] }
  0xa0   : > { %2157 = vmatpush.bf16.msra.mxu2 %v4484_v58  ;;  %v5359_v58 = vld [vmem:[%s8246_s3 + $0xc4] sm:$0xf] }
  0xa1   : > { %2170 = vmatpush.bf16.msra.mxu3 %v4612_v63  ;;  %2143 = vmatpush.bf16.msra.mxu1 %v4372_v0  ;;  %v6836_v63 = vpack.c.bf16 %v330_v51, %v330_v51  ;;  %v331_v0 = vld [vmem:[#allocation2 + $0x8] sm:$0xff]  ;;  %v4280_v6 = vor.u32 %v5359_v58, %v4277_v59  ;;  %v5343_v8 = vld [vmem:[%s8246_s3 + $0x44] sm:$0xf]  ;;  %v4453_v51 = vld [vmem:[%s8246_s3 + $0x230] sm:$0xf0] }
  0xa2   : > { %2131 = vmatpush.bf16.msra.mxu0 %v4228_v3  ;;  %v4424_v3 = vor.u32 %v5395_v50, %v4421_v55  ;;  %v6858_v11 = vpack.c.bf16 %v331_v0, %v331_v0  ;;  %v5403_v50 = vld [vmem:[%s8246_s3 + $0x224] sm:$0xf]  ;;  %v4341_v58 = vld [vmem:[%s8246_s3 + $0x150] sm:$0xf0] }
  0xa3   : > { %v5375_v55 = vld [vmem:[%s8246_s3 + $0x144] sm:$0xf]  ;;  %v4197_v0 = vld [vmem:[%s8246_s3 + $0x30] sm:$0xf0]  ;;  %v4456_v1 = vor.u32 %v5403_v50, %v4453_v51  ;;  %v4507_v51 = vld [vmem:[%s8246_s3 + $0x288] sm:$0xf] }
  0xa4   : > { %2158 = vmatpush.bf16.msra.mxu2 %v4468_v7  ;;  %v4405_v7 = vld [vmem:[%s8246_s3 + $0x1d0] sm:$0xf0]  ;;  %v5435_v59 = vld [vmem:[%s8246_s3 + $0x324] sm:$0xf] }
  0xa5   : > { %2171 = vmatpush.bf16.msra.mxu3 %v4596_v12  ;;  %2144 = vmatpush.bf16.msra.mxu1 %v4356_v13  ;;  %v5355_v12 = vld [vmem:[%s8246_s3 + $0xa4] sm:$0xf]  ;;  %v4261_v13 = vld [vmem:[%s8246_s3 + $0xb0] sm:$0xf0]  ;;  %v4408_v19 = vor.u32 %v5391_v4, %v4405_v7 }
  0xa6   : > { %2132 = vmatpush.bf16.msra.mxu0 %v4212_v16  ;;  %v4501_v16 = vld [vmem:[%s8246_s3 + $0x290] sm:$0xf0] }
  0xa7   : > { %v4504_v28 = vor.u32 %v5415_v15, %v4501_v16  ;;  %v4437_v4 = vld [vmem:[%s8246_s3 + $0x210] sm:$0xf0] }
  0xa8   : > { %2159 = vmatpush.bf16.msra.mxu2 %v4452_v22  ;;  %v4264_v22 = vor.u32 %v5355_v12, %v4261_v13  ;;  %v5335_v13 = vld [vmem:[%s8246_s3 + $0x4] sm:$0xf]  ;;  %v4565_v15 = vld [vmem:[%s8246_s3 + $0x310] sm:$0xf0] }
  0xa9   : > { %2172 = vmatpush.bf16.msra.mxu3 %v4580_v26  ;;  %2145 = vmatpush.bf16.msra.mxu1 %v4340_v29  ;;  %v5351_v26 = vld [vmem:[%s8246_s3 + $0x84] sm:$0xf]  ;;  %v4181_v16 = vld [vmem:[%s8246_s3 + $0x10] sm:$0xf0] }
  0xaa   : > { %2133 = vmatpush.bf16.msra.mxu0 %v4196_v33  ;;  %v5411_v29 = vld [vmem:[%s8246_s3 + $0x264] sm:$0xf]  ;;  %v4632_v33 = vor.u32 %v5447_v24, %v4629_v25  ;;  %v4248_v34 = vor.u32 %v5351_v26, %v4245_v27  ;;  %v4556_v24 = vor.u32 %v5430_v10, %v4555_v9  ;;  %v4539_v27 = vld [vmem:[%s8246_s3 + $0x2c8] sm:$0xf] }
  0xac   : > { %2160 = vmatpush.bf16.msra.mxu2 %v4436_v35  ;;  %v4373_v35 = vld [vmem:[%s8246_s3 + $0x190] sm:$0xf0] }
  0xad   : > { %2173 = vmatpush.bf16.msra.mxu3 %v4564_v41  ;;  %2146 = vmatpush.bf16.msra.mxu1 %v4324_v44  ;;  %v4469_v41 = vld [vmem:[%s8246_s3 + $0x250] sm:$0xf0]  ;;  %v4376_v42 = vor.u32 %v5383_v32, %v4373_v35  ;;  %v4232_v44 = vor.u32 %v5347_v54, %v4229_v38  ;;  %v4427_v32 = vld [vmem:[%s8246_s3 + $0x1e8] sm:$0xf]  ;;  %v5398_v35 = vld [vmem:[%s8246_s3 + $0x1f4] sm:$0xf0] }
  0xae   : > { %2134 = vmatpush.bf16.msra.mxu0 %v4180_v48  ;;  %v4213_v48 = vld [vmem:[%s8246_s3 + $0x50] sm:$0xf0]  ;;  %v4472_v49 = vor.u32 %v5407_v40, %v4469_v41  ;;  %v4283_v54 = vld [vmem:[%s8246_s3 + $0xc8] sm:$0xf]  ;;  %v5362_v38 = vld [vmem:[%s8246_s3 + $0xd4] sm:$0xf0] }
  0xaf   : > { %2161 = vmatmul.bf16.vlgmr.msra.gmra.mxu2 %v6817_v52  ;;  %v4216_v57 = vor.u32 %v5343_v8, %v4213_v48  ;;  %v4523_v41 = vld [vmem:[%s8246_s3 + $0x2a8] sm:$0xf]  ;;  %v5454_v8 = vld [vmem:[%s8246_s3 + $0x3b4] sm:$0xf0] }
  0xb0   : > { %2205 = vmatpush.bf16.msrb.mxu2 %v4552_v39  ;;  %2174 = vmatmul.bf16.vlgmr.msra.gmra.mxu3 %v6822_v56  ;;  %v4488_v39 = vor.u32 %v5411_v29, %v4485_v30  ;;  %v4184_v29 = vor.u32 %v5335_v13, %v4181_v16  ;;  %v5367_v30 = vld [vmem:[%s8246_s3 + $0x104] sm:$0xf]  ;;  %v4267_v48 = vld [vmem:[%s8246_s3 + $0xa8] sm:$0xf]  ;;  %v5350_v16 = vld [vmem:[%s8246_s3 + $0x74] sm:$0xf0] }
  0xb1   : > { %2218 = vmatpush.bf16.msrb.mxu3 %v4680_v46  ;;  %2147 = vmatpush.bf16.msra.mxu1 %v4308_v61  ;;  %v5439_v46 = vld [vmem:[%s8246_s3 + $0x344] sm:$0xf]  ;;  %v4619_v13 = vld [vmem:[%s8246_s3 + $0x368] sm:$0xf] }
  0xb2   : > { %2179 = vmatpush.bf16.msrb.mxu0 %v4296_v53  ;;  %v4360_v53 = vor.u32 %v5379_v43, %v4357_v45  ;;  %v4600_v17 = vor.u32 %v5439_v46, %v4597_v47  ;;  %v5339_v61 = vld [vmem:[%s8246_s3 + $0x24] sm:$0xf]  ;;  %v4428_v43 = vor.u32 %v5398_v35, %v4427_v32  ;;  %v4284_v45 = vor.u32 %v5362_v38, %v4283_v54  ;;  %v5394_v46 = vld [vmem:[%s8246_s3 + $0x1d4] sm:$0xf0]  ;;  %v4651_v47 = vld [vmem:[%s8246_s3 + $0x3a8] sm:$0xf] }
  0xb3   : > { %2135 = vmatmul.bf16.vlgmr.msra.gmra.mxu0 %v6836_v63  ;;  %v4200_v12 = vor.u32 %v5339_v61, %v4197_v0  ;;  %v5450_v61 = vld [vmem:[%s8246_s3 + $0x394] sm:$0xf0]  ;;  %v4251_v0 = vld [vmem:[%s8246_s3 + $0x88] sm:$0xf] }
  0xb4   : > { %2206 = vmatpush.bf16.msrb.mxu2 %v4536_v60  ;;  %2148 = vmatmul.bf16.vlgmr.msra.gmra.mxu1 %v6858_v11  ;;  %v4581_v60 = vld [vmem:[%s8246_s3 + $0x330] sm:$0xf0]  ;;  %v5442_v32 = vld [vmem:[%s8246_s3 + $0x354] sm:$0xf0] }
  0xb5   : > { %2192 = vmatpush.bf16.msrb.mxu1 %v4424_v3  ;;  %2219 = vmatpush.bf16.msrb.mxu3 %v4664_v5  ;;  %v5399_v3 = vld [vmem:[%s8246_s3 + $0x204] sm:$0xf]  ;;  %v4344_v5 = vor.u32 %v5375_v55, %v4341_v58  ;;  %v4584_v7 = vor.u32 %v5435_v59, %v4581_v60  ;;  %v5390_v59 = vld [vmem:[%s8246_s3 + $0x1b4] sm:$0xf0]  ;;  %v4635_v60 = vld [vmem:[%s8246_s3 + $0x388] sm:$0xf] }
  0xb6   : > { %2180 = vmatpush.bf16.msrb.mxu0 %v4280_v6  ;;  %v4325_v6 = vld [vmem:[%s8246_s3 + $0x130] sm:$0xf0]  ;;  %v5406_v54 = vld [vmem:[%s8246_s3 + $0x234] sm:$0xf0] }
  0xb7   : > { %v4328_v25 = vor.u32 %v5371_v2, %v4325_v6  ;;  %v4379_v6 = vld [vmem:[%s8246_s3 + $0x188] sm:$0xf] }
  0xb8   : > { %2207 = vmatpush.bf16.msrb.mxu2 %v4520_v14  ;;  %v5431_v14 = vld [vmem:[%s8246_s3 + $0x304] sm:$0xf] }
  0xb9   : > { %2193 = vmatpush.bf16.msrb.mxu1 %v4408_v19  ;;  %2220 = vmatpush.bf16.msrb.mxu3 %v4648_v21  ;;  %v4440_v19 = vor.u32 %v5399_v3, %v4437_v4  ;;  %v5462_v21 = vld [vmem:[%s8246_s3 + $0x3f4] sm:$0xf0]  ;;  %v4568_v26 = vor.u32 %v5431_v14, %v4565_v15  ;;  %v4491_v3 = vld [vmem:[%s8246_s3 + $0x268] sm:$0xf] }
  0xba   : > { %2181 = vmatpush.bf16.msrb.mxu0 %v4264_v22  ;;  %v4299_v22 = vld [vmem:[%s8246_s3 + $0xe8] sm:$0xf]  ;;  %v5414_v4 = vld [vmem:[%s8246_s3 + $0x274] sm:$0xf0] }
  0xbb   : > { %v5446_v14 = vld [vmem:[%s8246_s3 + $0x374] sm:$0xf0]  ;;  %v4235_v15 = vld [vmem:[%s8246_s3 + $0x68] sm:$0xf] }
  0xbc   : > { %2208 = vmatpush.bf16.msrb.mxu2 %v4504_v28  ;;  %v5426_v28 = vld [vmem:[%s8246_s3 + $0x2d4] sm:$0xf0] }
  0xbd   : > { %2194 = vmatpush.bf16.msrb.mxu1 %v4392_v31  ;;  %2221 = vmatpush.bf16.msrb.mxu3 %v4632_v33  ;;  %v4309_v31 = vld [vmem:[%s8246_s3 + $0x110] sm:$0xf0]  ;;  %v4684_v33 = vor.u32 %v5462_v21, %v4683_v20  ;;  %v4475_v21 = vld [vmem:[%s8246_s3 + $0x248] sm:$0xf] }
  0xbe   : > { %2182 = vmatpush.bf16.msrb.mxu0 %v4248_v34  ;;  %v4300_v34 = vor.u32 %v5366_v23, %v4299_v22  ;;  %v4312_v40 = vor.u32 %v5367_v30, %v4309_v31  ;;  %v5410_v22 = vld [vmem:[%s8246_s3 + $0x254] sm:$0xf0]  ;;  %v4603_v31 = vld [vmem:[%s8246_s3 + $0x348] sm:$0xf] }
  0xbf   : > { %v5382_v30 = vld [vmem:[%s8246_s3 + $0x174] sm:$0xf0]  ;;  %v4476_v35 = vor.u32 %v5410_v22, %v4475_v21  ;;  %v5396_v21 = vld [vmem:[%s8246_s3 + $0x1ec] sm:$0xf] }
  0xc0   : > { %2209 = vmatpush.bf16.msrb.mxu2 %v4488_v39  ;;  %v4540_v39 = vor.u32 %v5426_v28, %v4539_v27 }
  0xc1   : > { %2195 = vmatpush.bf16.msrb.mxu1 %v4376_v42  ;;  %2222 = vmatpush.bf16.msrb.mxu3 %v4616_v62  ;;  %v5422_v42 = vld [vmem:[%s8246_s3 + $0x2b4] sm:$0xf0]  ;;  %v4411_v62 = vld [vmem:[%s8246_s3 + $0x1c8] sm:$0xf] }
  0xc2   : > { %2183 = vmatpush.bf16.msrb.mxu0 %v4232_v44  ;;  %v4668_v44 = vor.u32 %v5458_v37, %v4667_v36  ;;  %v4524_v50 = vor.u32 %v5422_v42, %v4523_v41  ;;  %v4412_v55 = vor.u32 %v5394_v46, %v4411_v62  ;;  %v4459_v37 = vld [vmem:[%s8246_s3 + $0x228] sm:$0xf]  ;;  %v5378_v62 = vld [vmem:[%s8246_s3 + $0x154] sm:$0xf0] }
  0xc3   : > { %v4203_v46 = vld [vmem:[%s8246_s3 + $0x28] sm:$0xf] }
  0xc4   : > { %2210 = vmatpush.bf16.msrb.mxu2 %v4472_v49  ;;  %v5358_v49 = vld [vmem:[%s8246_s3 + $0xb4] sm:$0xf0] }
  0xc5   : > { %2196 = vmatpush.bf16.msrb.mxu1 %v4360_v53  ;;  %2223 = vmatpush.bf16.msrb.mxu3 %v4600_v17  ;;  %v5418_v53 = vld [vmem:[%s8246_s3 + $0x294] sm:$0xf0]  ;;  %v4395_v17 = vld [vmem:[%s8246_s3 + $0x1a8] sm:$0xf]  ;;  %v4268_v58 = vor.u32 %v5358_v49, %v4267_v48 }
  0xc6   : > { %2184 = vmatpush.bf16.msrb.mxu0 %v4216_v57  ;;  %v4652_v57 = vor.u32 %v5454_v8, %v4651_v47  ;;  %v4508_v2 = vor.u32 %v5418_v53, %v4507_v51  ;;  %v5342_v47 = vld [vmem:[%s8246_s3 + $0x34] sm:$0xf0]  ;;  %v4460_v8 = vor.u32 %v5406_v54, %v4459_v37  ;;  %v4331_v49 = vld [vmem:[%s8246_s3 + $0x128] sm:$0xf]  ;;  %v5392_v37 = vld [vmem:[%s8246_s3 + $0x1cc] sm:$0xf] }
  0xc7   : > { %v5402_v51 = vld [vmem:[%s8246_s3 + $0x214] sm:$0xf0] }
  0xc8   : > { %2211 = vmatpush.bf16.msrb.mxu2 %v4456_v1  ;;  %v5354_v1 = vld [vmem:[%s8246_s3 + $0x94] sm:$0xf0] }
  0xc9   : > { %2197 = vmatpush.bf16.msrb.mxu1 %v4344_v5  ;;  %2224 = vmatpush.bf16.msrb.mxu3 %v4584_v7  ;;  %v4396_v5 = vor.u32 %v5390_v59, %v4395_v17  ;;  %v4636_v7 = vor.u32 %v5450_v61, %v4635_v60  ;;  %v4252_v10 = vor.u32 %v5354_v1, %v4251_v0  ;;  %v5374_v17 = vld [vmem:[%s8246_s3 + $0x134] sm:$0xf0]  ;;  %v4557_v59 = vld [vmem:[%s8246_s3 + $0x2f8] sm:$0xf0]  ;;  %v4187_v0 = vld [vmem:[%s8246_s3 + $0x8] sm:$0xf] }
  0xca   : > { %2185 = vmatpush.bf16.msrb.mxu0 %v4200_v12  ;;  %v5386_v12 = vld [vmem:[%s8246_s3 + $0x194] sm:$0xf0]  ;;  %v4204_v61 = vor.u32 %v5342_v47, %v4203_v46  ;;  %v4571_v1 = vld [vmem:[%s8246_s3 + $0x308] sm:$0xf]  ;;  %v4269_v46 = vld [vmem:[%s8246_s3 + $0xb8] sm:$0xf0] }
  0xcc   : > { %2212 = vmatpush.bf16.msrb.mxu2 %v4440_v19  ;;  %v4492_v19 = vor.u32 %v5414_v4, %v4491_v3  ;;  %v5338_v3 = vld [vmem:[%s8246_s3 + $0x14] sm:$0xf0] }
  0xcd   : > { %2198 = vmatpush.bf16.msrb.mxu1 %v4328_v25  ;;  %2225 = vmatpush.bf16.msrb.mxu3 %v4568_v26  ;;  %v4363_v25 = vld [vmem:[%s8246_s3 + $0x168] sm:$0xf]  ;;  %v4620_v26 = vor.u32 %v5446_v14, %v4619_v13  ;;  %v5424_v14 = vld [vmem:[%s8246_s3 + $0x2cc] sm:$0xf] }
  0xce   : > { %2186 = vmatpush.bf16.msrb.mxu0 %v4184_v29  ;;  %v1288_v9 = vpop.f32.mrf.mxu0  ;;  %v4236_v29 = vor.u32 %v5350_v16, %v4235_v15  ;;  %v4364_v38 = vor.u32 %v5382_v30, %v4363_v25  ;;  %v4541_v15 = vld [vmem:[%s8246_s3 + $0x2d8] sm:$0xf0]  ;;  %v4188_v16 = vor.u32 %v5338_v3, %v4187_v0  ;;  %v5412_v3 = vld [vmem:[%s8246_s3 + $0x26c] sm:$0xf] }
  0xcf   : > { %2213 = vmatmul.bf16.vlgmr.msrb.gmra.mxu2 %v6817_v52  ;;  %v4429_v25 = vld [vmem:[%s8246_s3 + $0x1f8] sm:$0xf0]  ;;  %v4544_v30 = vor.u32 %v5424_v14, %v4541_v15  ;;  %v5348_v15 = vld [vmem:[%s8246_s3 + $0x6c] sm:$0xf] }
  0xd0   : > { %2257 = vmatpush.bf16.msra.mxu2 %v4556_v24  ;;  %2226 = vmatmul.bf16.vlgmr.msrb.gmra.mxu3 %v6822_v56  ;;  %v1301_v23 = vpop.f32.mrf.mxu1  ;;  %v4380_v24 = vor.u32 %v5386_v12, %v4379_v6  ;;  %v4685_v6 = vld [vmem:[%s8246_s3 + $0x3f8] sm:$0xf0]  ;;  %v4332_v12 = vor.u32 %v5374_v17, %v4331_v49 }
  0xd1   : > { %2270 = vmatpush.bf16.msra.mxu3 %v4684_v33  ;;  %2199 = vmatpush.bf16.msrb.mxu1 %v4312_v40  ;;  %v1314_v20 = vpop.f32.mrf.mxu2  ;;  %v1302_v27 = vadd.f32 %v1301_v23, %v1288_v9  ;;  %v4219_v33 = vld [vmem:[%s8246_s3 + $0x48] sm:$0xf]  ;;  %v4604_v40 = vor.u32 %v5442_v32, %v4603_v31  ;;  %v4301_v9 = vld [vmem:[%s8246_s3 + $0xf8] sm:$0xf0] }
  0xd2   : > { %2231 = vmatpush.bf16.msra.mxu0 %v4300_v34  ;;  %v1327_v28 = vpop.f32.mrf.mxu3  ;;  %v5346_v34 = vld [vmem:[%s8246_s3 + $0x54] sm:$0xf0]  ;;  %v4621_v14 = vld [vmem:[%s8246_s3 + $0x378] sm:$0xf0] }
  0xd3   : > { %2187 = vmatmul.bf16.vlgmr.msrb.gmra.mxu0 %v6836_v63  ;;  %v1315_v36 = vadd.f32 %v1314_v20, %v1302_v27  ;;  %v5370_v20 = vld [vmem:[%s8246_s3 + $0x114] sm:$0xf0]  ;;  %v4669_v27 = vld [vmem:[%s8246_s3 + $0x3d8] sm:$0xf0] }
  0xd4   : > { %2258 = vmatpush.bf16.msra.mxu2 %v4540_v39  ;;  %2200 = vmatmul.bf16.vlgmr.msrb.gmra.mxu1 %v6858_v11  ;;  %v4347_v39 = vld [vmem:[%s8246_s3 + $0x148] sm:$0xf] }
  0xd5   : > { %2244 = vmatpush.bf16.msra.mxu1 %v4428_v43  ;;  %2271 = vmatpush.bf16.msra.mxu3 %v4668_v44  ;;  %v7145_v41 = vadd.f32 %v1327_v28, %v1315_v36  ;;  %v4220_v43 = vor.u32 %v5346_v34, %v4219_v33  ;;  %v4587_v44 = vld [vmem:[%s8246_s3 + $0x328] sm:$0xf]  ;;  %v5360_v28 = vld [vmem:[%s8246_s3 + $0xcc] sm:$0xf]  ;;  %v4432_v36 = vor.u32 %v5396_v21, %v4429_v25  ;;  %v4477_v21 = vld [vmem:[%s8246_s3 + $0x258] sm:$0xf0] }
  0xd6   : > { %2232 = vmatpush.bf16.msra.mxu0 %v4284_v45  ;;  %v1290_v42 = vpop.f32.mrf.mxu0  ;;  %v5438_v45 = vld [vmem:[%s8246_s3 + $0x334] sm:$0xf0]  ;;  %v5420_v34 = vld [vmem:[%s8246_s3 + $0x2ac] sm:$0xf] }
  0xd7   : > { %v4413_v42 = vld [vmem:[%s8246_s3 + $0x1d8] sm:$0xf0] }
  0xd8   : > { %2259 = vmatpush.bf16.msra.mxu2 %v4524_v50  ;;  %v4443_v50 = vld [vmem:[%s8246_s3 + $0x208] sm:$0xf]  ;;  %v1303_v53 = vpop.f32.mrf.mxu1  ;;  %v4416_v49 = vor.u32 %v5392_v37, %v4413_v42  ;;  %v4349_v42 = vld [vmem:[%s8246_s3 + $0x158] sm:$0xf0] }
  0xd9   : > { %2245 = vmatpush.bf16.msra.mxu1 %v4412_v55  ;;  %2272 = vmatpush.bf16.msra.mxu3 %v4652_v57  ;;  %v1316_v48 = vpop.f32.mrf.mxu2  ;;  %v4348_v55 = vor.u32 %v5378_v62, %v4347_v39  ;;  %v4588_v57 = vor.u32 %v5438_v45, %v4587_v44  ;;  %v4444_v4 = vor.u32 %v5402_v51, %v4443_v50  ;;  %v4653_v62 = vld [vmem:[%s8246_s3 + $0x3b8] sm:$0xf0]  ;;  %v5356_v45 = vld [vmem:[%s8246_s3 + $0xac] sm:$0xf] }
  0xda   : > { %2233 = vmatpush.bf16.msra.mxu0 %v4268_v58  ;;  %v5428_v58 = vld [vmem:[%s8246_s3 + $0x2ec] sm:$0xf]  ;;  %v1329_v60 = vpop.f32.mrf.mxu3  ;;  %v4509_v48 = vld [vmem:[%s8246_s3 + $0x298] sm:$0xf0]  ;;  %v4272_v17 = vor.u32 %v5356_v45, %v4269_v46 }
  0xdb   : > { %v5388_v50 = vld [vmem:[%s8246_s3 + $0x1ac] sm:$0xf]  ;;  %v4205_v46 = vld [vmem:[%s8246_s3 + $0x38] sm:$0xf0] }
  0xdc   : > { %2260 = vmatpush.bf16.msra.mxu2 %v4508_v2  ;;  %v5434_v2 = vld [vmem:[%s8246_s3 + $0x314] sm:$0xf0]  ;;  %v5352_v60 = vld [vmem:[%s8246_s3 + $0x8c] sm:$0xf] }
  0xdd   : > { %2246 = vmatpush.bf16.msra.mxu1 %v4396_v5  ;;  %2273 = vmatpush.bf16.msra.mxu3 %v4636_v7  ;;  %v5460_v5 = vld [vmem:[%s8246_s3 + $0x3ec] sm:$0xf]  ;;  %v4572_v13 = vor.u32 %v5434_v2, %v4571_v1 }
  0xde   : > { %2234 = vmatpush.bf16.msra.mxu0 %v4252_v10  ;;  %v5364_v7 = vld [vmem:[%s8246_s3 + $0xec] sm:$0xf]  ;;  %v4560_v10 = vor.u32 %v5428_v58, %v4557_v59  ;;  %v4688_v22 = vor.u32 %v5460_v5, %v4685_v6  ;;  %v1340_v23 = vpop.f32.mrf.mxu0  ;;  %v4637_v59 = vld [vmem:[%s8246_s3 + $0x398] sm:$0xf0] }
  0xdf   : > { %v5448_v58 = vld [vmem:[%s8246_s3 + $0x38c] sm:$0xf] }
  0xe0   : > { %2261 = vmatpush.bf16.msra.mxu2 %v4492_v19  ;;  %v4315_v19 = vld [vmem:[%s8246_s3 + $0x108] sm:$0xf]  ;;  %v1353_v33 = vpop.f32.mrf.mxu1  ;;  %v5384_v6 = vld [vmem:[%s8246_s3 + $0x18c] sm:$0xf] }
  0xe1   : > { %2247 = vmatpush.bf16.msra.mxu1 %v4380_v24  ;;  %2274 = vmatpush.bf16.msra.mxu3 %v4620_v26  ;;  %v4304_v24 = vor.u32 %v5364_v7, %v4301_v9  ;;  %v5456_v26 = vld [vmem:[%s8246_s3 + $0x3cc] sm:$0xf]  ;;  %v1366_v31 = vpop.f32.mrf.mxu2  ;;  %v4316_v32 = vor.u32 %v5370_v20, %v4315_v19  ;;  %v4640_v7 = vor.u32 %v5448_v58, %v4637_v59  ;;  %v5685_v58 = vld [vmem:[%s8246_s3 + $0xaec] sm:$0xf0] }
  0xe2   : > { %2235 = vmatpush.bf16.msra.mxu0 %v4236_v29  ;;  %v4285_v29 = vld [vmem:[%s8246_s3 + $0xd8] sm:$0xf0]  ;;  %v4672_v54 = vor.u32 %v5456_v26, %v4669_v27  ;;  %v1379_v39 = vpop.f32.mrf.mxu3  ;;  %v5408_v20 = vld [vmem:[%s8246_s3 + $0x24c] sm:$0xf] }
  0xe3   : > { %v4365_v26 = vld [vmem:[%s8246_s3 + $0x178] sm:$0xf0]  ;;  %v5440_v27 = vld [vmem:[%s8246_s3 + $0x34c] sm:$0xf] }
  0xe4   : > { %2262 = vmatpush.bf16.msra.mxu2 %v4476_v35  ;;  %v4525_v35 = vld [vmem:[%s8246_s3 + $0x2b8] sm:$0xf0]  ;;  %v5340_v45 = vld [vmem:[%s8246_s3 + $0x2c] sm:$0xf] }
  0xe5   : > { %2248 = vmatpush.bf16.msra.mxu1 %v4364_v38  ;;  %2275 = vmatpush.bf16.msra.mxu3 %v4604_v40  ;;  %v1354_v38 = vadd.f32 %v1353_v33, %v1340_v23  ;;  %v4288_v40 = vor.u32 %v5360_v28, %v4285_v29  ;;  %v4528_v47 = vor.u32 %v5420_v34, %v4525_v35  ;;  %v5380_v23 = vld [vmem:[%s8246_s3 + $0x16c] sm:$0xf]  ;;  %v4605_v28 = vld [vmem:[%s8246_s3 + $0x358] sm:$0xf0] }
  0xe6   : > { %2236 = vmatpush.bf16.msra.mxu0 %v4220_v43  ;;  %v5452_v43 = vld [vmem:[%s8246_s3 + $0x3ac] sm:$0xf]  ;;  %v4461_v34 = vld [vmem:[%s8246_s3 + $0x238] sm:$0xf0]  ;;  %v4368_v37 = vor.u32 %v5380_v23, %v4365_v26  ;;  %v5059_v23 = vld [vmem:[%s8246_s3 + $0x9e0] sm:$0xf] }
  0xe7   : > { %v1367_v44 = vadd.f32 %v1366_v31, %v1354_v38  ;;  %v4656_v51 = vor.u32 %v5452_v43, %v4653_v62  ;;  %v4221_v31 = vld [vmem:[%s8246_s3 + $0x58] sm:$0xf0]  ;;  %v5404_v33 = vld [vmem:[%s8246_s3 + $0x22c] sm:$0xf]  ;;  %v4608_v38 = vor.u32 %v5440_v27, %v4605_v28  ;;  %v5653_v27 = vld [vmem:[%s8246_s3 + $0x9ec] sm:$0xf0] }
  0xe8   : > { %2263 = vmatpush.bf16.msra.mxu2 %v4460_v8  ;;  %v5416_v8 = vld [vmem:[%s8246_s3 + $0x28c] sm:$0xf]  ;;  %v1355_v2 = vpop.f32.mrf.mxu1  ;;  %v4589_v62 = vld [vmem:[%s8246_s3 + $0x338] sm:$0xf0]  ;;  %v5299_v28 = vld [vmem:[%s8246_s3 + $0xbc0] sm:$0xf] }
  0xe9   : > { %2249 = vmatpush.bf16.msra.mxu1 %v4348_v55  ;;  %2276 = vmatpush.bf16.msra.mxu3 %v4588_v57  ;;  %v7270_v53 = vadd.f32 %v1379_v39, %v1367_v44  ;;  %v1342_v55 = vpop.f32.mrf.mxu0  ;;  %v4397_v57 = vld [vmem:[%s8246_s3 + $0x1b8] sm:$0xf0]  ;;  %v4512_v0 = vor.u32 %v5416_v8, %v4509_v48  ;;  %v1368_v1 = vpop.f32.mrf.mxu2  ;;  %v5436_v43 = vld [vmem:[%s8246_s3 + $0x32c] sm:$0xf] }
  0xea   : > { %2237 = vmatpush.bf16.msra.mxu0 %v4204_v61  ;;  %v4253_v61 = vld [vmem:[%s8246_s3 + $0x98] sm:$0xf0]  ;;  %v4400_v5 = vor.u32 %v5388_v50, %v4397_v57  ;;  %v1381_v9 = vpop.f32.mrf.mxu3  ;;  %v5372_v48 = vld [vmem:[%s8246_s3 + $0x12c] sm:$0xf]  ;;  %v5187_v57 = vld [vmem:[%s8246_s3 + $0xae0] sm:$0xf] }
  0xeb   : > { %v4445_v50 = vld [vmem:[%s8246_s3 + $0x218] sm:$0xf0]  ;;  %v5621_v9 = vld [vmem:[%s8246_s3 + $0x8ec] sm:$0xf0] }
  0xec   : > { %2264 = vmatpush.bf16.msra.mxu2 %v4444_v4  ;;  %v4493_v4 = vld [vmem:[%s8246_s3 + $0x278] sm:$0xf0] }
  0xed   : > { %2250 = vmatpush.bf16.msra.mxu1 %v4332_v12  ;;  %2277 = vmatpush.bf16.msra.mxu3 %v4572_v13  ;;  %v4381_v12 = vld [vmem:[%s8246_s3 + $0x198] sm:$0xf0]  ;;  %v5444_v13 = vld [vmem:[%s8246_s3 + $0x36c] sm:$0xf]  ;;  %v4496_v19 = vor.u32 %v5412_v3, %v4493_v4 }
  0xee   : > { %2238 = vmatpush.bf16.msra.mxu0 %v4188_v16  ;;  %v4237_v16 = vld [vmem:[%s8246_s3 + $0x78] sm:$0xf0] }
  0xef   : > { %2265 = vmatmul.bf16.vlgmr.msra.gmra.mxu2 %v6817_v52  ;;  %v4240_v25 = vor.u32 %v5348_v15, %v4237_v16  ;;  %v4333_v55 = vld [vmem:[%s8246_s3 + $0x138] sm:$0xf0]  ;;  %v5171_v16 = vld [vmem:[%s8246_s3 + $0xac0] sm:$0xf] }
  0xf0   : > { %2309 = vmatpush.bf16.msrb.mxu2 %v4560_v10  ;;  %2278 = vmatmul.bf16.vlgmr.msra.gmra.mxu3 %v6822_v56  ;;  %v4256_v10 = vor.u32 %v5352_v60, %v4253_v61  ;;  %v4208_v60 = vor.u32 %v5340_v45, %v4205_v46  ;;  %v5336_v61 = vld [vmem:[%s8246_s3 + $0xc] sm:$0xf]  ;;  %v4573_v1 = vld [vmem:[%s8246_s3 + $0x318] sm:$0xf0]  ;;  %v5027_v46 = vld [vmem:[%s8246_s3 + $0x9a0] sm:$0xf] }
  0xf1   : > { %2322 = vmatpush.bf16.msrb.mxu3 %v4688_v22  ;;  %2251 = vmatpush.bf16.msra.mxu1 %v4316_v32  ;;  %v4384_v22 = vor.u32 %v5384_v6, %v4381_v12  ;;  %v1392_v29 = vpop.f32.mrf.mxu0  ;;  %v4480_v32 = vor.u32 %v5408_v20, %v4477_v21  ;;  %v1405_v35 = vpop.f32.mrf.mxu1  ;;  %v4189_v3 = vld [vmem:[%s8246_s3 + $0x18] sm:$0xf0]  ;;  %v5717_v6 = vld [vmem:[%s8246_s3 + $0xbec] sm:$0xf0]  ;;  %v5368_v21 = vld [vmem:[%s8246_s3 + $0x10c] sm:$0xf] }
  0xf2   : > { %2283 = vmatpush.bf16.msrb.mxu0 %v4304_v24  ;;  %v4624_v24 = vor.u32 %v5444_v13, %v4621_v14  ;;  %v1406_v39 = vadd.f32 %v1405_v35, %v1392_v29  ;;  %v4336_v14 = vor.u32 %v5372_v48, %v4333_v55  ;;  %v4192_v20 = vor.u32 %v5336_v61, %v4189_v3  ;;  %v5713_v29 = vld [vmem:[%s8246_s3 + $0xbcc] sm:$0xf0]  ;;  %v5267_v48 = vld [vmem:[%s8246_s3 + $0xb80] sm:$0xf] }
  0xf3   : > { %2239 = vmatmul.bf16.vlgmr.msra.gmra.mxu0 %v6836_v63  ;;  %v1431_v44 = vpop.f32.mrf.mxu3  ;;  %v5677_v35 = vld [vmem:[%s8246_s3 + $0xaac] sm:$0xf0]  ;;  %v4867_v3 = vld [vmem:[%s8246_s3 + $0x860] sm:$0xf] }
  0xf4   : > { %2310 = vmatpush.bf16.msrb.mxu2 %v4544_v30  ;;  %2252 = vmatmul.bf16.vlgmr.msra.gmra.mxu1 %v6858_v11  ;;  %v5344_v30 = vld [vmem:[%s8246_s3 + $0x4c] sm:$0xf] }
  0xf5   : > { %2296 = vmatpush.bf16.msrb.mxu1 %v4432_v36  ;;  %2323 = vmatpush.bf16.msrb.mxu3 %v4672_v54  ;;  %v1418_v36 = vpop.f32.mrf.mxu2  ;;  %v5376_v54 = vld [vmem:[%s8246_s3 + $0x14c] sm:$0xf] }
  0xf6   : > { %2284 = vmatpush.bf16.msrb.mxu0 %v4288_v40  ;;  %v4224_v40 = vor.u32 %v5344_v30, %v4221_v31  ;;  %v1419_v8 = vadd.f32 %v1418_v36, %v1406_v39  ;;  %v4915_v30 = vld [vmem:[%s8246_s3 + $0x8c0] sm:$0xf]  ;;  %v5617_v31 = vld [vmem:[%s8246_s3 + $0x8cc] sm:$0xf0]  ;;  %v5060_v36 = vor.u32 %v5653_v27, %v5059_v23 }
  0xf7   : > { %v5649_v39 = vld [vmem:[%s8246_s3 + $0x9cc] sm:$0xf0]  ;;  %v5091_v23 = vld [vmem:[%s8246_s3 + $0xa20] sm:$0xf] }
  0xf8   : > { %2311 = vmatpush.bf16.msrb.mxu2 %v4528_v47  ;;  %v4464_v47 = vor.u32 %v5404_v33, %v4461_v34  ;;  %v7378_v59 = vadd.f32 %v1431_v44, %v1419_v8  ;;  %v5155_v34 = vld [vmem:[%s8246_s3 + $0xaa0] sm:$0xf] }
  0xf9   : > { %2297 = vmatpush.bf16.msrb.mxu1 %v4416_v49  ;;  %2324 = vmatpush.bf16.msrb.mxu3 %v4656_v51  ;;  %v5400_v49 = vld [vmem:[%s8246_s3 + $0x20c] sm:$0xf]  ;;  %v4352_v51 = vor.u32 %v5376_v54, %v4349_v42  ;;  %v1394_v2 = vpop.f32.mrf.mxu0  ;;  %v1407_v12 = vpop.f32.mrf.mxu1  ;;  %v5300_v54 = vor.u32 %v5713_v29, %v5299_v28  ;;  %v5709_v42 = vld [vmem:[%s8246_s3 + $0xbac] sm:$0xf0]  ;;  %v5139_v44 = vld [vmem:[%s8246_s3 + $0xa80] sm:$0xf] }
  0xfa   : > { %2285 = vmatpush.bf16.msrb.mxu0 %v4272_v17  ;;  %v4592_v17 = vor.u32 %v5436_v43, %v4589_v62  ;;  %v4448_v4 = vor.u32 %v5400_v49, %v4445_v50  ;;  %v5613_v43 = vld [vmem:[%s8246_s3 + $0x8ac] sm:$0xf0]  ;;  %v5156_v62 = vor.u32 %v5677_v35, %v5155_v34  ;;  %v4883_v50 = vld [vmem:[%s8246_s3 + $0x880] sm:$0xf] }
  0xfb   : > { %v5705_v49 = vld [vmem:[%s8246_s3 + $0xb8c] sm:$0xf0]  ;;  %v4979_v28 = vld [vmem:[%s8246_s3 + $0x940] sm:$0xf] }
  0xfc   : > { %2312 = vmatpush.bf16.msrb.mxu2 %v4512_v0  ;;  %v5432_v0 = vld [vmem:[%s8246_s3 + $0x30c] sm:$0xf]  ;;  %v5701_v2 = vld [vmem:[%s8246_s3 + $0xb6c] sm:$0xf0]  ;;  %v5219_v34 = vld [vmem:[%s8246_s3 + $0xb20] sm:$0xf] }
  0xfd   : > { %2298 = vmatpush.bf16.msrb.mxu1 %v4400_v5  ;;  %2325 = vmatpush.bf16.msrb.mxu3 %v4640_v7  ;;  %v5315_v5 = vld [vmem:[%s8246_s3 + $0xbe0] sm:$0xf]  ;;  %v1420_v13 = vpop.f32.mrf.mxu2  ;;  %v4576_v15 = vor.u32 %v5432_v0, %v4573_v1  ;;  %v5641_v0 = vld [vmem:[%s8246_s3 + $0x98c] sm:$0xf0] }
  0xfe   : > { %2286 = vmatpush.bf16.msrb.mxu0 %v4256_v10  ;;  %v4931_v7 = vld [vmem:[%s8246_s3 + $0x8e0] sm:$0xf]  ;;  %v5188_v10 = vor.u32 %v5685_v58, %v5187_v57  ;;  %v5669_v57 = vld [vmem:[%s8246_s3 + $0xa6c] sm:$0xf0] }
  0xff   : > { %v4932_v26 = vor.u32 %v5621_v9, %v4931_v7  ;;  %v5011_v58 = vld [vmem:[%s8246_s3 + $0x980] sm:$0xf]  ;;  %v5665_v7 = vld [vmem:[%s8246_s3 + $0xa4c] sm:$0xf0] }
 0x100   : > { %2313 = vmatpush.bf16.msrb.mxu2 %v4496_v19  ;;  %v5681_v19 = vld [vmem:[%s8246_s3 + $0xacc] sm:$0xf0]  ;;  %v5251_v1 = vld [vmem:[%s8246_s3 + $0xb60] sm:$0xf]  ;;  %v5012_v9 = vor.u32 %v5641_v0, %v5011_v58 }
 0x101   : > { %2299 = vmatpush.bf16.msrb.mxu1 %v4384_v22  ;;  %2326 = vmatpush.bf16.msrb.mxu3 %v4624_v24  ;;  %v4317_v22 = vld [vmem:[%s8246_s3 + $0x118] sm:$0xf0]  ;;  %v5316_v24 = vor.u32 %v5717_v6, %v5315_v5  ;;  %v5107_v6 = vld [vmem:[%s8246_s3 + $0xa40] sm:$0xf]  ;;  %v5252_v12 = vor.u32 %v5701_v2, %v5251_v1  ;;  %v5633_v29 = vld [vmem:[%s8246_s3 + $0x94c] sm:$0xf0] }
 0x102   : > { %2287 = vmatpush.bf16.msrb.mxu0 %v4240_v25  ;;  %v1433_v25 = vpop.f32.mrf.mxu3  ;;  %v4320_v33 = vor.u32 %v5368_v21, %v4317_v22  ;;  %v5601_v21 = vld [vmem:[%s8246_s3 + $0x84c] sm:$0xf0]  ;;  %v5108_v22 = vor.u32 %v5665_v7, %v5107_v6  ;;  %v4947_v1 = vld [vmem:[%s8246_s3 + $0x900] sm:$0xf]  ;;  %v5619_v2 = vld [vmem:[%s8246_s3 + $0x8e4] sm:$0xf] }
 0x103   : > { %v5693_v35 = vld [vmem:[%s8246_s3 + $0xb2c] sm:$0xf0]  ;;  %v5679_v6 = vld [vmem:[%s8246_s3 + $0xac4] sm:$0xf] }
 0x104   : > { %2314 = vmatpush.bf16.msrb.mxu2 %v4480_v32  ;;  %v5172_v32 = vor.u32 %v5681_v19, %v5171_v16  ;;  %v5697_v16 = vld [vmem:[%s8246_s3 + $0xb4c] sm:$0xf0] }
 0x105   : > { %2300 = vmatpush.bf16.msrb.mxu1 %v4368_v37  ;;  %2327 = vmatpush.bf16.msrb.mxu3 %v4608_v38  ;;  %v5043_v37 = vld [vmem:[%s8246_s3 + $0x9c0] sm:$0xf]  ;;  %v4916_v38 = vor.u32 %v5617_v31, %v4915_v30 }
 0x106   : > { %2288 = vmatpush.bf16.msrb.mxu0 %v4224_v40  ;;  %v5283_v40 = vld [vmem:[%s8246_s3 + $0xba0] sm:$0xf]  ;;  %v5044_v45 = vor.u32 %v5649_v39, %v5043_v37  ;;  %v5597_v37 = vld [vmem:[%s8246_s3 + $0x82c] sm:$0xf0] }
 0x107   : > { %v5657_v39 = vld [vmem:[%s8246_s3 + $0xa0c] sm:$0xf0] }
 0x108   : > { %2315 = vmatpush.bf16.msrb.mxu2 %v4464_v47  ;;  %v5284_v47 = vor.u32 %v5709_v42, %v5283_v40  ;;  %v4963_v42 = vld [vmem:[%s8246_s3 + $0x920] sm:$0xf] }
 0x109   : > { %2301 = vmatpush.bf16.msrb.mxu1 %v4352_v51  ;;  %2328 = vmatpush.bf16.msrb.mxu3 %v4592_v17  ;;  %v5609_v51 = vld [vmem:[%s8246_s3 + $0x88c] sm:$0xf0]  ;;  %v5123_v17 = vld [vmem:[%s8246_s3 + $0xa60] sm:$0xf] }
 0x10a   : > { %2289 = vmatpush.bf16.msrb.mxu0 %v4208_v60  ;;  %v5268_v60 = vor.u32 %v5705_v49, %v5267_v48  ;;  %v4884_v61 = vor.u32 %v5609_v51, %v4883_v50  ;;  %v5124_v5 = vor.u32 %v5669_v57, %v5123_v17  ;;  %v2338_v48 = vld [vmem:[#allocation2 + $0x18] sm:$0xfc]  ;;  %v2342_v49 = vld [vmem:[#allocation2 + $0x38] sm:$0x3]  ;;  %v5689_v51 = vld [vmem:[%s8246_s3 + $0xb0c] sm:$0xf0] }
 0x10b   : > { %v2335_v17 = vld [vmem:[#allocation2] sm:$0xfc]  ;;  %v2339_v57 = vld [vmem:[#allocation2 + $0x20] sm:$0x3] }
 0x10c   : > { %2316 = vmatpush.bf16.msrb.mxu2 %v4448_v4  ;;  %v5605_v4 = vld [vmem:[%s8246_s3 + $0x86c] sm:$0xf0] }
 0x10d   : > { %2302 = vmatpush.bf16.msrb.mxu1 %v4336_v14  ;;  %2329 = vmatpush.bf16.msrb.mxu3 %v4576_v15  ;;  %v4868_v13 = vor.u32 %v5605_v4, %v4867_v3  ;;  %v5637_v14 = vld [vmem:[%s8246_s3 + $0x96c] sm:$0xf0]  ;;  %v5235_v15 = vld [vmem:[%s8246_s3 + $0xb40] sm:$0xf]  ;;  %v4933_v3 = vld [vmem:[%s8246_s3 + $0x8f0] sm:$0xf0] }
 0x10e   : > { %2290 = vmatpush.bf16.msrb.mxu0 %v4192_v20  ;;  %v4851_v20 = vld [vmem:[%s8246_s3 + $0x840] sm:$0xf]  ;;  %v5236_v30 = vor.u32 %v5697_v16, %v5235_v15  ;;  %v2336_v15 = vld [vmem:[#allocation2 + $0x8] sm:$0xfc]  ;;  %v2340_v16 = vld [vmem:[#allocation2 + $0x28] sm:$0x3] }
 0x10f   : > { %2317 = vmatmul.bf16.vlgmr.msrb.gmra.mxu2 %v6817_v52  ;;  %v4899_v52 = vld [vmem:[%s8246_s3 + $0x8a0] sm:$0xf] }
 0x110   : > { %3154 = vmatpush.bf16.msra.mxu2 %v5188_v10  ;;  %2330 = vmatmul.bf16.vlgmr.msrb.gmra.mxu3 %v6822_v56  ;;  %v5673_v56 = vld [vmem:[%s8246_s3 + $0xa8c] sm:$0xf0]  ;;  %v4900_v8 = vor.u32 %v5613_v43, %v4899_v52  ;;  %v4995_v10 = vld [vmem:[%s8246_s3 + $0x960] sm:$0xf]  ;;  %v1444_v19 = vpop.f32.mrf.mxu0 }
 0x111   : > { %3167 = vmatpush.bf16.msra.mxu3 %v5316_v24  ;;  %2303 = vmatpush.bf16.msrb.mxu1 %v4320_v33  ;;  %v5140_v55 = vor.u32 %v5673_v56, %v5139_v44  ;;  %v5661_v24 = vld [vmem:[%s8246_s3 + $0xa2c] sm:$0xf0]  ;;  %v1457_v25 = vpop.f32.mrf.mxu1  ;;  %v4996_v27 = vor.u32 %v5637_v14, %v4995_v10  ;;  %v4835_v33 = vld [vmem:[%s8246_s3 + $0x820] sm:$0xf]  ;;  %v2343_v14 = vpack.c.bf16 %v2339_v57, %v2335_v17  ;;  %v5269_v17 = vld [vmem:[%s8246_s3 + $0xb90] sm:$0xf0] }
 0x112   : > { %3128 = vmatpush.bf16.msra.mxu0 %v4932_v26  ;;  %v1470_v26 = vpop.f32.mrf.mxu2  ;;  %v1458_v31 = vadd.f32 %v1457_v25, %v1444_v19  ;;  %v5629_v52 = vld [vmem:[%s8246_s3 + $0x92c] sm:$0xf0]  ;;  %v5203_v43 = vld [vmem:[%s8246_s3 + $0xb00] sm:$0xf]  ;;  %v4836_v50 = vor.u32 %v5597_v37, %v4835_v33  ;;  %v4936_v25 = vor.u32 %v5619_v2, %v4933_v3  ;;  %v2344_v33 = vpack.c.bf16 %v2340_v16, %v2336_v15  ;;  %v5157_v37 = vld [vmem:[%s8246_s3 + $0xab0] sm:$0xf0] }
 0x113   : > { %2291 = vmatmul.bf16.vlgmr.msrb.gmra.mxu0 %v6836_v63  ;;  %v5645_v63 = vld [vmem:[%s8246_s3 + $0x9ac] sm:$0xf0]  ;;  %v4964_v10 = vor.u32 %v5629_v52, %v4963_v42  ;;  %v5045_v42 = vld [vmem:[%s8246_s3 + $0x9d0] sm:$0xf0]  ;;  %v5707_v52 = vld [vmem:[%s8246_s3 + $0xba4] sm:$0xf] }
 0x114   : > { %3155 = vmatpush.bf16.msra.mxu2 %v5172_v32  ;;  %2304 = vmatmul.bf16.vlgmr.msrb.gmra.mxu1 %v6858_v11  ;;  %v5028_v11 = vor.u32 %v5645_v63, %v5027_v46  ;;  %v4852_v32 = vor.u32 %v5601_v21, %v4851_v20  ;;  %v1471_v40 = vadd.f32 %v1470_v26, %v1458_v31  ;;  %v2337_v44 = vld [vmem:[#allocation2 + $0x10] sm:$0xfc]  ;;  %v2341_v56 = vld [vmem:[#allocation2 + $0x30] sm:$0x3]  ;;  %v5651_v21 = vld [vmem:[%s8246_s3 + $0x9e4] sm:$0xf] }
 0x115   : > { %3141 = vmatpush.bf16.msra.mxu1 %v5060_v36  ;;  %3168 = vmatpush.bf16.msra.mxu3 %v5300_v54  ;;  %v1483_v36 = vpop.f32.mrf.mxu3  ;;  %v5092_v54 = vor.u32 %v5661_v24, %v5091_v23  ;;  %v5220_v46 = vor.u32 %v5693_v35, %v5219_v34  ;;  %v2345_v0 = vpack.c.bf16 %v2341_v56, %v2337_v44  ;;  %v5625_v20 = vld [vmem:[%s8246_s3 + $0x90c] sm:$0xf0]  ;;  %v4917_v31 = vld [vmem:[%s8246_s3 + $0x8d0] sm:$0xf0]  ;;  %v7636_v35 = vrot.slane %v2343_v14, 1 }
 0x116   : > { %3129 = vmatpush.bf16.msra.mxu0 %v4916_v38  ;;  %v5075_v38 = vld [vmem:[%s8246_s3 + $0xa00] sm:$0xf]  ;;  %v7582_v63 = vadd.f32 %v1483_v36, %v1471_v40  ;;  %v4948_v34 = vor.u32 %v5625_v20, %v4947_v1  ;;  %v5675_v36 = vld [vmem:[%s8246_s3 + $0xaa4] sm:$0xf]  ;;  %v4901_v56 = vld [vmem:[%s8246_s3 + $0x8b0] sm:$0xf0] }
 0x117   : > { %v5076_v58 = vor.u32 %v5657_v39, %v5075_v38  ;;  %v7620_v26 = vrot.slane %v2345_v0, 1  ;;  %v5647_v38 = vld [vmem:[%s8246_s3 + $0x9c4] sm:$0xf] }
 0x118   : > { %3156 = vmatpush.bf16.msra.mxu2 %v5156_v62  ;;  %v5683_v62 = vld [vmem:[%s8246_s3 + $0xae4] sm:$0xf] }
 0x119   : > { %3142 = vmatpush.bf16.msra.mxu1 %v5044_v45  ;;  %3169 = vmatpush.bf16.msra.mxu3 %v5284_v47  ;;  %v4980_v45 = vor.u32 %v5633_v29, %v4979_v28  ;;  %v4819_v47 = vld [vmem:[%s8246_s3 + $0x800] sm:$0xf]  ;;  %v1459_v7 = vpop.f32.mrf.mxu1  ;;  %v5301_v28 = vld [vmem:[%s8246_s3 + $0xbd0] sm:$0xf0]  ;;  %v5611_v44 = vld [vmem:[%s8246_s3 + $0x8a4] sm:$0xf] }
 0x11a   : > { %3130 = vmatpush.bf16.msra.mxu0 %v4900_v8  ;;  %v5189_v8 = vld [vmem:[%s8246_s3 + $0xaf0] sm:$0xf0]  ;;  %v5607_v57 = vld [vmem:[%s8246_s3 + $0x884] sm:$0xf] }
 0x11b   : > { %v5192_v4 = vor.u32 %v5683_v62, %v5189_v8  ;;  %v7658_v62 = vrot.slane %v2344_v33, 1  ;;  %v5048_v8 = vor.u32 %v5647_v38, %v5045_v42  ;;  %v5639_v1 = vld [vmem:[%s8246_s3 + $0x984] sm:$0xf]  ;;  %v5221_v42 = vld [vmem:[%s8246_s3 + $0xb30] sm:$0xf0] }
 0x11c   : > { %3157 = vmatpush.bf16.msra.mxu2 %v5140_v55  ;;  %v1446_v55 = vpop.f32.mrf.mxu0  ;;  %v5603_v7 = vld [vmem:[%s8246_s3 + $0x864] sm:$0xf] }
 0x11d   : > { %3143 = vmatpush.bf16.msra.mxu1 %v5028_v11  ;;  %3170 = vmatpush.bf16.msra.mxu3 %v5268_v60  ;;  %v5593_v11 = vld [vmem:[%s8246_s3 + $0x80c] sm:$0xf0]  ;;  %v5715_v60 = vld [vmem:[%s8246_s3 + $0xbe4] sm:$0xf]  ;;  %v1485_v24 = vpop.f32.mrf.mxu3 }
 0x11e   : > { %3131 = vmatpush.bf16.msra.mxu0 %v4884_v61  ;;  %v5317_v61 = vld [vmem:[%s8246_s3 + $0xbf0] sm:$0xf0]  ;;  %v4820_v19 = vor.u32 %v5593_v11, %v4819_v47  ;;  %v5703_v55 = vld [vmem:[%s8246_s3 + $0xb84] sm:$0xf] }
 0x11f   : > { %v5320_v23 = vor.u32 %v5715_v60, %v5317_v61  ;;  %v5141_v47 = vld [vmem:[%s8246_s3 + $0xa90] sm:$0xf0]  ;;  %v5667_v60 = vld [vmem:[%s8246_s3 + $0xa64] sm:$0xf]  ;;  %v5272_v2 = vor.u32 %v5703_v55, %v5269_v17  ;;  %v5686_v55 = vld [vmem:[%s8246_s3 + $0xaf4] sm:$0xf0] }
 0x120   : > { %3158 = vmatpush.bf16.msra.mxu2 %v5124_v5  ;;  %v2346_v5 = vpack.c.bf16 %v2342_v49, %v2338_v48  ;;  %v5643_v48 = vld [vmem:[%s8246_s3 + $0x9a4] sm:$0xf]  ;;  %v4885_v11 = vld [vmem:[%s8246_s3 + $0x890] sm:$0xf0] }
 0x121   : > { %3144 = vmatpush.bf16.msra.mxu1 %v5012_v9  ;;  %3171 = vmatpush.bf16.msra.mxu3 %v5252_v12  ;;  %v1472_v9 = vpop.f32.mrf.mxu2  ;;  %v5204_v12 = vor.u32 %v5689_v51, %v5203_v43  ;;  %v5285_v43 = vld [vmem:[%s8246_s3 + $0xbb0] sm:$0xf0]  ;;  %v4888_v3 = vor.u32 %v5607_v57, %v4885_v11  ;;  %v5635_v16 = vld [vmem:[%s8246_s3 + $0x964] sm:$0xf] }
 0x122   : > { %3132 = vmatpush.bf16.msra.mxu0 %v4868_v13  ;;  %v5173_v13 = vld [vmem:[%s8246_s3 + $0xad0] sm:$0xf0]  ;;  %v7628_v29 = vrot.slane %v2346_v5, 1  ;;  %v5288_v49 = vor.u32 %v5707_v52, %v5285_v43  ;;  %v5699_v5 = vld [vmem:[%s8246_s3 + $0xb64] sm:$0xf] }
 0x123   : > { %v5029_v51 = vld [vmem:[%s8246_s3 + $0x9b0] sm:$0xf0]  ;;  %v5595_v43 = vld [vmem:[%s8246_s3 + $0x824] sm:$0xf] }
 0x124   : > { %3159 = vmatpush.bf16.msra.mxu2 %v5108_v22  ;;  %v5061_v22 = vld [vmem:[%s8246_s3 + $0x9f0] sm:$0xf0]  ;;  %v5032_v0 = vor.u32 %v5643_v48, %v5029_v51  ;;  %v5195_v51 = vld [vmem:[%s8246_s3 + $0xae8] sm:$0xf]  ;;  %v5591_v11 = vld [vmem:[%s8246_s3 + $0x804] sm:$0xf] }
 0x125   : > { %3145 = vmatpush.bf16.msra.mxu1 %v4996_v27  ;;  %3172 = vmatpush.bf16.msra.mxu3 %v5236_v30  ;;  %v5711_v27 = vld [vmem:[%s8246_s3 + $0xbc4] sm:$0xf]  ;;  %v5125_v61 = vld [vmem:[%s8246_s3 + $0xa70] sm:$0xf0] }
 0x126   : > { %3133 = vmatpush.bf16.msra.mxu0 %v4852_v32  ;;  %v5615_v30 = vld [vmem:[%s8246_s3 + $0x8c4] sm:$0xf]  ;;  %v5176_v32 = vor.u32 %v5679_v6, %v5173_v13  ;;  %v5304_v39 = vor.u32 %v5711_v27, %v5301_v28  ;;  %v5253_v6 = vld [vmem:[%s8246_s3 + $0xb70] sm:$0xf0] }
 0x127   : > { %v4920_v40 = vor.u32 %v5615_v30, %v4917_v31  ;;  %v4869_v9 = vld [vmem:[%s8246_s3 + $0x870] sm:$0xf0]  ;;  %v5659_v31 = vld [vmem:[%s8246_s3 + $0xa24] sm:$0xf] }
 0x128   : > { %3160 = vmatpush.bf16.msra.mxu2 %v5092_v54  ;;  %v5064_v54 = vor.u32 %v5651_v21, %v5061_v22  ;;  %v5109_v13 = vld [vmem:[%s8246_s3 + $0xa50] sm:$0xf0]  ;;  %v4872_v21 = vor.u32 %v5603_v7, %v4869_v9 }
 0x129   : > { %3146 = vmatpush.bf16.msra.mxu1 %v4980_v45  ;;  %3173 = vmatpush.bf16.msra.mxu3 %v5220_v46  ;;  %v5160_v45 = vor.u32 %v5675_v36, %v5157_v37  ;;  %v5671_v46 = vld [vmem:[%s8246_s3 + $0xa84] sm:$0xf]  ;;  %v4997_v22 = vld [vmem:[%s8246_s3 + $0x970] sm:$0xf0] }
 0x12a   : > { %3134 = vmatpush.bf16.msra.mxu0 %v4836_v50  ;;  %v4904_v50 = vor.u32 %v5611_v44, %v4901_v56  ;;  %v5237_v24 = vld [vmem:[%s8246_s3 + $0xb50] sm:$0xf0]  ;;  %v5631_v37 = vld [vmem:[%s8246_s3 + $0x944] sm:$0xf] }
 0x12b   : > { %v4837_v44 = vld [vmem:[%s8246_s3 + $0x830] sm:$0xf0] }
 0x12c   : > { %3161 = vmatpush.bf16.msra.mxu2 %v5076_v58  ;;  %v5144_v58 = vor.u32 %v5671_v46, %v5141_v47  ;;  %v5655_v46 = vld [vmem:[%s8246_s3 + $0xa04] sm:$0xf]  ;;  %v5077_v47 = vld [vmem:[%s8246_s3 + $0xa10] sm:$0xf0]  ;;  %v4840_v57 = vor.u32 %v5595_v43, %v4837_v44  ;;  %v5147_v43 = vld [vmem:[%s8246_s3 + $0xa88] sm:$0xf] }
 0x12d   : > { %3147 = vmatpush.bf16.msra.mxu1 %v4964_v10  ;;  %3174 = vmatpush.bf16.msra.mxu3 %v5204_v12  ;;  %v5128_v10 = vor.u32 %v5667_v60, %v5125_v61  ;;  %v5663_v12 = vld [vmem:[%s8246_s3 + $0xa44] sm:$0xf]  ;;  %v5205_v60 = vld [vmem:[%s8246_s3 + $0xb10] sm:$0xf0]  ;;  %v5674_v44 = vld [vmem:[%s8246_s3 + $0xa94] sm:$0xf0] }
 0x12e   : > { %3135 = vmatpush.bf16.msra.mxu0 %v4820_v19  ;;  %v5256_v19 = vor.u32 %v5699_v5, %v5253_v6  ;;  %v5112_v27 = vor.u32 %v5663_v12, %v5109_v13  ;;  %v4821_v61 = vld [vmem:[%s8246_s3 + $0x810] sm:$0xf0]  ;;  %v5196_v5 = vor.u32 %v5686_v55, %v5195_v51  ;;  %v5179_v12 = vld [vmem:[%s8246_s3 + $0xac8] sm:$0xf]  ;;  %v5682_v13 = vld [vmem:[%s8246_s3 + $0xad4] sm:$0xf0] }
 0x12f   : > { %3162 = vmatmul.bf16.vlgmr.msra.gmra.mxu2 %v7620_v26  ;;  %v4891_v51 = vld [vmem:[%s8246_s3 + $0x888] sm:$0xf]  ;;  %v5610_v55 = vld [vmem:[%s8246_s3 + $0x894] sm:$0xf0] }
 0x130   : > { %3206 = vmatpush.bf16.msrb.mxu2 %v5192_v4  ;;  %3175 = vmatmul.bf16.vlgmr.msra.gmra.mxu3 %v7628_v29  ;;  %v5013_v4 = vld [vmem:[%s8246_s3 + $0x990] sm:$0xf0]  ;;  %v2136_v14 = vpop.f32.mrf.mxu0 }
 0x131   : > { %3219 = vmatpush.bf16.msrb.mxu3 %v5320_v23  ;;  %3148 = vmatpush.bf16.msra.mxu1 %v4948_v34  ;;  %v5016_v15 = vor.u32 %v5639_v1, %v5013_v4  ;;  %v2137_v20 = vadd.f32 %v2136_v14, %v7145_v41  ;;  %v5695_v23 = vld [vmem:[%s8246_s3 + $0xb44] sm:$0xf]  ;;  %v4853_v41 = vld [vmem:[%s8246_s3 + $0x850] sm:$0xf0]  ;;  %v2149_v28 = vpop.f32.mrf.mxu1  ;;  %v5000_v34 = vor.u32 %v5635_v16, %v4997_v22  ;;  %v5323_v1 = vld [vmem:[%s8246_s3 + $0xbe8] sm:$0xf] }
 0x132   : > { %3180 = vmatpush.bf16.msrb.mxu0 %v4936_v25  ;;  %v5599_v25 = vld [vmem:[%s8246_s3 + $0x844] sm:$0xf]  ;;  %v2162_v30 = vpop.f32.mrf.mxu2  ;;  %v5622_v4 = vld [vmem:[%s8246_s3 + $0x8f4] sm:$0xf0] }
 0x133   : > { %3136 = vmatmul.bf16.vlgmr.msra.gmra.mxu0 %v7636_v35  ;;  %v2150_v33 = vadd.f32 %v2149_v28, %v2137_v20  ;;  %v2175_v36 = vpop.f32.mrf.mxu3  ;;  %v4856_v38 = vor.u32 %v5599_v25, %v4853_v41  ;;  %v5623_v16 = vld [vmem:[%s8246_s3 + $0x904] sm:$0xf]  ;;  %v5067_v20 = vld [vmem:[%s8246_s3 + $0x9e8] sm:$0xf]  ;;  %v5714_v25 = vld [vmem:[%s8246_s3 + $0xbd4] sm:$0xf0]  ;;  %v5180_v28 = vor.u32 %v5682_v13, %v5179_v12 }
 0x134   : > { %3207 = vmatpush.bf16.msrb.mxu2 %v5176_v32  ;;  %3149 = vmatmul.bf16.vlgmr.msra.gmra.mxu1 %v7658_v62  ;;  %v5093_v32 = vld [vmem:[%s8246_s3 + $0xa30] sm:$0xf0]  ;;  %v4923_v41 = vld [vmem:[%s8246_s3 + $0x8c8] sm:$0xf] }
 0x135   : > { %3193 = vmatpush.bf16.msrb.mxu1 %v5064_v54  ;;  %3220 = vmatpush.bf16.msrb.mxu3 %v5304_v39  ;;  %v5240_v54 = vor.u32 %v5695_v23, %v5237_v24  ;;  %v4981_v39 = vld [vmem:[%s8246_s3 + $0x950] sm:$0xf0]  ;;  %v2163_v52 = vadd.f32 %v2162_v30, %v2150_v33  ;;  %v5096_v56 = vor.u32 %v5659_v31, %v5093_v32  ;;  %v5654_v23 = vld [vmem:[%s8246_s3 + $0x9f4] sm:$0xf0]  ;;  %v5307_v24 = vld [vmem:[%s8246_s3 + $0xbc8] sm:$0xf] }
 0x136   : > { %3181 = vmatpush.bf16.msrb.mxu0 %v4920_v40  ;;  %v5691_v40 = vld [vmem:[%s8246_s3 + $0xb24] sm:$0xf]  ;;  %v4984_v48 = vor.u32 %v5631_v37, %v4981_v39  ;;  %v5163_v31 = vld [vmem:[%s8246_s3 + $0xaa8] sm:$0xf]  ;;  %v5678_v32 = vld [vmem:[%s8246_s3 + $0xab4] sm:$0xf0]  ;;  %v5068_v33 = vor.u32 %v5654_v23, %v5067_v20 }
 0x137   : > { %v5710_v39 = vld [vmem:[%s8246_s3 + $0xbb4] sm:$0xf0]  ;;  %v5003_v13 = vld [vmem:[%s8246_s3 + $0x968] sm:$0xf] }
 0x138   : > { %3208 = vmatpush.bf16.msrb.mxu2 %v5160_v45  ;;  %v5627_v45 = vld [vmem:[%s8246_s3 + $0x924] sm:$0xf]  ;;  %v2138_v17 = vpop.f32.mrf.mxu0  ;;  %v5243_v20 = vld [vmem:[%s8246_s3 + $0xb48] sm:$0xf] }
 0x139   : > { %3194 = vmatpush.bf16.msrb.mxu1 %v5048_v8  ;;  %3221 = vmatpush.bf16.msrb.mxu3 %v5288_v49  ;;  %v7774_v8 = vadd.f32 %v2175_v36, %v2163_v52  ;;  %v4965_v49 = vld [vmem:[%s8246_s3 + $0x930] sm:$0xf0]  ;;  %v2151_v6 = vpop.f32.mrf.mxu1  ;;  %v5308_v36 = vor.u32 %v5714_v25, %v5307_v24  ;;  %v5164_v52 = vor.u32 %v5678_v32, %v5163_v31  ;;  %v5099_v25 = vld [vmem:[%s8246_s3 + $0xa28] sm:$0xf] }
 0x13a   : > { %3182 = vmatpush.bf16.msrb.mxu0 %v4904_v50  ;;  %v5224_v50 = vor.u32 %v5691_v40, %v5221_v42  ;;  %v2164_v7 = vpop.f32.mrf.mxu2  ;;  %v4968_v9 = vor.u32 %v5627_v45, %v4965_v49  ;;  %v4907_v40 = vld [vmem:[%s8246_s3 + $0x8a8] sm:$0xf]  ;;  %v5614_v42 = vld [vmem:[%s8246_s3 + $0x8b4] sm:$0xf0]  ;;  %v5148_v17 = vor.u32 %v5674_v44, %v5147_v43 }
 0x13b   : > { %v2177_v14 = vpop.f32.mrf.mxu3  ;;  %v5035_v45 = vld [vmem:[%s8246_s3 + $0x9a8] sm:$0xf]  ;;  %v5658_v44 = vld [vmem:[%s8246_s3 + $0xa14] sm:$0xf0] }
 0x13c   : > { %3209 = vmatpush.bf16.msrb.mxu2 %v5144_v58  ;;  %v5687_v58 = vld [vmem:[%s8246_s3 + $0xb04] sm:$0xf]  ;;  %v5275_v49 = vld [vmem:[%s8246_s3 + $0xb88] sm:$0xf] }
 0x13d   : > { %3195 = vmatpush.bf16.msrb.mxu1 %v5032_v0  ;;  %3222 = vmatpush.bf16.msrb.mxu3 %v5272_v2  ;;  %v5080_v0 = vor.u32 %v5655_v46, %v5077_v47  ;;  %v5718_v2 = vld [vmem:[%s8246_s3 + $0xbf4] sm:$0xf0]  ;;  %v4908_v47 = vor.u32 %v5614_v42, %v4907_v40  ;;  %v5115_v7 = vld [vmem:[%s8246_s3 + $0xa48] sm:$0xf] }
 0x13e   : > { %3183 = vmatpush.bf16.msrb.mxu0 %v4888_v3  ;;  %v4939_v3 = vld [vmem:[%s8246_s3 + $0x8e8] sm:$0xf]  ;;  %v5598_v40 = vld [vmem:[%s8246_s3 + $0x834] sm:$0xf0] }
 0x13f   : > { %v4940_v22 = vor.u32 %v5622_v4, %v4939_v3  ;;  %v5702_v3 = vld [vmem:[%s8246_s3 + $0xb74] sm:$0xf0]  ;;  %v4875_v4 = vld [vmem:[%s8246_s3 + $0x868] sm:$0xf] }
 0x140   : > { %3210 = vmatpush.bf16.msrb.mxu2 %v5128_v10  ;;  %v5208_v10 = vor.u32 %v5687_v58, %v5205_v60  ;;  %v5019_v60 = vld [vmem:[%s8246_s3 + $0x988] sm:$0xf] }
 0x141   : > { %3196 = vmatpush.bf16.msrb.mxu1 %v5016_v15  ;;  %3223 = vmatpush.bf16.msrb.mxu3 %v5256_v19  ;;  %v4824_v15 = vor.u32 %v5591_v11, %v4821_v61  ;;  %v4949_v19 = vld [vmem:[%s8246_s3 + $0x910] sm:$0xf0]  ;;  %v5670_v11 = vld [vmem:[%s8246_s3 + $0xa74] sm:$0xf0]  ;;  %v4987_v31 = vld [vmem:[%s8246_s3 + $0x948] sm:$0xf] }
 0x142   : > { %3184 = vmatpush.bf16.msrb.mxu0 %v4872_v21  ;;  %v5324_v21 = vor.u32 %v5718_v2, %v5323_v1  ;;  %v4952_v30 = vor.u32 %v5623_v16, %v4949_v19  ;;  %v5642_v1 = vld [vmem:[%s8246_s3 + $0x994] sm:$0xf0]  ;;  %v5259_v2 = vld [vmem:[%s8246_s3 + $0xb68] sm:$0xf] }
 0x143   : > { %v5020_v12 = vor.u32 %v5642_v1, %v5019_v60  ;;  %v5260_v14 = vor.u32 %v5702_v3, %v5259_v2  ;;  %v5638_v19 = vld [vmem:[%s8246_s3 + $0x974] sm:$0xf0]  ;;  %v5083_v43 = vld [vmem:[%s8246_s3 + $0xa08] sm:$0xf]  ;;  %v5716_v60 = vld [vmem:[%s8246_s3 + $0xbec] sm:$0xf] }
 0x144   : > { %3211 = vmatpush.bf16.msrb.mxu2 %v5112_v27  ;;  %v5618_v27 = vld [vmem:[%s8246_s3 + $0x8d4] sm:$0xf0]  ;;  %v4941_v1 = vld [vmem:[%s8246_s3 + $0x8f8] sm:$0xf0] }
 0x145   : > { %3197 = vmatpush.bf16.msrb.mxu1 %v5000_v34  ;;  %3224 = vmatpush.bf16.msrb.mxu3 %v5240_v54  ;;  %v5051_v34 = vld [vmem:[%s8246_s3 + $0x9c8] sm:$0xf]  ;;  %v4924_v37 = vor.u32 %v5618_v27, %v4923_v41  ;;  %v5650_v54 = vld [vmem:[%s8246_s3 + $0x9d4] sm:$0xf0] }
 0x146   : > { %3185 = vmatpush.bf16.msrb.mxu0 %v4856_v38  ;;  %v5291_v38 = vld [vmem:[%s8246_s3 + $0xba8] sm:$0xf]  ;;  %v5662_v41 = vld [vmem:[%s8246_s3 + $0xa34] sm:$0xf0] }
 0x147   : > { %v5292_v46 = vor.u32 %v5710_v39, %v5291_v38  ;;  %v4843_v39 = vld [vmem:[%s8246_s3 + $0x828] sm:$0xf]  ;;  %v5100_v42 = vor.u32 %v5662_v41, %v5099_v25  ;;  %v5676_v41 = vld [vmem:[%s8246_s3 + $0xaac] sm:$0xf] }
 0x148   : > { %3212 = vmatpush.bf16.msrb.mxu2 %v5096_v56  ;;  %v5052_v56 = vor.u32 %v5650_v54, %v5051_v34  ;;  %v5694_v54 = vld [vmem:[%s8246_s3 + $0xb34] sm:$0xf0] }
 0x149   : > { %3198 = vmatpush.bf16.msrb.mxu1 %v4984_v48  ;;  %3225 = vmatpush.bf16.msrb.mxu3 %v5224_v50  ;;  %v5646_v48 = vld [vmem:[%s8246_s3 + $0x9b4] sm:$0xf0] }
 0x14a   : > { %3186 = vmatpush.bf16.msrb.mxu0 %v4840_v57  ;;  %v5706_v50 = vld [vmem:[%s8246_s3 + $0xb94] sm:$0xf0]  ;;  %v5131_v57 = vld [vmem:[%s8246_s3 + $0xa68] sm:$0xf]  ;;  %v5036_v58 = vor.u32 %v5646_v48, %v5035_v45  ;;  %v5684_v48 = vld [vmem:[%s8246_s3 + $0xaec] sm:$0xf] }
 0x14b   : > { %v5276_v61 = vor.u32 %v5706_v50, %v5275_v49  ;;  %v5132_v6 = vor.u32 %v5670_v11, %v5131_v57  ;;  %v5197_v49 = vld [vmem:[%s8246_s3 + $0xaf8] sm:$0xf0]  ;;  %v5690_v57 = vld [vmem:[%s8246_s3 + $0xb14] sm:$0xf0] }
 0x14c   : > { %3213 = vmatpush.bf16.msrb.mxu2 %v5080_v0  ;;  %v4892_v0 = vor.u32 %v5610_v55, %v4891_v51  ;;  %v4844_v51 = vor.u32 %v5598_v40, %v4843_v39  ;;  %v4827_v55 = vld [vmem:[%s8246_s3 + $0x808] sm:$0xf]  ;;  %v5594_v11 = vld [vmem:[%s8246_s3 + $0x814] sm:$0xf0]  ;;  %v5200_v2 = vor.u32 %v5684_v48, %v5197_v49  ;;  %v5672_v39 = vld [vmem:[%s8246_s3 + $0xa8c] sm:$0xf] }
 0x14d   : > { %3199 = vmatpush.bf16.msrb.mxu1 %v4968_v9  ;;  %3226 = vmatpush.bf16.msrb.mxu3 %v5208_v10  ;;  %v5666_v9 = vld [vmem:[%s8246_s3 + $0xa54] sm:$0xf0]  ;;  %v5149_v40 = vld [vmem:[%s8246_s3 + $0xa98] sm:$0xf0]  ;;  %v5608_v48 = vld [vmem:[%s8246_s3 + $0x88c] sm:$0xf] }
 0x14e   : > { %3187 = vmatpush.bf16.msrb.mxu0 %v4824_v15  ;;  %v5116_v23 = vor.u32 %v5666_v9, %v5115_v7  ;;  %v5181_v7 = vld [vmem:[%s8246_s3 + $0xad8] sm:$0xf0] }
 0x14f   : > { %3214 = vmatmul.bf16.vlgmr.msrb.gmra.mxu2 %v7620_v26  ;;  %v4893_v49 = vld [vmem:[%s8246_s3 + $0x898] sm:$0xf0] }
 0x150   : > { %3258 = vmatpush.bf16.msra.mxu2 %v5196_v5  ;;  %3227 = vmatmul.bf16.vlgmr.msrb.gmra.mxu3 %v7628_v29  ;;  %v5606_v5 = vld [vmem:[%s8246_s3 + $0x874] sm:$0xf0]  ;;  %v2188_v10 = vpop.f32.mrf.mxu0 }
 0x151   : > { %3271 = vmatpush.bf16.msra.mxu3 %v5324_v21  ;;  %3200 = vmatpush.bf16.msrb.mxu1 %v4952_v30  ;;  %v2189_v15 = vadd.f32 %v2188_v10, %v7270_v53  ;;  %v4876_v16 = vor.u32 %v5606_v5, %v4875_v4  ;;  %v5698_v21 = vld [vmem:[%s8246_s3 + $0xb54] sm:$0xf0]  ;;  %v2201_v24 = vpop.f32.mrf.mxu1  ;;  %v4828_v10 = vor.u32 %v5594_v11, %v4827_v55  ;;  %v5133_v55 = vld [vmem:[%s8246_s3 + $0xa78] sm:$0xf0] }
 0x152   : > { %3232 = vmatpush.bf16.msra.mxu0 %v4940_v22  ;;  %v4859_v22 = vld [vmem:[%s8246_s3 + $0x848] sm:$0xf]  ;;  %v5602_v53 = vld [vmem:[%s8246_s3 + $0x854] sm:$0xf0]  ;;  %v2214_v30 = vpop.f32.mrf.mxu2  ;;  %v5244_v32 = vor.u32 %v5698_v21, %v5243_v20  ;;  %v5069_v20 = vld [vmem:[%s8246_s3 + $0x9f8] sm:$0xf0] }
 0x153   : > { %3188 = vmatmul.bf16.vlgmr.msrb.gmra.mxu0 %v7636_v35  ;;  %v2202_v27 = vadd.f32 %v2201_v24, %v2189_v15  ;;  %v4860_v34 = vor.u32 %v5602_v53, %v4859_v22  ;;  %v5712_v21 = vld [vmem:[%s8246_s3 + $0xbcc] sm:$0xf]  ;;  %v5309_v22 = vld [vmem:[%s8246_s3 + $0xbd8] sm:$0xf0] }
 0x154   : > { %3259 = vmatpush.bf16.msra.mxu2 %v5180_v28  ;;  %3201 = vmatmul.bf16.vlgmr.msrb.gmra.mxu1 %v7658_v62  ;;  %v5004_v28 = vor.u32 %v5638_v19, %v5003_v13  ;;  %v5626_v13 = vld [vmem:[%s8246_s3 + $0x914] sm:$0xf0]  ;;  %v5616_v53 = vld [vmem:[%s8246_s3 + $0x8cc] sm:$0xf] }
 0x155   : > { %3245 = vmatpush.bf16.msra.mxu1 %v5068_v33  ;;  %3272 = vmatpush.bf16.msra.mxu3 %v5308_v36  ;;  %v2227_v33 = vpop.f32.mrf.mxu3  ;;  %v5634_v36 = vld [vmem:[%s8246_s3 + $0x954] sm:$0xf0]  ;;  %v2215_v38 = vadd.f32 %v2214_v30, %v2202_v27  ;;  %v5165_v27 = vld [vmem:[%s8246_s3 + $0xab8] sm:$0xf0]  ;;  %v5648_v30 = vld [vmem:[%s8246_s3 + $0x9cc] sm:$0xf] }
 0x156   : > { %3233 = vmatpush.bf16.msra.mxu0 %v4924_v37  ;;  %v5227_v37 = vld [vmem:[%s8246_s3 + $0xb28] sm:$0xf]  ;;  %v4988_v45 = vor.u32 %v5634_v36, %v4987_v31  ;;  %v5312_v31 = vor.u32 %v5712_v21, %v5309_v22  ;;  %v5293_v36 = vld [vmem:[%s8246_s3 + $0xbb8] sm:$0xf0]  ;;  %v5660_v22 = vld [vmem:[%s8246_s3 + $0xa2c] sm:$0xf] }
 0x158   : > { %3260 = vmatpush.bf16.msra.mxu2 %v5164_v52  ;;  %v4971_v52 = vld [vmem:[%s8246_s3 + $0x928] sm:$0xf]  ;;  %v2190_v50 = vpop.f32.mrf.mxu0 }
 0x159   : > { %3246 = vmatpush.bf16.msra.mxu1 %v5052_v56  ;;  %3273 = vmatpush.bf16.msra.mxu3 %v5292_v46  ;;  %v7973_v56 = vadd.f32 %v2227_v33, %v2215_v38  ;;  %v5630_v46 = vld [vmem:[%s8246_s3 + $0x934] sm:$0xf0]  ;;  %v2203_v3 = vpop.f32.mrf.mxu1  ;;  %v5053_v33 = vld [vmem:[%s8246_s3 + $0x9d8] sm:$0xf0]  ;;  %v5168_v38 = vor.u32 %v5676_v41, %v5165_v27  ;;  %v5152_v50 = vor.u32 %v5672_v39, %v5149_v40  ;;  %v5632_v41 = vld [vmem:[%s8246_s3 + $0x94c] sm:$0xf] }
 0x15a   : > { %3234 = vmatpush.bf16.msra.mxu0 %v4908_v47  ;;  %v5228_v47 = vor.u32 %v5694_v54, %v5227_v37  ;;  %v4972_v4 = vor.u32 %v5630_v46, %v4971_v52  ;;  %v2216_v9 = vpop.f32.mrf.mxu2  ;;  %v5612_v37 = vld [vmem:[%s8246_s3 + $0x8ac] sm:$0xf]  ;;  %v4909_v54 = vld [vmem:[%s8246_s3 + $0x8b8] sm:$0xf0] }
 0x15b   : > { %v5644_v52 = vld [vmem:[%s8246_s3 + $0x9ac] sm:$0xf]  ;;  %v5085_v39 = vld [vmem:[%s8246_s3 + $0xa18] sm:$0xf0] }
 0x15c   : > { %3261 = vmatpush.bf16.msra.mxu2 %v5148_v17  ;;  %v5211_v17 = vld [vmem:[%s8246_s3 + $0xb08] sm:$0xf]  ;;  %v5704_v46 = vld [vmem:[%s8246_s3 + $0xb8c] sm:$0xf] }
 0x15d   : > { %3247 = vmatpush.bf16.msra.mxu1 %v5036_v58  ;;  %3274 = vmatpush.bf16.msra.mxu3 %v5276_v61  ;;  %v5084_v58 = vor.u32 %v5658_v44, %v5083_v43  ;;  %v5325_v61 = vld [vmem:[%s8246_s3 + $0xbf8] sm:$0xf0]  ;;  %v5212_v5 = vor.u32 %v5690_v57, %v5211_v17  ;;  %v4912_v44 = vor.u32 %v5612_v37, %v4909_v54  ;;  %v5640_v57 = vld [vmem:[%s8246_s3 + $0x98c] sm:$0xf] }
 0x15e   : > { %3235 = vmatpush.bf16.msra.mxu0 %v4892_v0  ;;  %v5620_v0 = vld [vmem:[%s8246_s3 + $0x8ec] sm:$0xf]  ;;  %v5328_v15 = vor.u32 %v5716_v60, %v5325_v61  ;;  %v5021_v60 = vld [vmem:[%s8246_s3 + $0x998] sm:$0xf0] }
 0x15f   : > { %v4944_v19 = vor.u32 %v5620_v0, %v4941_v1  ;;  %v5700_v61 = vld [vmem:[%s8246_s3 + $0xb6c] sm:$0xf]  ;;  %v5261_v0 = vld [vmem:[%s8246_s3 + $0xb78] sm:$0xf0] }
 0x160   : > { %3262 = vmatpush.bf16.msra.mxu2 %v5132_v6  ;;  %v5680_v6 = vld [vmem:[%s8246_s3 + $0xacc] sm:$0xf]  ;;  %v4845_v37 = vld [vmem:[%s8246_s3 + $0x838] sm:$0xf0] }
 0x161   : > { %3248 = vmatpush.bf16.msra.mxu1 %v5020_v12  ;;  %3275 = vmatpush.bf16.msra.mxu3 %v5260_v14  ;;  %v4955_v12 = vld [vmem:[%s8246_s3 + $0x908] sm:$0xf]  ;;  %v5652_v14 = vld [vmem:[%s8246_s3 + $0x9ec] sm:$0xf]  ;;  %v5184_v24 = vor.u32 %v5680_v6, %v5181_v7  ;;  %v5024_v7 = vor.u32 %v5640_v57, %v5021_v60 }
 0x162   : > { %3236 = vmatpush.bf16.msra.mxu0 %v4876_v16  ;;  %v2229_v16 = vpop.f32.mrf.mxu3  ;;  %v4956_v25 = vor.u32 %v5626_v13, %v4955_v12  ;;  %v5604_v1 = vld [vmem:[%s8246_s3 + $0x86c] sm:$0xf] }
 0x163   : > { %v5636_v9 = vld [vmem:[%s8246_s3 + $0x96c] sm:$0xf]  ;;  %v5245_v16 = vld [vmem:[%s8246_s3 + $0xb58] sm:$0xf0] }
 0x164   : > { %3263 = vmatpush.bf16.msra.mxu2 %v5116_v23  ;;  %v4925_v23 = vld [vmem:[%s8246_s3 + $0x8d8] sm:$0xf0]  ;;  %v5624_v60 = vld [vmem:[%s8246_s3 + $0x90c] sm:$0xf] }
 0x165   : > { %3249 = vmatpush.bf16.msra.mxu1 %v5004_v28  ;;  %3276 = vmatpush.bf16.msra.mxu3 %v5244_v32  ;;  %v5072_v28 = vor.u32 %v5652_v14, %v5069_v20  ;;  %v4928_v32 = vor.u32 %v5616_v53, %v4925_v23  ;;  %v5005_v14 = vld [vmem:[%s8246_s3 + $0x978] sm:$0xf0] }
 0x166   : > { %3237 = vmatpush.bf16.msra.mxu0 %v4860_v34  ;;  %v5708_v34 = vld [vmem:[%s8246_s3 + $0xbac] sm:$0xf]  ;;  %v5101_v53 = vld [vmem:[%s8246_s3 + $0xa38] sm:$0xf0] }
 0x167   : > { %v5296_v43 = vor.u32 %v5708_v34, %v5293_v36  ;;  %v5596_v36 = vld [vmem:[%s8246_s3 + $0x82c] sm:$0xf]  ;;  %v5104_v54 = vor.u32 %v5660_v22, %v5101_v53 }
 0x168   : > { %3264 = vmatpush.bf16.msra.mxu2 %v5100_v42  ;;  %v5056_v42 = vor.u32 %v5648_v30, %v5053_v33  ;;  %v5229_v33 = vld [vmem:[%s8246_s3 + $0xb38] sm:$0xf0] }
 0x169   : > { %3250 = vmatpush.bf16.msra.mxu1 %v4988_v45  ;;  %3277 = vmatpush.bf16.msra.mxu3 %v5228_v47  ;;  %v5037_v45 = vld [vmem:[%s8246_s3 + $0x9b8] sm:$0xf0] }
 0x16a   : > { %3238 = vmatpush.bf16.msra.mxu0 %v4844_v51  ;;  %v5277_v47 = vld [vmem:[%s8246_s3 + $0xb98] sm:$0xf0]  ;;  %v5668_v51 = vld [vmem:[%s8246_s3 + $0xa6c] sm:$0xf]  ;;  %v5040_v17 = vor.u32 %v5644_v52, %v5037_v45  ;;  %v4848_v45 = vor.u32 %v5596_v36, %v4845_v37 }
 0x16b   : > { %v5280_v11 = vor.u32 %v5704_v46, %v5277_v47  ;;  %v5136_v3 = vor.u32 %v5668_v51, %v5133_v55  ;;  %v5628_v52 = vld [vmem:[%s8246_s3 + $0x92c] sm:$0xf]  ;;  %v4973_v46 = vld [vmem:[%s8246_s3 + $0x938] sm:$0xf0] }
 0x16c   : > { %3265 = vmatpush.bf16.msra.mxu2 %v5084_v58  ;;  %v4896_v58 = vor.u32 %v5608_v48, %v4893_v49  ;;  %v5688_v47 = vld [vmem:[%s8246_s3 + $0xb0c] sm:$0xf]  ;;  %v5213_v48 = vld [vmem:[%s8246_s3 + $0xb18] sm:$0xf0] }
 0x16d   : > { %3251 = vmatpush.bf16.msra.mxu1 %v4972_v4  ;;  %3278 = vmatpush.bf16.msra.mxu3 %v5212_v5  ;;  %v5664_v4 = vld [vmem:[%s8246_s3 + $0xa4c] sm:$0xf]  ;;  %v5117_v5 = vld [vmem:[%s8246_s3 + $0xa58] sm:$0xf0]  ;;  %v5216_v57 = vor.u32 %v5688_v47, %v5213_v48 }
 0x16e   : > { %3239 = vmatpush.bf16.msra.mxu0 %v4828_v10  ;;  %v5264_v10 = vor.u32 %v5700_v61, %v5261_v0  ;;  %v5120_v20 = vor.u32 %v5664_v4, %v5117_v5  ;;  %v5592_v49 = vld [vmem:[%s8246_s3 + $0x80c] sm:$0xf]  ;;  %v4957_v61 = vld [vmem:[%s8246_s3 + $0x918] sm:$0xf0] }
 0x16f   : > { %3266 = vmatmul.bf16.vlgmr.msra.gmra.mxu2 %v7620_v26 }
 0x170   : > { %3310 = vmatpush.bf16.msrb.mxu2 %v5200_v2  ;;  %3279 = vmatmul.bf16.vlgmr.msra.gmra.mxu3 %v7628_v29  ;;  %v4877_v2 = vld [vmem:[%s8246_s3 + $0x878] sm:$0xf0]  ;;  %v2240_v6 = vpop.f32.mrf.mxu0 }
 0x171   : > { %3323 = vmatpush.bf16.msrb.mxu3 %v5328_v15  ;;  %3252 = vmatpush.bf16.msra.mxu1 %v4956_v25  ;;  %v2241_v12 = vadd.f32 %v2240_v6, %v7378_v59  ;;  %v4880_v13 = vor.u32 %v5604_v1, %v4877_v2  ;;  %v5696_v15 = vld [vmem:[%s8246_s3 + $0xb4c] sm:$0xf]  ;;  %v4861_v59 = vld [vmem:[%s8246_s3 + $0x858] sm:$0xf0]  ;;  %v2253_v21 = vpop.f32.mrf.mxu1  ;;  %v4960_v1 = vor.u32 %v5624_v60, %v4957_v61 }
 0x172   : > { %3284 = vmatpush.bf16.msrb.mxu0 %v4944_v19  ;;  %v5600_v19 = vld [vmem:[%s8246_s3 + $0x84c] sm:$0xf]  ;;  %v2266_v25 = vpop.f32.mrf.mxu2  ;;  %v5248_v27 = vor.u32 %v5696_v15, %v5245_v16 }
 0x173   : > { %3240 = vmatmul.bf16.vlgmr.msra.gmra.mxu0 %v7636_v35  ;;  %v2254_v23 = vadd.f32 %v2253_v21, %v2241_v12  ;;  %v4864_v30 = vor.u32 %v5600_v19, %v4861_v59 }
 0x174   : > { %3311 = vmatpush.bf16.msrb.mxu2 %v5184_v24  ;;  %3253 = vmatmul.bf16.vlgmr.msra.gmra.mxu1 %v7658_v62  ;;  %v5008_v24 = vor.u32 %v5636_v9, %v5005_v14 }
 0x175   : > { %3297 = vmatpush.bf16.msrb.mxu1 %v5072_v28  ;;  %3324 = vmatpush.bf16.msrb.mxu3 %v5312_v31  ;;  %v2279_v28 = vpop.f32.mrf.mxu3  ;;  %v4989_v31 = vld [vmem:[%s8246_s3 + $0x958] sm:$0xf0]  ;;  %v2267_v34 = vadd.f32 %v2266_v25, %v2254_v23 }
 0x176   : > { %3285 = vmatpush.bf16.msrb.mxu0 %v4928_v32  ;;  %v5692_v32 = vld [vmem:[%s8246_s3 + $0xb2c] sm:$0xf] }
 0x177   : > { %v8169_v40 = vadd.f32 %v2279_v28, %v2267_v34 }
 0x178   : > { %3312 = vmatpush.bf16.msrb.mxu2 %v5168_v38  ;;  %v5656_v38 = vld [vmem:[%s8246_s3 + $0xa0c] sm:$0xf] }
 0x179   : > { %3298 = vmatpush.bf16.msrb.mxu1 %v5056_v42  ;;  %3325 = vmatpush.bf16.msrb.mxu3 %v5296_v43  ;;  %v4992_v42 = vor.u32 %v5632_v41, %v4989_v31  ;;  %v5232_v43 = vor.u32 %v5692_v32, %v5229_v33  ;;  %v5088_v51 = vor.u32 %v5656_v38, %v5085_v39  ;;  %v2255_v55 = vpop.f32.mrf.mxu1 }
 0x17a   : > { %3286 = vmatpush.bf16.msrb.mxu0 %v4912_v44  ;;  %v2242_v44 = vpop.f32.mrf.mxu0 }
 0x17c   : > { %3313 = vmatpush.bf16.msrb.mxu2 %v5152_v50  ;;  %v4829_v50 = vld [vmem:[%s8246_s3 + $0x818] sm:$0xf0] }
 0x17d   : > { %3299 = vmatpush.bf16.msrb.mxu1 %v5040_v17  ;;  %3326 = vmatpush.bf16.msrb.mxu3 %v5280_v11  ;;  %v4976_v17 = vor.u32 %v5628_v52, %v4973_v46  ;;  %v2268_v11 = vpop.f32.mrf.mxu2  ;;  %v2281_v0 = vpop.f32.mrf.mxu3 }
 0x17e   : > { %3287 = vmatpush.bf16.msrb.mxu0 %v4896_v58  ;;  %v4832_v58 = vor.u32 %v5592_v49, %v4829_v50 }
 0x180   : > { %3314 = vmatpush.bf16.msrb.mxu2 %v5136_v3 }
 0x181   : > { %3300 = vmatpush.bf16.msrb.mxu1 %v5024_v7  ;;  %3327 = vmatpush.bf16.msrb.mxu3 %v5264_v10 }
 0x182   : > { %3288 = vmatpush.bf16.msrb.mxu0 %v4880_v13 }
 0x184   : > { %3315 = vmatpush.bf16.msrb.mxu2 %v5120_v20 }
 0x185   : > { %3301 = vmatpush.bf16.msrb.mxu1 %v5008_v24  ;;  %3328 = vmatpush.bf16.msrb.mxu3 %v5248_v27 }
 0x186   : > { %3289 = vmatpush.bf16.msrb.mxu0 %v4864_v30 }
 0x188   : > { %3316 = vmatpush.bf16.msrb.mxu2 %v5104_v54 }
 0x189   : > { %3302 = vmatpush.bf16.msrb.mxu1 %v4992_v42  ;;  %3329 = vmatpush.bf16.msrb.mxu3 %v5232_v43 }
 0x18a   : > { %3290 = vmatpush.bf16.msrb.mxu0 %v4848_v45 }
 0x18c   : > { %3317 = vmatpush.bf16.msrb.mxu2 %v5088_v51 }
 0x18d   : > { %3303 = vmatpush.bf16.msrb.mxu1 %v4976_v17  ;;  %3330 = vmatpush.bf16.msrb.mxu3 %v5216_v57 }
 0x18e   : > { %3291 = vmatpush.bf16.msrb.mxu0 %v4832_v58 }
 0x18f   : > { %3318 = vmatmul.bf16.vlgmr.msrb.gmra.mxu2 %v7620_v26 }
 0x190   : > { %3331 = vmatmul.bf16.vlgmr.msrb.gmra.mxu3 %v7628_v29  ;;  %v2292_v2 = vpop.f32.mrf.mxu0 }
 0x191   : > { %3304 = vmatpush.bf16.msrb.mxu1 %v4960_v1  ;;  %3292 = vmatmul.bf16.vlgmr.msrb.gmra.mxu0 %v7636_v35  ;;  %v2293_v3 = vadd.f32 %v2292_v2, %v7582_v63  ;;  %v2305_v4 = vpop.f32.mrf.mxu1  ;;  %v8205_v63 = vld [vmem:[%s8247_s4] sm:$0xf] }
 0x192   : > { %v2318_v6 = vpop.f32.mrf.mxu2  ;;  %v3342_v20 = vperm.slane %v8205_v63, 0  ;;  %v3343_v37 = vperm.slane %v8205_v63, 1 }
 0x193   : > { %v2306_v5 = vadd.f32 %v2305_v4, %v2293_v3  ;;  %v2331_v7 = vpop.f32.mrf.mxu3 }
 0x194   : > { %3305 = vmatmul.bf16.vlgmr.msrb.gmra.mxu1 %v7658_v62 }
 0x195   : > { %v2319_v9 = vadd.f32 %v2318_v6, %v2306_v5 }
 0x197   : > { %v8200_v10 = vadd.f32 %v2331_v7, %v2319_v9 }
 0x198   : > { %v2294_v12 = vpop.f32.mrf.mxu0 }
 0x199   : > { %v2307_v26 = vpop.f32.mrf.mxu1 }
 0x19a   : > { %v2320_v13 = vpop.f32.mrf.mxu2 }
 0x19b   : > { %v2333_v29 = vpop.f32.mrf.mxu3 }
 0x1b0   : > { %v3137_v14 = vpop.f32.mrf.mxu0 }
 0x1b1   : > { %v3150_v15 = vpop.f32.mrf.mxu1 }
 0x1b2   : > { %v3151_v35 = vadd.f32 %v3150_v15, %v3137_v14  ;;  %v3163_v16 = vpop.f32.mrf.mxu2 }
 0x1b3   : > { %v3176_v62 = vpop.f32.mrf.mxu3 }
 0x1b4   : > { %v3164_v19 = vadd.f32 %v3163_v16, %v3151_v35 }
 0x1b6   : > { %v3177_v59 = vadd.f32 %v3176_v62, %v3164_v19  ;;  %v3344_v19 = vperm.slane %v8205_v63, 2 }
 0x1b8   : > { %v3139_v21 = vpop.f32.mrf.mxu0  ;;  %v3336_v22 = vadd.f32 %v3177_v59, %v7774_v8 }
 0x1b9   : > { %v3152_v53 = vpop.f32.mrf.mxu1 }
 0x1ba   : > { %v3350_v23 = vadd.f32 %v3342_v20, %v3336_v22  ;;  %v3165_v24 = vpop.f32.mrf.mxu2 }
 0x1bb   : > { %v3178_v25 = vpop.f32.mrf.mxu3 }
 0x1bc   : > { %3354 = vst [vmem:[%s8214_s28] sm:$0xff] %v3350_v23  ;;  %v3397_v28 = vmul.f32 %v3350_v23, %v3350_v23  ;;  %v3358_v8 = vrot.slane %v3350_v23, 4 }
 0x1be   : > { %v3401_v34 = vrot.slane %v3397_v28, 4  ;;  %v3359_v38 = vadd.f32 %v3358_v8, %v3350_v23 }
 0x1c0   : > { %v3402_v52 = vadd.f32 %v3401_v34, %v3397_v28  ;;  %v3360_v46 = vrot.slane %v3359_v38, 2 }
 0x1c2   : > { %v3403_v49 = vrot.slane %v3402_v52, 2  ;;  %v3361_v55 = vadd.f32 %v3360_v46, %v3359_v38 }
 0x1c4   : > { %v3404_v11 = vadd.f32 %v3403_v49, %v3402_v52  ;;  %v3362_v61 = vrot.slane %v3361_v55, 1 }
 0x1c6   : > { %v3405_v1 = vrot.slane %v3404_v11, 1  ;;  %v3363_v4 = vadd.f32 %v3362_v61, %v3361_v55 }
 0x1c8   : > { %v3406_v7 = vadd.f32 %v3405_v1, %v3404_v11 }
 0x1d0   : > { %v3189_v41 = vpop.f32.mrf.mxu0 }
 0x1d1   : > { %v3202_v27 = vpop.f32.mrf.mxu1 }
 0x1d2   : > { %v3203_v30 = vadd.f32 %v3202_v27, %v3189_v41  ;;  %v3215_v31 = vpop.f32.mrf.mxu2 }
 0x1d3   : > { %v3228_v32 = vpop.f32.mrf.mxu3 }
 0x1d4   : > { %v3216_v33 = vadd.f32 %v3215_v31, %v3203_v30 }
 0x1d6   : > { %v3229_v36 = vadd.f32 %v3228_v32, %v3216_v33 }
 0x1d8   : > { %v3191_v54 = vpop.f32.mrf.mxu0  ;;  %v3337_v39 = vadd.f32 %v3229_v36, %v7973_v56 }
 0x1d9   : > { %v3204_v42 = vpop.f32.mrf.mxu1 }
 0x1da   : > { %v3351_v43 = vadd.f32 %v3343_v37, %v3337_v39  ;;  %v3217_v44 = vpop.f32.mrf.mxu2 }
 0x1db   : > { %v3230_v45 = vpop.f32.mrf.mxu3 }
 0x1dc   : > { %3355 = vst [vmem:[%s8214_s28 + $0x8] sm:$0xff] %v3351_v43  ;;  %v3364_v47 = vrot.slane %v3351_v43, 4  ;;  %v3398_v48 = vmul.f32 %v3351_v43, %v3351_v43 }
 0x1de   : > { %v3365_v50 = vadd.f32 %v3364_v47, %v3351_v43  ;;  %v3407_v51 = vrot.slane %v3398_v48, 4 }
 0x1e0   : > { %v3366_v17 = vrot.slane %v3365_v50, 2  ;;  %v3408_v57 = vadd.f32 %v3407_v51, %v3398_v48 }
 0x1e2   : > { %v3367_v58 = vadd.f32 %v3366_v17, %v3365_v50  ;;  %v3409_v60 = vrot.slane %v3408_v57, 2 }
 0x1e4   : > { %v3368_v56 = vrot.slane %v3367_v58, 1  ;;  %v3410_v0 = vadd.f32 %v3409_v60, %v3408_v57 }
 0x1e6   : > { %v3369_v2 = vadd.f32 %v3368_v56, %v3367_v58  ;;  %v3411_v3 = vrot.slane %v3410_v0, 1 }
 0x1e8   : > { %v3386_v5 = vrot.slane %v3369_v2, 7  ;;  %v3412_v6 = vadd.f32 %v3411_v3, %v3410_v0 }
 0x1ea   : > { %v8220_v9 = vsel %vm3389_vm1, %v3363_v4, %v3386_v5  ;;  %v3429_v12 = vrot.slane %v3412_v6, 7 }
 0x1ec   : > { %v8222_v13 = vsel %vm3389_vm1, %v3406_v7, %v3429_v12 }
 0x1f0   : > { %v3241_v26 = vpop.f32.mrf.mxu0 }
 0x1f1   : > { %v3254_v29 = vpop.f32.mrf.mxu1 }
 0x1f2   : > { %v3255_v14 = vadd.f32 %v3254_v29, %v3241_v26  ;;  %v3267_v15 = vpop.f32.mrf.mxu2 }
 0x1f3   : > { %v3280_v35 = vpop.f32.mrf.mxu3 }
 0x1f4   : > { %v3268_v16 = vadd.f32 %v3267_v15, %v3255_v14 }
 0x1f6   : > { %v3281_v62 = vadd.f32 %v3280_v35, %v3268_v16 }
 0x1f8   : > { %v3243_v59 = vpop.f32.mrf.mxu0  ;;  %v3338_v20 = vadd.f32 %v3281_v62, %v8169_v40  ;;  %v3345_v40 = vperm.slane %v8205_v63, 3 }
 0x1f9   : > { %v3256_v21 = vpop.f32.mrf.mxu1 }
 0x1fa   : > { %v3352_v22 = vadd.f32 %v3344_v19, %v3338_v20  ;;  %v3269_v53 = vpop.f32.mrf.mxu2 }
 0x1fb   : > { %v3282_v23 = vpop.f32.mrf.mxu3 }
 0x1fc   : > { %3356 = vst [vmem:[%s8214_s28 + $0x10] sm:$0xff] %v3352_v22  ;;  %v3399_v24 = vmul.f32 %v3352_v22, %v3352_v22  ;;  %v3370_v41 = vrot.slane %v3352_v22, 4 }
 0x1fe   : > { %v3413_v30 = vrot.slane %v3399_v24, 4  ;;  %v3371_v8 = vadd.f32 %v3370_v41, %v3352_v22 }
 0x200   : > { %v3414_v34 = vadd.f32 %v3413_v30, %v3399_v24  ;;  %v3372_v54 = vrot.slane %v3371_v8, 2 }
 0x202   : > { %v3415_v52 = vrot.slane %v3414_v34, 2  ;;  %v3373_v45 = vadd.f32 %v3372_v54, %v3371_v8 }
 0x204   : > { %v3416_v48 = vadd.f32 %v3415_v52, %v3414_v34  ;;  %v3374_v51 = vrot.slane %v3373_v45, 1 }
 0x206   : > { %v3417_v17 = vrot.slane %v3416_v48, 1 }
 0x208   : > { %v3418_v61 = vadd.f32 %v3417_v17, %v3416_v48 }
 0x20a   : > { %v3430_v4 = vrot.slane %v3418_v61, 6 }
 0x20e   : > { %v3293_v25 = vpop.f32.mrf.mxu0 }
 0x211   : > { %v3306_v27 = vpop.f32.mrf.mxu1 }
 0x212   : > { %v3319_v28 = vpop.f32.mrf.mxu2  ;;  %v3307_v31 = vadd.f32 %v3306_v27, %v3293_v25 }
 0x213   : > { %v3332_v32 = vpop.f32.mrf.mxu3 }
 0x214   : > { %v3320_v33 = vadd.f32 %v3319_v28, %v3307_v31 }
 0x216   : > { %v3333_v36 = vadd.f32 %v3332_v32, %v3320_v33  ;;  %v3295_v37 = vpop.f32.mrf.mxu0 }
 0x218   : > { %v3339_v38 = vadd.f32 %v3333_v36, %v8200_v10  ;;  %v3375_v10 = vadd.f32 %v3374_v51, %v3373_v45 }
 0x219   : > { %v3308_v39 = vpop.f32.mrf.mxu1 }
 0x21a   : > { %v3321_v42 = vpop.f32.mrf.mxu2  ;;  %v3353_v43 = vadd.f32 %v3345_v40, %v3339_v38  ;;  %v3387_v1 = vrot.slane %v3375_v10, 6 }
 0x21b   : > { %v3334_v44 = vpop.f32.mrf.mxu3 }
 0x21c   : > { %3357 = vst [vmem:[%s8214_s28 + $0x18] sm:$0xff] %v3353_v43  ;;  %v3376_v46 = vrot.slane %v3353_v43, 4  ;;  %v3400_v47 = vmul.f32 %v3353_v43, %v3353_v43 }
 0x21e   : > { %v3377_v49 = vadd.f32 %v3376_v46, %v3353_v43  ;;  %v3419_v50 = vrot.slane %v3400_v47, 4 }
 0x220   : > { %v3378_v55 = vrot.slane %v3377_v49, 2  ;;  %v3420_v63 = vadd.f32 %v3419_v50, %v3400_v47 }
 0x222   : > { %v3379_v57 = vadd.f32 %v3378_v55, %v3377_v49  ;;  %v3421_v11 = vrot.slane %v3420_v63, 2 }
 0x224   : > { %v3380_v58 = vrot.slane %v3379_v57, 1  ;;  %v3422_v60 = vadd.f32 %v3421_v11, %v3420_v63 }
 0x226   : > { %v3381_v56 = vadd.f32 %v3380_v58, %v3379_v57  ;;  %v3423_v0 = vrot.slane %v3422_v60, 1 }
 0x228   : > { %v3388_v2 = vrot.slane %v3381_v56, 5  ;;  %v3424_v3 = vadd.f32 %v3423_v0, %v3422_v60 }
 0x22a   : > { %v3392_v5 = vsel %vm3391_vm2, %v3387_v1, %v3388_v2  ;;  %v3431_v6 = vrot.slane %v3424_v3, 5 }
 0x22b   : > { %v3394_v7 = vsel %vm3393_vm3, %v8220_v9, %v3392_v5 }
 0x22c   : > { %3396 = vst.msk [vmem:[%s264_s8] ss:$2 sm:$0xf] %vm6616_vm0, %v3394_v7  ;;  %v3433_v12 = vsel %vm3391_vm2, %v3430_v4, %v3431_v6 }
 0x22d   : > { %v3434_v26 = vsel %vm3393_vm3, %v8222_v13, %v3433_v12 }
 0x22e   : > { %5329 = vst.msk [vmem:[%s264_s8 + $0x1] ss:$2 sm:$0xf] %vm6616_vm0, %v3434_v26 }
 0x22f PF: > { %s17_s21 = sadd.s32 1, %s5734_s21  }
 0x230   : > { %p14_p4 = scmp.ge.s32.totalorder %s17_s21, 4  }
 0x232   :  { %16 = sbr.rel (!%p14_p4) target bundleno = 1 (0x1), region = 86 }

// kernel: cleaning_backbone_forward.5
= control target key start
LH: loop header
LB: loop body
LE: loop exit
PB: predicated region body
PF: predicated region fallthrough
CT: control target
= control target key end

     0   :  { %s5847_s24 = smov 0   ;;  %s8328_s0 = inlined_call_operand.vmem [shape: f32[2,8,512], index: 0, kind: input, shape index: {}]   ;;  %s8329_s1 = inlined_call_operand.vmem [shape: f32[1,512], index: 1, kind: input, shape index: {}]   ;;  %s8330_s2 = inlined_call_operand.vmem [shape: f32[1,512], index: 2, kind: input, shape index: {}]   ;;  %s8331_s3 = inlined_call_operand.vmem [shape: bf16[3,512,512], index: 3, kind: input, shape index: {}]   ;;  %s8332_s4 = inlined_call_operand.vmem [shape: f32[1,512], index: 4, kind: input, shape index: {}]   ;;  %s8333_s5 = inlined_call_operand.vmem [shape: f32[2,8,512], index: 5, kind: input, shape index: {}]   ;;  %s8334_s6 = inlined_call_operand.vmem [shape: f32[2,8,512], index: 6, kind: output, shape index: {0}]   ;;  %s8335_s7 = inlined_call_operand.vmem [shape: f32[2,2,512], index: 7, kind: output, shape index: {1}]  }
   0x1 LB: > { %s3593_s25 = sadd.s32 4294967295, %s5804_s24   ;;  %p3597_p0 = scmp.ge.s32.totalorder %s5804_s24, 1  ;;  %s5804_s24 = sphi %s5847_s24, %s18_s24  }
   0x2   : > { %p250_p1 = scmp.lt.s32.totalorder %s5804_s24, 3 }
   0x4   : > { %p251_p2 = pnand %p3597_p0, %p250_p1 }
   0x5   : > { %p292_p3 = scmp.lt.s32.totalorder (!%p251_p2), %s3593_s25, 1 }
   0x6   : > { %254 = sbr.rel (%p251_p2) target bundleno = 561 (0x231), region = 44 }
   0xb   : > { %v3848_v0 = vld [vmem:[%s8331_s3 + $0x4e0] sm:$0xf]  ;;  %v5563_v1 = vld [vmem:[%s8331_s3 + $0x4ec] sm:$0xf0]  ;;  %s8339_s25 = smov (!%p292_p3, %s3593_s25), 1  ;;  %vm3444_vm1 = vcmask 1040384  }
   0xc   : > { %v3976_v2 = vld [vmem:[%s8331_s3 + $0x5e0] sm:$0xf]  ;;  %v3849_v3 = vor.u32 %v5563_v1, %v3848_v0  ;;  %v5595_v4 = vld [vmem:[%s8331_s3 + $0x5ec] sm:$0xf0]  ;;  %s6171_s20 = sshll.u32 %s8339_s25, 5  ;;  %vm3446_vm2 = vcmask 1042434  }
   0xd   : > { %v4104_v5 = vld [vmem:[%s8331_s3 + $0x6e0] sm:$0xf]  ;;  %v5627_v6 = vld [vmem:[%s8331_s3 + $0x6ec] sm:$0xf0]  ;;  %v3977_v7 = vor.u32 %v5595_v4, %v3976_v2  ;;  %s296_s27 = scalar_lea.vmem %s8328_s0, %s6171_s20  ;;  %s8287_s22 = scalar_lea.vmem %s8333_s5, %s6171_s20  ;;  %vm3448_vm3 = vcmask 1041408  }
   0xe   : > { %v4105_v8 = vor.u32 %v5627_v6, %v4104_v5  ;;  %v4232_v9 = vld [vmem:[%s8331_s3 + $0x7e0] sm:$0xf]  ;;  %v5659_v10 = vld [vmem:[%s8331_s3 + $0x7ec] sm:$0xf0]  ;;  %1326 = vmatpush.bf16.msra.mxu0 %v3849_v3 }
   0xf   : > { %v3832_v11 = vld [vmem:[%s8331_s3 + $0x4c0] sm:$0xf]  ;;  %v4233_v12 = vor.u32 %v5659_v10, %v4232_v9  ;;  %v5559_v13 = vld [vmem:[%s8331_s3 + $0x4cc] sm:$0xf0]  ;;  %1339 = vmatpush.bf16.msra.mxu1 %v3977_v7 }
  0x10   : > { %v3960_v14 = vld [vmem:[%s8331_s3 + $0x5c0] sm:$0xf]  ;;  %v5591_v15 = vld [vmem:[%s8331_s3 + $0x5cc] sm:$0xf0]  ;;  %1352 = vmatpush.bf16.msra.mxu2 %v4105_v8  ;;  %v3833_v16 = vor.u32 %v5559_v13, %v3832_v11 }
  0x11   : > { %v3961_v17 = vor.u32 %v5591_v15, %v3960_v14  ;;  %v4088_v18 = vld [vmem:[%s8331_s3 + $0x6c0] sm:$0xf]  ;;  %v5623_v19 = vld [vmem:[%s8331_s3 + $0x6cc] sm:$0xf0]  ;;  %1365 = vmatpush.bf16.msra.mxu3 %v4233_v12 }
  0x12   : > { %v4216_v20 = vld [vmem:[%s8331_s3 + $0x7c0] sm:$0xf]  ;;  %v4089_v21 = vor.u32 %v5623_v19, %v4088_v18  ;;  %v5655_v22 = vld [vmem:[%s8331_s3 + $0x7cc] sm:$0xf0]  ;;  %1327 = vmatpush.bf16.msra.mxu0 %v3833_v16 }
  0x13   : > { %v3816_v23 = vld [vmem:[%s8331_s3 + $0x4a0] sm:$0xf]  ;;  %v5555_v24 = vld [vmem:[%s8331_s3 + $0x4ac] sm:$0xf0]  ;;  %v4217_v25 = vor.u32 %v5655_v22, %v4216_v20  ;;  %1340 = vmatpush.bf16.msra.mxu1 %v3961_v17 }
  0x14   : > { %v3944_v26 = vld [vmem:[%s8331_s3 + $0x5a0] sm:$0xf]  ;;  %v5587_v27 = vld [vmem:[%s8331_s3 + $0x5ac] sm:$0xf0]  ;;  %v3817_v29 = vor.u32 %v5555_v24, %v3816_v23  ;;  %1353 = vmatpush.bf16.msra.mxu2 %v4089_v21 }
  0x15   : > { %v4072_v28 = vld [vmem:[%s8331_s3 + $0x6a0] sm:$0xf]  ;;  %v5619_v30 = vld [vmem:[%s8331_s3 + $0x6ac] sm:$0xf0]  ;;  %v3945_v33 = vor.u32 %v5587_v27, %v3944_v26  ;;  %1366 = vmatpush.bf16.msra.mxu3 %v4217_v25 }
  0x16   : > { %v4200_v31 = vld [vmem:[%s8331_s3 + $0x7a0] sm:$0xf]  ;;  %v5651_v32 = vld [vmem:[%s8331_s3 + $0x7ac] sm:$0xf0]  ;;  %v4073_v34 = vor.u32 %v5619_v30, %v4072_v28  ;;  %1328 = vmatpush.bf16.msra.mxu0 %v3817_v29  ;;  %v5561_v28 = vld [vmem:[%s8331_s3 + $0x4e4] sm:$0xf] }
  0x17   : > { %v3800_v35 = vld [vmem:[%s8331_s3 + $0x480] sm:$0xf]  ;;  %v5551_v36 = vld [vmem:[%s8331_s3 + $0x48c] sm:$0xf0]  ;;  %v4201_v38 = vor.u32 %v5651_v32, %v4200_v31  ;;  %1341 = vmatpush.bf16.msra.mxu1 %v3945_v33  ;;  %v3850_v29 = vld [vmem:[%s8331_s3 + $0x4f0] sm:$0xf0] }
  0x18   : > { %v3928_v37 = vld [vmem:[%s8331_s3 + $0x580] sm:$0xf]  ;;  %v5583_v39 = vld [vmem:[%s8331_s3 + $0x58c] sm:$0xf0]  ;;  %v3801_v44 = vor.u32 %v5551_v36, %v3800_v35  ;;  %1354 = vmatpush.bf16.msra.mxu2 %v4073_v34  ;;  %v5593_v30 = vld [vmem:[%s8331_s3 + $0x5e4] sm:$0xf] }
  0x19   : > { %v4056_v40 = vld [vmem:[%s8331_s3 + $0x680] sm:$0xf]  ;;  %v5615_v41 = vld [vmem:[%s8331_s3 + $0x68c] sm:$0xf0]  ;;  %v3929_v45 = vor.u32 %v5583_v39, %v3928_v37  ;;  %1367 = vmatpush.bf16.msra.mxu3 %v4201_v38  ;;  %v3978_v32 = vld [vmem:[%s8331_s3 + $0x5f0] sm:$0xf0] }
  0x1a   : > { %v4184_v42 = vld [vmem:[%s8331_s3 + $0x780] sm:$0xf]  ;;  %v5647_v43 = vld [vmem:[%s8331_s3 + $0x78c] sm:$0xf0]  ;;  %v4057_v46 = vor.u32 %v5615_v41, %v4056_v40  ;;  %1329 = vmatpush.bf16.msra.mxu0 %v3801_v44  ;;  %v5625_v33 = vld [vmem:[%s8331_s3 + $0x6e4] sm:$0xf]  ;;  %v3853_v40 = vor.u32 %v5561_v28, %v3850_v29  ;;  %v3981_v41 = vor.u32 %v5593_v30, %v3978_v32 }
  0x1b   : > { %v3784_v47 = vld [vmem:[%s8331_s3 + $0x460] sm:$0xf]  ;;  %v5547_v48 = vld [vmem:[%s8331_s3 + $0x46c] sm:$0xf0]  ;;  %v4185_v50 = vor.u32 %v5647_v43, %v4184_v42  ;;  %1342 = vmatpush.bf16.msra.mxu1 %v3929_v45  ;;  %v4106_v34 = vld [vmem:[%s8331_s3 + $0x6f0] sm:$0xf0] }
  0x1c   : > { %v3912_v49 = vld [vmem:[%s8331_s3 + $0x560] sm:$0xf]  ;;  %v5579_v51 = vld [vmem:[%s8331_s3 + $0x56c] sm:$0xf0]  ;;  %v3785_v56 = vor.u32 %v5547_v48, %v3784_v47  ;;  %1355 = vmatpush.bf16.msra.mxu2 %v4057_v46  ;;  %v5657_v37 = vld [vmem:[%s8331_s3 + $0x7e4] sm:$0xf]  ;;  %v4109_v42 = vor.u32 %v5625_v33, %v4106_v34 }
  0x1d   : > { %v4040_v52 = vld [vmem:[%s8331_s3 + $0x660] sm:$0xf]  ;;  %v5611_v53 = vld [vmem:[%s8331_s3 + $0x66c] sm:$0xf0]  ;;  %v3913_v57 = vor.u32 %v5579_v51, %v3912_v49  ;;  %1368 = vmatpush.bf16.msra.mxu3 %v4185_v50  ;;  %v4234_v38 = vld [vmem:[%s8331_s3 + $0x7f0] sm:$0xf0] }
  0x1e   : > { %v4168_v54 = vld [vmem:[%s8331_s3 + $0x760] sm:$0xf]  ;;  %v5643_v55 = vld [vmem:[%s8331_s3 + $0x76c] sm:$0xf0]  ;;  %v4041_v58 = vor.u32 %v5611_v53, %v4040_v52  ;;  %1330 = vmatpush.bf16.msra.mxu0 %v3785_v56  ;;  %v5557_v43 = vld [vmem:[%s8331_s3 + $0x4c4] sm:$0xf]  ;;  %v4237_v46 = vor.u32 %v5657_v37, %v4234_v38 }
  0x1f   : > { %v3768_v59 = vld [vmem:[%s8331_s3 + $0x440] sm:$0xf]  ;;  %v5543_v60 = vld [vmem:[%s8331_s3 + $0x44c] sm:$0xf0]  ;;  %v4169_v62 = vor.u32 %v5643_v55, %v4168_v54  ;;  %1343 = vmatpush.bf16.msra.mxu1 %v3913_v57  ;;  %v3834_v44 = vld [vmem:[%s8331_s3 + $0x4d0] sm:$0xf0] }
  0x20   : > { %v3896_v61 = vld [vmem:[%s8331_s3 + $0x540] sm:$0xf]  ;;  %v5575_v63 = vld [vmem:[%s8331_s3 + $0x54c] sm:$0xf0]  ;;  %v3769_v4 = vor.u32 %v5543_v60, %v3768_v59  ;;  %1356 = vmatpush.bf16.msra.mxu2 %v4041_v58  ;;  %v5589_v45 = vld [vmem:[%s8331_s3 + $0x5c4] sm:$0xf]  ;;  %v3837_v52 = vor.u32 %v5557_v43, %v3834_v44 }
  0x21   : > { %v4024_v0 = vld [vmem:[%s8331_s3 + $0x640] sm:$0xf]  ;;  %v5607_v1 = vld [vmem:[%s8331_s3 + $0x64c] sm:$0xf0]  ;;  %v3897_v5 = vor.u32 %v5575_v63, %v3896_v61  ;;  %1369 = vmatpush.bf16.msra.mxu3 %v4169_v62  ;;  %v3962_v47 = vld [vmem:[%s8331_s3 + $0x5d0] sm:$0xf0] }
  0x22   : > { %v4152_v2 = vld [vmem:[%s8331_s3 + $0x740] sm:$0xf]  ;;  %v5639_v3 = vld [vmem:[%s8331_s3 + $0x74c] sm:$0xf0]  ;;  %v4025_v6 = vor.u32 %v5607_v1, %v4024_v0  ;;  %1331 = vmatpush.bf16.msra.mxu0 %v3769_v4  ;;  %v5621_v48 = vld [vmem:[%s8331_s3 + $0x6c4] sm:$0xf]  ;;  %v3965_v55 = vor.u32 %v5589_v45, %v3962_v47 }
  0x23   : > { %v3752_v7 = vld [vmem:[%s8331_s3 + $0x420] sm:$0xf]  ;;  %v5539_v8 = vld [vmem:[%s8331_s3 + $0x42c] sm:$0xf0]  ;;  %v4153_v10 = vor.u32 %v5639_v3, %v4152_v2  ;;  %1344 = vmatpush.bf16.msra.mxu1 %v3897_v5  ;;  %v4090_v49 = vld [vmem:[%s8331_s3 + $0x6d0] sm:$0xf0] }
  0x24   : > { %v3880_v9 = vld [vmem:[%s8331_s3 + $0x520] sm:$0xf]  ;;  %v5571_v11 = vld [vmem:[%s8331_s3 + $0x52c] sm:$0xf0]  ;;  %v3753_v16 = vor.u32 %v5539_v8, %v3752_v7  ;;  %1357 = vmatpush.bf16.msra.mxu2 %v4025_v6  ;;  %v5653_v50 = vld [vmem:[%s8331_s3 + $0x7c4] sm:$0xf]  ;;  %v4093_v56 = vor.u32 %v5621_v48, %v4090_v49 }
  0x25   : > { %v4008_v12 = vld [vmem:[%s8331_s3 + $0x620] sm:$0xf]  ;;  %v5603_v13 = vld [vmem:[%s8331_s3 + $0x62c] sm:$0xf0]  ;;  %v3881_v19 = vor.u32 %v5571_v11, %v3880_v9  ;;  %1370 = vmatpush.bf16.msra.mxu3 %v4153_v10  ;;  %v4218_v51 = vld [vmem:[%s8331_s3 + $0x7d0] sm:$0xf0] }
  0x26   : > { %v4136_v14 = vld [vmem:[%s8331_s3 + $0x720] sm:$0xf]  ;;  %v5635_v15 = vld [vmem:[%s8331_s3 + $0x72c] sm:$0xf0]  ;;  %v4009_v20 = vor.u32 %v5603_v13, %v4008_v12  ;;  %1332 = vmatpush.bf16.msra.mxu0 %v3753_v16  ;;  %v5553_v53 = vld [vmem:[%s8331_s3 + $0x4a4] sm:$0xf]  ;;  %v4221_v60 = vor.u32 %v5653_v50, %v4218_v51 }
  0x27   : > { %v3736_v17 = vld [vmem:[%s8331_s3 + $0x400] sm:$0xf]  ;;  %v5535_v18 = vld [vmem:[%s8331_s3 + $0x40c] sm:$0xf0]  ;;  %v4137_v24 = vor.u32 %v5635_v15, %v4136_v14  ;;  %1345 = vmatpush.bf16.msra.mxu1 %v3881_v19  ;;  %v3818_v54 = vld [vmem:[%s8331_s3 + $0x4b0] sm:$0xf0] }
  0x28   : > { %v3864_v21 = vld [vmem:[%s8331_s3 + $0x500] sm:$0xf]  ;;  %v5567_v22 = vld [vmem:[%s8331_s3 + $0x50c] sm:$0xf0]  ;;  %v3737_v31 = vor.u32 %v5535_v18, %v3736_v17  ;;  %1358 = vmatpush.bf16.msra.mxu2 %v4009_v20  ;;  %v5585_v57 = vld [vmem:[%s8331_s3 + $0x5a4] sm:$0xf]  ;;  %v3821_v3 = vor.u32 %v5553_v53, %v3818_v54 }
  0x29   : > { %v3992_v23 = vld [vmem:[%s8331_s3 + $0x600] sm:$0xf]  ;;  %v5599_v25 = vld [vmem:[%s8331_s3 + $0x60c] sm:$0xf0]  ;;  %v3865_v35 = vor.u32 %v5567_v22, %v3864_v21  ;;  %1371 = vmatpush.bf16.msra.mxu3 %v4137_v24  ;;  %v3946_v58 = vld [vmem:[%s8331_s3 + $0x5b0] sm:$0xf0] }
  0x2a   : > { %v4120_v26 = vld [vmem:[%s8331_s3 + $0x700] sm:$0xf]  ;;  %v5631_v27 = vld [vmem:[%s8331_s3 + $0x70c] sm:$0xf0]  ;;  %v3993_v36 = vor.u32 %v5599_v25, %v3992_v23  ;;  %1333 = vmatpush.bf16.msra.mxu0 %v3737_v31  ;;  %v5617_v59 = vld [vmem:[%s8331_s3 + $0x6a4] sm:$0xf]  ;;  %v3949_v6 = vor.u32 %v5585_v57, %v3946_v58 }
  0x2b   : > { %v4121_v39 = vor.u32 %v5631_v27, %v4120_v26  ;;  %1346 = vmatpush.bf16.msra.mxu1 %v3865_v35  ;;  %v4074_v61 = vld [vmem:[%s8331_s3 + $0x6b0] sm:$0xf0]  ;;  %v5649_v62 = vld [vmem:[%s8331_s3 + $0x7a4] sm:$0xf]  ;;  %v316_v5 = vld [vmem:[%s8329_s1] sm:$0xf] }
  0x2c   : > { %1359 = vmatpush.bf16.msra.mxu2 %v3993_v36  ;;  %v4202_v63 = vld [vmem:[%s8331_s3 + $0x7b0] sm:$0xf0]  ;;  %v5549_v0 = vld [vmem:[%s8331_s3 + $0x484] sm:$0xf]  ;;  %v4077_v7 = vor.u32 %v5617_v59, %v4074_v61  ;;  %v330_v13 = vld [vmem:[%s8330_s2] sm:$0xf] }
  0x2d   : > { %1372 = vmatpush.bf16.msra.mxu3 %v4121_v39  ;;  %v3802_v1 = vld [vmem:[%s8331_s3 + $0x490] sm:$0xf0]  ;;  %v5581_v2 = vld [vmem:[%s8331_s3 + $0x584] sm:$0xf]  ;;  %v4205_v11 = vor.u32 %v5649_v62, %v4202_v63  ;;  %v320_v17 = vperm.slane %v316_v5, 2  ;;  %v321_v18 = vperm.slane %v316_v5, 3 }
  0x2e   : > { %1378 = vmatpush.bf16.msrb.mxu0 %v3853_v40  ;;  %v3930_v4 = vld [vmem:[%s8331_s3 + $0x590] sm:$0xf0]  ;;  %v5613_v8 = vld [vmem:[%s8331_s3 + $0x684] sm:$0xf]  ;;  %v318_v19 = vperm.slane %v316_v5, 0  ;;  %v3805_v20 = vor.u32 %v5549_v0, %v3802_v1  ;;  %v334_v26 = vperm.slane %v330_v13, 2 }
  0x2f   : > { %1391 = vmatpush.bf16.msrb.mxu1 %v3981_v41  ;;  %v4058_v9 = vld [vmem:[%s8331_s3 + $0x690] sm:$0xf0]  ;;  %v5645_v10 = vld [vmem:[%s8331_s3 + $0x784] sm:$0xf]  ;;  %v3933_v21 = vor.u32 %v5581_v2, %v3930_v4  ;;  %v335_v27 = vperm.slane %v330_v13, 3  ;;  %v332_v28 = vperm.slane %v330_v13, 0 }
  0x30   : > { %1404 = vmatpush.bf16.msrb.mxu2 %v4109_v42  ;;  %v4186_v12 = vld [vmem:[%s8331_s3 + $0x790] sm:$0xf0]  ;;  %v5545_v14 = vld [vmem:[%s8331_s3 + $0x464] sm:$0xf]  ;;  %v4061_v22 = vor.u32 %v5613_v8, %v4058_v9  ;;  %v319_v29 = vperm.slane %v316_v5, 1  ;;  %v315_v32 = vld [vmem:[%s296_s27 + $0x18] sm:$0xff] }
  0x31   : > { %1417 = vmatpush.bf16.msrb.mxu3 %v4237_v46  ;;  %v3786_v15 = vld [vmem:[%s8331_s3 + $0x470] sm:$0xf0]  ;;  %v5577_v16 = vld [vmem:[%s8331_s3 + $0x564] sm:$0xf]  ;;  %v4189_v30 = vor.u32 %v5645_v10, %v4186_v12  ;;  %v333_v34 = vperm.slane %v330_v13, 1  ;;  %v329_v38 = vmul.f32 %v321_v18, %v315_v32  ;;  %v313_v40 = vld [vmem:[%s296_s27 + $0x8] sm:$0xff] }
  0x32   : > { %1379 = vmatpush.bf16.msrb.mxu0 %v3837_v52  ;;  %v3914_v23 = vld [vmem:[%s8331_s3 + $0x570] sm:$0xf0]  ;;  %v5609_v24 = vld [vmem:[%s8331_s3 + $0x664] sm:$0xf]  ;;  %v3789_v41 = vor.u32 %v5545_v14, %v3786_v15  ;;  %v327_v46 = vmul.f32 %v319_v29, %v313_v40  ;;  %v5628_v40 = vld [vmem:[%s8331_s3 + $0x6f4] sm:$0xf0] }
  0x33   : > { %1392 = vmatpush.bf16.msrb.mxu1 %v3965_v55  ;;  %v4042_v25 = vld [vmem:[%s8331_s3 + $0x670] sm:$0xf0]  ;;  %v312_v33 = vld [vmem:[%s296_s27] sm:$0xff]  ;;  %v3917_v42 = vor.u32 %v5577_v16, %v3914_v23  ;;  %v343_v51 = vadd.f32 %v335_v27, %v329_v38 }
  0x34   : > { %1405 = vmatpush.bf16.msrb.mxu2 %v4093_v56  ;;  %v314_v31 = vld [vmem:[%s296_s27 + $0x10] sm:$0xff]  ;;  %v5641_v35 = vld [vmem:[%s8331_s3 + $0x764] sm:$0xf]  ;;  %v326_v39 = vmul.f32 %v318_v19, %v312_v33  ;;  %v4045_v43 = vor.u32 %v5609_v24, %v4042_v25  ;;  %v341_v57 = vadd.f32 %v333_v34, %v327_v46  ;;  %s8296_s27 = scalar_lea.vmem %s8334_s6, %s6171_s20  ;;  %s5404_s20 = sshll.u32 %s8339_s25, 3 }
  0x35   : > { %1418 = vmatpush.bf16.msrb.mxu3 %v4221_v60  ;;  %v4170_v36 = vld [vmem:[%s8331_s3 + $0x770] sm:$0xf0]  ;;  %v328_v37 = vmul.f32 %v320_v17, %v314_v31  ;;  %v5541_v44 = vld [vmem:[%s8331_s3 + $0x444] sm:$0xf]  ;;  %v347_v59 = vmax.f32 %v343_v51, 0.0  ;;  %s311_s30 = scalar_lea.vmem %s8335_s7, %s5404_s20 }
  0x36   : > { %1380 = vmatpush.bf16.msrb.mxu0 %v3821_v3  ;;  %v3770_v45 = vld [vmem:[%s8331_s3 + $0x450] sm:$0xf0]  ;;  %v5573_v47 = vld [vmem:[%s8331_s3 + $0x544] sm:$0xf]  ;;  %v340_v52 = vadd.f32 %v332_v28, %v326_v39  ;;  %v4173_v53 = vor.u32 %v5641_v35, %v4170_v36  ;;  %v4112_v35 = vld [vmem:[%s8331_s3 + $0x6e8] sm:$0xf] }
  0x37   : > { %1393 = vmatpush.bf16.msrb.mxu1 %v3949_v6  ;;  %v3898_v48 = vld [vmem:[%s8331_s3 + $0x550] sm:$0xf0]  ;;  %v5605_v49 = vld [vmem:[%s8331_s3 + $0x644] sm:$0xf]  ;;  %v342_v50 = vadd.f32 %v334_v26, %v328_v37  ;;  %v3773_v62 = vor.u32 %v5541_v44, %v3770_v45  ;;  %v364_v5 = vrot.slane %v347_v59, 7 }
  0x38   : > { %1406 = vmatpush.bf16.msrb.mxu2 %v4077_v7  ;;  %v4026_v54 = vld [vmem:[%s8331_s3 + $0x650] sm:$0xf0]  ;;  %v5637_v55 = vld [vmem:[%s8331_s3 + $0x744] sm:$0xf]  ;;  %v344_v61 = vmax.f32 %v340_v52, 0.0  ;;  %v3901_v63 = vor.u32 %v5573_v47, %v3898_v48  ;;  %v345_v7 = vmax.f32 %v341_v57, 0.0  ;;  %v4113_v52 = vor.u32 %v5628_v40, %v4112_v35 }
  0x39   : > { %1419 = vmatpush.bf16.msrb.mxu3 %v4205_v11  ;;  %v4154_v56 = vld [vmem:[%s8331_s3 + $0x750] sm:$0xf0]  ;;  %v346_v58 = vmax.f32 %v342_v50, 0.0  ;;  %v5537_v60 = vld [vmem:[%s8331_s3 + $0x424] sm:$0xf]  ;;  %v4029_v3 = vor.u32 %v5605_v49, %v4026_v54 }
  0x3a   : > { %1381 = vmatpush.bf16.msrb.mxu0 %v3805_v20  ;;  %v3754_v0 = vld [vmem:[%s8331_s3 + $0x430] sm:$0xf0]  ;;  %v5569_v1 = vld [vmem:[%s8331_s3 + $0x524] sm:$0xf]  ;;  %v4157_v8 = vor.u32 %v5637_v55, %v4154_v56  ;;  %v361_v12 = vrot.slane %v344_v61, 7  ;;  %v362_v19 = vrot.slane %v345_v7, 7 }
  0x3b   : > { %1394 = vmatpush.bf16.msrb.mxu1 %v3933_v21  ;;  %v3882_v2 = vld [vmem:[%s8331_s3 + $0x530] sm:$0xf0]  ;;  %v363_v4 = vrot.slane %v346_v58, 7  ;;  %v5601_v6 = vld [vmem:[%s8331_s3 + $0x624] sm:$0xf]  ;;  %v3757_v14 = vor.u32 %v5537_v60, %v3754_v0 }
  0x3c   : > { %1407 = vmatpush.bf16.msrb.mxu2 %v4061_v22  ;;  %v4010_v9 = vld [vmem:[%s8331_s3 + $0x630] sm:$0xf0]  ;;  %v5633_v10 = vld [vmem:[%s8331_s3 + $0x724] sm:$0xf]  ;;  %372 = vst [vmem:[#allocation2 + $0x18] sm:$0xfe] %v364_v5  ;;  %v3885_v17 = vor.u32 %v5569_v1, %v3882_v2 }
  0x3d   : > { %1420 = vmatpush.bf16.msrb.mxu3 %v4189_v30  ;;  %v4138_v11 = vld [vmem:[%s8331_s3 + $0x730] sm:$0xf0]  ;;  %371 = vst [vmem:[#allocation2 + $0x10] sm:$0xfe] %v363_v4  ;;  %v5533_v13 = vld [vmem:[%s8331_s3 + $0x404] sm:$0xf]  ;;  %v4013_v18 = vor.u32 %v5601_v6, %v4010_v9 }
  0x3e   : > { %1382 = vmatpush.bf16.msrb.mxu0 %v3789_v41  ;;  %375 = vst [vmem:[#allocation2 + $0x30] sm:$0x1] %v363_v4  ;;  %v3738_v15 = vld [vmem:[%s8331_s3 + $0x410] sm:$0xf0]  ;;  %v5565_v16 = vld [vmem:[%s8331_s3 + $0x504] sm:$0xf]  ;;  %v4141_v21 = vor.u32 %v5633_v10, %v4138_v11 }
  0x3f   : > { %1395 = vmatpush.bf16.msrb.mxu1 %v3917_v42  ;;  %v3866_v20 = vld [vmem:[%s8331_s3 + $0x510] sm:$0xf0]  ;;  %376 = vst [vmem:[#allocation2 + $0x38] sm:$0x1] %v364_v5  ;;  %v5597_v22 = vld [vmem:[%s8331_s3 + $0x604] sm:$0xf]  ;;  %v3741_v26 = vor.u32 %v5533_v13, %v3738_v15 }
  0x40   : > { %1408 = vmatpush.bf16.msrb.mxu2 %v4045_v43  ;;  %v3994_v23 = vld [vmem:[%s8331_s3 + $0x610] sm:$0xf0]  ;;  %369 = vst [vmem:[#allocation2] sm:$0xfe] %v361_v12  ;;  %v5629_v24 = vld [vmem:[%s8331_s3 + $0x704] sm:$0xf]  ;;  %v3869_v27 = vor.u32 %v5565_v16, %v3866_v20 }
  0x41   : > { %1421 = vmatpush.bf16.msrb.mxu3 %v4173_v53  ;;  %v4122_v25 = vld [vmem:[%s8331_s3 + $0x710] sm:$0xf0]  ;;  %373 = vst [vmem:[#allocation2 + $0x20] sm:$0x1] %v361_v12  ;;  %v3997_v28 = vor.u32 %v5597_v22, %v3994_v23  ;;  %v4240_v42 = vld [vmem:[%s8331_s3 + $0x7e8] sm:$0xf] }
  0x42   : > { %1383 = vmatpush.bf16.msrb.mxu0 %v3773_v62  ;;  %370 = vst [vmem:[#allocation2 + $0x8] sm:$0xfe] %v362_v19  ;;  %v4125_v30 = vor.u32 %v5629_v24, %v4122_v25  ;;  %v5660_v43 = vld [vmem:[%s8331_s3 + $0x7f4] sm:$0xf0]  ;;  %v3856_v49 = vld [vmem:[%s8331_s3 + $0x4e8] sm:$0xf] }
  0x43   : > { %1396 = vmatpush.bf16.msrb.mxu1 %v3901_v63  ;;  %374 = vst [vmem:[#allocation2 + $0x28] sm:$0x1] %v362_v19  ;;  %v516_v33 = vld [vmem:[#allocation2 + $0x18] sm:$0xfe]  ;;  %v4096_v53 = vld [vmem:[%s8331_s3 + $0x6c8] sm:$0xf]  ;;  %v4241_v61 = vor.u32 %v5660_v43, %v4240_v42 }
  0x44   : > { %1409 = vmatpush.bf16.msrb.mxu2 %v4029_v3  ;;  %v515_v29 = vld [vmem:[#allocation2 + $0x10] sm:$0xfe]  ;;  %v5564_v51 = vld [vmem:[%s8331_s3 + $0x4f4] sm:$0xf0]  ;;  %v3984_v60 = vld [vmem:[%s8331_s3 + $0x5e8] sm:$0xf] }
  0x45   : > { %1422 = vmatpush.bf16.msrb.mxu3 %v4157_v8  ;;  %v519_v31 = vld [vmem:[#allocation2 + $0x30] sm:$0x1]  ;;  %v5624_v58 = vld [vmem:[%s8331_s3 + $0x6d4] sm:$0xf0]  ;;  %v4224_v0 = vld [vmem:[%s8331_s3 + $0x7c8] sm:$0xf]  ;;  %v3857_v4 = vor.u32 %v5564_v51, %v3856_v49 }
  0x46   : > { %1384 = vmatpush.bf16.msrb.mxu0 %v3757_v14  ;;  %v523_v32 = vpack.c.bf16 %v519_v31, %v515_v29  ;;  %v520_v34 = vld [vmem:[#allocation2 + $0x38] sm:$0x1]  ;;  %v3840_v6 = vld [vmem:[%s8331_s3 + $0x4c8] sm:$0xf]  ;;  %v4097_v7 = vor.u32 %v5624_v58, %v4096_v53 }
  0x47   : > { %1397 = vmatpush.bf16.msrb.mxu1 %v3885_v17  ;;  %v524_v38 = vpack.c.bf16 %v520_v34, %v516_v33  ;;  %v513_v39 = vld [vmem:[#allocation2] sm:$0xfe]  ;;  %v5656_v1 = vld [vmem:[%s8331_s3 + $0x7d4] sm:$0xf0]  ;;  %v4080_v10 = vld [vmem:[%s8331_s3 + $0x6a8] sm:$0xf] }
  0x48   : > { %1410 = vmatpush.bf16.msrb.mxu2 %v4013_v18  ;;  %v669_v36 = vshrl.u32 %v523_v32, 16  ;;  %v671_v37 = vshll.u32 %v523_v32, 16  ;;  %v517_v41 = vld [vmem:[#allocation2 + $0x20] sm:$0x1]  ;;  %v5596_v5 = vld [vmem:[%s8331_s3 + $0x5f4] sm:$0xf0]  ;;  %v4225_v13 = vor.u32 %v5656_v1, %v4224_v0 }
  0x49   : > { %1423 = vmatpush.bf16.msrb.mxu3 %v4141_v21  ;;  %v676_v45 = vshrl.u32 %v524_v38, 16  ;;  %v678_v46 = vshll.u32 %v524_v38, 16  ;;  %v521_v47 = vpack.c.bf16 %v517_v41, %v513_v39  ;;  %v514_v48 = vld [vmem:[#allocation2 + $0x8] sm:$0xfe]  ;;  %v5560_v9 = vld [vmem:[%s8331_s3 + $0x4d4] sm:$0xf0]  ;;  %v3985_v14 = vor.u32 %v5596_v5, %v3984_v60 }
  0x4a   : > { %1385 = vmatpush.bf16.msrb.mxu0 %v3741_v26  ;;  %v673_v44 = vrot.slane %v671_v37, 1  ;;  %v518_v50 = vld [vmem:[#allocation2 + $0x28] sm:$0x1]  ;;  %v5620_v11 = vld [vmem:[%s8331_s3 + $0x6b4] sm:$0xf0]  ;;  %v3841_v18 = vor.u32 %v5560_v9, %v3840_v6 }
  0x4b   : > { %1398 = vmatpush.bf16.msrb.mxu1 %v3869_v27  ;;  %v680_v55 = vrot.slane %v678_v46, 1  ;;  %v655_v56 = vshrl.u32 %v521_v47, 16  ;;  %v657_v57 = vshll.u32 %v521_v47, 16  ;;  %v522_v59 = vpack.c.bf16 %v518_v50, %v514_v48  ;;  %v4208_v15 = vld [vmem:[%s8331_s3 + $0x7a8] sm:$0xf] }
  0x4c   : > { %1411 = vmatpush.bf16.msrb.mxu2 %v3997_v28  ;;  %v6279_v54 = vor.u32 %v673_v44, %v669_v36  ;;  %v5652_v16 = vld [vmem:[%s8331_s3 + $0x7b4] sm:$0xf0]  ;;  %v3968_v19 = vld [vmem:[%s8331_s3 + $0x5c8] sm:$0xf]  ;;  %v4081_v22 = vor.u32 %v5620_v11, %v4080_v10 }
  0x4d   : > { %1424 = vmatpush.bf16.msrb.mxu3 %v4125_v30  ;;  %v6288_v62 = vor.u32 %v680_v55, %v676_v45  ;;  %v659_v63 = vrot.slane %v657_v57, 1  ;;  %v662_v2 = vshrl.u32 %v522_v59, 16  ;;  %v664_v3 = vshll.u32 %v522_v59, 16  ;;  %v5592_v20 = vld [vmem:[%s8331_s3 + $0x5d4] sm:$0xf0] }
  0x4e   : > { %1360 = vmatmul.bf16.vlgmr.msra.gmra.mxu2 %v6279_v54  ;;  %v3824_v21 = vld [vmem:[%s8331_s3 + $0x4a8] sm:$0xf]  ;;  %v5556_v23 = vld [vmem:[%s8331_s3 + $0x4b4] sm:$0xf0]  ;;  %v4209_v26 = vor.u32 %v5652_v16, %v4208_v15  ;;  %v3969_v27 = vor.u32 %v5592_v20, %v3968_v19  ;;  %v4114_v15 = vld [vmem:[%s8331_s3 + $0x6f8] sm:$0xf0] }
  0x4f   : > { %1373 = vmatmul.bf16.vlgmr.msra.gmra.mxu3 %v6288_v62  ;;  %v6303_v8 = vor.u32 %v659_v63, %v655_v56  ;;  %v666_v12 = vrot.slane %v664_v3, 1  ;;  %v4064_v24 = vld [vmem:[%s8331_s3 + $0x688] sm:$0xf]  ;;  %v5616_v25 = vld [vmem:[%s8331_s3 + $0x694] sm:$0xf0]  ;;  %v3825_v30 = vor.u32 %v5556_v23, %v3824_v21 }
  0x50   : > { %1456 = vmatpush.bf16.msra.mxu2 %v4113_v52  ;;  %v4192_v28 = vld [vmem:[%s8331_s3 + $0x788] sm:$0xf]  ;;  %v5648_v29 = vld [vmem:[%s8331_s3 + $0x794] sm:$0xf0]  ;;  %v4065_v34 = vor.u32 %v5616_v25, %v4064_v24  ;;  %v5658_v24 = vld [vmem:[%s8331_s3 + $0x7ec] sm:$0xf] }
  0x51   : > { %1469 = vmatpush.bf16.msra.mxu3 %v4241_v61  ;;  %1334 = vmatmul.bf16.vlgmr.msra.gmra.mxu0 %v6303_v8  ;;  %v6321_v17 = vor.u32 %v666_v12, %v662_v2  ;;  %v3952_v31 = vld [vmem:[%s8331_s3 + $0x5a8] sm:$0xf]  ;;  %v5588_v32 = vld [vmem:[%s8331_s3 + $0x5b4] sm:$0xf0]  ;;  %v4193_v38 = vor.u32 %v5648_v29, %v4192_v28  ;;  %v4242_v25 = vld [vmem:[%s8331_s3 + $0x7f8] sm:$0xf0] }
  0x52   : > { %1430 = vmatpush.bf16.msra.mxu0 %v3857_v4  ;;  %v3808_v33 = vld [vmem:[%s8331_s3 + $0x488] sm:$0xf]  ;;  %v5552_v35 = vld [vmem:[%s8331_s3 + $0x494] sm:$0xf0]  ;;  %v3953_v39 = vor.u32 %v5588_v32, %v3952_v31  ;;  %v5562_v28 = vld [vmem:[%s8331_s3 + $0x4ec] sm:$0xf] }
  0x53   : > { %1347 = vmatmul.bf16.vlgmr.msra.gmra.mxu1 %v6321_v17  ;;  %v4048_v36 = vld [vmem:[%s8331_s3 + $0x668] sm:$0xf]  ;;  %v5612_v37 = vld [vmem:[%s8331_s3 + $0x674] sm:$0xf0]  ;;  %v3809_v42 = vor.u32 %v5552_v35, %v3808_v33  ;;  %v3858_v31 = vld [vmem:[%s8331_s3 + $0x4f8] sm:$0xf0] }
  0x54   : > { %1457 = vmatpush.bf16.msra.mxu2 %v4097_v7  ;;  %1443 = vmatpush.bf16.msra.mxu1 %v3985_v14  ;;  %v4176_v40 = vld [vmem:[%s8331_s3 + $0x768] sm:$0xf]  ;;  %v5644_v41 = vld [vmem:[%s8331_s3 + $0x774] sm:$0xf0]  ;;  %v4049_v46 = vor.u32 %v5612_v37, %v4048_v36  ;;  %v5626_v14 = vld [vmem:[%s8331_s3 + $0x6ec] sm:$0xf]  ;;  %v4245_v36 = vor.u32 %v5658_v24, %v4242_v25 }
  0x55   : > { %1470 = vmatpush.bf16.msra.mxu3 %v4225_v13  ;;  %v3936_v43 = vld [vmem:[%s8331_s3 + $0x588] sm:$0xf]  ;;  %v5584_v44 = vld [vmem:[%s8331_s3 + $0x594] sm:$0xf0]  ;;  %v4177_v50 = vor.u32 %v5644_v41, %v4176_v40  ;;  %v4117_v29 = vor.u32 %v5626_v14, %v4114_v15  ;;  %v5622_v32 = vld [vmem:[%s8331_s3 + $0x6cc] sm:$0xf]  ;;  %v3861_v41 = vor.u32 %v5562_v28, %v3858_v31 }
  0x56   : > { %1431 = vmatpush.bf16.msra.mxu0 %v3841_v18  ;;  %v3792_v45 = vld [vmem:[%s8331_s3 + $0x468] sm:$0xf]  ;;  %v5548_v47 = vld [vmem:[%s8331_s3 + $0x474] sm:$0xf0]  ;;  %v3937_v51 = vor.u32 %v5584_v44, %v3936_v43  ;;  %v4098_v33 = vld [vmem:[%s8331_s3 + $0x6d8] sm:$0xf0] }
  0x57   : > { %v4032_v48 = vld [vmem:[%s8331_s3 + $0x648] sm:$0xf]  ;;  %v5608_v49 = vld [vmem:[%s8331_s3 + $0x654] sm:$0xf0]  ;;  %v3793_v55 = vor.u32 %v5548_v47, %v3792_v45  ;;  %v4226_v40 = vld [vmem:[%s8331_s3 + $0x7d8] sm:$0xf0]  ;;  %v4101_v45 = vor.u32 %v5622_v32, %v4098_v33 }
  0x58   : > { %1458 = vmatpush.bf16.msra.mxu2 %v4081_v22  ;;  %1444 = vmatpush.bf16.msra.mxu1 %v3969_v27  ;;  %v4160_v52 = vld [vmem:[%s8331_s3 + $0x748] sm:$0xf]  ;;  %v5640_v53 = vld [vmem:[%s8331_s3 + $0x754] sm:$0xf0]  ;;  %v4033_v59 = vor.u32 %v5608_v49, %v4032_v48  ;;  %v3986_v43 = vld [vmem:[%s8331_s3 + $0x5f8] sm:$0xf0] }
  0x59   : > { %1471 = vmatpush.bf16.msra.mxu3 %v4209_v26  ;;  %v3920_v56 = vld [vmem:[%s8331_s3 + $0x568] sm:$0xf]  ;;  %v5580_v57 = vld [vmem:[%s8331_s3 + $0x574] sm:$0xf0]  ;;  %v4161_v0 = vor.u32 %v5640_v53, %v4160_v52  ;;  %v5558_v44 = vld [vmem:[%s8331_s3 + $0x4cc] sm:$0xf] }
  0x5a   : > { %1432 = vmatpush.bf16.msra.mxu0 %v3825_v30  ;;  %v3776_v58 = vld [vmem:[%s8331_s3 + $0x448] sm:$0xf]  ;;  %v5544_v60 = vld [vmem:[%s8331_s3 + $0x454] sm:$0xf0]  ;;  %v3921_v1 = vor.u32 %v5580_v57, %v3920_v56  ;;  %v5618_v47 = vld [vmem:[%s8331_s3 + $0x6ac] sm:$0xf] }
  0x5b   : > { %v4016_v61 = vld [vmem:[%s8331_s3 + $0x628] sm:$0xf]  ;;  %v5604_v63 = vld [vmem:[%s8331_s3 + $0x634] sm:$0xf0]  ;;  %v3777_v4 = vor.u32 %v5544_v60, %v3776_v58  ;;  %v4082_v48 = vld [vmem:[%s8331_s3 + $0x6b8] sm:$0xf0] }
  0x5c   : > { %1459 = vmatpush.bf16.msra.mxu2 %v4065_v34  ;;  %1445 = vmatpush.bf16.msra.mxu1 %v3953_v39  ;;  %v4144_v2 = vld [vmem:[%s8331_s3 + $0x728] sm:$0xf]  ;;  %v5636_v3 = vld [vmem:[%s8331_s3 + $0x734] sm:$0xf0]  ;;  %v4017_v9 = vor.u32 %v5604_v63, %v4016_v61  ;;  %v5654_v39 = vld [vmem:[%s8331_s3 + $0x7cc] sm:$0xf] }
  0x5d   : > { %1472 = vmatpush.bf16.msra.mxu3 %v4193_v38  ;;  %v3904_v5 = vld [vmem:[%s8331_s3 + $0x548] sm:$0xf]  ;;  %v5576_v6 = vld [vmem:[%s8331_s3 + $0x554] sm:$0xf0]  ;;  %v4145_v13 = vor.u32 %v5636_v3, %v4144_v2  ;;  %v5650_v52 = vld [vmem:[%s8331_s3 + $0x7ac] sm:$0xf] }
  0x5e   : > { %1412 = vmatmul.bf16.vlgmr.msrb.gmra.mxu2 %v6279_v54  ;;  %1433 = vmatpush.bf16.msra.mxu0 %v3809_v42  ;;  %v3760_v7 = vld [vmem:[%s8331_s3 + $0x428] sm:$0xf]  ;;  %v5540_v10 = vld [vmem:[%s8331_s3 + $0x434] sm:$0xf0]  ;;  %v3905_v16 = vor.u32 %v5576_v6, %v3904_v5  ;;  %v5594_v42 = vld [vmem:[%s8331_s3 + $0x5ec] sm:$0xf] }
  0x5f   : > { %1425 = vmatmul.bf16.vlgmr.msrb.gmra.mxu3 %v6288_v62  ;;  %v4000_v11 = vld [vmem:[%s8331_s3 + $0x608] sm:$0xf]  ;;  %v5600_v12 = vld [vmem:[%s8331_s3 + $0x614] sm:$0xf0]  ;;  %v3761_v21 = vor.u32 %v5540_v10, %v3760_v7  ;;  %v4210_v53 = vld [vmem:[%s8331_s3 + $0x7b8] sm:$0xf0] }
  0x60   : > { %1460 = vmatpush.bf16.msra.mxu2 %v4049_v46  ;;  %1446 = vmatpush.bf16.msra.mxu1 %v3937_v51  ;;  %v3888_v18 = vld [vmem:[%s8331_s3 + $0x528] sm:$0xf]  ;;  %v5632_v20 = vld [vmem:[%s8331_s3 + $0x714] sm:$0xf0]  ;;  %v4001_v23 = vor.u32 %v5600_v12, %v4000_v11  ;;  %v3842_v46 = vld [vmem:[%s8331_s3 + $0x4d8] sm:$0xf0]  ;;  %v3989_v51 = vor.u32 %v5594_v42, %v3986_v43 }
  0x61   : > { %1473 = vmatpush.bf16.msra.mxu3 %v4177_v50  ;;  %1386 = vmatmul.bf16.vlgmr.msrb.gmra.mxu0 %v6303_v8  ;;  %v4128_v19 = vld [vmem:[%s8331_s3 + $0x708] sm:$0xf]  ;;  %v5572_v22 = vld [vmem:[%s8331_s3 + $0x534] sm:$0xf0]  ;;  %v4229_v50 = vor.u32 %v5654_v39, %v4226_v40  ;;  %v5590_v56 = vld [vmem:[%s8331_s3 + $0x5cc] sm:$0xf] }
  0x62   : > { %1434 = vmatpush.bf16.msra.mxu0 %v3793_v55  ;;  %v3744_v26 = vld [vmem:[%s8331_s3 + $0x408] sm:$0xf]  ;;  %v5536_v27 = vld [vmem:[%s8331_s3 + $0x414] sm:$0xf0]  ;;  %v4129_v30 = vor.u32 %v5632_v20, %v4128_v19  ;;  %v3889_v34 = vor.u32 %v5572_v22, %v3888_v18  ;;  %v3845_v55 = vor.u32 %v5558_v44, %v3842_v46  ;;  %v3970_v57 = vld [vmem:[%s8331_s3 + $0x5d8] sm:$0xf0] }
  0x63   : > { %1399 = vmatmul.bf16.vlgmr.msrb.gmra.mxu1 %v6321_v17  ;;  %v3872_v35 = vld [vmem:[%s8331_s3 + $0x508] sm:$0xf]  ;;  %v3745_v37 = vor.u32 %v5536_v27, %v3744_v26  ;;  %v5568_v38 = vld [vmem:[%s8331_s3 + $0x514] sm:$0xf0]  ;;  %v5554_v58 = vld [vmem:[%s8331_s3 + $0x4ac] sm:$0xf] }
  0x64   : > { %1461 = vmatpush.bf16.msra.mxu2 %v4033_v59  ;;  %1447 = vmatpush.bf16.msra.mxu1 %v3921_v1  ;;  %v3873_v49 = vor.u32 %v5568_v38, %v3872_v35  ;;  %v4085_v59 = vor.u32 %v5618_v47, %v4082_v48  ;;  %v3826_v60 = vld [vmem:[%s8331_s3 + $0x4b8] sm:$0xf0]  ;;  %v5614_v61 = vld [vmem:[%s8331_s3 + $0x68c] sm:$0xf]  ;;  %v3973_v1 = vor.u32 %v5590_v56, %v3970_v57 }
  0x65   : > { %1474 = vmatpush.bf16.msra.mxu3 %v4161_v0  ;;  %v4066_v63 = vld [vmem:[%s8331_s3 + $0x698] sm:$0xf0]  ;;  %v4213_v0 = vor.u32 %v5650_v52, %v4210_v53  ;;  %v5646_v2 = vld [vmem:[%s8331_s3 + $0x78c] sm:$0xf]  ;;  %v5499_v52 = vld [vmem:[%s8331_s3 + $0x2ec] sm:$0xf0] }
  0x66   : > { %1435 = vmatpush.bf16.msra.mxu0 %v3777_v4  ;;  %v4194_v3 = vld [vmem:[%s8331_s3 + $0x798] sm:$0xf0]  ;;  %v3829_v4 = vor.u32 %v5554_v58, %v3826_v60  ;;  %v5586_v5 = vld [vmem:[%s8331_s3 + $0x5ac] sm:$0xf] }
  0x67   : > { %v3954_v6 = vld [vmem:[%s8331_s3 + $0x5b8] sm:$0xf0]  ;;  %v5550_v7 = vld [vmem:[%s8331_s3 + $0x48c] sm:$0xf] }
  0x68   : > { %1462 = vmatpush.bf16.msra.mxu2 %v4017_v9  ;;  %1448 = vmatpush.bf16.msra.mxu1 %v3905_v16  ;;  %v4069_v9 = vor.u32 %v5614_v61, %v4066_v63  ;;  %v3810_v10 = vld [vmem:[%s8331_s3 + $0x498] sm:$0xf0]  ;;  %v5610_v11 = vld [vmem:[%s8331_s3 + $0x66c] sm:$0xf]  ;;  %v3957_v14 = vor.u32 %v5586_v5, %v3954_v6  ;;  %v4744_v61 = vld [vmem:[%s8331_s3 + $0x3e0] sm:$0xf] }
  0x69   : > { %1475 = vmatpush.bf16.msra.mxu3 %v4145_v13  ;;  %v4050_v12 = vld [vmem:[%s8331_s3 + $0x678] sm:$0xf0]  ;;  %v4197_v13 = vor.u32 %v5646_v2, %v4194_v3  ;;  %v5642_v15 = vld [vmem:[%s8331_s3 + $0x76c] sm:$0xf]  ;;  %v3813_v18 = vor.u32 %v5550_v7, %v3810_v10  ;;  %v5531_v63 = vld [vmem:[%s8331_s3 + $0x3ec] sm:$0xf0] }
  0x6a   : > { %1436 = vmatpush.bf16.msra.mxu0 %v3761_v21  ;;  %v4178_v16 = vld [vmem:[%s8331_s3 + $0x778] sm:$0xf0]  ;;  %v5582_v19 = vld [vmem:[%s8331_s3 + $0x58c] sm:$0xf]  ;;  %v4053_v22 = vor.u32 %v5610_v11, %v4050_v12  ;;  %v4360_v2 = vld [vmem:[%s8331_s3 + $0xe0] sm:$0xf] }
  0x6b   : > { %v3938_v20 = vld [vmem:[%s8331_s3 + $0x598] sm:$0xf0]  ;;  %v5546_v21 = vld [vmem:[%s8331_s3 + $0x46c] sm:$0xf]  ;;  %v4181_v26 = vor.u32 %v5642_v15, %v4178_v16  ;;  %v5435_v6 = vld [vmem:[%s8331_s3 + $0xec] sm:$0xf0] }
  0x6c   : > { %1463 = vmatpush.bf16.msra.mxu2 %v4001_v23  ;;  %1449 = vmatpush.bf16.msra.mxu1 %v3889_v34  ;;  %v3794_v23 = vld [vmem:[%s8331_s3 + $0x478] sm:$0xf0]  ;;  %v5606_v24 = vld [vmem:[%s8331_s3 + $0x64c] sm:$0xf]  ;;  %v3941_v27 = vor.u32 %v5582_v19, %v3938_v20  ;;  %v4600_v7 = vld [vmem:[%s8331_s3 + $0x2c0] sm:$0xf]  ;;  %v4361_v19 = vor.u32 %v5435_v6, %v4360_v2 }
  0x6d   : > { %1476 = vmatpush.bf16.msra.mxu3 %v4129_v30  ;;  %v4034_v25 = vld [vmem:[%s8331_s3 + $0x658] sm:$0xf0]  ;;  %v5638_v28 = vld [vmem:[%s8331_s3 + $0x74c] sm:$0xf]  ;;  %v3797_v30 = vor.u32 %v5546_v21, %v3794_v23  ;;  %v4728_v15 = vld [vmem:[%s8331_s3 + $0x3c0] sm:$0xf] }
  0x6e   : > { %1437 = vmatpush.bf16.msra.mxu0 %v3745_v37  ;;  %v5578_v31 = vld [vmem:[%s8331_s3 + $0x56c] sm:$0xf]  ;;  %v3922_v32 = vld [vmem:[%s8331_s3 + $0x578] sm:$0xf0]  ;;  %v4037_v34 = vor.u32 %v5606_v24, %v4034_v25  ;;  %v5527_v16 = vld [vmem:[%s8331_s3 + $0x3cc] sm:$0xf0] }
  0x6f   : > { %1464 = vmatmul.bf16.vlgmr.msra.gmra.mxu2 %v6279_v54  ;;  %v5542_v33 = vld [vmem:[%s8331_s3 + $0x44c] sm:$0xf]  ;;  %v3778_v35 = vld [vmem:[%s8331_s3 + $0x458] sm:$0xf0]  ;;  %v3925_v39 = vor.u32 %v5578_v31, %v3922_v32  ;;  %v4488_v20 = vld [vmem:[%s8331_s3 + $0x1e0] sm:$0xf] }
  0x70   : > { %1508 = vmatpush.bf16.msrb.mxu2 %v4117_v29  ;;  %1477 = vmatmul.bf16.vlgmr.msra.gmra.mxu3 %v6288_v62  ;;  %v4162_v29 = vld [vmem:[%s8331_s3 + $0x758] sm:$0xf0]  ;;  %v5634_v40 = vld [vmem:[%s8331_s3 + $0x72c] sm:$0xf]  ;;  %v3781_v42 = vor.u32 %v5542_v33, %v3778_v35  ;;  %v5467_v21 = vld [vmem:[%s8331_s3 + $0x1ec] sm:$0xf0] }
  0x71   : > { %1521 = vmatpush.bf16.msrb.mxu3 %v4245_v36  ;;  %1450 = vmatpush.bf16.msra.mxu1 %v3873_v49  ;;  %v5602_v36 = vld [vmem:[%s8331_s3 + $0x62c] sm:$0xf]  ;;  %v4018_v37 = vld [vmem:[%s8331_s3 + $0x638] sm:$0xf0]  ;;  %v4165_v38 = vor.u32 %v5638_v28, %v4162_v29  ;;  %v5431_v24 = vld [vmem:[%s8331_s3 + $0xcc] sm:$0xf0]  ;;  %v4729_v28 = vor.u32 %v5527_v16, %v4728_v15 }
  0x72   : > { %1482 = vmatpush.bf16.msrb.mxu0 %v3861_v41  ;;  %v4146_v41 = vld [vmem:[%s8331_s3 + $0x738] sm:$0xf0]  ;;  %v5574_v43 = vld [vmem:[%s8331_s3 + $0x54c] sm:$0xf]  ;;  %v4021_v46 = vor.u32 %v5602_v36, %v4018_v37  ;;  %v4584_v25 = vld [vmem:[%s8331_s3 + $0x2a0] sm:$0xf] }
  0x73   : > { %1438 = vmatmul.bf16.vlgmr.msra.gmra.mxu0 %v6303_v8  ;;  %v3906_v44 = vld [vmem:[%s8331_s3 + $0x558] sm:$0xf0]  ;;  %v5598_v48 = vld [vmem:[%s8331_s3 + $0x60c] sm:$0xf]  ;;  %v5806_v29 = vmov 0.0  }
  0x74   : > { %1509 = vmatpush.bf16.msrb.mxu2 %v4101_v45  ;;  %1451 = vmatmul.bf16.vlgmr.msra.gmra.mxu1 %v6321_v17  ;;  %v5538_v45 = vld [vmem:[%s8331_s3 + $0x42c] sm:$0xf]  ;;  %v3762_v47 = vld [vmem:[%s8331_s3 + $0x438] sm:$0xf0]  ;;  %v3909_v53 = vor.u32 %v5574_v43, %v3906_v44  ;;  %v4712_v31 = vld [vmem:[%s8331_s3 + $0x3a0] sm:$0xf] }
  0x75   : > { %1522 = vmatpush.bf16.msrb.mxu3 %v4229_v50  ;;  %1495 = vmatpush.bf16.msrb.mxu1 %v3989_v51  ;;  %v4002_v49 = vld [vmem:[%s8331_s3 + $0x618] sm:$0xf0]  ;;  %v4149_v50 = vor.u32 %v5634_v40, %v4146_v41  ;;  %v4616_v51 = vld [vmem:[%s8331_s3 + $0x2e0] sm:$0xf]  ;;  %v5630_v56 = vld [vmem:[%s8331_s3 + $0x70c] sm:$0xf]  ;;  %v3765_v58 = vor.u32 %v5538_v45, %v3762_v47 }
  0x76   : > { %1483 = vmatpush.bf16.msrb.mxu0 %v3845_v55  ;;  %v5570_v55 = vld [vmem:[%s8331_s3 + $0x52c] sm:$0xf]  ;;  %v4130_v57 = vld [vmem:[%s8331_s3 + $0x718] sm:$0xf0]  ;;  %v4005_v60 = vor.u32 %v5598_v48, %v4002_v49  ;;  %v4617_v3 = vor.u32 %v5499_v52, %v4616_v51  ;;  %v5523_v32 = vld [vmem:[%s8331_s3 + $0x3ac] sm:$0xf0] }
  0x77   : > { %v4133_v5 = vor.u32 %v5630_v56, %v4130_v57  ;;  %v5566_v11 = vld [vmem:[%s8331_s3 + $0x50c] sm:$0xf]  ;;  %v3874_v12 = vld [vmem:[%s8331_s3 + $0x518] sm:$0xf0]  ;;  %v5463_v35 = vld [vmem:[%s8331_s3 + $0x1cc] sm:$0xf0]  ;;  %v4713_v40 = vor.u32 %v5523_v32, %v4712_v31 }
  0x78   : > { %1510 = vmatpush.bf16.msrb.mxu2 %v4085_v59  ;;  %v3890_v59 = vld [vmem:[%s8331_s3 + $0x538] sm:$0xf0]  ;;  %v4328_v36 = vld [vmem:[%s8331_s3 + $0xa0] sm:$0xf]  ;;  %v5519_v43 = vld [vmem:[%s8331_s3 + $0x38c] sm:$0xf0] }
  0x79   : > { %1523 = vmatpush.bf16.msrb.mxu3 %v4213_v0  ;;  %1496 = vmatpush.bf16.msrb.mxu1 %v3973_v1  ;;  %v5534_v0 = vld [vmem:[%s8331_s3 + $0x40c] sm:$0xf]  ;;  %v3746_v1 = vld [vmem:[%s8331_s3 + $0x418] sm:$0xf0]  ;;  %v3893_v10 = vor.u32 %v5570_v55, %v3890_v59  ;;  %v4696_v41 = vld [vmem:[%s8331_s3 + $0x380] sm:$0xf] }
  0x7a   : > { %1484 = vmatpush.bf16.msrb.mxu0 %v3829_v4  ;;  %v348_v4 = vlaneseq  ;;  %v4456_v44 = vld [vmem:[%s8331_s3 + $0x1a0] sm:$0xf]  ;;  %v5459_v45 = vld [vmem:[%s8331_s3 + $0x1ac] sm:$0xf0] }
  0x7b   : > { %v4552_v48 = vld [vmem:[%s8331_s3 + $0x260] sm:$0xf]  ;;  %v5483_v49 = vld [vmem:[%s8331_s3 + $0x26c] sm:$0xf0]  ;;  %v4457_v51 = vor.u32 %v5459_v45, %v4456_v44 }
  0x7c   : > { %1511 = vmatpush.bf16.msrb.mxu2 %v4069_v9  ;;  %v5495_v9 = vld [vmem:[%s8331_s3 + $0x2cc] sm:$0xf0]  ;;  %vm6692_vm0 = vcmp.lt.s32.totalorder %v348_v4, 512  ;;  %v4680_v52 = vld [vmem:[%s8331_s3 + $0x360] sm:$0xf] }
  0x7d   : > { %1524 = vmatpush.bf16.msrb.mxu3 %v4197_v13  ;;  %1497 = vmatpush.bf16.msrb.mxu1 %v3957_v14  ;;  %v4745_v13 = vor.u32 %v5531_v63, %v4744_v61  ;;  %v3749_v14 = vor.u32 %v5534_v0, %v3746_v1  ;;  %v4601_v23 = vor.u32 %v5495_v9, %v4600_v7  ;;  %v4440_v56 = vld [vmem:[%s8331_s3 + $0x180] sm:$0xf]  ;;  %v5419_v59 = vld [vmem:[%s8331_s3 + $0x6c] sm:$0xf0] }
  0x7e   : > { %1485 = vmatpush.bf16.msrb.mxu0 %v3813_v18  ;;  %352 = vst.msk [vmem:[#allocation2] ss:$8 sm:$0xf] %vm6692_vm0, %v5806_v29  ;;  %v4296_v57 = vld [vmem:[%s8331_s3 + $0x60] sm:$0xf] }
  0x7f   : > { %355 = vst.msk [vmem:[#allocation2 + $0x21] ss:$8 sm:$0xf] %vm6692_vm0, %v5806_v29  ;;  %v5479_v61 = vld [vmem:[%s8331_s3 + $0x24c] sm:$0xf0] }
  0x80   : > { %1512 = vmatpush.bf16.msrb.mxu2 %v4053_v22  ;;  %v4344_v22 = vld [vmem:[%s8331_s3 + $0xc0] sm:$0xf]  ;;  %v5511_v2 = vld [vmem:[%s8331_s3 + $0x34c] sm:$0xf0] }
  0x81   : > { %1525 = vmatpush.bf16.msrb.mxu3 %v4181_v26  ;;  %1498 = vmatpush.bf16.msrb.mxu1 %v3941_v27  ;;  %v5491_v26 = vld [vmem:[%s8331_s3 + $0x2ac] sm:$0xf0]  ;;  %v3877_v27 = vor.u32 %v5566_v11, %v3874_v12  ;;  %v4345_v33 = vor.u32 %v5431_v24, %v4344_v22  ;;  %v4664_v1 = vld [vmem:[%s8331_s3 + $0x340] sm:$0xf] }
  0x82   : > { %1486 = vmatpush.bf16.msrb.mxu0 %v3797_v30  ;;  %v4489_v30 = vor.u32 %v5467_v21, %v4488_v20  ;;  %v4585_v37 = vor.u32 %v5491_v26, %v4584_v25  ;;  %v4424_v4 = vld [vmem:[%s8331_s3 + $0x160] sm:$0xf]  ;;  %v5415_v9 = vld [vmem:[%s8331_s3 + $0x4c] sm:$0xf0]  ;;  %v4665_v12 = vor.u32 %v5511_v2, %v4664_v1  ;;  %v5489_v1 = vld [vmem:[%s8331_s3 + $0x2a4] sm:$0xf] }
  0x83   : > { %v4280_v6 = vld [vmem:[%s8331_s3 + $0x40] sm:$0xf]  ;;  %v5475_v11 = vld [vmem:[%s8331_s3 + $0x22c] sm:$0xf0]  ;;  %v4586_v2 = vld [vmem:[%s8331_s3 + $0x2b0] sm:$0xf0] }
  0x84   : > { %1513 = vmatpush.bf16.msrb.mxu2 %v4037_v34  ;;  %v4472_v34 = vld [vmem:[%s8331_s3 + $0x1c0] sm:$0xf]  ;;  %v5507_v15 = vld [vmem:[%s8331_s3 + $0x32c] sm:$0xf0]  ;;  %v4281_v16 = vor.u32 %v5415_v9, %v4280_v6  ;;  %v5521_v9 = vld [vmem:[%s8331_s3 + $0x3a4] sm:$0xf] }
  0x85   : > { %1526 = vmatpush.bf16.msrb.mxu3 %v4165_v38  ;;  %1499 = vmatpush.bf16.msrb.mxu1 %v3925_v39  ;;  %v4568_v38 = vld [vmem:[%s8331_s3 + $0x280] sm:$0xf]  ;;  %v5487_v39 = vld [vmem:[%s8331_s3 + $0x28c] sm:$0xf0] }
  0x86   : > { %1487 = vmatpush.bf16.msrb.mxu0 %v3781_v42  ;;  %v4473_v42 = vor.u32 %v5463_v35, %v4472_v34  ;;  %v4569_v47 = vor.u32 %v5487_v39, %v4568_v38  ;;  %v5447_v20 = vld [vmem:[%s8331_s3 + $0x14c] sm:$0xf0]  ;;  %v4264_v21 = vld [vmem:[%s8331_s3 + $0x20] sm:$0xf] }
  0x87   : > { %v4504_v24 = vld [vmem:[%s8331_s3 + $0x200] sm:$0xf]  ;;  %v5471_v25 = vld [vmem:[%s8331_s3 + $0x20c] sm:$0xf0] }
  0x88   : > { %1514 = vmatpush.bf16.msrb.mxu2 %v4021_v46  ;;  %v4312_v46 = vld [vmem:[%s8331_s3 + $0x80] sm:$0xf]  ;;  %v5503_v32 = vld [vmem:[%s8331_s3 + $0x30c] sm:$0xf0]  ;;  %v4505_v35 = vor.u32 %v5471_v25, %v4504_v24  ;;  %v5517_v24 = vld [vmem:[%s8331_s3 + $0x384] sm:$0xf] }
  0x89   : > { %1527 = vmatpush.bf16.msrb.mxu3 %v4149_v50  ;;  %1500 = vmatpush.bf16.msrb.mxu1 %v3909_v53  ;;  %v4697_v50 = vor.u32 %v5519_v43, %v4696_v41  ;;  %v5515_v53 = vld [vmem:[%s8331_s3 + $0x36c] sm:$0xf0]  ;;  %v4632_v31 = vld [vmem:[%s8331_s3 + $0x300] sm:$0xf]  ;;  %v4362_v43 = vld [vmem:[%s8331_s3 + $0xf0] sm:$0xf0] }
  0x8a   : > { %1488 = vmatpush.bf16.msrb.mxu0 %v3765_v58  ;;  %v4553_v58 = vor.u32 %v5483_v49, %v4552_v48  ;;  %v4681_v63 = vor.u32 %v5515_v53, %v4680_v52  ;;  %v5443_v34 = vld [vmem:[%s8331_s3 + $0x12c] sm:$0xf0]  ;;  %v4633_v41 = vor.u32 %v5503_v32, %v4632_v31  ;;  %v4376_v45 = vld [vmem:[%s8331_s3 + $0x100] sm:$0xf]  ;;  %v4698_v25 = vld [vmem:[%s8331_s3 + $0x390] sm:$0xf0] }
  0x8b   : > { %v5407_v38 = vld [vmem:[%s8331_s3 + $0xc] sm:$0xf0]  ;;  %v5453_v32 = vld [vmem:[%s8331_s3 + $0x184] sm:$0xf] }
  0x8c   : > { %1515 = vmatpush.bf16.msrb.mxu2 %v4005_v60  ;;  %v4536_v60 = vld [vmem:[%s8331_s3 + $0x240] sm:$0xf]  ;;  %v5439_v49 = vld [vmem:[%s8331_s3 + $0x10c] sm:$0xf0] }
  0x8d   : > { %1528 = vmatpush.bf16.msrb.mxu3 %v4133_v5  ;;  %1501 = vmatpush.bf16.msrb.mxu1 %v3893_v10  ;;  %v5451_v5 = vld [vmem:[%s8331_s3 + $0x16c] sm:$0xf0]  ;;  %v4537_v7 = vor.u32 %v5479_v61, %v4536_v60  ;;  %v4520_v10 = vld [vmem:[%s8331_s3 + $0x220] sm:$0xf]  ;;  %v4377_v61 = vor.u32 %v5439_v49, %v4376_v45  ;;  %v4426_v45 = vld [vmem:[%s8331_s3 + $0x170] sm:$0xf0] }
  0x8e   : > { %1489 = vmatpush.bf16.msrb.mxu0 %v3749_v14  ;;  %v4648_v14 = vld [vmem:[%s8331_s3 + $0x320] sm:$0xf]  ;;  %v4521_v22 = vor.u32 %v5475_v11, %v4520_v10  ;;  %v4714_v10 = vld [vmem:[%s8331_s3 + $0x3b0] sm:$0xf0] }
  0x8f   : > { %1516 = vmatmul.bf16.vlgmr.msrb.gmra.mxu2 %v6279_v54  ;;  %v5427_v54 = vld [vmem:[%s8331_s3 + $0xac] sm:$0xf0]  ;;  %v4649_v26 = vor.u32 %v5507_v15, %v4648_v14  ;;  %v4589_v14 = vor.u32 %v5489_v1, %v4586_v2  ;;  %v5485_v15 = vld [vmem:[%s8331_s3 + $0x284] sm:$0xf] }
  0x90   : > { %2200 = vmatpush.bf16.msra.mxu2 %v4617_v3  ;;  %1529 = vmatmul.bf16.vlgmr.msrb.gmra.mxu3 %v6288_v62  ;;  %v4329_v62 = vor.u32 %v5427_v54, %v4328_v36  ;;  %v4297_v3 = vor.u32 %v5419_v59, %v4296_v57  ;;  %v5529_v36 = vld [vmem:[%s8331_s3 + $0x3e4] sm:$0xf]  ;;  %v4248_v54 = vld [vmem:[%s8331_s3] sm:$0xf]  ;;  %v4730_v57 = vld [vmem:[%s8331_s3 + $0x3d0] sm:$0xf0] }
  0x91   : > { %2213 = vmatpush.bf16.msra.mxu3 %v4745_v13  ;;  %1502 = vmatpush.bf16.msrb.mxu1 %v3877_v27  ;;  %v4425_v13 = vor.u32 %v5451_v5, %v4424_v4  ;;  %v5497_v27 = vld [vmem:[%s8331_s3 + $0x2e4] sm:$0xf]  ;;  %v4249_v48 = vor.u32 %v5407_v38, %v4248_v54  ;;  %v4346_v59 = vld [vmem:[%s8331_s3 + $0xd0] sm:$0xf0] }
  0x92   : > { %2174 = vmatpush.bf16.msra.mxu0 %v4361_v19  ;;  %v4408_v19 = vld [vmem:[%s8331_s3 + $0x140] sm:$0xf]  ;;  %v5461_v4 = vld [vmem:[%s8331_s3 + $0x1c4] sm:$0xf]  ;;  %v4298_v38 = vld [vmem:[%s8331_s3 + $0x70] sm:$0xf0] }
  0x93   : > { %1490 = vmatmul.bf16.vlgmr.msrb.gmra.mxu0 %v6303_v8  ;;  %v5423_v8 = vld [vmem:[%s8331_s3 + $0x8c] sm:$0xf0]  ;;  %v4409_v29 = vor.u32 %v5447_v20, %v4408_v19  ;;  %v5457_v20 = vld [vmem:[%s8331_s3 + $0x1a4] sm:$0xf] }
  0x94   : > { %2201 = vmatpush.bf16.msra.mxu2 %v4601_v23  ;;  %1503 = vmatmul.bf16.vlgmr.msrb.gmra.mxu1 %v6321_v17  ;;  %v4313_v55 = vor.u32 %v5423_v8, %v4312_v46  ;;  %v5455_v17 = vld [vmem:[%s8331_s3 + $0x18c] sm:$0xf0]  ;;  %v4602_v8 = vld [vmem:[%s8331_s3 + $0x2d0] sm:$0xf0]  ;;  %v5417_v54 = vld [vmem:[%s8331_s3 + $0x64] sm:$0xf] }
  0x95   : > { %2214 = vmatpush.bf16.msra.mxu3 %v4729_v28  ;;  %2187 = vmatpush.bf16.msra.mxu1 %v4489_v30  ;;  %v4441_v0 = vor.u32 %v5455_v17, %v4440_v56  ;;  %v5411_v23 = vld [vmem:[%s8331_s3 + $0x2c] sm:$0xf0]  ;;  %v4618_v28 = vld [vmem:[%s8331_s3 + $0x2f0] sm:$0xf0]  ;;  %v4392_v30 = vld [vmem:[%s8331_s3 + $0x120] sm:$0xf] }
  0x96   : > { %2175 = vmatpush.bf16.msra.mxu0 %v4345_v33  ;;  %v4265_v33 = vor.u32 %v5411_v23, %v4264_v21  ;;  %v4621_v39 = vor.u32 %v5497_v27, %v4618_v28  ;;  %v4393_v44 = vor.u32 %v5443_v34, %v4392_v30  ;;  %v5525_v17 = vld [vmem:[%s8331_s3 + $0x3c4] sm:$0xf]  ;;  %v4717_v21 = vor.u32 %v5521_v9, %v4714_v10  ;;  %v4458_v23 = vld [vmem:[%s8331_s3 + $0x1b0] sm:$0xf0]  ;;  %v4624_v9 = vld [vmem:[%s8331_s3 + $0x2e8] sm:$0xf] }
  0x97   : > { %v4733_v5 = vor.u32 %v5525_v17, %v4730_v57  ;;  %v4314_v27 = vld [vmem:[%s8331_s3 + $0x90] sm:$0xf0]  ;;  %v4461_v31 = vor.u32 %v5457_v20, %v4458_v23  ;;  %v5441_v2 = vld [vmem:[%s8331_s3 + $0x124] sm:$0xf]  ;;  %v5500_v10 = vld [vmem:[%s8331_s3 + $0x2f4] sm:$0xf0] }
  0x98   : > { %2202 = vmatpush.bf16.msra.mxu2 %v4585_v37  ;;  %v4746_v37 = vld [vmem:[%s8331_s3 + $0x3f0] sm:$0xf0]  ;;  %v4752_v20 = vld [vmem:[%s8331_s3 + $0x3e8] sm:$0xf]  ;;  %v5436_v23 = vld [vmem:[%s8331_s3 + $0xf4] sm:$0xf0] }
  0x99   : > { %2215 = vmatpush.bf16.msra.mxu3 %v4713_v40  ;;  %2188 = vmatpush.bf16.msra.mxu1 %v4473_v42  ;;  %v379_v40 = vld [vmem:[#allocation2 + $0x10] sm:$0xff]  ;;  %v5433_v42 = vld [vmem:[%s8331_s3 + $0xe4] sm:$0xf]  ;;  %v4749_v46 = vor.u32 %v5529_v36, %v4746_v37 }
  0x9a   : > { %2176 = vmatpush.bf16.msra.mxu0 %v4329_v62  ;;  %v380_v62 = vld [vmem:[#allocation2 + $0x18] sm:$0xff]  ;;  %v6893_v52 = vpack.c.bf16 %v379_v40, %v379_v40  ;;  %v4365_v53 = vor.u32 %v5433_v42, %v4362_v43  ;;  %v4554_v30 = vld [vmem:[%s8331_s3 + $0x270] sm:$0xf0]  ;;  %v5513_v36 = vld [vmem:[%s8331_s3 + $0x364] sm:$0xf] }
  0x9b   : > { %v6898_v56 = vpack.c.bf16 %v380_v62, %v380_v62  ;;  %v4682_v37 = vld [vmem:[%s8331_s3 + $0x370] sm:$0xf0]  ;;  %v5477_v40 = vld [vmem:[%s8331_s3 + $0x244] sm:$0xf] }
  0x9c   : > { %2203 = vmatpush.bf16.msra.mxu2 %v4569_v47  ;;  %v5493_v47 = vld [vmem:[%s8331_s3 + $0x2c4] sm:$0xf]  ;;  %v4685_v62 = vor.u32 %v5513_v36, %v4682_v37  ;;  %v4736_v36 = vld [vmem:[%s8331_s3 + $0x3c8] sm:$0xf]  ;;  %v5528_v37 = vld [vmem:[%s8331_s3 + $0x3d4] sm:$0xf0] }
  0x9d   : > { %2216 = vmatpush.bf16.msra.mxu3 %v4697_v50  ;;  %2189 = vmatpush.bf16.msra.mxu1 %v4457_v51  ;;  %v5465_v50 = vld [vmem:[%s8331_s3 + $0x1e4] sm:$0xf]  ;;  %v4605_v60 = vor.u32 %v5493_v47, %v4602_v8  ;;  %v4666_v47 = vld [vmem:[%s8331_s3 + $0x350] sm:$0xf0] }
  0x9e   : > { %2177 = vmatpush.bf16.msra.mxu0 %v4313_v55  ;;  %v377_v51 = vld [vmem:[#allocation2] sm:$0xff]  ;;  %v4490_v55 = vld [vmem:[%s8331_s3 + $0x1f0] sm:$0xf0] }
  0x9f   : > { %v5449_v43 = vld [vmem:[%s8331_s3 + $0x164] sm:$0xf] }
  0xa0   : > { %2204 = vmatpush.bf16.msra.mxu2 %v4553_v58  ;;  %v5429_v58 = vld [vmem:[%s8331_s3 + $0xc4] sm:$0xf] }
  0xa1   : > { %2217 = vmatpush.bf16.msra.mxu3 %v4681_v63  ;;  %2190 = vmatpush.bf16.msra.mxu1 %v4441_v0  ;;  %v6912_v63 = vpack.c.bf16 %v377_v51, %v377_v51  ;;  %v378_v0 = vld [vmem:[#allocation2 + $0x8] sm:$0xff]  ;;  %v4349_v6 = vor.u32 %v5429_v58, %v4346_v59  ;;  %v5413_v8 = vld [vmem:[%s8331_s3 + $0x44] sm:$0xf]  ;;  %v4522_v51 = vld [vmem:[%s8331_s3 + $0x230] sm:$0xf0] }
  0xa2   : > { %2178 = vmatpush.bf16.msra.mxu0 %v4297_v3  ;;  %v4493_v3 = vor.u32 %v5465_v50, %v4490_v55  ;;  %v6934_v11 = vpack.c.bf16 %v378_v0, %v378_v0  ;;  %v5473_v50 = vld [vmem:[%s8331_s3 + $0x224] sm:$0xf]  ;;  %v4410_v58 = vld [vmem:[%s8331_s3 + $0x150] sm:$0xf0] }
  0xa3   : > { %v5445_v55 = vld [vmem:[%s8331_s3 + $0x144] sm:$0xf]  ;;  %v4266_v0 = vld [vmem:[%s8331_s3 + $0x30] sm:$0xf0]  ;;  %v4525_v1 = vor.u32 %v5473_v50, %v4522_v51  ;;  %v4576_v51 = vld [vmem:[%s8331_s3 + $0x288] sm:$0xf] }
  0xa4   : > { %2205 = vmatpush.bf16.msra.mxu2 %v4537_v7  ;;  %v4474_v7 = vld [vmem:[%s8331_s3 + $0x1d0] sm:$0xf0]  ;;  %v5505_v59 = vld [vmem:[%s8331_s3 + $0x324] sm:$0xf] }
  0xa5   : > { %2218 = vmatpush.bf16.msra.mxu3 %v4665_v12  ;;  %2191 = vmatpush.bf16.msra.mxu1 %v4425_v13  ;;  %v5425_v12 = vld [vmem:[%s8331_s3 + $0xa4] sm:$0xf]  ;;  %v4330_v13 = vld [vmem:[%s8331_s3 + $0xb0] sm:$0xf0]  ;;  %v4477_v19 = vor.u32 %v5461_v4, %v4474_v7 }
  0xa6   : > { %2179 = vmatpush.bf16.msra.mxu0 %v4281_v16  ;;  %v4570_v16 = vld [vmem:[%s8331_s3 + $0x290] sm:$0xf0] }
  0xa7   : > { %v4573_v28 = vor.u32 %v5485_v15, %v4570_v16  ;;  %v4506_v4 = vld [vmem:[%s8331_s3 + $0x210] sm:$0xf0] }
  0xa8   : > { %2206 = vmatpush.bf16.msra.mxu2 %v4521_v22  ;;  %v4333_v22 = vor.u32 %v5425_v12, %v4330_v13  ;;  %v5405_v13 = vld [vmem:[%s8331_s3 + $0x4] sm:$0xf]  ;;  %v4634_v15 = vld [vmem:[%s8331_s3 + $0x310] sm:$0xf0] }
  0xa9   : > { %2219 = vmatpush.bf16.msra.mxu3 %v4649_v26  ;;  %2192 = vmatpush.bf16.msra.mxu1 %v4409_v29  ;;  %v5421_v26 = vld [vmem:[%s8331_s3 + $0x84] sm:$0xf]  ;;  %v4250_v16 = vld [vmem:[%s8331_s3 + $0x10] sm:$0xf0] }
  0xaa   : > { %2180 = vmatpush.bf16.msra.mxu0 %v4265_v33  ;;  %v5481_v29 = vld [vmem:[%s8331_s3 + $0x264] sm:$0xf]  ;;  %v4701_v33 = vor.u32 %v5517_v24, %v4698_v25  ;;  %v4317_v34 = vor.u32 %v5421_v26, %v4314_v27  ;;  %v4625_v24 = vor.u32 %v5500_v10, %v4624_v9  ;;  %v4608_v27 = vld [vmem:[%s8331_s3 + $0x2c8] sm:$0xf] }
  0xac   : > { %2207 = vmatpush.bf16.msra.mxu2 %v4505_v35  ;;  %v4442_v35 = vld [vmem:[%s8331_s3 + $0x190] sm:$0xf0] }
  0xad   : > { %2220 = vmatpush.bf16.msra.mxu3 %v4633_v41  ;;  %2193 = vmatpush.bf16.msra.mxu1 %v4393_v44  ;;  %v4538_v41 = vld [vmem:[%s8331_s3 + $0x250] sm:$0xf0]  ;;  %v4445_v42 = vor.u32 %v5453_v32, %v4442_v35  ;;  %v4301_v44 = vor.u32 %v5417_v54, %v4298_v38  ;;  %v4496_v32 = vld [vmem:[%s8331_s3 + $0x1e8] sm:$0xf]  ;;  %v5468_v35 = vld [vmem:[%s8331_s3 + $0x1f4] sm:$0xf0] }
  0xae   : > { %2181 = vmatpush.bf16.msra.mxu0 %v4249_v48  ;;  %v4282_v48 = vld [vmem:[%s8331_s3 + $0x50] sm:$0xf0]  ;;  %v4541_v49 = vor.u32 %v5477_v40, %v4538_v41  ;;  %v4352_v54 = vld [vmem:[%s8331_s3 + $0xc8] sm:$0xf]  ;;  %v5432_v38 = vld [vmem:[%s8331_s3 + $0xd4] sm:$0xf0] }
  0xaf   : > { %2208 = vmatmul.bf16.vlgmr.msra.gmra.mxu2 %v6893_v52  ;;  %v4285_v57 = vor.u32 %v5413_v8, %v4282_v48  ;;  %v4592_v41 = vld [vmem:[%s8331_s3 + $0x2a8] sm:$0xf]  ;;  %v5524_v8 = vld [vmem:[%s8331_s3 + $0x3b4] sm:$0xf0] }
  0xb0   : > { %2252 = vmatpush.bf16.msrb.mxu2 %v4621_v39  ;;  %2221 = vmatmul.bf16.vlgmr.msra.gmra.mxu3 %v6898_v56  ;;  %v4557_v39 = vor.u32 %v5481_v29, %v4554_v30  ;;  %v4253_v29 = vor.u32 %v5405_v13, %v4250_v16  ;;  %v5437_v30 = vld [vmem:[%s8331_s3 + $0x104] sm:$0xf]  ;;  %v4336_v48 = vld [vmem:[%s8331_s3 + $0xa8] sm:$0xf]  ;;  %v5420_v16 = vld [vmem:[%s8331_s3 + $0x74] sm:$0xf0] }
  0xb1   : > { %2265 = vmatpush.bf16.msrb.mxu3 %v4749_v46  ;;  %2194 = vmatpush.bf16.msra.mxu1 %v4377_v61  ;;  %v5509_v46 = vld [vmem:[%s8331_s3 + $0x344] sm:$0xf]  ;;  %v4688_v13 = vld [vmem:[%s8331_s3 + $0x368] sm:$0xf] }
  0xb2   : > { %2226 = vmatpush.bf16.msrb.mxu0 %v4365_v53  ;;  %v4429_v53 = vor.u32 %v5449_v43, %v4426_v45  ;;  %v4669_v17 = vor.u32 %v5509_v46, %v4666_v47  ;;  %v5409_v61 = vld [vmem:[%s8331_s3 + $0x24] sm:$0xf]  ;;  %v4497_v43 = vor.u32 %v5468_v35, %v4496_v32  ;;  %v4353_v45 = vor.u32 %v5432_v38, %v4352_v54  ;;  %v5464_v46 = vld [vmem:[%s8331_s3 + $0x1d4] sm:$0xf0]  ;;  %v4720_v47 = vld [vmem:[%s8331_s3 + $0x3a8] sm:$0xf] }
  0xb3   : > { %2182 = vmatmul.bf16.vlgmr.msra.gmra.mxu0 %v6912_v63  ;;  %v4269_v12 = vor.u32 %v5409_v61, %v4266_v0  ;;  %v5520_v61 = vld [vmem:[%s8331_s3 + $0x394] sm:$0xf0]  ;;  %v4320_v0 = vld [vmem:[%s8331_s3 + $0x88] sm:$0xf] }
  0xb4   : > { %2253 = vmatpush.bf16.msrb.mxu2 %v4605_v60  ;;  %2195 = vmatmul.bf16.vlgmr.msra.gmra.mxu1 %v6934_v11  ;;  %v4650_v60 = vld [vmem:[%s8331_s3 + $0x330] sm:$0xf0]  ;;  %v5512_v32 = vld [vmem:[%s8331_s3 + $0x354] sm:$0xf0] }
  0xb5   : > { %2239 = vmatpush.bf16.msrb.mxu1 %v4493_v3  ;;  %2266 = vmatpush.bf16.msrb.mxu3 %v4733_v5  ;;  %v5469_v3 = vld [vmem:[%s8331_s3 + $0x204] sm:$0xf]  ;;  %v4413_v5 = vor.u32 %v5445_v55, %v4410_v58  ;;  %v4653_v7 = vor.u32 %v5505_v59, %v4650_v60  ;;  %v5460_v59 = vld [vmem:[%s8331_s3 + $0x1b4] sm:$0xf0]  ;;  %v4704_v60 = vld [vmem:[%s8331_s3 + $0x388] sm:$0xf] }
  0xb6   : > { %2227 = vmatpush.bf16.msrb.mxu0 %v4349_v6  ;;  %v4394_v6 = vld [vmem:[%s8331_s3 + $0x130] sm:$0xf0]  ;;  %v5476_v54 = vld [vmem:[%s8331_s3 + $0x234] sm:$0xf0] }
  0xb7   : > { %v4397_v25 = vor.u32 %v5441_v2, %v4394_v6  ;;  %v4448_v6 = vld [vmem:[%s8331_s3 + $0x188] sm:$0xf] }
  0xb8   : > { %2254 = vmatpush.bf16.msrb.mxu2 %v4589_v14  ;;  %v5501_v14 = vld [vmem:[%s8331_s3 + $0x304] sm:$0xf] }
  0xb9   : > { %2240 = vmatpush.bf16.msrb.mxu1 %v4477_v19  ;;  %2267 = vmatpush.bf16.msrb.mxu3 %v4717_v21  ;;  %v4509_v19 = vor.u32 %v5469_v3, %v4506_v4  ;;  %v5532_v21 = vld [vmem:[%s8331_s3 + $0x3f4] sm:$0xf0]  ;;  %v4637_v26 = vor.u32 %v5501_v14, %v4634_v15  ;;  %v4560_v3 = vld [vmem:[%s8331_s3 + $0x268] sm:$0xf] }
  0xba   : > { %2228 = vmatpush.bf16.msrb.mxu0 %v4333_v22  ;;  %v4368_v22 = vld [vmem:[%s8331_s3 + $0xe8] sm:$0xf]  ;;  %v5484_v4 = vld [vmem:[%s8331_s3 + $0x274] sm:$0xf0] }
  0xbb   : > { %v5516_v14 = vld [vmem:[%s8331_s3 + $0x374] sm:$0xf0]  ;;  %v4304_v15 = vld [vmem:[%s8331_s3 + $0x68] sm:$0xf] }
  0xbc   : > { %2255 = vmatpush.bf16.msrb.mxu2 %v4573_v28  ;;  %v5496_v28 = vld [vmem:[%s8331_s3 + $0x2d4] sm:$0xf0] }
  0xbd   : > { %2241 = vmatpush.bf16.msrb.mxu1 %v4461_v31  ;;  %2268 = vmatpush.bf16.msrb.mxu3 %v4701_v33  ;;  %v4378_v31 = vld [vmem:[%s8331_s3 + $0x110] sm:$0xf0]  ;;  %v4753_v33 = vor.u32 %v5532_v21, %v4752_v20  ;;  %v4544_v21 = vld [vmem:[%s8331_s3 + $0x248] sm:$0xf] }
  0xbe   : > { %2229 = vmatpush.bf16.msrb.mxu0 %v4317_v34  ;;  %v4369_v34 = vor.u32 %v5436_v23, %v4368_v22  ;;  %v4381_v40 = vor.u32 %v5437_v30, %v4378_v31  ;;  %v5480_v22 = vld [vmem:[%s8331_s3 + $0x254] sm:$0xf0]  ;;  %v4672_v31 = vld [vmem:[%s8331_s3 + $0x348] sm:$0xf] }
  0xbf   : > { %v5452_v30 = vld [vmem:[%s8331_s3 + $0x174] sm:$0xf0]  ;;  %v4545_v35 = vor.u32 %v5480_v22, %v4544_v21  ;;  %v5466_v21 = vld [vmem:[%s8331_s3 + $0x1ec] sm:$0xf] }
  0xc0   : > { %2256 = vmatpush.bf16.msrb.mxu2 %v4557_v39  ;;  %v4609_v39 = vor.u32 %v5496_v28, %v4608_v27 }
  0xc1   : > { %2242 = vmatpush.bf16.msrb.mxu1 %v4445_v42  ;;  %2269 = vmatpush.bf16.msrb.mxu3 %v4685_v62  ;;  %v5492_v42 = vld [vmem:[%s8331_s3 + $0x2b4] sm:$0xf0]  ;;  %v4480_v62 = vld [vmem:[%s8331_s3 + $0x1c8] sm:$0xf] }
  0xc2   : > { %2230 = vmatpush.bf16.msrb.mxu0 %v4301_v44  ;;  %v4737_v44 = vor.u32 %v5528_v37, %v4736_v36  ;;  %v4593_v50 = vor.u32 %v5492_v42, %v4592_v41  ;;  %v4481_v55 = vor.u32 %v5464_v46, %v4480_v62  ;;  %v4528_v37 = vld [vmem:[%s8331_s3 + $0x228] sm:$0xf]  ;;  %v5448_v62 = vld [vmem:[%s8331_s3 + $0x154] sm:$0xf0] }
  0xc3   : > { %v4272_v46 = vld [vmem:[%s8331_s3 + $0x28] sm:$0xf] }
  0xc4   : > { %2257 = vmatpush.bf16.msrb.mxu2 %v4541_v49  ;;  %v5428_v49 = vld [vmem:[%s8331_s3 + $0xb4] sm:$0xf0] }
  0xc5   : > { %2243 = vmatpush.bf16.msrb.mxu1 %v4429_v53  ;;  %2270 = vmatpush.bf16.msrb.mxu3 %v4669_v17  ;;  %v5488_v53 = vld [vmem:[%s8331_s3 + $0x294] sm:$0xf0]  ;;  %v4464_v17 = vld [vmem:[%s8331_s3 + $0x1a8] sm:$0xf]  ;;  %v4337_v58 = vor.u32 %v5428_v49, %v4336_v48 }
  0xc6   : > { %2231 = vmatpush.bf16.msrb.mxu0 %v4285_v57  ;;  %v4721_v57 = vor.u32 %v5524_v8, %v4720_v47  ;;  %v4577_v2 = vor.u32 %v5488_v53, %v4576_v51  ;;  %v5412_v47 = vld [vmem:[%s8331_s3 + $0x34] sm:$0xf0]  ;;  %v4529_v8 = vor.u32 %v5476_v54, %v4528_v37  ;;  %v4400_v49 = vld [vmem:[%s8331_s3 + $0x128] sm:$0xf]  ;;  %v5462_v37 = vld [vmem:[%s8331_s3 + $0x1cc] sm:$0xf] }
  0xc7   : > { %v5472_v51 = vld [vmem:[%s8331_s3 + $0x214] sm:$0xf0] }
  0xc8   : > { %2258 = vmatpush.bf16.msrb.mxu2 %v4525_v1  ;;  %v5424_v1 = vld [vmem:[%s8331_s3 + $0x94] sm:$0xf0] }
  0xc9   : > { %2244 = vmatpush.bf16.msrb.mxu1 %v4413_v5  ;;  %2271 = vmatpush.bf16.msrb.mxu3 %v4653_v7  ;;  %v4465_v5 = vor.u32 %v5460_v59, %v4464_v17  ;;  %v4705_v7 = vor.u32 %v5520_v61, %v4704_v60  ;;  %v4321_v10 = vor.u32 %v5424_v1, %v4320_v0  ;;  %v5444_v17 = vld [vmem:[%s8331_s3 + $0x134] sm:$0xf0]  ;;  %v4626_v59 = vld [vmem:[%s8331_s3 + $0x2f8] sm:$0xf0]  ;;  %v4256_v0 = vld [vmem:[%s8331_s3 + $0x8] sm:$0xf] }
  0xca   : > { %2232 = vmatpush.bf16.msrb.mxu0 %v4269_v12  ;;  %v5456_v12 = vld [vmem:[%s8331_s3 + $0x194] sm:$0xf0]  ;;  %v4273_v61 = vor.u32 %v5412_v47, %v4272_v46  ;;  %v4640_v1 = vld [vmem:[%s8331_s3 + $0x308] sm:$0xf]  ;;  %v4338_v46 = vld [vmem:[%s8331_s3 + $0xb8] sm:$0xf0] }
  0xcc   : > { %2259 = vmatpush.bf16.msrb.mxu2 %v4509_v19  ;;  %v4561_v19 = vor.u32 %v5484_v4, %v4560_v3  ;;  %v5408_v3 = vld [vmem:[%s8331_s3 + $0x14] sm:$0xf0] }
  0xcd   : > { %2245 = vmatpush.bf16.msrb.mxu1 %v4397_v25  ;;  %2272 = vmatpush.bf16.msrb.mxu3 %v4637_v26  ;;  %v4432_v25 = vld [vmem:[%s8331_s3 + $0x168] sm:$0xf]  ;;  %v4689_v26 = vor.u32 %v5516_v14, %v4688_v13  ;;  %v5494_v14 = vld [vmem:[%s8331_s3 + $0x2cc] sm:$0xf] }
  0xce   : > { %2233 = vmatpush.bf16.msrb.mxu0 %v4253_v29  ;;  %v1335_v9 = vpop.f32.mrf.mxu0  ;;  %v4305_v29 = vor.u32 %v5420_v16, %v4304_v15  ;;  %v4433_v38 = vor.u32 %v5452_v30, %v4432_v25  ;;  %v4610_v15 = vld [vmem:[%s8331_s3 + $0x2d8] sm:$0xf0]  ;;  %v4257_v16 = vor.u32 %v5408_v3, %v4256_v0  ;;  %v5482_v3 = vld [vmem:[%s8331_s3 + $0x26c] sm:$0xf] }
  0xcf   : > { %2260 = vmatmul.bf16.vlgmr.msrb.gmra.mxu2 %v6893_v52  ;;  %v4498_v25 = vld [vmem:[%s8331_s3 + $0x1f8] sm:$0xf0]  ;;  %v4613_v30 = vor.u32 %v5494_v14, %v4610_v15  ;;  %v5418_v15 = vld [vmem:[%s8331_s3 + $0x6c] sm:$0xf] }
  0xd0   : > { %2304 = vmatpush.bf16.msra.mxu2 %v4625_v24  ;;  %2273 = vmatmul.bf16.vlgmr.msrb.gmra.mxu3 %v6898_v56  ;;  %v1348_v23 = vpop.f32.mrf.mxu1  ;;  %v4449_v24 = vor.u32 %v5456_v12, %v4448_v6  ;;  %v4754_v6 = vld [vmem:[%s8331_s3 + $0x3f8] sm:$0xf0]  ;;  %v4401_v12 = vor.u32 %v5444_v17, %v4400_v49 }
  0xd1   : > { %2317 = vmatpush.bf16.msra.mxu3 %v4753_v33  ;;  %2246 = vmatpush.bf16.msrb.mxu1 %v4381_v40  ;;  %v1361_v20 = vpop.f32.mrf.mxu2  ;;  %v1349_v27 = vadd.f32 %v1348_v23, %v1335_v9  ;;  %v4288_v33 = vld [vmem:[%s8331_s3 + $0x48] sm:$0xf]  ;;  %v4673_v40 = vor.u32 %v5512_v32, %v4672_v31  ;;  %v4370_v9 = vld [vmem:[%s8331_s3 + $0xf8] sm:$0xf0] }
  0xd2   : > { %2278 = vmatpush.bf16.msra.mxu0 %v4369_v34  ;;  %v1374_v28 = vpop.f32.mrf.mxu3  ;;  %v5416_v34 = vld [vmem:[%s8331_s3 + $0x54] sm:$0xf0]  ;;  %v4690_v14 = vld [vmem:[%s8331_s3 + $0x378] sm:$0xf0] }
  0xd3   : > { %2234 = vmatmul.bf16.vlgmr.msrb.gmra.mxu0 %v6912_v63  ;;  %v1362_v36 = vadd.f32 %v1361_v20, %v1349_v27  ;;  %v5440_v20 = vld [vmem:[%s8331_s3 + $0x114] sm:$0xf0]  ;;  %v4738_v27 = vld [vmem:[%s8331_s3 + $0x3d8] sm:$0xf0] }
  0xd4   : > { %2305 = vmatpush.bf16.msra.mxu2 %v4609_v39  ;;  %2247 = vmatmul.bf16.vlgmr.msrb.gmra.mxu1 %v6934_v11  ;;  %v4416_v39 = vld [vmem:[%s8331_s3 + $0x148] sm:$0xf] }
  0xd5   : > { %2291 = vmatpush.bf16.msra.mxu1 %v4497_v43  ;;  %2318 = vmatpush.bf16.msra.mxu3 %v4737_v44  ;;  %v7221_v41 = vadd.f32 %v1374_v28, %v1362_v36  ;;  %v4289_v43 = vor.u32 %v5416_v34, %v4288_v33  ;;  %v4656_v44 = vld [vmem:[%s8331_s3 + $0x328] sm:$0xf]  ;;  %v5430_v28 = vld [vmem:[%s8331_s3 + $0xcc] sm:$0xf]  ;;  %v4501_v36 = vor.u32 %v5466_v21, %v4498_v25  ;;  %v4546_v21 = vld [vmem:[%s8331_s3 + $0x258] sm:$0xf0] }
  0xd6   : > { %2279 = vmatpush.bf16.msra.mxu0 %v4353_v45  ;;  %v1337_v42 = vpop.f32.mrf.mxu0  ;;  %v5508_v45 = vld [vmem:[%s8331_s3 + $0x334] sm:$0xf0]  ;;  %v5490_v34 = vld [vmem:[%s8331_s3 + $0x2ac] sm:$0xf] }
  0xd7   : > { %v4482_v42 = vld [vmem:[%s8331_s3 + $0x1d8] sm:$0xf0] }
  0xd8   : > { %2306 = vmatpush.bf16.msra.mxu2 %v4593_v50  ;;  %v4512_v50 = vld [vmem:[%s8331_s3 + $0x208] sm:$0xf]  ;;  %v1350_v53 = vpop.f32.mrf.mxu1  ;;  %v4485_v49 = vor.u32 %v5462_v37, %v4482_v42  ;;  %v4418_v42 = vld [vmem:[%s8331_s3 + $0x158] sm:$0xf0] }
  0xd9   : > { %2292 = vmatpush.bf16.msra.mxu1 %v4481_v55  ;;  %2319 = vmatpush.bf16.msra.mxu3 %v4721_v57  ;;  %v1363_v48 = vpop.f32.mrf.mxu2  ;;  %v4417_v55 = vor.u32 %v5448_v62, %v4416_v39  ;;  %v4657_v57 = vor.u32 %v5508_v45, %v4656_v44  ;;  %v4513_v4 = vor.u32 %v5472_v51, %v4512_v50  ;;  %v4722_v62 = vld [vmem:[%s8331_s3 + $0x3b8] sm:$0xf0]  ;;  %v5426_v45 = vld [vmem:[%s8331_s3 + $0xac] sm:$0xf] }
  0xda   : > { %2280 = vmatpush.bf16.msra.mxu0 %v4337_v58  ;;  %v5498_v58 = vld [vmem:[%s8331_s3 + $0x2ec] sm:$0xf]  ;;  %v1376_v60 = vpop.f32.mrf.mxu3  ;;  %v4578_v48 = vld [vmem:[%s8331_s3 + $0x298] sm:$0xf0]  ;;  %v4341_v17 = vor.u32 %v5426_v45, %v4338_v46 }
  0xdb   : > { %v5458_v50 = vld [vmem:[%s8331_s3 + $0x1ac] sm:$0xf]  ;;  %v4274_v46 = vld [vmem:[%s8331_s3 + $0x38] sm:$0xf0] }
  0xdc   : > { %2307 = vmatpush.bf16.msra.mxu2 %v4577_v2  ;;  %v5504_v2 = vld [vmem:[%s8331_s3 + $0x314] sm:$0xf0]  ;;  %v5422_v60 = vld [vmem:[%s8331_s3 + $0x8c] sm:$0xf] }
  0xdd   : > { %2293 = vmatpush.bf16.msra.mxu1 %v4465_v5  ;;  %2320 = vmatpush.bf16.msra.mxu3 %v4705_v7  ;;  %v5530_v5 = vld [vmem:[%s8331_s3 + $0x3ec] sm:$0xf]  ;;  %v4641_v13 = vor.u32 %v5504_v2, %v4640_v1 }
  0xde   : > { %2281 = vmatpush.bf16.msra.mxu0 %v4321_v10  ;;  %v5434_v7 = vld [vmem:[%s8331_s3 + $0xec] sm:$0xf]  ;;  %v4629_v10 = vor.u32 %v5498_v58, %v4626_v59  ;;  %v4757_v22 = vor.u32 %v5530_v5, %v4754_v6  ;;  %v1387_v23 = vpop.f32.mrf.mxu0  ;;  %v4706_v59 = vld [vmem:[%s8331_s3 + $0x398] sm:$0xf0] }
  0xdf   : > { %v5518_v58 = vld [vmem:[%s8331_s3 + $0x38c] sm:$0xf] }
  0xe0   : > { %2308 = vmatpush.bf16.msra.mxu2 %v4561_v19  ;;  %v4384_v19 = vld [vmem:[%s8331_s3 + $0x108] sm:$0xf]  ;;  %v1400_v33 = vpop.f32.mrf.mxu1  ;;  %v5454_v6 = vld [vmem:[%s8331_s3 + $0x18c] sm:$0xf] }
  0xe1   : > { %2294 = vmatpush.bf16.msra.mxu1 %v4449_v24  ;;  %2321 = vmatpush.bf16.msra.mxu3 %v4689_v26  ;;  %v4373_v24 = vor.u32 %v5434_v7, %v4370_v9  ;;  %v5526_v26 = vld [vmem:[%s8331_s3 + $0x3cc] sm:$0xf]  ;;  %v1413_v31 = vpop.f32.mrf.mxu2  ;;  %v4385_v32 = vor.u32 %v5440_v20, %v4384_v19  ;;  %v4709_v7 = vor.u32 %v5518_v58, %v4706_v59  ;;  %v5755_v58 = vld [vmem:[%s8331_s3 + $0xaec] sm:$0xf0] }
  0xe2   : > { %2282 = vmatpush.bf16.msra.mxu0 %v4305_v29  ;;  %v4354_v29 = vld [vmem:[%s8331_s3 + $0xd8] sm:$0xf0]  ;;  %v4741_v54 = vor.u32 %v5526_v26, %v4738_v27  ;;  %v1426_v39 = vpop.f32.mrf.mxu3  ;;  %v5478_v20 = vld [vmem:[%s8331_s3 + $0x24c] sm:$0xf] }
  0xe3   : > { %v4434_v26 = vld [vmem:[%s8331_s3 + $0x178] sm:$0xf0]  ;;  %v5510_v27 = vld [vmem:[%s8331_s3 + $0x34c] sm:$0xf] }
  0xe4   : > { %2309 = vmatpush.bf16.msra.mxu2 %v4545_v35  ;;  %v4594_v35 = vld [vmem:[%s8331_s3 + $0x2b8] sm:$0xf0]  ;;  %v5410_v45 = vld [vmem:[%s8331_s3 + $0x2c] sm:$0xf] }
  0xe5   : > { %2295 = vmatpush.bf16.msra.mxu1 %v4433_v38  ;;  %2322 = vmatpush.bf16.msra.mxu3 %v4673_v40  ;;  %v1401_v38 = vadd.f32 %v1400_v33, %v1387_v23  ;;  %v4357_v40 = vor.u32 %v5430_v28, %v4354_v29  ;;  %v4597_v47 = vor.u32 %v5490_v34, %v4594_v35  ;;  %v5450_v23 = vld [vmem:[%s8331_s3 + $0x16c] sm:$0xf]  ;;  %v4674_v28 = vld [vmem:[%s8331_s3 + $0x358] sm:$0xf0] }
  0xe6   : > { %2283 = vmatpush.bf16.msra.mxu0 %v4289_v43  ;;  %v5522_v43 = vld [vmem:[%s8331_s3 + $0x3ac] sm:$0xf]  ;;  %v4530_v34 = vld [vmem:[%s8331_s3 + $0x238] sm:$0xf0]  ;;  %v4437_v37 = vor.u32 %v5450_v23, %v4434_v26  ;;  %v5128_v23 = vld [vmem:[%s8331_s3 + $0x9e0] sm:$0xf] }
  0xe7   : > { %v1414_v44 = vadd.f32 %v1413_v31, %v1401_v38  ;;  %v4725_v51 = vor.u32 %v5522_v43, %v4722_v62  ;;  %v4290_v31 = vld [vmem:[%s8331_s3 + $0x58] sm:$0xf0]  ;;  %v5474_v33 = vld [vmem:[%s8331_s3 + $0x22c] sm:$0xf]  ;;  %v4677_v38 = vor.u32 %v5510_v27, %v4674_v28  ;;  %v5723_v27 = vld [vmem:[%s8331_s3 + $0x9ec] sm:$0xf0] }
  0xe8   : > { %2310 = vmatpush.bf16.msra.mxu2 %v4529_v8  ;;  %v5486_v8 = vld [vmem:[%s8331_s3 + $0x28c] sm:$0xf]  ;;  %v1402_v2 = vpop.f32.mrf.mxu1  ;;  %v4658_v62 = vld [vmem:[%s8331_s3 + $0x338] sm:$0xf0]  ;;  %v5368_v28 = vld [vmem:[%s8331_s3 + $0xbc0] sm:$0xf] }
  0xe9   : > { %2296 = vmatpush.bf16.msra.mxu1 %v4417_v55  ;;  %2323 = vmatpush.bf16.msra.mxu3 %v4657_v57  ;;  %v7346_v53 = vadd.f32 %v1426_v39, %v1414_v44  ;;  %v1389_v55 = vpop.f32.mrf.mxu0  ;;  %v4466_v57 = vld [vmem:[%s8331_s3 + $0x1b8] sm:$0xf0]  ;;  %v4581_v0 = vor.u32 %v5486_v8, %v4578_v48  ;;  %v1415_v1 = vpop.f32.mrf.mxu2  ;;  %v5506_v43 = vld [vmem:[%s8331_s3 + $0x32c] sm:$0xf] }
  0xea   : > { %2284 = vmatpush.bf16.msra.mxu0 %v4273_v61  ;;  %v4322_v61 = vld [vmem:[%s8331_s3 + $0x98] sm:$0xf0]  ;;  %v4469_v5 = vor.u32 %v5458_v50, %v4466_v57  ;;  %v1428_v9 = vpop.f32.mrf.mxu3  ;;  %v5442_v48 = vld [vmem:[%s8331_s3 + $0x12c] sm:$0xf]  ;;  %v5256_v57 = vld [vmem:[%s8331_s3 + $0xae0] sm:$0xf] }
  0xeb   : > { %v4514_v50 = vld [vmem:[%s8331_s3 + $0x218] sm:$0xf0]  ;;  %v5691_v9 = vld [vmem:[%s8331_s3 + $0x8ec] sm:$0xf0] }
  0xec   : > { %2311 = vmatpush.bf16.msra.mxu2 %v4513_v4  ;;  %v4562_v4 = vld [vmem:[%s8331_s3 + $0x278] sm:$0xf0] }
  0xed   : > { %2297 = vmatpush.bf16.msra.mxu1 %v4401_v12  ;;  %2324 = vmatpush.bf16.msra.mxu3 %v4641_v13  ;;  %v4450_v12 = vld [vmem:[%s8331_s3 + $0x198] sm:$0xf0]  ;;  %v5514_v13 = vld [vmem:[%s8331_s3 + $0x36c] sm:$0xf]  ;;  %v4565_v19 = vor.u32 %v5482_v3, %v4562_v4 }
  0xee   : > { %2285 = vmatpush.bf16.msra.mxu0 %v4257_v16  ;;  %v4306_v16 = vld [vmem:[%s8331_s3 + $0x78] sm:$0xf0] }
  0xef   : > { %2312 = vmatmul.bf16.vlgmr.msra.gmra.mxu2 %v6893_v52  ;;  %v4309_v25 = vor.u32 %v5418_v15, %v4306_v16  ;;  %v4402_v55 = vld [vmem:[%s8331_s3 + $0x138] sm:$0xf0]  ;;  %v5240_v16 = vld [vmem:[%s8331_s3 + $0xac0] sm:$0xf] }
  0xf0   : > { %2356 = vmatpush.bf16.msrb.mxu2 %v4629_v10  ;;  %2325 = vmatmul.bf16.vlgmr.msra.gmra.mxu3 %v6898_v56  ;;  %v4325_v10 = vor.u32 %v5422_v60, %v4322_v61  ;;  %v4277_v60 = vor.u32 %v5410_v45, %v4274_v46  ;;  %v5406_v61 = vld [vmem:[%s8331_s3 + $0xc] sm:$0xf]  ;;  %v4642_v1 = vld [vmem:[%s8331_s3 + $0x318] sm:$0xf0]  ;;  %v5096_v46 = vld [vmem:[%s8331_s3 + $0x9a0] sm:$0xf] }
  0xf1   : > { %2369 = vmatpush.bf16.msrb.mxu3 %v4757_v22  ;;  %2298 = vmatpush.bf16.msra.mxu1 %v4385_v32  ;;  %v4453_v22 = vor.u32 %v5454_v6, %v4450_v12  ;;  %v1439_v29 = vpop.f32.mrf.mxu0  ;;  %v4549_v32 = vor.u32 %v5478_v20, %v4546_v21  ;;  %v1452_v35 = vpop.f32.mrf.mxu1  ;;  %v4258_v3 = vld [vmem:[%s8331_s3 + $0x18] sm:$0xf0]  ;;  %v5787_v6 = vld [vmem:[%s8331_s3 + $0xbec] sm:$0xf0]  ;;  %v5438_v21 = vld [vmem:[%s8331_s3 + $0x10c] sm:$0xf] }
  0xf2   : > { %2330 = vmatpush.bf16.msrb.mxu0 %v4373_v24  ;;  %v4693_v24 = vor.u32 %v5514_v13, %v4690_v14  ;;  %v1453_v39 = vadd.f32 %v1452_v35, %v1439_v29  ;;  %v4405_v14 = vor.u32 %v5442_v48, %v4402_v55  ;;  %v4261_v20 = vor.u32 %v5406_v61, %v4258_v3  ;;  %v5783_v29 = vld [vmem:[%s8331_s3 + $0xbcc] sm:$0xf0]  ;;  %v5336_v48 = vld [vmem:[%s8331_s3 + $0xb80] sm:$0xf] }
  0xf3   : > { %2286 = vmatmul.bf16.vlgmr.msra.gmra.mxu0 %v6912_v63  ;;  %v1478_v44 = vpop.f32.mrf.mxu3  ;;  %v5747_v35 = vld [vmem:[%s8331_s3 + $0xaac] sm:$0xf0]  ;;  %v4936_v3 = vld [vmem:[%s8331_s3 + $0x860] sm:$0xf] }
  0xf4   : > { %2357 = vmatpush.bf16.msrb.mxu2 %v4613_v30  ;;  %2299 = vmatmul.bf16.vlgmr.msra.gmra.mxu1 %v6934_v11  ;;  %v5414_v30 = vld [vmem:[%s8331_s3 + $0x4c] sm:$0xf] }
  0xf5   : > { %2343 = vmatpush.bf16.msrb.mxu1 %v4501_v36  ;;  %2370 = vmatpush.bf16.msrb.mxu3 %v4741_v54  ;;  %v1465_v36 = vpop.f32.mrf.mxu2  ;;  %v5446_v54 = vld [vmem:[%s8331_s3 + $0x14c] sm:$0xf] }
  0xf6   : > { %2331 = vmatpush.bf16.msrb.mxu0 %v4357_v40  ;;  %v4293_v40 = vor.u32 %v5414_v30, %v4290_v31  ;;  %v1466_v8 = vadd.f32 %v1465_v36, %v1453_v39  ;;  %v4984_v30 = vld [vmem:[%s8331_s3 + $0x8c0] sm:$0xf]  ;;  %v5687_v31 = vld [vmem:[%s8331_s3 + $0x8cc] sm:$0xf0]  ;;  %v5129_v36 = vor.u32 %v5723_v27, %v5128_v23 }
  0xf7   : > { %v5719_v39 = vld [vmem:[%s8331_s3 + $0x9cc] sm:$0xf0]  ;;  %v5160_v23 = vld [vmem:[%s8331_s3 + $0xa20] sm:$0xf] }
  0xf8   : > { %2358 = vmatpush.bf16.msrb.mxu2 %v4597_v47  ;;  %v4533_v47 = vor.u32 %v5474_v33, %v4530_v34  ;;  %v7454_v59 = vadd.f32 %v1478_v44, %v1466_v8  ;;  %v5224_v34 = vld [vmem:[%s8331_s3 + $0xaa0] sm:$0xf] }
  0xf9   : > { %2344 = vmatpush.bf16.msrb.mxu1 %v4485_v49  ;;  %2371 = vmatpush.bf16.msrb.mxu3 %v4725_v51  ;;  %v5470_v49 = vld [vmem:[%s8331_s3 + $0x20c] sm:$0xf]  ;;  %v4421_v51 = vor.u32 %v5446_v54, %v4418_v42  ;;  %v1441_v2 = vpop.f32.mrf.mxu0  ;;  %v1454_v12 = vpop.f32.mrf.mxu1  ;;  %v5369_v54 = vor.u32 %v5783_v29, %v5368_v28  ;;  %v5779_v42 = vld [vmem:[%s8331_s3 + $0xbac] sm:$0xf0]  ;;  %v5208_v44 = vld [vmem:[%s8331_s3 + $0xa80] sm:$0xf] }
  0xfa   : > { %2332 = vmatpush.bf16.msrb.mxu0 %v4341_v17  ;;  %v4661_v17 = vor.u32 %v5506_v43, %v4658_v62  ;;  %v4517_v4 = vor.u32 %v5470_v49, %v4514_v50  ;;  %v5683_v43 = vld [vmem:[%s8331_s3 + $0x8ac] sm:$0xf0]  ;;  %v5225_v62 = vor.u32 %v5747_v35, %v5224_v34  ;;  %v4952_v50 = vld [vmem:[%s8331_s3 + $0x880] sm:$0xf] }
  0xfb   : > { %v5775_v49 = vld [vmem:[%s8331_s3 + $0xb8c] sm:$0xf0]  ;;  %v5048_v28 = vld [vmem:[%s8331_s3 + $0x940] sm:$0xf] }
  0xfc   : > { %2359 = vmatpush.bf16.msrb.mxu2 %v4581_v0  ;;  %v5502_v0 = vld [vmem:[%s8331_s3 + $0x30c] sm:$0xf]  ;;  %v5771_v2 = vld [vmem:[%s8331_s3 + $0xb6c] sm:$0xf0]  ;;  %v5288_v34 = vld [vmem:[%s8331_s3 + $0xb20] sm:$0xf] }
  0xfd   : > { %2345 = vmatpush.bf16.msrb.mxu1 %v4469_v5  ;;  %2372 = vmatpush.bf16.msrb.mxu3 %v4709_v7  ;;  %v5384_v5 = vld [vmem:[%s8331_s3 + $0xbe0] sm:$0xf]  ;;  %v1467_v13 = vpop.f32.mrf.mxu2  ;;  %v4645_v15 = vor.u32 %v5502_v0, %v4642_v1  ;;  %v5711_v0 = vld [vmem:[%s8331_s3 + $0x98c] sm:$0xf0] }
  0xfe   : > { %2333 = vmatpush.bf16.msrb.mxu0 %v4325_v10  ;;  %v5000_v7 = vld [vmem:[%s8331_s3 + $0x8e0] sm:$0xf]  ;;  %v5257_v10 = vor.u32 %v5755_v58, %v5256_v57  ;;  %v5739_v57 = vld [vmem:[%s8331_s3 + $0xa6c] sm:$0xf0] }
  0xff   : > { %v5001_v26 = vor.u32 %v5691_v9, %v5000_v7  ;;  %v5080_v58 = vld [vmem:[%s8331_s3 + $0x980] sm:$0xf]  ;;  %v5735_v7 = vld [vmem:[%s8331_s3 + $0xa4c] sm:$0xf0] }
 0x100   : > { %2360 = vmatpush.bf16.msrb.mxu2 %v4565_v19  ;;  %v5751_v19 = vld [vmem:[%s8331_s3 + $0xacc] sm:$0xf0]  ;;  %v5320_v1 = vld [vmem:[%s8331_s3 + $0xb60] sm:$0xf]  ;;  %v5081_v9 = vor.u32 %v5711_v0, %v5080_v58 }
 0x101   : > { %2346 = vmatpush.bf16.msrb.mxu1 %v4453_v22  ;;  %2373 = vmatpush.bf16.msrb.mxu3 %v4693_v24  ;;  %v4386_v22 = vld [vmem:[%s8331_s3 + $0x118] sm:$0xf0]  ;;  %v5385_v24 = vor.u32 %v5787_v6, %v5384_v5  ;;  %v5176_v6 = vld [vmem:[%s8331_s3 + $0xa40] sm:$0xf]  ;;  %v5321_v12 = vor.u32 %v5771_v2, %v5320_v1  ;;  %v5703_v29 = vld [vmem:[%s8331_s3 + $0x94c] sm:$0xf0] }
 0x102   : > { %2334 = vmatpush.bf16.msrb.mxu0 %v4309_v25  ;;  %v1480_v25 = vpop.f32.mrf.mxu3  ;;  %v4389_v33 = vor.u32 %v5438_v21, %v4386_v22  ;;  %v5671_v21 = vld [vmem:[%s8331_s3 + $0x84c] sm:$0xf0]  ;;  %v5177_v22 = vor.u32 %v5735_v7, %v5176_v6  ;;  %v5016_v1 = vld [vmem:[%s8331_s3 + $0x900] sm:$0xf]  ;;  %v5689_v2 = vld [vmem:[%s8331_s3 + $0x8e4] sm:$0xf] }
 0x103   : > { %v5763_v35 = vld [vmem:[%s8331_s3 + $0xb2c] sm:$0xf0]  ;;  %v5749_v6 = vld [vmem:[%s8331_s3 + $0xac4] sm:$0xf] }
 0x104   : > { %2361 = vmatpush.bf16.msrb.mxu2 %v4549_v32  ;;  %v5241_v32 = vor.u32 %v5751_v19, %v5240_v16  ;;  %v5767_v16 = vld [vmem:[%s8331_s3 + $0xb4c] sm:$0xf0] }
 0x105   : > { %2347 = vmatpush.bf16.msrb.mxu1 %v4437_v37  ;;  %2374 = vmatpush.bf16.msrb.mxu3 %v4677_v38  ;;  %v5112_v37 = vld [vmem:[%s8331_s3 + $0x9c0] sm:$0xf]  ;;  %v4985_v38 = vor.u32 %v5687_v31, %v4984_v30 }
 0x106   : > { %2335 = vmatpush.bf16.msrb.mxu0 %v4293_v40  ;;  %v5352_v40 = vld [vmem:[%s8331_s3 + $0xba0] sm:$0xf]  ;;  %v5113_v45 = vor.u32 %v5719_v39, %v5112_v37  ;;  %v5667_v37 = vld [vmem:[%s8331_s3 + $0x82c] sm:$0xf0] }
 0x107   : > { %v5727_v39 = vld [vmem:[%s8331_s3 + $0xa0c] sm:$0xf0] }
 0x108   : > { %2362 = vmatpush.bf16.msrb.mxu2 %v4533_v47  ;;  %v5353_v47 = vor.u32 %v5779_v42, %v5352_v40  ;;  %v5032_v42 = vld [vmem:[%s8331_s3 + $0x920] sm:$0xf] }
 0x109   : > { %2348 = vmatpush.bf16.msrb.mxu1 %v4421_v51  ;;  %2375 = vmatpush.bf16.msrb.mxu3 %v4661_v17  ;;  %v5679_v51 = vld [vmem:[%s8331_s3 + $0x88c] sm:$0xf0]  ;;  %v5192_v17 = vld [vmem:[%s8331_s3 + $0xa60] sm:$0xf] }
 0x10a   : > { %2336 = vmatpush.bf16.msrb.mxu0 %v4277_v60  ;;  %v5337_v60 = vor.u32 %v5775_v49, %v5336_v48  ;;  %v4953_v61 = vor.u32 %v5679_v51, %v4952_v50  ;;  %v5193_v5 = vor.u32 %v5739_v57, %v5192_v17  ;;  %v2385_v48 = vld [vmem:[#allocation2 + $0x18] sm:$0xfc]  ;;  %v2389_v49 = vld [vmem:[#allocation2 + $0x38] sm:$0x3]  ;;  %v5759_v51 = vld [vmem:[%s8331_s3 + $0xb0c] sm:$0xf0] }
 0x10b   : > { %v2382_v17 = vld [vmem:[#allocation2] sm:$0xfc]  ;;  %v2386_v57 = vld [vmem:[#allocation2 + $0x20] sm:$0x3] }
 0x10c   : > { %2363 = vmatpush.bf16.msrb.mxu2 %v4517_v4  ;;  %v5675_v4 = vld [vmem:[%s8331_s3 + $0x86c] sm:$0xf0] }
 0x10d   : > { %2349 = vmatpush.bf16.msrb.mxu1 %v4405_v14  ;;  %2376 = vmatpush.bf16.msrb.mxu3 %v4645_v15  ;;  %v4937_v13 = vor.u32 %v5675_v4, %v4936_v3  ;;  %v5707_v14 = vld [vmem:[%s8331_s3 + $0x96c] sm:$0xf0]  ;;  %v5304_v15 = vld [vmem:[%s8331_s3 + $0xb40] sm:$0xf]  ;;  %v5002_v3 = vld [vmem:[%s8331_s3 + $0x8f0] sm:$0xf0] }
 0x10e   : > { %2337 = vmatpush.bf16.msrb.mxu0 %v4261_v20  ;;  %v4920_v20 = vld [vmem:[%s8331_s3 + $0x840] sm:$0xf]  ;;  %v5305_v30 = vor.u32 %v5767_v16, %v5304_v15  ;;  %v2383_v15 = vld [vmem:[#allocation2 + $0x8] sm:$0xfc]  ;;  %v2387_v16 = vld [vmem:[#allocation2 + $0x28] sm:$0x3] }
 0x10f   : > { %2364 = vmatmul.bf16.vlgmr.msrb.gmra.mxu2 %v6893_v52  ;;  %v4968_v52 = vld [vmem:[%s8331_s3 + $0x8a0] sm:$0xf] }
 0x110   : > { %3201 = vmatpush.bf16.msra.mxu2 %v5257_v10  ;;  %2377 = vmatmul.bf16.vlgmr.msrb.gmra.mxu3 %v6898_v56  ;;  %v5743_v56 = vld [vmem:[%s8331_s3 + $0xa8c] sm:$0xf0]  ;;  %v4969_v8 = vor.u32 %v5683_v43, %v4968_v52  ;;  %v5064_v10 = vld [vmem:[%s8331_s3 + $0x960] sm:$0xf]  ;;  %v1491_v19 = vpop.f32.mrf.mxu0 }
 0x111   : > { %3214 = vmatpush.bf16.msra.mxu3 %v5385_v24  ;;  %2350 = vmatpush.bf16.msrb.mxu1 %v4389_v33  ;;  %v5209_v55 = vor.u32 %v5743_v56, %v5208_v44  ;;  %v5731_v24 = vld [vmem:[%s8331_s3 + $0xa2c] sm:$0xf0]  ;;  %v1504_v25 = vpop.f32.mrf.mxu1  ;;  %v5065_v27 = vor.u32 %v5707_v14, %v5064_v10  ;;  %v4904_v33 = vld [vmem:[%s8331_s3 + $0x820] sm:$0xf]  ;;  %v2390_v14 = vpack.c.bf16 %v2386_v57, %v2382_v17  ;;  %v5338_v17 = vld [vmem:[%s8331_s3 + $0xb90] sm:$0xf0] }
 0x112   : > { %3175 = vmatpush.bf16.msra.mxu0 %v5001_v26  ;;  %v1517_v26 = vpop.f32.mrf.mxu2  ;;  %v1505_v31 = vadd.f32 %v1504_v25, %v1491_v19  ;;  %v5699_v52 = vld [vmem:[%s8331_s3 + $0x92c] sm:$0xf0]  ;;  %v5272_v43 = vld [vmem:[%s8331_s3 + $0xb00] sm:$0xf]  ;;  %v4905_v50 = vor.u32 %v5667_v37, %v4904_v33  ;;  %v5005_v25 = vor.u32 %v5689_v2, %v5002_v3  ;;  %v2391_v33 = vpack.c.bf16 %v2387_v16, %v2383_v15  ;;  %v5226_v37 = vld [vmem:[%s8331_s3 + $0xab0] sm:$0xf0] }
 0x113   : > { %2338 = vmatmul.bf16.vlgmr.msrb.gmra.mxu0 %v6912_v63  ;;  %v5715_v63 = vld [vmem:[%s8331_s3 + $0x9ac] sm:$0xf0]  ;;  %v5033_v10 = vor.u32 %v5699_v52, %v5032_v42  ;;  %v5114_v42 = vld [vmem:[%s8331_s3 + $0x9d0] sm:$0xf0]  ;;  %v5777_v52 = vld [vmem:[%s8331_s3 + $0xba4] sm:$0xf] }
 0x114   : > { %3202 = vmatpush.bf16.msra.mxu2 %v5241_v32  ;;  %2351 = vmatmul.bf16.vlgmr.msrb.gmra.mxu1 %v6934_v11  ;;  %v5097_v11 = vor.u32 %v5715_v63, %v5096_v46  ;;  %v4921_v32 = vor.u32 %v5671_v21, %v4920_v20  ;;  %v1518_v40 = vadd.f32 %v1517_v26, %v1505_v31  ;;  %v2384_v44 = vld [vmem:[#allocation2 + $0x10] sm:$0xfc]  ;;  %v2388_v56 = vld [vmem:[#allocation2 + $0x30] sm:$0x3]  ;;  %v5721_v21 = vld [vmem:[%s8331_s3 + $0x9e4] sm:$0xf] }
 0x115   : > { %3188 = vmatpush.bf16.msra.mxu1 %v5129_v36  ;;  %3215 = vmatpush.bf16.msra.mxu3 %v5369_v54  ;;  %v1530_v36 = vpop.f32.mrf.mxu3  ;;  %v5161_v54 = vor.u32 %v5731_v24, %v5160_v23  ;;  %v5289_v46 = vor.u32 %v5763_v35, %v5288_v34  ;;  %v2392_v0 = vpack.c.bf16 %v2388_v56, %v2384_v44  ;;  %v5695_v20 = vld [vmem:[%s8331_s3 + $0x90c] sm:$0xf0]  ;;  %v4986_v31 = vld [vmem:[%s8331_s3 + $0x8d0] sm:$0xf0]  ;;  %v7712_v35 = vrot.slane %v2390_v14, 1 }
 0x116   : > { %3176 = vmatpush.bf16.msra.mxu0 %v4985_v38  ;;  %v5144_v38 = vld [vmem:[%s8331_s3 + $0xa00] sm:$0xf]  ;;  %v7658_v63 = vadd.f32 %v1530_v36, %v1518_v40  ;;  %v5017_v34 = vor.u32 %v5695_v20, %v5016_v1  ;;  %v5745_v36 = vld [vmem:[%s8331_s3 + $0xaa4] sm:$0xf]  ;;  %v4970_v56 = vld [vmem:[%s8331_s3 + $0x8b0] sm:$0xf0] }
 0x117   : > { %v5145_v58 = vor.u32 %v5727_v39, %v5144_v38  ;;  %v7696_v26 = vrot.slane %v2392_v0, 1  ;;  %v5717_v38 = vld [vmem:[%s8331_s3 + $0x9c4] sm:$0xf] }
 0x118   : > { %3203 = vmatpush.bf16.msra.mxu2 %v5225_v62  ;;  %v5753_v62 = vld [vmem:[%s8331_s3 + $0xae4] sm:$0xf] }
 0x119   : > { %3189 = vmatpush.bf16.msra.mxu1 %v5113_v45  ;;  %3216 = vmatpush.bf16.msra.mxu3 %v5353_v47  ;;  %v5049_v45 = vor.u32 %v5703_v29, %v5048_v28  ;;  %v4888_v47 = vld [vmem:[%s8331_s3 + $0x800] sm:$0xf]  ;;  %v1506_v7 = vpop.f32.mrf.mxu1  ;;  %v5370_v28 = vld [vmem:[%s8331_s3 + $0xbd0] sm:$0xf0]  ;;  %v5681_v44 = vld [vmem:[%s8331_s3 + $0x8a4] sm:$0xf] }
 0x11a   : > { %3177 = vmatpush.bf16.msra.mxu0 %v4969_v8  ;;  %v5258_v8 = vld [vmem:[%s8331_s3 + $0xaf0] sm:$0xf0]  ;;  %v5677_v57 = vld [vmem:[%s8331_s3 + $0x884] sm:$0xf] }
 0x11b   : > { %v5261_v4 = vor.u32 %v5753_v62, %v5258_v8  ;;  %v7734_v62 = vrot.slane %v2391_v33, 1  ;;  %v5117_v8 = vor.u32 %v5717_v38, %v5114_v42  ;;  %v5709_v1 = vld [vmem:[%s8331_s3 + $0x984] sm:$0xf]  ;;  %v5290_v42 = vld [vmem:[%s8331_s3 + $0xb30] sm:$0xf0] }
 0x11c   : > { %3204 = vmatpush.bf16.msra.mxu2 %v5209_v55  ;;  %v1493_v55 = vpop.f32.mrf.mxu0  ;;  %v5673_v7 = vld [vmem:[%s8331_s3 + $0x864] sm:$0xf] }
 0x11d   : > { %3190 = vmatpush.bf16.msra.mxu1 %v5097_v11  ;;  %3217 = vmatpush.bf16.msra.mxu3 %v5337_v60  ;;  %v5663_v11 = vld [vmem:[%s8331_s3 + $0x80c] sm:$0xf0]  ;;  %v5785_v60 = vld [vmem:[%s8331_s3 + $0xbe4] sm:$0xf]  ;;  %v1532_v24 = vpop.f32.mrf.mxu3 }
 0x11e   : > { %3178 = vmatpush.bf16.msra.mxu0 %v4953_v61  ;;  %v5386_v61 = vld [vmem:[%s8331_s3 + $0xbf0] sm:$0xf0]  ;;  %v4889_v19 = vor.u32 %v5663_v11, %v4888_v47  ;;  %v5773_v55 = vld [vmem:[%s8331_s3 + $0xb84] sm:$0xf] }
 0x11f   : > { %v5389_v23 = vor.u32 %v5785_v60, %v5386_v61  ;;  %v5210_v47 = vld [vmem:[%s8331_s3 + $0xa90] sm:$0xf0]  ;;  %v5737_v60 = vld [vmem:[%s8331_s3 + $0xa64] sm:$0xf]  ;;  %v5341_v2 = vor.u32 %v5773_v55, %v5338_v17  ;;  %v5756_v55 = vld [vmem:[%s8331_s3 + $0xaf4] sm:$0xf0] }
 0x120   : > { %3205 = vmatpush.bf16.msra.mxu2 %v5193_v5  ;;  %v2393_v5 = vpack.c.bf16 %v2389_v49, %v2385_v48  ;;  %v5713_v48 = vld [vmem:[%s8331_s3 + $0x9a4] sm:$0xf]  ;;  %v4954_v11 = vld [vmem:[%s8331_s3 + $0x890] sm:$0xf0] }
 0x121   : > { %3191 = vmatpush.bf16.msra.mxu1 %v5081_v9  ;;  %3218 = vmatpush.bf16.msra.mxu3 %v5321_v12  ;;  %v1519_v9 = vpop.f32.mrf.mxu2  ;;  %v5273_v12 = vor.u32 %v5759_v51, %v5272_v43  ;;  %v5354_v43 = vld [vmem:[%s8331_s3 + $0xbb0] sm:$0xf0]  ;;  %v4957_v3 = vor.u32 %v5677_v57, %v4954_v11  ;;  %v5705_v16 = vld [vmem:[%s8331_s3 + $0x964] sm:$0xf] }
 0x122   : > { %3179 = vmatpush.bf16.msra.mxu0 %v4937_v13  ;;  %v5242_v13 = vld [vmem:[%s8331_s3 + $0xad0] sm:$0xf0]  ;;  %v7704_v29 = vrot.slane %v2393_v5, 1  ;;  %v5357_v49 = vor.u32 %v5777_v52, %v5354_v43  ;;  %v5769_v5 = vld [vmem:[%s8331_s3 + $0xb64] sm:$0xf] }
 0x123   : > { %v5098_v51 = vld [vmem:[%s8331_s3 + $0x9b0] sm:$0xf0]  ;;  %v5665_v43 = vld [vmem:[%s8331_s3 + $0x824] sm:$0xf] }
 0x124   : > { %3206 = vmatpush.bf16.msra.mxu2 %v5177_v22  ;;  %v5130_v22 = vld [vmem:[%s8331_s3 + $0x9f0] sm:$0xf0]  ;;  %v5101_v0 = vor.u32 %v5713_v48, %v5098_v51  ;;  %v5264_v51 = vld [vmem:[%s8331_s3 + $0xae8] sm:$0xf]  ;;  %v5661_v11 = vld [vmem:[%s8331_s3 + $0x804] sm:$0xf] }
 0x125   : > { %3192 = vmatpush.bf16.msra.mxu1 %v5065_v27  ;;  %3219 = vmatpush.bf16.msra.mxu3 %v5305_v30  ;;  %v5781_v27 = vld [vmem:[%s8331_s3 + $0xbc4] sm:$0xf]  ;;  %v5194_v61 = vld [vmem:[%s8331_s3 + $0xa70] sm:$0xf0] }
 0x126   : > { %3180 = vmatpush.bf16.msra.mxu0 %v4921_v32  ;;  %v5685_v30 = vld [vmem:[%s8331_s3 + $0x8c4] sm:$0xf]  ;;  %v5245_v32 = vor.u32 %v5749_v6, %v5242_v13  ;;  %v5373_v39 = vor.u32 %v5781_v27, %v5370_v28  ;;  %v5322_v6 = vld [vmem:[%s8331_s3 + $0xb70] sm:$0xf0] }
 0x127   : > { %v4989_v40 = vor.u32 %v5685_v30, %v4986_v31  ;;  %v4938_v9 = vld [vmem:[%s8331_s3 + $0x870] sm:$0xf0]  ;;  %v5729_v31 = vld [vmem:[%s8331_s3 + $0xa24] sm:$0xf] }
 0x128   : > { %3207 = vmatpush.bf16.msra.mxu2 %v5161_v54  ;;  %v5133_v54 = vor.u32 %v5721_v21, %v5130_v22  ;;  %v5178_v13 = vld [vmem:[%s8331_s3 + $0xa50] sm:$0xf0]  ;;  %v4941_v21 = vor.u32 %v5673_v7, %v4938_v9 }
 0x129   : > { %3193 = vmatpush.bf16.msra.mxu1 %v5049_v45  ;;  %3220 = vmatpush.bf16.msra.mxu3 %v5289_v46  ;;  %v5229_v45 = vor.u32 %v5745_v36, %v5226_v37  ;;  %v5741_v46 = vld [vmem:[%s8331_s3 + $0xa84] sm:$0xf]  ;;  %v5066_v22 = vld [vmem:[%s8331_s3 + $0x970] sm:$0xf0] }
 0x12a   : > { %3181 = vmatpush.bf16.msra.mxu0 %v4905_v50  ;;  %v4973_v50 = vor.u32 %v5681_v44, %v4970_v56  ;;  %v5306_v24 = vld [vmem:[%s8331_s3 + $0xb50] sm:$0xf0]  ;;  %v5701_v37 = vld [vmem:[%s8331_s3 + $0x944] sm:$0xf] }
 0x12b   : > { %v4906_v44 = vld [vmem:[%s8331_s3 + $0x830] sm:$0xf0] }
 0x12c   : > { %3208 = vmatpush.bf16.msra.mxu2 %v5145_v58  ;;  %v5213_v58 = vor.u32 %v5741_v46, %v5210_v47  ;;  %v5725_v46 = vld [vmem:[%s8331_s3 + $0xa04] sm:$0xf]  ;;  %v5146_v47 = vld [vmem:[%s8331_s3 + $0xa10] sm:$0xf0]  ;;  %v4909_v57 = vor.u32 %v5665_v43, %v4906_v44  ;;  %v5216_v43 = vld [vmem:[%s8331_s3 + $0xa88] sm:$0xf] }
 0x12d   : > { %3194 = vmatpush.bf16.msra.mxu1 %v5033_v10  ;;  %3221 = vmatpush.bf16.msra.mxu3 %v5273_v12  ;;  %v5197_v10 = vor.u32 %v5737_v60, %v5194_v61  ;;  %v5733_v12 = vld [vmem:[%s8331_s3 + $0xa44] sm:$0xf]  ;;  %v5274_v60 = vld [vmem:[%s8331_s3 + $0xb10] sm:$0xf0]  ;;  %v5744_v44 = vld [vmem:[%s8331_s3 + $0xa94] sm:$0xf0] }
 0x12e   : > { %3182 = vmatpush.bf16.msra.mxu0 %v4889_v19  ;;  %v5325_v19 = vor.u32 %v5769_v5, %v5322_v6  ;;  %v5181_v27 = vor.u32 %v5733_v12, %v5178_v13  ;;  %v4890_v61 = vld [vmem:[%s8331_s3 + $0x810] sm:$0xf0]  ;;  %v5265_v5 = vor.u32 %v5756_v55, %v5264_v51  ;;  %v5248_v12 = vld [vmem:[%s8331_s3 + $0xac8] sm:$0xf]  ;;  %v5752_v13 = vld [vmem:[%s8331_s3 + $0xad4] sm:$0xf0] }
 0x12f   : > { %3209 = vmatmul.bf16.vlgmr.msra.gmra.mxu2 %v7696_v26  ;;  %v4960_v51 = vld [vmem:[%s8331_s3 + $0x888] sm:$0xf]  ;;  %v5680_v55 = vld [vmem:[%s8331_s3 + $0x894] sm:$0xf0] }
 0x130   : > { %3253 = vmatpush.bf16.msrb.mxu2 %v5261_v4  ;;  %3222 = vmatmul.bf16.vlgmr.msra.gmra.mxu3 %v7704_v29  ;;  %v5082_v4 = vld [vmem:[%s8331_s3 + $0x990] sm:$0xf0]  ;;  %v2183_v14 = vpop.f32.mrf.mxu0 }
 0x131   : > { %3266 = vmatpush.bf16.msrb.mxu3 %v5389_v23  ;;  %3195 = vmatpush.bf16.msra.mxu1 %v5017_v34  ;;  %v5085_v15 = vor.u32 %v5709_v1, %v5082_v4  ;;  %v2184_v20 = vadd.f32 %v2183_v14, %v7221_v41  ;;  %v5765_v23 = vld [vmem:[%s8331_s3 + $0xb44] sm:$0xf]  ;;  %v4922_v41 = vld [vmem:[%s8331_s3 + $0x850] sm:$0xf0]  ;;  %v2196_v28 = vpop.f32.mrf.mxu1  ;;  %v5069_v34 = vor.u32 %v5705_v16, %v5066_v22  ;;  %v5392_v1 = vld [vmem:[%s8331_s3 + $0xbe8] sm:$0xf] }
 0x132   : > { %3227 = vmatpush.bf16.msrb.mxu0 %v5005_v25  ;;  %v5669_v25 = vld [vmem:[%s8331_s3 + $0x844] sm:$0xf]  ;;  %v2209_v30 = vpop.f32.mrf.mxu2  ;;  %v5692_v4 = vld [vmem:[%s8331_s3 + $0x8f4] sm:$0xf0] }
 0x133   : > { %3183 = vmatmul.bf16.vlgmr.msra.gmra.mxu0 %v7712_v35  ;;  %v2197_v33 = vadd.f32 %v2196_v28, %v2184_v20  ;;  %v2222_v36 = vpop.f32.mrf.mxu3  ;;  %v4925_v38 = vor.u32 %v5669_v25, %v4922_v41  ;;  %v5693_v16 = vld [vmem:[%s8331_s3 + $0x904] sm:$0xf]  ;;  %v5136_v20 = vld [vmem:[%s8331_s3 + $0x9e8] sm:$0xf]  ;;  %v5784_v25 = vld [vmem:[%s8331_s3 + $0xbd4] sm:$0xf0]  ;;  %v5249_v28 = vor.u32 %v5752_v13, %v5248_v12 }
 0x134   : > { %3254 = vmatpush.bf16.msrb.mxu2 %v5245_v32  ;;  %3196 = vmatmul.bf16.vlgmr.msra.gmra.mxu1 %v7734_v62  ;;  %v5162_v32 = vld [vmem:[%s8331_s3 + $0xa30] sm:$0xf0]  ;;  %v4992_v41 = vld [vmem:[%s8331_s3 + $0x8c8] sm:$0xf] }
 0x135   : > { %3240 = vmatpush.bf16.msrb.mxu1 %v5133_v54  ;;  %3267 = vmatpush.bf16.msrb.mxu3 %v5373_v39  ;;  %v5309_v54 = vor.u32 %v5765_v23, %v5306_v24  ;;  %v5050_v39 = vld [vmem:[%s8331_s3 + $0x950] sm:$0xf0]  ;;  %v2210_v52 = vadd.f32 %v2209_v30, %v2197_v33  ;;  %v5165_v56 = vor.u32 %v5729_v31, %v5162_v32  ;;  %v5724_v23 = vld [vmem:[%s8331_s3 + $0x9f4] sm:$0xf0]  ;;  %v5376_v24 = vld [vmem:[%s8331_s3 + $0xbc8] sm:$0xf] }
 0x136   : > { %3228 = vmatpush.bf16.msrb.mxu0 %v4989_v40  ;;  %v5761_v40 = vld [vmem:[%s8331_s3 + $0xb24] sm:$0xf]  ;;  %v5053_v48 = vor.u32 %v5701_v37, %v5050_v39  ;;  %v5232_v31 = vld [vmem:[%s8331_s3 + $0xaa8] sm:$0xf]  ;;  %v5748_v32 = vld [vmem:[%s8331_s3 + $0xab4] sm:$0xf0]  ;;  %v5137_v33 = vor.u32 %v5724_v23, %v5136_v20 }
 0x137   : > { %v5780_v39 = vld [vmem:[%s8331_s3 + $0xbb4] sm:$0xf0]  ;;  %v5072_v13 = vld [vmem:[%s8331_s3 + $0x968] sm:$0xf] }
 0x138   : > { %3255 = vmatpush.bf16.msrb.mxu2 %v5229_v45  ;;  %v5697_v45 = vld [vmem:[%s8331_s3 + $0x924] sm:$0xf]  ;;  %v2185_v17 = vpop.f32.mrf.mxu0  ;;  %v5312_v20 = vld [vmem:[%s8331_s3 + $0xb48] sm:$0xf] }
 0x139   : > { %3241 = vmatpush.bf16.msrb.mxu1 %v5117_v8  ;;  %3268 = vmatpush.bf16.msrb.mxu3 %v5357_v49  ;;  %v7850_v8 = vadd.f32 %v2222_v36, %v2210_v52  ;;  %v5034_v49 = vld [vmem:[%s8331_s3 + $0x930] sm:$0xf0]  ;;  %v2198_v6 = vpop.f32.mrf.mxu1  ;;  %v5377_v36 = vor.u32 %v5784_v25, %v5376_v24  ;;  %v5233_v52 = vor.u32 %v5748_v32, %v5232_v31  ;;  %v5168_v25 = vld [vmem:[%s8331_s3 + $0xa28] sm:$0xf] }
 0x13a   : > { %3229 = vmatpush.bf16.msrb.mxu0 %v4973_v50  ;;  %v5293_v50 = vor.u32 %v5761_v40, %v5290_v42  ;;  %v2211_v7 = vpop.f32.mrf.mxu2  ;;  %v5037_v9 = vor.u32 %v5697_v45, %v5034_v49  ;;  %v4976_v40 = vld [vmem:[%s8331_s3 + $0x8a8] sm:$0xf]  ;;  %v5684_v42 = vld [vmem:[%s8331_s3 + $0x8b4] sm:$0xf0]  ;;  %v5217_v17 = vor.u32 %v5744_v44, %v5216_v43 }
 0x13b   : > { %v2224_v14 = vpop.f32.mrf.mxu3  ;;  %v5104_v45 = vld [vmem:[%s8331_s3 + $0x9a8] sm:$0xf]  ;;  %v5728_v44 = vld [vmem:[%s8331_s3 + $0xa14] sm:$0xf0] }
 0x13c   : > { %3256 = vmatpush.bf16.msrb.mxu2 %v5213_v58  ;;  %v5757_v58 = vld [vmem:[%s8331_s3 + $0xb04] sm:$0xf]  ;;  %v5344_v49 = vld [vmem:[%s8331_s3 + $0xb88] sm:$0xf] }
 0x13d   : > { %3242 = vmatpush.bf16.msrb.mxu1 %v5101_v0  ;;  %3269 = vmatpush.bf16.msrb.mxu3 %v5341_v2  ;;  %v5149_v0 = vor.u32 %v5725_v46, %v5146_v47  ;;  %v5788_v2 = vld [vmem:[%s8331_s3 + $0xbf4] sm:$0xf0]  ;;  %v4977_v47 = vor.u32 %v5684_v42, %v4976_v40  ;;  %v5184_v7 = vld [vmem:[%s8331_s3 + $0xa48] sm:$0xf] }
 0x13e   : > { %3230 = vmatpush.bf16.msrb.mxu0 %v4957_v3  ;;  %v5008_v3 = vld [vmem:[%s8331_s3 + $0x8e8] sm:$0xf]  ;;  %v5668_v40 = vld [vmem:[%s8331_s3 + $0x834] sm:$0xf0] }
 0x13f   : > { %v5009_v22 = vor.u32 %v5692_v4, %v5008_v3  ;;  %v5772_v3 = vld [vmem:[%s8331_s3 + $0xb74] sm:$0xf0]  ;;  %v4944_v4 = vld [vmem:[%s8331_s3 + $0x868] sm:$0xf] }
 0x140   : > { %3257 = vmatpush.bf16.msrb.mxu2 %v5197_v10  ;;  %v5277_v10 = vor.u32 %v5757_v58, %v5274_v60  ;;  %v5088_v60 = vld [vmem:[%s8331_s3 + $0x988] sm:$0xf] }
 0x141   : > { %3243 = vmatpush.bf16.msrb.mxu1 %v5085_v15  ;;  %3270 = vmatpush.bf16.msrb.mxu3 %v5325_v19  ;;  %v4893_v15 = vor.u32 %v5661_v11, %v4890_v61  ;;  %v5018_v19 = vld [vmem:[%s8331_s3 + $0x910] sm:$0xf0]  ;;  %v5740_v11 = vld [vmem:[%s8331_s3 + $0xa74] sm:$0xf0]  ;;  %v5056_v31 = vld [vmem:[%s8331_s3 + $0x948] sm:$0xf] }
 0x142   : > { %3231 = vmatpush.bf16.msrb.mxu0 %v4941_v21  ;;  %v5393_v21 = vor.u32 %v5788_v2, %v5392_v1  ;;  %v5021_v30 = vor.u32 %v5693_v16, %v5018_v19  ;;  %v5712_v1 = vld [vmem:[%s8331_s3 + $0x994] sm:$0xf0]  ;;  %v5328_v2 = vld [vmem:[%s8331_s3 + $0xb68] sm:$0xf] }
 0x143   : > { %v5089_v12 = vor.u32 %v5712_v1, %v5088_v60  ;;  %v5329_v14 = vor.u32 %v5772_v3, %v5328_v2  ;;  %v5708_v19 = vld [vmem:[%s8331_s3 + $0x974] sm:$0xf0]  ;;  %v5152_v43 = vld [vmem:[%s8331_s3 + $0xa08] sm:$0xf]  ;;  %v5786_v60 = vld [vmem:[%s8331_s3 + $0xbec] sm:$0xf] }
 0x144   : > { %3258 = vmatpush.bf16.msrb.mxu2 %v5181_v27  ;;  %v5688_v27 = vld [vmem:[%s8331_s3 + $0x8d4] sm:$0xf0]  ;;  %v5010_v1 = vld [vmem:[%s8331_s3 + $0x8f8] sm:$0xf0] }
 0x145   : > { %3244 = vmatpush.bf16.msrb.mxu1 %v5069_v34  ;;  %3271 = vmatpush.bf16.msrb.mxu3 %v5309_v54  ;;  %v5120_v34 = vld [vmem:[%s8331_s3 + $0x9c8] sm:$0xf]  ;;  %v4993_v37 = vor.u32 %v5688_v27, %v4992_v41  ;;  %v5720_v54 = vld [vmem:[%s8331_s3 + $0x9d4] sm:$0xf0] }
 0x146   : > { %3232 = vmatpush.bf16.msrb.mxu0 %v4925_v38  ;;  %v5360_v38 = vld [vmem:[%s8331_s3 + $0xba8] sm:$0xf]  ;;  %v5732_v41 = vld [vmem:[%s8331_s3 + $0xa34] sm:$0xf0] }
 0x147   : > { %v5361_v46 = vor.u32 %v5780_v39, %v5360_v38  ;;  %v4912_v39 = vld [vmem:[%s8331_s3 + $0x828] sm:$0xf]  ;;  %v5169_v42 = vor.u32 %v5732_v41, %v5168_v25  ;;  %v5746_v41 = vld [vmem:[%s8331_s3 + $0xaac] sm:$0xf] }
 0x148   : > { %3259 = vmatpush.bf16.msrb.mxu2 %v5165_v56  ;;  %v5121_v56 = vor.u32 %v5720_v54, %v5120_v34  ;;  %v5764_v54 = vld [vmem:[%s8331_s3 + $0xb34] sm:$0xf0] }
 0x149   : > { %3245 = vmatpush.bf16.msrb.mxu1 %v5053_v48  ;;  %3272 = vmatpush.bf16.msrb.mxu3 %v5293_v50  ;;  %v5716_v48 = vld [vmem:[%s8331_s3 + $0x9b4] sm:$0xf0] }
 0x14a   : > { %3233 = vmatpush.bf16.msrb.mxu0 %v4909_v57  ;;  %v5776_v50 = vld [vmem:[%s8331_s3 + $0xb94] sm:$0xf0]  ;;  %v5200_v57 = vld [vmem:[%s8331_s3 + $0xa68] sm:$0xf]  ;;  %v5105_v58 = vor.u32 %v5716_v48, %v5104_v45  ;;  %v5754_v48 = vld [vmem:[%s8331_s3 + $0xaec] sm:$0xf] }
 0x14b   : > { %v5345_v61 = vor.u32 %v5776_v50, %v5344_v49  ;;  %v5201_v6 = vor.u32 %v5740_v11, %v5200_v57  ;;  %v5266_v49 = vld [vmem:[%s8331_s3 + $0xaf8] sm:$0xf0]  ;;  %v5760_v57 = vld [vmem:[%s8331_s3 + $0xb14] sm:$0xf0] }
 0x14c   : > { %3260 = vmatpush.bf16.msrb.mxu2 %v5149_v0  ;;  %v4961_v0 = vor.u32 %v5680_v55, %v4960_v51  ;;  %v4913_v51 = vor.u32 %v5668_v40, %v4912_v39  ;;  %v4896_v55 = vld [vmem:[%s8331_s3 + $0x808] sm:$0xf]  ;;  %v5664_v11 = vld [vmem:[%s8331_s3 + $0x814] sm:$0xf0]  ;;  %v5269_v2 = vor.u32 %v5754_v48, %v5266_v49  ;;  %v5742_v39 = vld [vmem:[%s8331_s3 + $0xa8c] sm:$0xf] }
 0x14d   : > { %3246 = vmatpush.bf16.msrb.mxu1 %v5037_v9  ;;  %3273 = vmatpush.bf16.msrb.mxu3 %v5277_v10  ;;  %v5736_v9 = vld [vmem:[%s8331_s3 + $0xa54] sm:$0xf0]  ;;  %v5218_v40 = vld [vmem:[%s8331_s3 + $0xa98] sm:$0xf0]  ;;  %v5678_v48 = vld [vmem:[%s8331_s3 + $0x88c] sm:$0xf] }
 0x14e   : > { %3234 = vmatpush.bf16.msrb.mxu0 %v4893_v15  ;;  %v5185_v23 = vor.u32 %v5736_v9, %v5184_v7  ;;  %v5250_v7 = vld [vmem:[%s8331_s3 + $0xad8] sm:$0xf0] }
 0x14f   : > { %3261 = vmatmul.bf16.vlgmr.msrb.gmra.mxu2 %v7696_v26  ;;  %v4962_v49 = vld [vmem:[%s8331_s3 + $0x898] sm:$0xf0] }
 0x150   : > { %3305 = vmatpush.bf16.msra.mxu2 %v5265_v5  ;;  %3274 = vmatmul.bf16.vlgmr.msrb.gmra.mxu3 %v7704_v29  ;;  %v5676_v5 = vld [vmem:[%s8331_s3 + $0x874] sm:$0xf0]  ;;  %v2235_v10 = vpop.f32.mrf.mxu0 }
 0x151   : > { %3318 = vmatpush.bf16.msra.mxu3 %v5393_v21  ;;  %3247 = vmatpush.bf16.msrb.mxu1 %v5021_v30  ;;  %v2236_v15 = vadd.f32 %v2235_v10, %v7346_v53  ;;  %v4945_v16 = vor.u32 %v5676_v5, %v4944_v4  ;;  %v5768_v21 = vld [vmem:[%s8331_s3 + $0xb54] sm:$0xf0]  ;;  %v2248_v24 = vpop.f32.mrf.mxu1  ;;  %v4897_v10 = vor.u32 %v5664_v11, %v4896_v55  ;;  %v5202_v55 = vld [vmem:[%s8331_s3 + $0xa78] sm:$0xf0] }
 0x152   : > { %3279 = vmatpush.bf16.msra.mxu0 %v5009_v22  ;;  %v4928_v22 = vld [vmem:[%s8331_s3 + $0x848] sm:$0xf]  ;;  %v5672_v53 = vld [vmem:[%s8331_s3 + $0x854] sm:$0xf0]  ;;  %v2261_v30 = vpop.f32.mrf.mxu2  ;;  %v5313_v32 = vor.u32 %v5768_v21, %v5312_v20  ;;  %v5138_v20 = vld [vmem:[%s8331_s3 + $0x9f8] sm:$0xf0] }
 0x153   : > { %3235 = vmatmul.bf16.vlgmr.msrb.gmra.mxu0 %v7712_v35  ;;  %v2249_v27 = vadd.f32 %v2248_v24, %v2236_v15  ;;  %v4929_v34 = vor.u32 %v5672_v53, %v4928_v22  ;;  %v5782_v21 = vld [vmem:[%s8331_s3 + $0xbcc] sm:$0xf]  ;;  %v5378_v22 = vld [vmem:[%s8331_s3 + $0xbd8] sm:$0xf0] }
 0x154   : > { %3306 = vmatpush.bf16.msra.mxu2 %v5249_v28  ;;  %3248 = vmatmul.bf16.vlgmr.msrb.gmra.mxu1 %v7734_v62  ;;  %v5073_v28 = vor.u32 %v5708_v19, %v5072_v13  ;;  %v5696_v13 = vld [vmem:[%s8331_s3 + $0x914] sm:$0xf0]  ;;  %v5686_v53 = vld [vmem:[%s8331_s3 + $0x8cc] sm:$0xf] }
 0x155   : > { %3292 = vmatpush.bf16.msra.mxu1 %v5137_v33  ;;  %3319 = vmatpush.bf16.msra.mxu3 %v5377_v36  ;;  %v2274_v33 = vpop.f32.mrf.mxu3  ;;  %v5704_v36 = vld [vmem:[%s8331_s3 + $0x954] sm:$0xf0]  ;;  %v2262_v38 = vadd.f32 %v2261_v30, %v2249_v27  ;;  %v5234_v27 = vld [vmem:[%s8331_s3 + $0xab8] sm:$0xf0]  ;;  %v5718_v30 = vld [vmem:[%s8331_s3 + $0x9cc] sm:$0xf] }
 0x156   : > { %3280 = vmatpush.bf16.msra.mxu0 %v4993_v37  ;;  %v5296_v37 = vld [vmem:[%s8331_s3 + $0xb28] sm:$0xf]  ;;  %v5057_v45 = vor.u32 %v5704_v36, %v5056_v31  ;;  %v5381_v31 = vor.u32 %v5782_v21, %v5378_v22  ;;  %v5362_v36 = vld [vmem:[%s8331_s3 + $0xbb8] sm:$0xf0]  ;;  %v5730_v22 = vld [vmem:[%s8331_s3 + $0xa2c] sm:$0xf] }
 0x158   : > { %3307 = vmatpush.bf16.msra.mxu2 %v5233_v52  ;;  %v5040_v52 = vld [vmem:[%s8331_s3 + $0x928] sm:$0xf]  ;;  %v2237_v50 = vpop.f32.mrf.mxu0 }
 0x159   : > { %3293 = vmatpush.bf16.msra.mxu1 %v5121_v56  ;;  %3320 = vmatpush.bf16.msra.mxu3 %v5361_v46  ;;  %v8049_v56 = vadd.f32 %v2274_v33, %v2262_v38  ;;  %v5700_v46 = vld [vmem:[%s8331_s3 + $0x934] sm:$0xf0]  ;;  %v2250_v3 = vpop.f32.mrf.mxu1  ;;  %v5122_v33 = vld [vmem:[%s8331_s3 + $0x9d8] sm:$0xf0]  ;;  %v5237_v38 = vor.u32 %v5746_v41, %v5234_v27  ;;  %v5221_v50 = vor.u32 %v5742_v39, %v5218_v40  ;;  %v5702_v41 = vld [vmem:[%s8331_s3 + $0x94c] sm:$0xf] }
 0x15a   : > { %3281 = vmatpush.bf16.msra.mxu0 %v4977_v47  ;;  %v5297_v47 = vor.u32 %v5764_v54, %v5296_v37  ;;  %v5041_v4 = vor.u32 %v5700_v46, %v5040_v52  ;;  %v2263_v9 = vpop.f32.mrf.mxu2  ;;  %v5682_v37 = vld [vmem:[%s8331_s3 + $0x8ac] sm:$0xf]  ;;  %v4978_v54 = vld [vmem:[%s8331_s3 + $0x8b8] sm:$0xf0] }
 0x15b   : > { %v5714_v52 = vld [vmem:[%s8331_s3 + $0x9ac] sm:$0xf]  ;;  %v5154_v39 = vld [vmem:[%s8331_s3 + $0xa18] sm:$0xf0] }
 0x15c   : > { %3308 = vmatpush.bf16.msra.mxu2 %v5217_v17  ;;  %v5280_v17 = vld [vmem:[%s8331_s3 + $0xb08] sm:$0xf]  ;;  %v5774_v46 = vld [vmem:[%s8331_s3 + $0xb8c] sm:$0xf] }
 0x15d   : > { %3294 = vmatpush.bf16.msra.mxu1 %v5105_v58  ;;  %3321 = vmatpush.bf16.msra.mxu3 %v5345_v61  ;;  %v5153_v58 = vor.u32 %v5728_v44, %v5152_v43  ;;  %v5394_v61 = vld [vmem:[%s8331_s3 + $0xbf8] sm:$0xf0]  ;;  %v5281_v5 = vor.u32 %v5760_v57, %v5280_v17  ;;  %v4981_v44 = vor.u32 %v5682_v37, %v4978_v54  ;;  %v5710_v57 = vld [vmem:[%s8331_s3 + $0x98c] sm:$0xf] }
 0x15e   : > { %3282 = vmatpush.bf16.msra.mxu0 %v4961_v0  ;;  %v5690_v0 = vld [vmem:[%s8331_s3 + $0x8ec] sm:$0xf]  ;;  %v5397_v15 = vor.u32 %v5786_v60, %v5394_v61  ;;  %v5090_v60 = vld [vmem:[%s8331_s3 + $0x998] sm:$0xf0] }
 0x15f   : > { %v5013_v19 = vor.u32 %v5690_v0, %v5010_v1  ;;  %v5770_v61 = vld [vmem:[%s8331_s3 + $0xb6c] sm:$0xf]  ;;  %v5330_v0 = vld [vmem:[%s8331_s3 + $0xb78] sm:$0xf0] }
 0x160   : > { %3309 = vmatpush.bf16.msra.mxu2 %v5201_v6  ;;  %v5750_v6 = vld [vmem:[%s8331_s3 + $0xacc] sm:$0xf]  ;;  %v4914_v37 = vld [vmem:[%s8331_s3 + $0x838] sm:$0xf0] }
 0x161   : > { %3295 = vmatpush.bf16.msra.mxu1 %v5089_v12  ;;  %3322 = vmatpush.bf16.msra.mxu3 %v5329_v14  ;;  %v5024_v12 = vld [vmem:[%s8331_s3 + $0x908] sm:$0xf]  ;;  %v5722_v14 = vld [vmem:[%s8331_s3 + $0x9ec] sm:$0xf]  ;;  %v5253_v24 = vor.u32 %v5750_v6, %v5250_v7  ;;  %v5093_v7 = vor.u32 %v5710_v57, %v5090_v60 }
 0x162   : > { %3283 = vmatpush.bf16.msra.mxu0 %v4945_v16  ;;  %v2276_v16 = vpop.f32.mrf.mxu3  ;;  %v5025_v25 = vor.u32 %v5696_v13, %v5024_v12  ;;  %v5674_v1 = vld [vmem:[%s8331_s3 + $0x86c] sm:$0xf] }
 0x163   : > { %v5706_v9 = vld [vmem:[%s8331_s3 + $0x96c] sm:$0xf]  ;;  %v5314_v16 = vld [vmem:[%s8331_s3 + $0xb58] sm:$0xf0] }
 0x164   : > { %3310 = vmatpush.bf16.msra.mxu2 %v5185_v23  ;;  %v4994_v23 = vld [vmem:[%s8331_s3 + $0x8d8] sm:$0xf0]  ;;  %v5694_v60 = vld [vmem:[%s8331_s3 + $0x90c] sm:$0xf] }
 0x165   : > { %3296 = vmatpush.bf16.msra.mxu1 %v5073_v28  ;;  %3323 = vmatpush.bf16.msra.mxu3 %v5313_v32  ;;  %v5141_v28 = vor.u32 %v5722_v14, %v5138_v20  ;;  %v4997_v32 = vor.u32 %v5686_v53, %v4994_v23  ;;  %v5074_v14 = vld [vmem:[%s8331_s3 + $0x978] sm:$0xf0] }
 0x166   : > { %3284 = vmatpush.bf16.msra.mxu0 %v4929_v34  ;;  %v5778_v34 = vld [vmem:[%s8331_s3 + $0xbac] sm:$0xf]  ;;  %v5170_v53 = vld [vmem:[%s8331_s3 + $0xa38] sm:$0xf0] }
 0x167   : > { %v5365_v43 = vor.u32 %v5778_v34, %v5362_v36  ;;  %v5666_v36 = vld [vmem:[%s8331_s3 + $0x82c] sm:$0xf]  ;;  %v5173_v54 = vor.u32 %v5730_v22, %v5170_v53  ;;  %v3401_v53 = vld [vmem:[%s8287_s22] sm:$0xff] }
 0x168   : > { %3311 = vmatpush.bf16.msra.mxu2 %v5169_v42  ;;  %v5125_v42 = vor.u32 %v5718_v30, %v5122_v33  ;;  %v5298_v33 = vld [vmem:[%s8331_s3 + $0xb38] sm:$0xf0] }
 0x169   : > { %3297 = vmatpush.bf16.msra.mxu1 %v5057_v45  ;;  %3324 = vmatpush.bf16.msra.mxu3 %v5297_v47  ;;  %v5106_v45 = vld [vmem:[%s8331_s3 + $0x9b8] sm:$0xf0] }
 0x16a   : > { %3285 = vmatpush.bf16.msra.mxu0 %v4913_v51  ;;  %v5346_v47 = vld [vmem:[%s8331_s3 + $0xb98] sm:$0xf0]  ;;  %v5738_v51 = vld [vmem:[%s8331_s3 + $0xa6c] sm:$0xf]  ;;  %v5109_v17 = vor.u32 %v5714_v52, %v5106_v45  ;;  %v4917_v45 = vor.u32 %v5666_v36, %v4914_v37 }
 0x16b   : > { %v5349_v11 = vor.u32 %v5774_v46, %v5346_v47  ;;  %v5205_v3 = vor.u32 %v5738_v51, %v5202_v55  ;;  %v5698_v52 = vld [vmem:[%s8331_s3 + $0x92c] sm:$0xf]  ;;  %v5042_v46 = vld [vmem:[%s8331_s3 + $0x938] sm:$0xf0] }
 0x16c   : > { %3312 = vmatpush.bf16.msra.mxu2 %v5153_v58  ;;  %v4965_v58 = vor.u32 %v5678_v48, %v4962_v49  ;;  %v5758_v47 = vld [vmem:[%s8331_s3 + $0xb0c] sm:$0xf]  ;;  %v5282_v48 = vld [vmem:[%s8331_s3 + $0xb18] sm:$0xf0] }
 0x16d   : > { %3298 = vmatpush.bf16.msra.mxu1 %v5041_v4  ;;  %3325 = vmatpush.bf16.msra.mxu3 %v5281_v5  ;;  %v5734_v4 = vld [vmem:[%s8331_s3 + $0xa4c] sm:$0xf]  ;;  %v5186_v5 = vld [vmem:[%s8331_s3 + $0xa58] sm:$0xf0]  ;;  %v5285_v57 = vor.u32 %v5758_v47, %v5282_v48 }
 0x16e   : > { %3286 = vmatpush.bf16.msra.mxu0 %v4897_v10  ;;  %v5333_v10 = vor.u32 %v5770_v61, %v5330_v0  ;;  %v5189_v20 = vor.u32 %v5734_v4, %v5186_v5  ;;  %v5662_v49 = vld [vmem:[%s8331_s3 + $0x80c] sm:$0xf]  ;;  %v5026_v61 = vld [vmem:[%s8331_s3 + $0x918] sm:$0xf0] }
 0x16f   : > { %3313 = vmatmul.bf16.vlgmr.msra.gmra.mxu2 %v7696_v26 }
 0x170   : > { %3357 = vmatpush.bf16.msrb.mxu2 %v5269_v2  ;;  %3326 = vmatmul.bf16.vlgmr.msra.gmra.mxu3 %v7704_v29  ;;  %v4946_v2 = vld [vmem:[%s8331_s3 + $0x878] sm:$0xf0]  ;;  %v2287_v6 = vpop.f32.mrf.mxu0 }
 0x171   : > { %3370 = vmatpush.bf16.msrb.mxu3 %v5397_v15  ;;  %3299 = vmatpush.bf16.msra.mxu1 %v5025_v25  ;;  %v2288_v12 = vadd.f32 %v2287_v6, %v7454_v59  ;;  %v4949_v13 = vor.u32 %v5674_v1, %v4946_v2  ;;  %v5766_v15 = vld [vmem:[%s8331_s3 + $0xb4c] sm:$0xf]  ;;  %v4930_v59 = vld [vmem:[%s8331_s3 + $0x858] sm:$0xf0]  ;;  %v2300_v21 = vpop.f32.mrf.mxu1  ;;  %v5029_v1 = vor.u32 %v5694_v60, %v5026_v61 }
 0x172   : > { %3331 = vmatpush.bf16.msrb.mxu0 %v5013_v19  ;;  %v5670_v19 = vld [vmem:[%s8331_s3 + $0x84c] sm:$0xf]  ;;  %v2313_v25 = vpop.f32.mrf.mxu2  ;;  %v5317_v27 = vor.u32 %v5766_v15, %v5314_v16 }
 0x173   : > { %3287 = vmatmul.bf16.vlgmr.msra.gmra.mxu0 %v7712_v35  ;;  %v2301_v23 = vadd.f32 %v2300_v21, %v2288_v12  ;;  %v4933_v30 = vor.u32 %v5670_v19, %v4930_v59 }
 0x174   : > { %3358 = vmatpush.bf16.msrb.mxu2 %v5253_v24  ;;  %3300 = vmatmul.bf16.vlgmr.msra.gmra.mxu1 %v7734_v62  ;;  %v5077_v24 = vor.u32 %v5706_v9, %v5074_v14 }
 0x175   : > { %3344 = vmatpush.bf16.msrb.mxu1 %v5141_v28  ;;  %3371 = vmatpush.bf16.msrb.mxu3 %v5381_v31  ;;  %v2326_v28 = vpop.f32.mrf.mxu3  ;;  %v5058_v31 = vld [vmem:[%s8331_s3 + $0x958] sm:$0xf0]  ;;  %v2314_v34 = vadd.f32 %v2313_v25, %v2301_v23 }
 0x176   : > { %3332 = vmatpush.bf16.msrb.mxu0 %v4997_v32  ;;  %v5762_v32 = vld [vmem:[%s8331_s3 + $0xb2c] sm:$0xf] }
 0x177   : > { %v8245_v40 = vadd.f32 %v2326_v28, %v2314_v34 }
 0x178   : > { %3359 = vmatpush.bf16.msrb.mxu2 %v5237_v38  ;;  %v5726_v38 = vld [vmem:[%s8331_s3 + $0xa0c] sm:$0xf] }
 0x179   : > { %3345 = vmatpush.bf16.msrb.mxu1 %v5125_v42  ;;  %3372 = vmatpush.bf16.msrb.mxu3 %v5365_v43  ;;  %v5061_v42 = vor.u32 %v5702_v41, %v5058_v31  ;;  %v5301_v43 = vor.u32 %v5762_v32, %v5298_v33  ;;  %v5157_v51 = vor.u32 %v5726_v38, %v5154_v39  ;;  %v2302_v55 = vpop.f32.mrf.mxu1 }
 0x17a   : > { %3333 = vmatpush.bf16.msrb.mxu0 %v4981_v44  ;;  %v2289_v44 = vpop.f32.mrf.mxu0 }
 0x17c   : > { %3360 = vmatpush.bf16.msrb.mxu2 %v5221_v50  ;;  %v4898_v50 = vld [vmem:[%s8331_s3 + $0x818] sm:$0xf0] }
 0x17d   : > { %3346 = vmatpush.bf16.msrb.mxu1 %v5109_v17  ;;  %3373 = vmatpush.bf16.msrb.mxu3 %v5349_v11  ;;  %v5045_v17 = vor.u32 %v5698_v52, %v5042_v46  ;;  %v2315_v11 = vpop.f32.mrf.mxu2  ;;  %v2328_v0 = vpop.f32.mrf.mxu3  ;;  %v3402_v52 = vld [vmem:[%s8287_s22 + $0x8] sm:$0xff] }
 0x17e   : > { %3334 = vmatpush.bf16.msrb.mxu0 %v4965_v58  ;;  %v4901_v58 = vor.u32 %v5662_v49, %v4898_v50 }
 0x180   : > { %3361 = vmatpush.bf16.msrb.mxu2 %v5205_v3 }
 0x181   : > { %3347 = vmatpush.bf16.msrb.mxu1 %v5093_v7  ;;  %3374 = vmatpush.bf16.msrb.mxu3 %v5333_v10 }
 0x182   : > { %3335 = vmatpush.bf16.msrb.mxu0 %v4949_v13 }
 0x184   : > { %3362 = vmatpush.bf16.msrb.mxu2 %v5189_v20 }
 0x185   : > { %3348 = vmatpush.bf16.msrb.mxu1 %v5077_v24  ;;  %3375 = vmatpush.bf16.msrb.mxu3 %v5317_v27 }
 0x186   : > { %3336 = vmatpush.bf16.msrb.mxu0 %v4933_v30 }
 0x188   : > { %3363 = vmatpush.bf16.msrb.mxu2 %v5173_v54 }
 0x189   : > { %3349 = vmatpush.bf16.msrb.mxu1 %v5061_v42  ;;  %3376 = vmatpush.bf16.msrb.mxu3 %v5301_v43 }
 0x18a   : > { %3337 = vmatpush.bf16.msrb.mxu0 %v4917_v45 }
 0x18c   : > { %3364 = vmatpush.bf16.msrb.mxu2 %v5157_v51 }
 0x18d   : > { %3350 = vmatpush.bf16.msrb.mxu1 %v5045_v17  ;;  %3377 = vmatpush.bf16.msrb.mxu3 %v5285_v57 }
 0x18e   : > { %3338 = vmatpush.bf16.msrb.mxu0 %v4901_v58 }
 0x18f   : > { %3365 = vmatmul.bf16.vlgmr.msrb.gmra.mxu2 %v7696_v26 }
 0x190   : > { %3378 = vmatmul.bf16.vlgmr.msrb.gmra.mxu3 %v7704_v29  ;;  %v2339_v2 = vpop.f32.mrf.mxu0 }
 0x191   : > { %3351 = vmatpush.bf16.msrb.mxu1 %v5029_v1  ;;  %3339 = vmatmul.bf16.vlgmr.msrb.gmra.mxu0 %v7712_v35  ;;  %v2340_v3 = vadd.f32 %v2339_v2, %v7658_v63  ;;  %v2352_v4 = vpop.f32.mrf.mxu1  ;;  %v8281_v63 = vld [vmem:[%s8332_s4] sm:$0xf] }
 0x192   : > { %v2365_v6 = vpop.f32.mrf.mxu2  ;;  %v3389_v20 = vperm.slane %v8281_v63, 0  ;;  %v3390_v54 = vperm.slane %v8281_v63, 1 }
 0x193   : > { %v2353_v5 = vadd.f32 %v2352_v4, %v2340_v3  ;;  %v2378_v7 = vpop.f32.mrf.mxu3 }
 0x194   : > { %3352 = vmatmul.bf16.vlgmr.msrb.gmra.mxu1 %v7734_v62 }
 0x195   : > { %v2366_v9 = vadd.f32 %v2365_v6, %v2353_v5 }
 0x197   : > { %v8276_v10 = vadd.f32 %v2378_v7, %v2366_v9 }
 0x198   : > { %v2341_v12 = vpop.f32.mrf.mxu0 }
 0x199   : > { %v2354_v26 = vpop.f32.mrf.mxu1 }
 0x19a   : > { %v2367_v13 = vpop.f32.mrf.mxu2 }
 0x19b   : > { %v2380_v29 = vpop.f32.mrf.mxu3 }
 0x1b0   : > { %v3184_v14 = vpop.f32.mrf.mxu0 }
 0x1b1   : > { %v3197_v35 = vpop.f32.mrf.mxu1 }
 0x1b2   : > { %v3198_v15 = vadd.f32 %v3197_v35, %v3184_v14  ;;  %v3210_v62 = vpop.f32.mrf.mxu2 }
 0x1b3   : > { %v3223_v16 = vpop.f32.mrf.mxu3 }
 0x1b4   : > { %v3211_v19 = vadd.f32 %v3210_v62, %v3198_v15 }
 0x1b6   : > { %v3224_v59 = vadd.f32 %v3223_v16, %v3211_v19 }
 0x1b8   : > { %v3186_v21 = vpop.f32.mrf.mxu0  ;;  %v3383_v22 = vadd.f32 %v3224_v59, %v7850_v8 }
 0x1b9   : > { %v3199_v23 = vpop.f32.mrf.mxu1 }
 0x1ba   : > { %v3397_v24 = vadd.f32 %v3389_v20, %v3383_v22  ;;  %v3212_v25 = vpop.f32.mrf.mxu2  ;;  %v3391_v22 = vperm.slane %v8281_v63, 2 }
 0x1bb   : > { %v3225_v41 = vpop.f32.mrf.mxu3 }
 0x1bc   : > { %v3405_v27 = vadd.f32 %v3401_v53, %v3397_v24  ;;  %v3403_v24 = vld [vmem:[%s8287_s22 + $0x10] sm:$0xff] }
 0x1be   : > { %3409 = vst [vmem:[%s8296_s27] sm:$0xff] %v3405_v27  ;;  %v3452_v8 = vmul.f32 %v3405_v27, %v3405_v27  ;;  %v3413_v36 = vrot.slane %v3405_v27, 4 }
 0x1c0   : > { %v3456_v39 = vrot.slane %v3452_v8, 4  ;;  %v3414_v44 = vadd.f32 %v3413_v36, %v3405_v27 }
 0x1c2   : > { %v3457_v48 = vadd.f32 %v3456_v39, %v3452_v8  ;;  %v3415_v50 = vrot.slane %v3414_v44, 2 }
 0x1c4   : > { %v3458_v17 = vrot.slane %v3457_v48, 2  ;;  %v3416_v58 = vadd.f32 %v3415_v50, %v3414_v44 }
 0x1c6   : > { %v3459_v0 = vadd.f32 %v3458_v17, %v3457_v48  ;;  %v3417_v2 = vrot.slane %v3416_v58, 1 }
 0x1c8   : > { %v3460_v5 = vrot.slane %v3459_v0, 1  ;;  %v3418_v9 = vadd.f32 %v3417_v2, %v3416_v58 }
 0x1ca   : > { %v3461_v29 = vadd.f32 %v3460_v5, %v3459_v0 }
 0x1d0   : > { %v3236_v28 = vpop.f32.mrf.mxu0 }
 0x1d1   : > { %v3249_v30 = vpop.f32.mrf.mxu1 }
 0x1d2   : > { %v3250_v31 = vadd.f32 %v3249_v30, %v3236_v28  ;;  %v3262_v32 = vpop.f32.mrf.mxu2 }
 0x1d3   : > { %v3275_v33 = vpop.f32.mrf.mxu3 }
 0x1d4   : > { %v3263_v34 = vadd.f32 %v3262_v32, %v3250_v31 }
 0x1d6   : > { %v3276_v37 = vadd.f32 %v3275_v33, %v3263_v34 }
 0x1d8   : > { %v3238_v38 = vpop.f32.mrf.mxu0  ;;  %v3384_v42 = vadd.f32 %v3276_v37, %v8049_v56 }
 0x1d9   : > { %v3251_v43 = vpop.f32.mrf.mxu1 }
 0x1da   : > { %v3398_v45 = vadd.f32 %v3390_v54, %v3384_v42  ;;  %v3264_v46 = vpop.f32.mrf.mxu2  ;;  %v3392_v42 = vperm.slane %v8281_v63, 3 }
 0x1db   : > { %v3277_v47 = vpop.f32.mrf.mxu3 }
 0x1dc   : > { %v3406_v49 = vadd.f32 %v3402_v52, %v3398_v45  ;;  %v3404_v45 = vld [vmem:[%s8287_s22 + $0x18] sm:$0xff] }
 0x1de   : > { %3410 = vst [vmem:[%s8296_s27 + $0x8] sm:$0xff] %v3406_v49  ;;  %v3419_v51 = vrot.slane %v3406_v49, 4  ;;  %v3453_v55 = vmul.f32 %v3406_v49, %v3406_v49 }
 0x1e0   : > { %v3420_v57 = vadd.f32 %v3419_v51, %v3406_v49  ;;  %v3462_v11 = vrot.slane %v3453_v55, 4 }
 0x1e2   : > { %v3421_v60 = vrot.slane %v3420_v57, 2  ;;  %v3463_v61 = vadd.f32 %v3462_v11, %v3453_v55 }
 0x1e4   : > { %v3422_v56 = vadd.f32 %v3421_v60, %v3420_v57  ;;  %v3464_v1 = vrot.slane %v3463_v61, 2 }
 0x1e6   : > { %v3423_v3 = vrot.slane %v3422_v56, 1  ;;  %v3465_v4 = vadd.f32 %v3464_v1, %v3463_v61 }
 0x1e8   : > { %v3424_v6 = vadd.f32 %v3423_v3, %v3422_v56  ;;  %v3466_v7 = vrot.slane %v3465_v4, 1 }
 0x1ea   : > { %v3441_v12 = vrot.slane %v3424_v6, 7  ;;  %v3467_v26 = vadd.f32 %v3466_v7, %v3465_v4 }
 0x1ec   : > { %v8303_v14 = vsel %vm3444_vm1, %v3418_v9, %v3441_v12  ;;  %v3484_v35 = vrot.slane %v3467_v26, 7 }
 0x1ee   : > { %v8305_v15 = vsel %vm3444_vm1, %v3461_v29, %v3484_v35 }
 0x1f0   : > { %v3288_v13 = vpop.f32.mrf.mxu0 }
 0x1f1   : > { %v3301_v62 = vpop.f32.mrf.mxu1 }
 0x1f2   : > { %v3302_v16 = vadd.f32 %v3301_v62, %v3288_v13  ;;  %v3314_v19 = vpop.f32.mrf.mxu2 }
 0x1f3   : > { %v3327_v59 = vpop.f32.mrf.mxu3 }
 0x1f4   : > { %v3315_v20 = vadd.f32 %v3314_v19, %v3302_v16 }
 0x1f6   : > { %v3328_v21 = vadd.f32 %v3327_v59, %v3315_v20 }
 0x1f8   : > { %v3290_v53 = vpop.f32.mrf.mxu0  ;;  %v3385_v23 = vadd.f32 %v3328_v21, %v8245_v40 }
 0x1f9   : > { %v3303_v25 = vpop.f32.mrf.mxu1 }
 0x1fa   : > { %v3399_v41 = vadd.f32 %v3391_v22, %v3385_v23  ;;  %v3316_v27 = vpop.f32.mrf.mxu2 }
 0x1fb   : > { %v3329_v28 = vpop.f32.mrf.mxu3 }
 0x1fc   : > { %v3407_v30 = vadd.f32 %v3403_v24, %v3399_v41 }
 0x1fe   : > { %3411 = vst [vmem:[%s8296_s27 + $0x10] sm:$0xff] %v3407_v30  ;;  %v3454_v32 = vmul.f32 %v3407_v30, %v3407_v30  ;;  %v3425_v34 = vrot.slane %v3407_v30, 4 }
 0x200   : > { %v3468_v54 = vrot.slane %v3454_v32, 4  ;;  %v3426_v39 = vadd.f32 %v3425_v34, %v3407_v30 }
 0x202   : > { %v3469_v43 = vadd.f32 %v3468_v54, %v3454_v32  ;;  %v3427_v48 = vrot.slane %v3426_v39, 2 }
 0x204   : > { %v3470_v51 = vrot.slane %v3469_v43, 2  ;;  %v3428_v17 = vadd.f32 %v3427_v48, %v3426_v39 }
 0x206   : > { %v3471_v58 = vadd.f32 %v3470_v51, %v3469_v43  ;;  %v3429_v61 = vrot.slane %v3428_v17, 1 }
 0x208   : > { %v3430_v3 = vadd.f32 %v3429_v61, %v3428_v17 }
 0x20a   : > { %v3442_v12 = vrot.slane %v3430_v3, 6 }
 0x20e   : > { %v3340_v31 = vpop.f32.mrf.mxu0 }
 0x211   : > { %v3353_v33 = vpop.f32.mrf.mxu1 }
 0x212   : > { %v3366_v8 = vpop.f32.mrf.mxu2  ;;  %v3354_v36 = vadd.f32 %v3353_v33, %v3340_v31 }
 0x213   : > { %v3379_v37 = vpop.f32.mrf.mxu3 }
 0x214   : > { %v3367_v38 = vadd.f32 %v3366_v8, %v3354_v36 }
 0x216   : > { %v3380_v40 = vadd.f32 %v3379_v37, %v3367_v38  ;;  %v3342_v52 = vpop.f32.mrf.mxu0 }
 0x218   : > { %v3386_v44 = vadd.f32 %v3380_v40, %v8276_v10  ;;  %v3472_v10 = vrot.slane %v3471_v58, 1 }
 0x219   : > { %v3355_v46 = vpop.f32.mrf.mxu1 }
 0x21a   : > { %v3368_v47 = vpop.f32.mrf.mxu2  ;;  %v3400_v49 = vadd.f32 %v3392_v42, %v3386_v44  ;;  %v3473_v6 = vadd.f32 %v3472_v10, %v3471_v58 }
 0x21b   : > { %v3381_v50 = vpop.f32.mrf.mxu3 }
 0x21c   : > { %v3408_v55 = vadd.f32 %v3404_v45, %v3400_v49  ;;  %v3485_v29 = vrot.slane %v3473_v6, 6 }
 0x21e   : > { %3412 = vst [vmem:[%s8296_s27 + $0x18] sm:$0xff] %v3408_v55  ;;  %v3431_v57 = vrot.slane %v3408_v55, 4  ;;  %v3455_v11 = vmul.f32 %v3408_v55, %v3408_v55 }
 0x220   : > { %v3432_v60 = vadd.f32 %v3431_v57, %v3408_v55  ;;  %v3474_v63 = vrot.slane %v3455_v11, 4 }
 0x222   : > { %v3433_v0 = vrot.slane %v3432_v60, 2  ;;  %v3475_v56 = vadd.f32 %v3474_v63, %v3455_v11 }
 0x224   : > { %v3434_v1 = vadd.f32 %v3433_v0, %v3432_v60  ;;  %v3476_v2 = vrot.slane %v3475_v56, 2 }
 0x226   : > { %v3435_v4 = vrot.slane %v3434_v1, 1  ;;  %v3477_v5 = vadd.f32 %v3476_v2, %v3475_v56 }
 0x228   : > { %v3436_v7 = vadd.f32 %v3435_v4, %v3434_v1  ;;  %v3478_v9 = vrot.slane %v3477_v5, 1 }
 0x22a   : > { %v3443_v26 = vrot.slane %v3436_v7, 5  ;;  %v3479_v13 = vadd.f32 %v3478_v9, %v3477_v5 }
 0x22c   : > { %v3447_v35 = vsel %vm3446_vm2, %v3442_v12, %v3443_v26  ;;  %v3486_v62 = vrot.slane %v3479_v13, 5 }
 0x22d   : > { %v3449_v16 = vsel %vm3448_vm3, %v8303_v14, %v3447_v35 }
 0x22e   : > { %3451 = vst.msk [vmem:[%s311_s30] ss:$2 sm:$0xf] %vm6692_vm0, %v3449_v16  ;;  %v3488_v19 = vsel %vm3446_vm2, %v3485_v29, %v3486_v62 }
 0x22f   : > { %v3489_v59 = vsel %vm3448_vm3, %v8305_v15, %v3488_v19 }
 0x230   : > { %5398 = vst.msk [vmem:[%s311_s30 + $0x1] ss:$2 sm:$0xf] %vm6692_vm0, %v3489_v59 }
 0x231 PF: > { %s18_s24 = sadd.s32 1, %s5804_s24  }
 0x232   : > { %p15_p4 = scmp.ge.s32.totalorder %s18_s24, 4  }
 0x234   :  { %17 = sbr.rel (!%p15_p4) target bundleno = 1 (0x1), region = 93 }

// kernel: cleaning_backbone_forward.7
= control target key start
LH: loop header
LB: loop body
LE: loop exit
PB: predicated region body
PF: predicated region fallthrough
CT: control target
= control target key end

     0   :  { %13 = vsyncpa [#allocation4], 0  ;;  %s8499_s0 = inlined_call_operand.vmem [shape: f32[2,8,512], index: 0, kind: input, shape index: {}]   ;;  %s8500_s1 = inlined_call_operand.vmem [shape: f32[1,512], index: 1, kind: input, shape index: {}]   ;;  %s8501_s2 = inlined_call_operand.vmem [shape: f32[1,512], index: 2, kind: input, shape index: {}]   ;;  %s8502_s3 = inlined_call_operand.vmem [shape: bf16[3,512,512], index: 3, kind: input, shape index: {}]   ;;  %s8503_s4 = inlined_call_operand.vmem [shape: f32[1,512], index: 4, kind: input, shape index: {}]   ;;  %s8504_s5 = inlined_call_operand.vmem [shape: f32[2,8,512], index: 5, kind: input, shape index: {}]   ;;  %s8505_s6 = inlined_call_operand.vmem [shape: f32[2,8,512], index: 6, kind: output, shape index: {0}]   ;;  %s8506_s7 = inlined_call_operand.hbm [shape: f32[2,2,512], index: 7, kind: output, shape index: {1}]  }
   0x1   :  { %15 = vsyncpa [#allocation4 + $0x1], 0  ;;  %s5954_s24 = smov 0   ;;  %s5956_s25 = smov 0  }
   0x2   :  { %s5958_s26 = smov 0   ;;  %s5960_s27 = smov 0  }
   0x3 LB: > { %s5975_s28 = sadd.s32 4294967295, %s5911_s27   ;;  %s3612_s29 = sadd.s32 4294967294, %s5911_s27   ;;  %s5911_s27 = sphi %s5960_s27, %s8514_s27   ;;  %s5907_s26 = sphi %s5958_s26, %s8513_s26   ;;  %s5903_s25 = sphi %s5956_s25, %s8512_s25   ;;  %s5899_s24 = sphi %s5954_s24, %s8511_s24  }
   0x4   : > { %s5979_s30 = sadd.s32 1, %s5911_s27   ;;  %s190_s8 = sadd.s32 1, %s5907_s26 }
   0x5   : > { %s187_s9 = ssub.s32 %s5911_s27, %s5979_s30  ;;  %p200_p0 = scmp.ne.s32.totalorder %s5907_s26, %s5903_s25 }
   0x6   : > { %p188_p1 = scmp.eq.s32.totalorder %s187_s9, 0  ;;  %p201_p2 = scmp.eq.s32.totalorder %s5975_s28, 1 }
   0x7   : > { %p206_p3 = scmp.ne.s32.totalorder %s5903_s25, %s5899_s24  ;;  %p207_p4 = scmp.eq.s32.totalorder %s3612_s29, 1 }
   0x8   : > { %s5990_s10 = scalar_select %p188_p1, %s5907_s26, %s190_s8  }
   0x9   : > { %p5992_p5 = por %p201_p2, %p200_p0  ;;  %p5996_p6 = por %p207_p4, %p206_p3 }
   0xa   : > { %p3615_p7 = scmp.ge.s32.totalorder %s5911_s27, 1  ;;  %p253_p8 = scmp.lt.s32.totalorder %s5911_s27, 3 }
   0xc   : > { %p254_p9 = pnand %p3615_p7, %p253_p8 }
   0xd   : > { %p295_p10 = scmp.lt.s32.totalorder (!%p254_p9), %s5975_s28, 1  ;;  %s5808_s18 = sshll.u32 (!%p254_p9), %s5975_s28, 3 }
   0xe   : > { %257 = sbr.rel (%p254_p9) target bundleno = 571 (0x23b), region = 44  ;;  %s3511_s21 = scalar_lea.hbm (!%p254_p9), %s8506_s7, %s5808_s18 }
   0xf   : > { %s3515_s9 = sshll.u32 (!%p254_p9), %s3511_s21, 4  ;;  %s3516_s9 = int_to_ptr.hbm [resolvable:$true] %s3515_s9 }
  0x10   : > { %s5863_s13 = sshra.s32 (!%p254_p9), %s3516_s9, 4  ;;  %s5864_s13 = int_to_ptr.hbm [resolvable:$true] %s5863_s13 }
  0x11   : > { %p5870_p0 = scmp.lt.s32.totalorder (!%p254_p9), %s5864_s13, %s8506_s7 }
  0x13   : > { %v3865_v0 = vld [vmem:[%s8502_s3 + $0x4e0] sm:$0xf]  ;;  %v5582_v1 = vld [vmem:[%s8502_s3 + $0x4ec] sm:$0xf0]  ;;  %s296_s8 = scalar_select %p295_p10, %s5975_s28, 1  ;;  %vm3442_vm1 = vcmask 1040384  }
  0x14   : > { %v3993_v2 = vld [vmem:[%s8502_s3 + $0x5e0] sm:$0xf]  ;;  %v3866_v3 = vor.u32 %v5582_v1, %v3865_v0  ;;  %v5614_v4 = vld [vmem:[%s8502_s3 + $0x5ec] sm:$0xf0]  ;;  %vm3444_vm2 = vcmask 1042434   ;;  %vm3446_vm3 = vcmask 1041408  }
  0x15   : > { %v4121_v5 = vld [vmem:[%s8502_s3 + $0x6e0] sm:$0xf]  ;;  %v5646_v6 = vld [vmem:[%s8502_s3 + $0x6ec] sm:$0xf0]  ;;  %v3994_v7 = vor.u32 %v5614_v4, %v3993_v2  ;;  %s6313_s29 = sshll.u32 %s296_s8, 5 }
  0x16   : > { %v4122_v8 = vor.u32 %v5646_v6, %v4121_v5  ;;  %v4249_v9 = vld [vmem:[%s8502_s3 + $0x7e0] sm:$0xf]  ;;  %v5678_v10 = vld [vmem:[%s8502_s3 + $0x7ec] sm:$0xf0]  ;;  %1324 = vmatpush.bf16.msra.mxu0 %v3866_v3  ;;  %s299_s16 = scalar_lea.vmem %s8499_s0, %s6313_s29  ;;  %s8429_s14 = scalar_lea.vmem %s8504_s5, %s6313_s29 }
  0x17   : > { %v3849_v11 = vld [vmem:[%s8502_s3 + $0x4c0] sm:$0xf]  ;;  %v4250_v12 = vor.u32 %v5678_v10, %v4249_v9  ;;  %v5578_v13 = vld [vmem:[%s8502_s3 + $0x4cc] sm:$0xf0]  ;;  %1337 = vmatpush.bf16.msra.mxu1 %v3994_v7  ;;  %s8438_s8 = scalar_lea.vmem %s8505_s6, %s6313_s29  ;;  %s292_s29 = sand.u32 1, %s5903_s25  }
  0x18   : > { %v3977_v14 = vld [vmem:[%s8502_s3 + $0x5c0] sm:$0xf]  ;;  %v5610_v15 = vld [vmem:[%s8502_s3 + $0x5cc] sm:$0xf0]  ;;  %1350 = vmatpush.bf16.msra.mxu2 %v4122_v8  ;;  %v3850_v16 = vor.u32 %v5578_v13, %v3849_v11  ;;  %s3616_s17 = sshll.u32 %s292_s29, 3  ;;  %s3497_s28 = scalar_lea.sflag [#allocation4], %s292_s29 }
  0x19   : > { %v3978_v17 = vor.u32 %v5610_v15, %v3977_v14  ;;  %v4105_v18 = vld [vmem:[%s8502_s3 + $0x6c0] sm:$0xf]  ;;  %v5642_v19 = vld [vmem:[%s8502_s3 + $0x6cc] sm:$0xf0]  ;;  %1363 = vmatpush.bf16.msra.mxu3 %v4250_v12  ;;  %s294_s22 = scalar_lea.vmem [#allocation3], %s3616_s17 }
  0x1a   : > { %v4233_v20 = vld [vmem:[%s8502_s3 + $0x7c0] sm:$0xf]  ;;  %v4106_v21 = vor.u32 %v5642_v19, %v4105_v18  ;;  %v5674_v22 = vld [vmem:[%s8502_s3 + $0x7cc] sm:$0xf0]  ;;  %1325 = vmatpush.bf16.msra.mxu0 %v3850_v16  ;;  %s3513_s23 = sshll.u32 %s294_s22, 4  ;;  %s3514_s23 = int_to_ptr.vmem [resolvable:$true] %s3513_s23 }
  0x1b   : > { %v3833_v23 = vld [vmem:[%s8502_s3 + $0x4a0] sm:$0xf]  ;;  %v5574_v24 = vld [vmem:[%s8502_s3 + $0x4ac] sm:$0xf0]  ;;  %v4234_v25 = vor.u32 %v5674_v22, %v4233_v20  ;;  %1338 = vmatpush.bf16.msra.mxu1 %v3978_v17 }
  0x1c   : > { %v3961_v26 = vld [vmem:[%s8502_s3 + $0x5a0] sm:$0xf]  ;;  %v5606_v27 = vld [vmem:[%s8502_s3 + $0x5ac] sm:$0xf0]  ;;  %v3834_v29 = vor.u32 %v5574_v24, %v3833_v23  ;;  %1351 = vmatpush.bf16.msra.mxu2 %v4106_v21 }
  0x1d   : > { %v4089_v28 = vld [vmem:[%s8502_s3 + $0x6a0] sm:$0xf]  ;;  %v5638_v30 = vld [vmem:[%s8502_s3 + $0x6ac] sm:$0xf0]  ;;  %v3962_v33 = vor.u32 %v5606_v27, %v3961_v26  ;;  %1364 = vmatpush.bf16.msra.mxu3 %v4234_v25 }
  0x1e   : > { %v4217_v31 = vld [vmem:[%s8502_s3 + $0x7a0] sm:$0xf]  ;;  %v5670_v32 = vld [vmem:[%s8502_s3 + $0x7ac] sm:$0xf0]  ;;  %v4090_v34 = vor.u32 %v5638_v30, %v4089_v28  ;;  %1326 = vmatpush.bf16.msra.mxu0 %v3834_v29  ;;  %v5580_v28 = vld [vmem:[%s8502_s3 + $0x4e4] sm:$0xf] }
  0x1f   : > { %v3817_v35 = vld [vmem:[%s8502_s3 + $0x480] sm:$0xf]  ;;  %v5570_v36 = vld [vmem:[%s8502_s3 + $0x48c] sm:$0xf0]  ;;  %v4218_v38 = vor.u32 %v5670_v32, %v4217_v31  ;;  %1339 = vmatpush.bf16.msra.mxu1 %v3962_v33  ;;  %v3867_v29 = vld [vmem:[%s8502_s3 + $0x4f0] sm:$0xf0] }
  0x20   : > { %v3945_v37 = vld [vmem:[%s8502_s3 + $0x580] sm:$0xf]  ;;  %v5602_v39 = vld [vmem:[%s8502_s3 + $0x58c] sm:$0xf0]  ;;  %v3818_v44 = vor.u32 %v5570_v36, %v3817_v35  ;;  %1352 = vmatpush.bf16.msra.mxu2 %v4090_v34  ;;  %v5612_v30 = vld [vmem:[%s8502_s3 + $0x5e4] sm:$0xf] }
  0x21   : > { %v4073_v40 = vld [vmem:[%s8502_s3 + $0x680] sm:$0xf]  ;;  %v5634_v41 = vld [vmem:[%s8502_s3 + $0x68c] sm:$0xf0]  ;;  %v3946_v45 = vor.u32 %v5602_v39, %v3945_v37  ;;  %1365 = vmatpush.bf16.msra.mxu3 %v4218_v38  ;;  %v3995_v32 = vld [vmem:[%s8502_s3 + $0x5f0] sm:$0xf0] }
  0x22   : > { %v4201_v42 = vld [vmem:[%s8502_s3 + $0x780] sm:$0xf]  ;;  %v5666_v43 = vld [vmem:[%s8502_s3 + $0x78c] sm:$0xf0]  ;;  %v4074_v46 = vor.u32 %v5634_v41, %v4073_v40  ;;  %1327 = vmatpush.bf16.msra.mxu0 %v3818_v44  ;;  %v5644_v33 = vld [vmem:[%s8502_s3 + $0x6e4] sm:$0xf]  ;;  %v3870_v40 = vor.u32 %v5580_v28, %v3867_v29  ;;  %v3998_v41 = vor.u32 %v5612_v30, %v3995_v32 }
  0x23   : > { %v3801_v47 = vld [vmem:[%s8502_s3 + $0x460] sm:$0xf]  ;;  %v5566_v48 = vld [vmem:[%s8502_s3 + $0x46c] sm:$0xf0]  ;;  %v4202_v50 = vor.u32 %v5666_v43, %v4201_v42  ;;  %1340 = vmatpush.bf16.msra.mxu1 %v3946_v45  ;;  %v4123_v34 = vld [vmem:[%s8502_s3 + $0x6f0] sm:$0xf0] }
  0x24   : > { %v3929_v49 = vld [vmem:[%s8502_s3 + $0x560] sm:$0xf]  ;;  %v5598_v51 = vld [vmem:[%s8502_s3 + $0x56c] sm:$0xf0]  ;;  %v3802_v56 = vor.u32 %v5566_v48, %v3801_v47  ;;  %1353 = vmatpush.bf16.msra.mxu2 %v4074_v46  ;;  %v5676_v37 = vld [vmem:[%s8502_s3 + $0x7e4] sm:$0xf]  ;;  %v4126_v42 = vor.u32 %v5644_v33, %v4123_v34 }
  0x25   : > { %v4057_v52 = vld [vmem:[%s8502_s3 + $0x660] sm:$0xf]  ;;  %v5630_v53 = vld [vmem:[%s8502_s3 + $0x66c] sm:$0xf0]  ;;  %v3930_v57 = vor.u32 %v5598_v51, %v3929_v49  ;;  %1366 = vmatpush.bf16.msra.mxu3 %v4202_v50  ;;  %v4251_v38 = vld [vmem:[%s8502_s3 + $0x7f0] sm:$0xf0] }
  0x26   : > { %v4185_v54 = vld [vmem:[%s8502_s3 + $0x760] sm:$0xf]  ;;  %v5662_v55 = vld [vmem:[%s8502_s3 + $0x76c] sm:$0xf0]  ;;  %v4058_v58 = vor.u32 %v5630_v53, %v4057_v52  ;;  %1328 = vmatpush.bf16.msra.mxu0 %v3802_v56  ;;  %v5576_v43 = vld [vmem:[%s8502_s3 + $0x4c4] sm:$0xf]  ;;  %v4254_v46 = vor.u32 %v5676_v37, %v4251_v38 }
  0x27   : > { %v3785_v59 = vld [vmem:[%s8502_s3 + $0x440] sm:$0xf]  ;;  %v5562_v60 = vld [vmem:[%s8502_s3 + $0x44c] sm:$0xf0]  ;;  %v4186_v62 = vor.u32 %v5662_v55, %v4185_v54  ;;  %1341 = vmatpush.bf16.msra.mxu1 %v3930_v57  ;;  %v3851_v44 = vld [vmem:[%s8502_s3 + $0x4d0] sm:$0xf0] }
  0x28   : > { %v3913_v61 = vld [vmem:[%s8502_s3 + $0x540] sm:$0xf]  ;;  %v5594_v63 = vld [vmem:[%s8502_s3 + $0x54c] sm:$0xf0]  ;;  %v3786_v4 = vor.u32 %v5562_v60, %v3785_v59  ;;  %1354 = vmatpush.bf16.msra.mxu2 %v4058_v58  ;;  %v5608_v45 = vld [vmem:[%s8502_s3 + $0x5c4] sm:$0xf]  ;;  %v3854_v52 = vor.u32 %v5576_v43, %v3851_v44 }
  0x29   : > { %v4041_v0 = vld [vmem:[%s8502_s3 + $0x640] sm:$0xf]  ;;  %v5626_v1 = vld [vmem:[%s8502_s3 + $0x64c] sm:$0xf0]  ;;  %v3914_v5 = vor.u32 %v5594_v63, %v3913_v61  ;;  %1367 = vmatpush.bf16.msra.mxu3 %v4186_v62  ;;  %v3979_v47 = vld [vmem:[%s8502_s3 + $0x5d0] sm:$0xf0] }
  0x2a   : > { %v4169_v2 = vld [vmem:[%s8502_s3 + $0x740] sm:$0xf]  ;;  %v5658_v3 = vld [vmem:[%s8502_s3 + $0x74c] sm:$0xf0]  ;;  %v4042_v6 = vor.u32 %v5626_v1, %v4041_v0  ;;  %1329 = vmatpush.bf16.msra.mxu0 %v3786_v4  ;;  %v5640_v48 = vld [vmem:[%s8502_s3 + $0x6c4] sm:$0xf]  ;;  %v3982_v55 = vor.u32 %v5608_v45, %v3979_v47 }
  0x2b   : > { %v3769_v7 = vld [vmem:[%s8502_s3 + $0x420] sm:$0xf]  ;;  %v5558_v8 = vld [vmem:[%s8502_s3 + $0x42c] sm:$0xf0]  ;;  %v4170_v10 = vor.u32 %v5658_v3, %v4169_v2  ;;  %1342 = vmatpush.bf16.msra.mxu1 %v3914_v5  ;;  %v4107_v49 = vld [vmem:[%s8502_s3 + $0x6d0] sm:$0xf0] }
  0x2c   : > { %v3897_v9 = vld [vmem:[%s8502_s3 + $0x520] sm:$0xf]  ;;  %v5590_v11 = vld [vmem:[%s8502_s3 + $0x52c] sm:$0xf0]  ;;  %v3770_v16 = vor.u32 %v5558_v8, %v3769_v7  ;;  %1355 = vmatpush.bf16.msra.mxu2 %v4042_v6  ;;  %v5672_v50 = vld [vmem:[%s8502_s3 + $0x7c4] sm:$0xf]  ;;  %v4110_v56 = vor.u32 %v5640_v48, %v4107_v49 }
  0x2d   : > { %v4025_v12 = vld [vmem:[%s8502_s3 + $0x620] sm:$0xf]  ;;  %v5622_v13 = vld [vmem:[%s8502_s3 + $0x62c] sm:$0xf0]  ;;  %v3898_v19 = vor.u32 %v5590_v11, %v3897_v9  ;;  %1368 = vmatpush.bf16.msra.mxu3 %v4170_v10  ;;  %v4235_v51 = vld [vmem:[%s8502_s3 + $0x7d0] sm:$0xf0] }
  0x2e   : > { %v4153_v14 = vld [vmem:[%s8502_s3 + $0x720] sm:$0xf]  ;;  %v5654_v15 = vld [vmem:[%s8502_s3 + $0x72c] sm:$0xf0]  ;;  %v4026_v20 = vor.u32 %v5622_v13, %v4025_v12  ;;  %1330 = vmatpush.bf16.msra.mxu0 %v3770_v16  ;;  %v5572_v53 = vld [vmem:[%s8502_s3 + $0x4a4] sm:$0xf]  ;;  %v4238_v60 = vor.u32 %v5672_v50, %v4235_v51 }
  0x2f   : > { %v3753_v17 = vld [vmem:[%s8502_s3 + $0x400] sm:$0xf]  ;;  %v5554_v18 = vld [vmem:[%s8502_s3 + $0x40c] sm:$0xf0]  ;;  %v4154_v24 = vor.u32 %v5654_v15, %v4153_v14  ;;  %1343 = vmatpush.bf16.msra.mxu1 %v3898_v19  ;;  %v3835_v54 = vld [vmem:[%s8502_s3 + $0x4b0] sm:$0xf0] }
  0x30   : > { %v3881_v21 = vld [vmem:[%s8502_s3 + $0x500] sm:$0xf]  ;;  %v5586_v22 = vld [vmem:[%s8502_s3 + $0x50c] sm:$0xf0]  ;;  %v3754_v31 = vor.u32 %v5554_v18, %v3753_v17  ;;  %1356 = vmatpush.bf16.msra.mxu2 %v4026_v20  ;;  %v5604_v57 = vld [vmem:[%s8502_s3 + $0x5a4] sm:$0xf]  ;;  %v3838_v3 = vor.u32 %v5572_v53, %v3835_v54 }
  0x31   : > { %v4009_v23 = vld [vmem:[%s8502_s3 + $0x600] sm:$0xf]  ;;  %v5618_v25 = vld [vmem:[%s8502_s3 + $0x60c] sm:$0xf0]  ;;  %v3882_v35 = vor.u32 %v5586_v22, %v3881_v21  ;;  %1369 = vmatpush.bf16.msra.mxu3 %v4154_v24  ;;  %v3963_v58 = vld [vmem:[%s8502_s3 + $0x5b0] sm:$0xf0] }
  0x32   : > { %v4137_v26 = vld [vmem:[%s8502_s3 + $0x700] sm:$0xf]  ;;  %v5650_v27 = vld [vmem:[%s8502_s3 + $0x70c] sm:$0xf0]  ;;  %v4010_v36 = vor.u32 %v5618_v25, %v4009_v23  ;;  %1331 = vmatpush.bf16.msra.mxu0 %v3754_v31  ;;  %v5636_v59 = vld [vmem:[%s8502_s3 + $0x6a4] sm:$0xf]  ;;  %v3966_v6 = vor.u32 %v5604_v57, %v3963_v58 }
  0x33   : > { %v4138_v39 = vor.u32 %v5650_v27, %v4137_v26  ;;  %1344 = vmatpush.bf16.msra.mxu1 %v3882_v35  ;;  %v4091_v61 = vld [vmem:[%s8502_s3 + $0x6b0] sm:$0xf0]  ;;  %v5668_v62 = vld [vmem:[%s8502_s3 + $0x7a4] sm:$0xf]  ;;  %v314_v5 = vld [vmem:[%s8500_s1] sm:$0xf] }
  0x34   : > { %1357 = vmatpush.bf16.msra.mxu2 %v4010_v36  ;;  %v4219_v63 = vld [vmem:[%s8502_s3 + $0x7b0] sm:$0xf0]  ;;  %v5568_v0 = vld [vmem:[%s8502_s3 + $0x484] sm:$0xf]  ;;  %v4094_v7 = vor.u32 %v5636_v59, %v4091_v61  ;;  %v328_v13 = vld [vmem:[%s8501_s2] sm:$0xf] }
  0x35   : > { %1370 = vmatpush.bf16.msra.mxu3 %v4138_v39  ;;  %v3819_v1 = vld [vmem:[%s8502_s3 + $0x490] sm:$0xf0]  ;;  %v5600_v2 = vld [vmem:[%s8502_s3 + $0x584] sm:$0xf]  ;;  %v4222_v11 = vor.u32 %v5668_v62, %v4219_v63  ;;  %v318_v17 = vperm.slane %v314_v5, 2  ;;  %v319_v18 = vperm.slane %v314_v5, 3 }
  0x36   : > { %1376 = vmatpush.bf16.msrb.mxu0 %v3870_v40  ;;  %v3947_v4 = vld [vmem:[%s8502_s3 + $0x590] sm:$0xf0]  ;;  %v5632_v8 = vld [vmem:[%s8502_s3 + $0x684] sm:$0xf]  ;;  %v316_v19 = vperm.slane %v314_v5, 0  ;;  %v3822_v20 = vor.u32 %v5568_v0, %v3819_v1  ;;  %v332_v26 = vperm.slane %v328_v13, 2 }
  0x37   : > { %1389 = vmatpush.bf16.msrb.mxu1 %v3998_v41  ;;  %v4075_v9 = vld [vmem:[%s8502_s3 + $0x690] sm:$0xf0]  ;;  %v5664_v10 = vld [vmem:[%s8502_s3 + $0x784] sm:$0xf]  ;;  %v3950_v21 = vor.u32 %v5600_v2, %v3947_v4  ;;  %v333_v27 = vperm.slane %v328_v13, 3  ;;  %v330_v28 = vperm.slane %v328_v13, 0 }
  0x38   : > { %1402 = vmatpush.bf16.msrb.mxu2 %v4126_v42  ;;  %v4203_v12 = vld [vmem:[%s8502_s3 + $0x790] sm:$0xf0]  ;;  %v5564_v14 = vld [vmem:[%s8502_s3 + $0x464] sm:$0xf]  ;;  %v4078_v22 = vor.u32 %v5632_v8, %v4075_v9  ;;  %v317_v29 = vperm.slane %v314_v5, 1  ;;  %v313_v32 = vld [vmem:[%s299_s16 + $0x18] sm:$0xff] }
  0x39   : > { %1415 = vmatpush.bf16.msrb.mxu3 %v4254_v46  ;;  %v3803_v15 = vld [vmem:[%s8502_s3 + $0x470] sm:$0xf0]  ;;  %v5596_v16 = vld [vmem:[%s8502_s3 + $0x564] sm:$0xf]  ;;  %v4206_v30 = vor.u32 %v5664_v10, %v4203_v12  ;;  %v331_v34 = vperm.slane %v328_v13, 1  ;;  %v327_v38 = vmul.f32 %v319_v18, %v313_v32  ;;  %v311_v40 = vld [vmem:[%s299_s16 + $0x8] sm:$0xff] }
  0x3a   : > { %1377 = vmatpush.bf16.msrb.mxu0 %v3854_v52  ;;  %v3931_v23 = vld [vmem:[%s8502_s3 + $0x570] sm:$0xf0]  ;;  %v5628_v24 = vld [vmem:[%s8502_s3 + $0x664] sm:$0xf]  ;;  %v3806_v41 = vor.u32 %v5564_v14, %v3803_v15  ;;  %v325_v46 = vmul.f32 %v317_v29, %v311_v40  ;;  %v5647_v40 = vld [vmem:[%s8502_s3 + $0x6f4] sm:$0xf0] }
  0x3b   : > { %1390 = vmatpush.bf16.msrb.mxu1 %v3982_v55  ;;  %v4059_v25 = vld [vmem:[%s8502_s3 + $0x670] sm:$0xf0]  ;;  %v310_v33 = vld [vmem:[%s299_s16] sm:$0xff]  ;;  %v3934_v42 = vor.u32 %v5596_v16, %v3931_v23  ;;  %v341_v51 = vadd.f32 %v333_v27, %v327_v38 }
  0x3c   : > { %1403 = vmatpush.bf16.msrb.mxu2 %v4110_v56  ;;  %v312_v31 = vld [vmem:[%s299_s16 + $0x10] sm:$0xff]  ;;  %v5660_v35 = vld [vmem:[%s8502_s3 + $0x764] sm:$0xf]  ;;  %v324_v39 = vmul.f32 %v316_v19, %v310_v33  ;;  %v4062_v43 = vor.u32 %v5628_v24, %v4059_v25  ;;  %v339_v57 = vadd.f32 %v331_v34, %v325_v46 }
  0x3d   : > { %1416 = vmatpush.bf16.msrb.mxu3 %v4238_v60  ;;  %v4187_v36 = vld [vmem:[%s8502_s3 + $0x770] sm:$0xf0]  ;;  %v326_v37 = vmul.f32 %v318_v17, %v312_v31  ;;  %v5560_v44 = vld [vmem:[%s8502_s3 + $0x444] sm:$0xf]  ;;  %v345_v59 = vmax.f32 %v341_v51, 0.0 }
  0x3e   : > { %1378 = vmatpush.bf16.msrb.mxu0 %v3838_v3  ;;  %v3787_v45 = vld [vmem:[%s8502_s3 + $0x450] sm:$0xf0]  ;;  %v5592_v47 = vld [vmem:[%s8502_s3 + $0x544] sm:$0xf]  ;;  %v338_v52 = vadd.f32 %v330_v28, %v324_v39  ;;  %v4190_v53 = vor.u32 %v5660_v35, %v4187_v36  ;;  %v4129_v35 = vld [vmem:[%s8502_s3 + $0x6e8] sm:$0xf] }
  0x3f   : > { %1391 = vmatpush.bf16.msrb.mxu1 %v3966_v6  ;;  %v3915_v48 = vld [vmem:[%s8502_s3 + $0x550] sm:$0xf0]  ;;  %v5624_v49 = vld [vmem:[%s8502_s3 + $0x644] sm:$0xf]  ;;  %v340_v50 = vadd.f32 %v332_v26, %v326_v37  ;;  %v3790_v62 = vor.u32 %v5560_v44, %v3787_v45  ;;  %v362_v5 = vrot.slane %v345_v59, 7 }
  0x40   : > { %1404 = vmatpush.bf16.msrb.mxu2 %v4094_v7  ;;  %v4043_v54 = vld [vmem:[%s8502_s3 + $0x650] sm:$0xf0]  ;;  %v5656_v55 = vld [vmem:[%s8502_s3 + $0x744] sm:$0xf]  ;;  %v342_v61 = vmax.f32 %v338_v52, 0.0  ;;  %v3918_v63 = vor.u32 %v5592_v47, %v3915_v48  ;;  %v343_v7 = vmax.f32 %v339_v57, 0.0  ;;  %v4130_v52 = vor.u32 %v5647_v40, %v4129_v35 }
  0x41   : > { %1417 = vmatpush.bf16.msrb.mxu3 %v4222_v11  ;;  %v4171_v56 = vld [vmem:[%s8502_s3 + $0x750] sm:$0xf0]  ;;  %v344_v58 = vmax.f32 %v340_v50, 0.0  ;;  %v5556_v60 = vld [vmem:[%s8502_s3 + $0x424] sm:$0xf]  ;;  %v4046_v3 = vor.u32 %v5624_v49, %v4043_v54 }
  0x42   : > { %1379 = vmatpush.bf16.msrb.mxu0 %v3822_v20  ;;  %v3771_v0 = vld [vmem:[%s8502_s3 + $0x430] sm:$0xf0]  ;;  %v5588_v1 = vld [vmem:[%s8502_s3 + $0x524] sm:$0xf]  ;;  %v4174_v8 = vor.u32 %v5656_v55, %v4171_v56  ;;  %v359_v12 = vrot.slane %v342_v61, 7  ;;  %v360_v19 = vrot.slane %v343_v7, 7 }
  0x43   : > { %1392 = vmatpush.bf16.msrb.mxu1 %v3950_v21  ;;  %v3899_v2 = vld [vmem:[%s8502_s3 + $0x530] sm:$0xf0]  ;;  %v361_v4 = vrot.slane %v344_v58, 7  ;;  %v5620_v6 = vld [vmem:[%s8502_s3 + $0x624] sm:$0xf]  ;;  %v3774_v14 = vor.u32 %v5556_v60, %v3771_v0 }
  0x44   : > { %1405 = vmatpush.bf16.msrb.mxu2 %v4078_v22  ;;  %v4027_v9 = vld [vmem:[%s8502_s3 + $0x630] sm:$0xf0]  ;;  %v5652_v10 = vld [vmem:[%s8502_s3 + $0x724] sm:$0xf]  ;;  %370 = vst [vmem:[#allocation2 + $0x18] sm:$0xfe] %v362_v5  ;;  %v3902_v17 = vor.u32 %v5588_v1, %v3899_v2 }
  0x45   : > { %1418 = vmatpush.bf16.msrb.mxu3 %v4206_v30  ;;  %v4155_v11 = vld [vmem:[%s8502_s3 + $0x730] sm:$0xf0]  ;;  %369 = vst [vmem:[#allocation2 + $0x10] sm:$0xfe] %v361_v4  ;;  %v5552_v13 = vld [vmem:[%s8502_s3 + $0x404] sm:$0xf]  ;;  %v4030_v18 = vor.u32 %v5620_v6, %v4027_v9 }
  0x46   : > { %1380 = vmatpush.bf16.msrb.mxu0 %v3806_v41  ;;  %373 = vst [vmem:[#allocation2 + $0x30] sm:$0x1] %v361_v4  ;;  %v3755_v15 = vld [vmem:[%s8502_s3 + $0x410] sm:$0xf0]  ;;  %v5584_v16 = vld [vmem:[%s8502_s3 + $0x504] sm:$0xf]  ;;  %v4158_v21 = vor.u32 %v5652_v10, %v4155_v11 }
  0x47   : > { %1393 = vmatpush.bf16.msrb.mxu1 %v3934_v42  ;;  %v3883_v20 = vld [vmem:[%s8502_s3 + $0x510] sm:$0xf0]  ;;  %374 = vst [vmem:[#allocation2 + $0x38] sm:$0x1] %v362_v5  ;;  %v5616_v22 = vld [vmem:[%s8502_s3 + $0x604] sm:$0xf]  ;;  %v3758_v26 = vor.u32 %v5552_v13, %v3755_v15 }
  0x48   : > { %1406 = vmatpush.bf16.msrb.mxu2 %v4062_v43  ;;  %v4011_v23 = vld [vmem:[%s8502_s3 + $0x610] sm:$0xf0]  ;;  %367 = vst [vmem:[#allocation2] sm:$0xfe] %v359_v12  ;;  %v5648_v24 = vld [vmem:[%s8502_s3 + $0x704] sm:$0xf]  ;;  %v3886_v27 = vor.u32 %v5584_v16, %v3883_v20 }
  0x49   : > { %1419 = vmatpush.bf16.msrb.mxu3 %v4190_v53  ;;  %v4139_v25 = vld [vmem:[%s8502_s3 + $0x710] sm:$0xf0]  ;;  %371 = vst [vmem:[#allocation2 + $0x20] sm:$0x1] %v359_v12  ;;  %v4014_v28 = vor.u32 %v5616_v22, %v4011_v23  ;;  %v4257_v42 = vld [vmem:[%s8502_s3 + $0x7e8] sm:$0xf] }
  0x4a   : > { %1381 = vmatpush.bf16.msrb.mxu0 %v3790_v62  ;;  %368 = vst [vmem:[#allocation2 + $0x8] sm:$0xfe] %v360_v19  ;;  %v4142_v30 = vor.u32 %v5648_v24, %v4139_v25  ;;  %v5679_v43 = vld [vmem:[%s8502_s3 + $0x7f4] sm:$0xf0]  ;;  %v3873_v49 = vld [vmem:[%s8502_s3 + $0x4e8] sm:$0xf] }
  0x4b   : > { %1394 = vmatpush.bf16.msrb.mxu1 %v3918_v63  ;;  %372 = vst [vmem:[#allocation2 + $0x28] sm:$0x1] %v360_v19  ;;  %v514_v33 = vld [vmem:[#allocation2 + $0x18] sm:$0xfe]  ;;  %v4113_v53 = vld [vmem:[%s8502_s3 + $0x6c8] sm:$0xf]  ;;  %v4258_v61 = vor.u32 %v5679_v43, %v4257_v42 }
  0x4c   : > { %1407 = vmatpush.bf16.msrb.mxu2 %v4046_v3  ;;  %v513_v29 = vld [vmem:[#allocation2 + $0x10] sm:$0xfe]  ;;  %v5583_v51 = vld [vmem:[%s8502_s3 + $0x4f4] sm:$0xf0]  ;;  %v4001_v60 = vld [vmem:[%s8502_s3 + $0x5e8] sm:$0xf] }
  0x4d   : > { %1420 = vmatpush.bf16.msrb.mxu3 %v4174_v8  ;;  %v517_v31 = vld [vmem:[#allocation2 + $0x30] sm:$0x1]  ;;  %v5643_v58 = vld [vmem:[%s8502_s3 + $0x6d4] sm:$0xf0]  ;;  %v4241_v0 = vld [vmem:[%s8502_s3 + $0x7c8] sm:$0xf]  ;;  %v3874_v4 = vor.u32 %v5583_v51, %v3873_v49 }
  0x4e   : > { %1382 = vmatpush.bf16.msrb.mxu0 %v3774_v14  ;;  %v521_v32 = vpack.c.bf16 %v517_v31, %v513_v29  ;;  %v518_v34 = vld [vmem:[#allocation2 + $0x38] sm:$0x1]  ;;  %v3857_v6 = vld [vmem:[%s8502_s3 + $0x4c8] sm:$0xf]  ;;  %v4114_v7 = vor.u32 %v5643_v58, %v4113_v53 }
  0x4f   : > { %1395 = vmatpush.bf16.msrb.mxu1 %v3902_v17  ;;  %v522_v38 = vpack.c.bf16 %v518_v34, %v514_v33  ;;  %v511_v39 = vld [vmem:[#allocation2] sm:$0xfe]  ;;  %v5675_v1 = vld [vmem:[%s8502_s3 + $0x7d4] sm:$0xf0]  ;;  %v4097_v10 = vld [vmem:[%s8502_s3 + $0x6a8] sm:$0xf] }
  0x50   : > { %1408 = vmatpush.bf16.msrb.mxu2 %v4030_v18  ;;  %v667_v36 = vshrl.u32 %v521_v32, 16  ;;  %v669_v37 = vshll.u32 %v521_v32, 16  ;;  %v515_v41 = vld [vmem:[#allocation2 + $0x20] sm:$0x1]  ;;  %v5615_v5 = vld [vmem:[%s8502_s3 + $0x5f4] sm:$0xf0]  ;;  %v4242_v13 = vor.u32 %v5675_v1, %v4241_v0 }
  0x51   : > { %1421 = vmatpush.bf16.msrb.mxu3 %v4158_v21  ;;  %v674_v45 = vshrl.u32 %v522_v38, 16  ;;  %v676_v46 = vshll.u32 %v522_v38, 16  ;;  %v519_v47 = vpack.c.bf16 %v515_v41, %v511_v39  ;;  %v512_v48 = vld [vmem:[#allocation2 + $0x8] sm:$0xfe]  ;;  %v5579_v9 = vld [vmem:[%s8502_s3 + $0x4d4] sm:$0xf0]  ;;  %v4002_v14 = vor.u32 %v5615_v5, %v4001_v60 }
  0x52   : > { %1383 = vmatpush.bf16.msrb.mxu0 %v3758_v26  ;;  %v671_v44 = vrot.slane %v669_v37, 1  ;;  %v516_v50 = vld [vmem:[#allocation2 + $0x28] sm:$0x1]  ;;  %v5639_v11 = vld [vmem:[%s8502_s3 + $0x6b4] sm:$0xf0]  ;;  %v3858_v18 = vor.u32 %v5579_v9, %v3857_v6 }
  0x53   : > { %1396 = vmatpush.bf16.msrb.mxu1 %v3886_v27  ;;  %v678_v55 = vrot.slane %v676_v46, 1  ;;  %v653_v56 = vshrl.u32 %v519_v47, 16  ;;  %v655_v57 = vshll.u32 %v519_v47, 16  ;;  %v520_v59 = vpack.c.bf16 %v516_v50, %v512_v48  ;;  %v4225_v15 = vld [vmem:[%s8502_s3 + $0x7a8] sm:$0xf] }
  0x54   : > { %1409 = vmatpush.bf16.msrb.mxu2 %v4014_v28  ;;  %v6421_v54 = vor.u32 %v671_v44, %v667_v36  ;;  %v5671_v16 = vld [vmem:[%s8502_s3 + $0x7b4] sm:$0xf0]  ;;  %v3985_v19 = vld [vmem:[%s8502_s3 + $0x5c8] sm:$0xf]  ;;  %v4098_v22 = vor.u32 %v5639_v11, %v4097_v10 }
  0x55   : > { %1422 = vmatpush.bf16.msrb.mxu3 %v4142_v30  ;;  %v6430_v62 = vor.u32 %v678_v55, %v674_v45  ;;  %v657_v63 = vrot.slane %v655_v57, 1  ;;  %v660_v2 = vshrl.u32 %v520_v59, 16  ;;  %v662_v3 = vshll.u32 %v520_v59, 16  ;;  %v5611_v20 = vld [vmem:[%s8502_s3 + $0x5d4] sm:$0xf0] }
  0x56   : > { %1358 = vmatmul.bf16.vlgmr.msra.gmra.mxu2 %v6421_v54  ;;  %v3841_v21 = vld [vmem:[%s8502_s3 + $0x4a8] sm:$0xf]  ;;  %v5575_v23 = vld [vmem:[%s8502_s3 + $0x4b4] sm:$0xf0]  ;;  %v4226_v26 = vor.u32 %v5671_v16, %v4225_v15  ;;  %v3986_v27 = vor.u32 %v5611_v20, %v3985_v19  ;;  %v4131_v15 = vld [vmem:[%s8502_s3 + $0x6f8] sm:$0xf0] }
  0x57   : > { %1371 = vmatmul.bf16.vlgmr.msra.gmra.mxu3 %v6430_v62  ;;  %v6445_v8 = vor.u32 %v657_v63, %v653_v56  ;;  %v664_v12 = vrot.slane %v662_v3, 1  ;;  %v4081_v24 = vld [vmem:[%s8502_s3 + $0x688] sm:$0xf]  ;;  %v5635_v25 = vld [vmem:[%s8502_s3 + $0x694] sm:$0xf0]  ;;  %v3842_v30 = vor.u32 %v5575_v23, %v3841_v21 }
  0x58   : > { %1454 = vmatpush.bf16.msra.mxu2 %v4130_v52  ;;  %v4209_v28 = vld [vmem:[%s8502_s3 + $0x788] sm:$0xf]  ;;  %v5667_v29 = vld [vmem:[%s8502_s3 + $0x794] sm:$0xf0]  ;;  %v4082_v34 = vor.u32 %v5635_v25, %v4081_v24  ;;  %v5677_v24 = vld [vmem:[%s8502_s3 + $0x7ec] sm:$0xf] }
  0x59   : > { %1467 = vmatpush.bf16.msra.mxu3 %v4258_v61  ;;  %1332 = vmatmul.bf16.vlgmr.msra.gmra.mxu0 %v6445_v8  ;;  %v6463_v17 = vor.u32 %v664_v12, %v660_v2  ;;  %v3969_v31 = vld [vmem:[%s8502_s3 + $0x5a8] sm:$0xf]  ;;  %v5607_v32 = vld [vmem:[%s8502_s3 + $0x5b4] sm:$0xf0]  ;;  %v4210_v38 = vor.u32 %v5667_v29, %v4209_v28  ;;  %v4259_v25 = vld [vmem:[%s8502_s3 + $0x7f8] sm:$0xf0] }
  0x5a   : > { %1428 = vmatpush.bf16.msra.mxu0 %v3874_v4  ;;  %v3825_v33 = vld [vmem:[%s8502_s3 + $0x488] sm:$0xf]  ;;  %v5571_v35 = vld [vmem:[%s8502_s3 + $0x494] sm:$0xf0]  ;;  %v3970_v39 = vor.u32 %v5607_v32, %v3969_v31  ;;  %v5581_v28 = vld [vmem:[%s8502_s3 + $0x4ec] sm:$0xf] }
  0x5b   : > { %1345 = vmatmul.bf16.vlgmr.msra.gmra.mxu1 %v6463_v17  ;;  %v4065_v36 = vld [vmem:[%s8502_s3 + $0x668] sm:$0xf]  ;;  %v5631_v37 = vld [vmem:[%s8502_s3 + $0x674] sm:$0xf0]  ;;  %v3826_v42 = vor.u32 %v5571_v35, %v3825_v33  ;;  %v3875_v31 = vld [vmem:[%s8502_s3 + $0x4f8] sm:$0xf0] }
  0x5c   : > { %1455 = vmatpush.bf16.msra.mxu2 %v4114_v7  ;;  %1441 = vmatpush.bf16.msra.mxu1 %v4002_v14  ;;  %v4193_v40 = vld [vmem:[%s8502_s3 + $0x768] sm:$0xf]  ;;  %v5663_v41 = vld [vmem:[%s8502_s3 + $0x774] sm:$0xf0]  ;;  %v4066_v46 = vor.u32 %v5631_v37, %v4065_v36  ;;  %v5645_v14 = vld [vmem:[%s8502_s3 + $0x6ec] sm:$0xf]  ;;  %v4262_v36 = vor.u32 %v5677_v24, %v4259_v25 }
  0x5d   : > { %1468 = vmatpush.bf16.msra.mxu3 %v4242_v13  ;;  %v3953_v43 = vld [vmem:[%s8502_s3 + $0x588] sm:$0xf]  ;;  %v5603_v44 = vld [vmem:[%s8502_s3 + $0x594] sm:$0xf0]  ;;  %v4194_v50 = vor.u32 %v5663_v41, %v4193_v40  ;;  %v4134_v29 = vor.u32 %v5645_v14, %v4131_v15  ;;  %v5641_v32 = vld [vmem:[%s8502_s3 + $0x6cc] sm:$0xf]  ;;  %v3878_v41 = vor.u32 %v5581_v28, %v3875_v31 }
  0x5e   : > { %1429 = vmatpush.bf16.msra.mxu0 %v3858_v18  ;;  %v3809_v45 = vld [vmem:[%s8502_s3 + $0x468] sm:$0xf]  ;;  %v5567_v47 = vld [vmem:[%s8502_s3 + $0x474] sm:$0xf0]  ;;  %v3954_v51 = vor.u32 %v5603_v44, %v3953_v43  ;;  %v4115_v33 = vld [vmem:[%s8502_s3 + $0x6d8] sm:$0xf0] }
  0x5f   : > { %v4049_v48 = vld [vmem:[%s8502_s3 + $0x648] sm:$0xf]  ;;  %v5627_v49 = vld [vmem:[%s8502_s3 + $0x654] sm:$0xf0]  ;;  %v3810_v55 = vor.u32 %v5567_v47, %v3809_v45  ;;  %v4243_v40 = vld [vmem:[%s8502_s3 + $0x7d8] sm:$0xf0]  ;;  %v4118_v45 = vor.u32 %v5641_v32, %v4115_v33 }
  0x60   : > { %1456 = vmatpush.bf16.msra.mxu2 %v4098_v22  ;;  %1442 = vmatpush.bf16.msra.mxu1 %v3986_v27  ;;  %v4177_v52 = vld [vmem:[%s8502_s3 + $0x748] sm:$0xf]  ;;  %v5659_v53 = vld [vmem:[%s8502_s3 + $0x754] sm:$0xf0]  ;;  %v4050_v59 = vor.u32 %v5627_v49, %v4049_v48  ;;  %v4003_v43 = vld [vmem:[%s8502_s3 + $0x5f8] sm:$0xf0] }
  0x61   : > { %1469 = vmatpush.bf16.msra.mxu3 %v4226_v26  ;;  %v3937_v56 = vld [vmem:[%s8502_s3 + $0x568] sm:$0xf]  ;;  %v5599_v57 = vld [vmem:[%s8502_s3 + $0x574] sm:$0xf0]  ;;  %v4178_v0 = vor.u32 %v5659_v53, %v4177_v52  ;;  %v5577_v44 = vld [vmem:[%s8502_s3 + $0x4cc] sm:$0xf] }
  0x62   : > { %1430 = vmatpush.bf16.msra.mxu0 %v3842_v30  ;;  %v3793_v58 = vld [vmem:[%s8502_s3 + $0x448] sm:$0xf]  ;;  %v5563_v60 = vld [vmem:[%s8502_s3 + $0x454] sm:$0xf0]  ;;  %v3938_v1 = vor.u32 %v5599_v57, %v3937_v56  ;;  %v5637_v47 = vld [vmem:[%s8502_s3 + $0x6ac] sm:$0xf] }
  0x63   : > { %v4033_v61 = vld [vmem:[%s8502_s3 + $0x628] sm:$0xf]  ;;  %v5623_v63 = vld [vmem:[%s8502_s3 + $0x634] sm:$0xf0]  ;;  %v3794_v4 = vor.u32 %v5563_v60, %v3793_v58  ;;  %v4099_v48 = vld [vmem:[%s8502_s3 + $0x6b8] sm:$0xf0] }
  0x64   : > { %1457 = vmatpush.bf16.msra.mxu2 %v4082_v34  ;;  %1443 = vmatpush.bf16.msra.mxu1 %v3970_v39  ;;  %v4161_v2 = vld [vmem:[%s8502_s3 + $0x728] sm:$0xf]  ;;  %v5655_v3 = vld [vmem:[%s8502_s3 + $0x734] sm:$0xf0]  ;;  %v4034_v9 = vor.u32 %v5623_v63, %v4033_v61  ;;  %v5673_v39 = vld [vmem:[%s8502_s3 + $0x7cc] sm:$0xf] }
  0x65   : > { %1470 = vmatpush.bf16.msra.mxu3 %v4210_v38  ;;  %v3921_v5 = vld [vmem:[%s8502_s3 + $0x548] sm:$0xf]  ;;  %v5595_v6 = vld [vmem:[%s8502_s3 + $0x554] sm:$0xf0]  ;;  %v4162_v13 = vor.u32 %v5655_v3, %v4161_v2  ;;  %v5669_v52 = vld [vmem:[%s8502_s3 + $0x7ac] sm:$0xf] }
  0x66   : > { %1410 = vmatmul.bf16.vlgmr.msrb.gmra.mxu2 %v6421_v54  ;;  %1431 = vmatpush.bf16.msra.mxu0 %v3826_v42  ;;  %v3777_v7 = vld [vmem:[%s8502_s3 + $0x428] sm:$0xf]  ;;  %v5559_v10 = vld [vmem:[%s8502_s3 + $0x434] sm:$0xf0]  ;;  %v3922_v16 = vor.u32 %v5595_v6, %v3921_v5  ;;  %v5613_v42 = vld [vmem:[%s8502_s3 + $0x5ec] sm:$0xf] }
  0x67   : > { %1423 = vmatmul.bf16.vlgmr.msrb.gmra.mxu3 %v6430_v62  ;;  %v4017_v11 = vld [vmem:[%s8502_s3 + $0x608] sm:$0xf]  ;;  %v5619_v12 = vld [vmem:[%s8502_s3 + $0x614] sm:$0xf0]  ;;  %v3778_v21 = vor.u32 %v5559_v10, %v3777_v7  ;;  %v4227_v53 = vld [vmem:[%s8502_s3 + $0x7b8] sm:$0xf0] }
  0x68   : > { %1458 = vmatpush.bf16.msra.mxu2 %v4066_v46  ;;  %1444 = vmatpush.bf16.msra.mxu1 %v3954_v51  ;;  %v3905_v18 = vld [vmem:[%s8502_s3 + $0x528] sm:$0xf]  ;;  %v5651_v20 = vld [vmem:[%s8502_s3 + $0x714] sm:$0xf0]  ;;  %v4018_v23 = vor.u32 %v5619_v12, %v4017_v11  ;;  %v3859_v46 = vld [vmem:[%s8502_s3 + $0x4d8] sm:$0xf0]  ;;  %v4006_v51 = vor.u32 %v5613_v42, %v4003_v43 }
  0x69   : > { %1471 = vmatpush.bf16.msra.mxu3 %v4194_v50  ;;  %1384 = vmatmul.bf16.vlgmr.msrb.gmra.mxu0 %v6445_v8  ;;  %v4145_v19 = vld [vmem:[%s8502_s3 + $0x708] sm:$0xf]  ;;  %v5591_v22 = vld [vmem:[%s8502_s3 + $0x534] sm:$0xf0]  ;;  %v4246_v50 = vor.u32 %v5673_v39, %v4243_v40  ;;  %v5609_v56 = vld [vmem:[%s8502_s3 + $0x5cc] sm:$0xf] }
  0x6a   : > { %1432 = vmatpush.bf16.msra.mxu0 %v3810_v55  ;;  %v3761_v26 = vld [vmem:[%s8502_s3 + $0x408] sm:$0xf]  ;;  %v5555_v27 = vld [vmem:[%s8502_s3 + $0x414] sm:$0xf0]  ;;  %v4146_v30 = vor.u32 %v5651_v20, %v4145_v19  ;;  %v3906_v34 = vor.u32 %v5591_v22, %v3905_v18  ;;  %v3862_v55 = vor.u32 %v5577_v44, %v3859_v46  ;;  %v3987_v57 = vld [vmem:[%s8502_s3 + $0x5d8] sm:$0xf0] }
  0x6b   : > { %1397 = vmatmul.bf16.vlgmr.msrb.gmra.mxu1 %v6463_v17  ;;  %v3889_v35 = vld [vmem:[%s8502_s3 + $0x508] sm:$0xf]  ;;  %v3762_v37 = vor.u32 %v5555_v27, %v3761_v26  ;;  %v5587_v38 = vld [vmem:[%s8502_s3 + $0x514] sm:$0xf0]  ;;  %v5573_v58 = vld [vmem:[%s8502_s3 + $0x4ac] sm:$0xf] }
  0x6c   : > { %1459 = vmatpush.bf16.msra.mxu2 %v4050_v59  ;;  %1445 = vmatpush.bf16.msra.mxu1 %v3938_v1  ;;  %v3890_v49 = vor.u32 %v5587_v38, %v3889_v35  ;;  %v4102_v59 = vor.u32 %v5637_v47, %v4099_v48  ;;  %v3843_v60 = vld [vmem:[%s8502_s3 + $0x4b8] sm:$0xf0]  ;;  %v5633_v61 = vld [vmem:[%s8502_s3 + $0x68c] sm:$0xf]  ;;  %v3990_v1 = vor.u32 %v5609_v56, %v3987_v57 }
  0x6d   : > { %1472 = vmatpush.bf16.msra.mxu3 %v4178_v0  ;;  %v4083_v63 = vld [vmem:[%s8502_s3 + $0x698] sm:$0xf0]  ;;  %v4230_v0 = vor.u32 %v5669_v52, %v4227_v53  ;;  %v5665_v2 = vld [vmem:[%s8502_s3 + $0x78c] sm:$0xf]  ;;  %v5518_v52 = vld [vmem:[%s8502_s3 + $0x2ec] sm:$0xf0] }
  0x6e   : > { %1433 = vmatpush.bf16.msra.mxu0 %v3794_v4  ;;  %v4211_v3 = vld [vmem:[%s8502_s3 + $0x798] sm:$0xf0]  ;;  %v3846_v4 = vor.u32 %v5573_v58, %v3843_v60  ;;  %v5605_v5 = vld [vmem:[%s8502_s3 + $0x5ac] sm:$0xf] }
  0x6f   : > { %v3971_v6 = vld [vmem:[%s8502_s3 + $0x5b8] sm:$0xf0]  ;;  %v5569_v7 = vld [vmem:[%s8502_s3 + $0x48c] sm:$0xf] }
  0x70   : > { %1460 = vmatpush.bf16.msra.mxu2 %v4034_v9  ;;  %1446 = vmatpush.bf16.msra.mxu1 %v3922_v16  ;;  %v4086_v9 = vor.u32 %v5633_v61, %v4083_v63  ;;  %v3827_v10 = vld [vmem:[%s8502_s3 + $0x498] sm:$0xf0]  ;;  %v5629_v11 = vld [vmem:[%s8502_s3 + $0x66c] sm:$0xf]  ;;  %v3974_v14 = vor.u32 %v5605_v5, %v3971_v6  ;;  %v4761_v61 = vld [vmem:[%s8502_s3 + $0x3e0] sm:$0xf] }
  0x71   : > { %1473 = vmatpush.bf16.msra.mxu3 %v4162_v13  ;;  %v4067_v12 = vld [vmem:[%s8502_s3 + $0x678] sm:$0xf0]  ;;  %v4214_v13 = vor.u32 %v5665_v2, %v4211_v3  ;;  %v5661_v15 = vld [vmem:[%s8502_s3 + $0x76c] sm:$0xf]  ;;  %v3830_v18 = vor.u32 %v5569_v7, %v3827_v10  ;;  %v5550_v63 = vld [vmem:[%s8502_s3 + $0x3ec] sm:$0xf0] }
  0x72   : > { %1434 = vmatpush.bf16.msra.mxu0 %v3778_v21  ;;  %v4195_v16 = vld [vmem:[%s8502_s3 + $0x778] sm:$0xf0]  ;;  %v5601_v19 = vld [vmem:[%s8502_s3 + $0x58c] sm:$0xf]  ;;  %v4070_v22 = vor.u32 %v5629_v11, %v4067_v12  ;;  %v4377_v2 = vld [vmem:[%s8502_s3 + $0xe0] sm:$0xf] }
  0x73   : > { %v3955_v20 = vld [vmem:[%s8502_s3 + $0x598] sm:$0xf0]  ;;  %v5565_v21 = vld [vmem:[%s8502_s3 + $0x46c] sm:$0xf]  ;;  %v4198_v26 = vor.u32 %v5661_v15, %v4195_v16  ;;  %v5454_v6 = vld [vmem:[%s8502_s3 + $0xec] sm:$0xf0] }
  0x74   : > { %1461 = vmatpush.bf16.msra.mxu2 %v4018_v23  ;;  %1447 = vmatpush.bf16.msra.mxu1 %v3906_v34  ;;  %v3811_v23 = vld [vmem:[%s8502_s3 + $0x478] sm:$0xf0]  ;;  %v5625_v24 = vld [vmem:[%s8502_s3 + $0x64c] sm:$0xf]  ;;  %v3958_v27 = vor.u32 %v5601_v19, %v3955_v20  ;;  %v4617_v7 = vld [vmem:[%s8502_s3 + $0x2c0] sm:$0xf]  ;;  %v4378_v19 = vor.u32 %v5454_v6, %v4377_v2 }
  0x75   : > { %1474 = vmatpush.bf16.msra.mxu3 %v4146_v30  ;;  %v4051_v25 = vld [vmem:[%s8502_s3 + $0x658] sm:$0xf0]  ;;  %v5657_v28 = vld [vmem:[%s8502_s3 + $0x74c] sm:$0xf]  ;;  %v3814_v30 = vor.u32 %v5565_v21, %v3811_v23  ;;  %v4745_v15 = vld [vmem:[%s8502_s3 + $0x3c0] sm:$0xf] }
  0x76   : > { %1435 = vmatpush.bf16.msra.mxu0 %v3762_v37  ;;  %v5597_v31 = vld [vmem:[%s8502_s3 + $0x56c] sm:$0xf]  ;;  %v3939_v32 = vld [vmem:[%s8502_s3 + $0x578] sm:$0xf0]  ;;  %v4054_v34 = vor.u32 %v5625_v24, %v4051_v25  ;;  %v5546_v16 = vld [vmem:[%s8502_s3 + $0x3cc] sm:$0xf0] }
  0x77   : > { %1462 = vmatmul.bf16.vlgmr.msra.gmra.mxu2 %v6421_v54  ;;  %v5561_v33 = vld [vmem:[%s8502_s3 + $0x44c] sm:$0xf]  ;;  %v3795_v35 = vld [vmem:[%s8502_s3 + $0x458] sm:$0xf0]  ;;  %v3942_v39 = vor.u32 %v5597_v31, %v3939_v32  ;;  %v4505_v20 = vld [vmem:[%s8502_s3 + $0x1e0] sm:$0xf] }
  0x78   : > { %1506 = vmatpush.bf16.msrb.mxu2 %v4134_v29  ;;  %1475 = vmatmul.bf16.vlgmr.msra.gmra.mxu3 %v6430_v62  ;;  %v4179_v29 = vld [vmem:[%s8502_s3 + $0x758] sm:$0xf0]  ;;  %v5653_v40 = vld [vmem:[%s8502_s3 + $0x72c] sm:$0xf]  ;;  %v3798_v42 = vor.u32 %v5561_v33, %v3795_v35  ;;  %v5486_v21 = vld [vmem:[%s8502_s3 + $0x1ec] sm:$0xf0] }
  0x79   : > { %1519 = vmatpush.bf16.msrb.mxu3 %v4262_v36  ;;  %1448 = vmatpush.bf16.msra.mxu1 %v3890_v49  ;;  %v5621_v36 = vld [vmem:[%s8502_s3 + $0x62c] sm:$0xf]  ;;  %v4035_v37 = vld [vmem:[%s8502_s3 + $0x638] sm:$0xf0]  ;;  %v4182_v38 = vor.u32 %v5657_v28, %v4179_v29  ;;  %v5450_v24 = vld [vmem:[%s8502_s3 + $0xcc] sm:$0xf0]  ;;  %v4746_v28 = vor.u32 %v5546_v16, %v4745_v15 }
  0x7a   : > { %1480 = vmatpush.bf16.msrb.mxu0 %v3878_v41  ;;  %v4163_v41 = vld [vmem:[%s8502_s3 + $0x738] sm:$0xf0]  ;;  %v5593_v43 = vld [vmem:[%s8502_s3 + $0x54c] sm:$0xf]  ;;  %v4038_v46 = vor.u32 %v5621_v36, %v4035_v37  ;;  %v4601_v25 = vld [vmem:[%s8502_s3 + $0x2a0] sm:$0xf] }
  0x7b   : > { %1436 = vmatmul.bf16.vlgmr.msra.gmra.mxu0 %v6445_v8  ;;  %v3923_v44 = vld [vmem:[%s8502_s3 + $0x558] sm:$0xf0]  ;;  %v5617_v48 = vld [vmem:[%s8502_s3 + $0x60c] sm:$0xf]  ;;  %v5913_v29 = vmov 0.0  }
  0x7c   : > { %1507 = vmatpush.bf16.msrb.mxu2 %v4118_v45  ;;  %1449 = vmatmul.bf16.vlgmr.msra.gmra.mxu1 %v6463_v17  ;;  %v5557_v45 = vld [vmem:[%s8502_s3 + $0x42c] sm:$0xf]  ;;  %v3779_v47 = vld [vmem:[%s8502_s3 + $0x438] sm:$0xf0]  ;;  %v3926_v53 = vor.u32 %v5593_v43, %v3923_v44  ;;  %v4729_v31 = vld [vmem:[%s8502_s3 + $0x3a0] sm:$0xf] }
  0x7d   : > { %1520 = vmatpush.bf16.msrb.mxu3 %v4246_v50  ;;  %1493 = vmatpush.bf16.msrb.mxu1 %v4006_v51  ;;  %v4019_v49 = vld [vmem:[%s8502_s3 + $0x618] sm:$0xf0]  ;;  %v4166_v50 = vor.u32 %v5653_v40, %v4163_v41  ;;  %v4633_v51 = vld [vmem:[%s8502_s3 + $0x2e0] sm:$0xf]  ;;  %v5649_v56 = vld [vmem:[%s8502_s3 + $0x70c] sm:$0xf]  ;;  %v3782_v58 = vor.u32 %v5557_v45, %v3779_v47 }
  0x7e   : > { %1481 = vmatpush.bf16.msrb.mxu0 %v3862_v55  ;;  %v5589_v55 = vld [vmem:[%s8502_s3 + $0x52c] sm:$0xf]  ;;  %v4147_v57 = vld [vmem:[%s8502_s3 + $0x718] sm:$0xf0]  ;;  %v4022_v60 = vor.u32 %v5617_v48, %v4019_v49  ;;  %v4634_v3 = vor.u32 %v5518_v52, %v4633_v51  ;;  %v5542_v32 = vld [vmem:[%s8502_s3 + $0x3ac] sm:$0xf0] }
  0x7f   : > { %v4150_v5 = vor.u32 %v5649_v56, %v4147_v57  ;;  %v5585_v11 = vld [vmem:[%s8502_s3 + $0x50c] sm:$0xf]  ;;  %v3891_v12 = vld [vmem:[%s8502_s3 + $0x518] sm:$0xf0]  ;;  %v5482_v35 = vld [vmem:[%s8502_s3 + $0x1cc] sm:$0xf0]  ;;  %v4730_v40 = vor.u32 %v5542_v32, %v4729_v31 }
  0x80   : > { %1508 = vmatpush.bf16.msrb.mxu2 %v4102_v59  ;;  %v3907_v59 = vld [vmem:[%s8502_s3 + $0x538] sm:$0xf0]  ;;  %v4345_v36 = vld [vmem:[%s8502_s3 + $0xa0] sm:$0xf]  ;;  %v5538_v43 = vld [vmem:[%s8502_s3 + $0x38c] sm:$0xf0] }
  0x81   : > { %1521 = vmatpush.bf16.msrb.mxu3 %v4230_v0  ;;  %1494 = vmatpush.bf16.msrb.mxu1 %v3990_v1  ;;  %v5553_v0 = vld [vmem:[%s8502_s3 + $0x40c] sm:$0xf]  ;;  %v3763_v1 = vld [vmem:[%s8502_s3 + $0x418] sm:$0xf0]  ;;  %v3910_v10 = vor.u32 %v5589_v55, %v3907_v59  ;;  %v4713_v41 = vld [vmem:[%s8502_s3 + $0x380] sm:$0xf] }
  0x82   : > { %1482 = vmatpush.bf16.msrb.mxu0 %v3846_v4  ;;  %v346_v4 = vlaneseq  ;;  %v4473_v44 = vld [vmem:[%s8502_s3 + $0x1a0] sm:$0xf]  ;;  %v5478_v45 = vld [vmem:[%s8502_s3 + $0x1ac] sm:$0xf0] }
  0x83   : > { %v4569_v48 = vld [vmem:[%s8502_s3 + $0x260] sm:$0xf]  ;;  %v5502_v49 = vld [vmem:[%s8502_s3 + $0x26c] sm:$0xf0]  ;;  %v4474_v51 = vor.u32 %v5478_v45, %v4473_v44 }
  0x84   : > { %1509 = vmatpush.bf16.msrb.mxu2 %v4086_v9  ;;  %v5514_v9 = vld [vmem:[%s8502_s3 + $0x2cc] sm:$0xf0]  ;;  %vm6834_vm0 = vcmp.lt.s32.totalorder %v346_v4, 512  ;;  %v4697_v52 = vld [vmem:[%s8502_s3 + $0x360] sm:$0xf] }
  0x85   : > { %1522 = vmatpush.bf16.msrb.mxu3 %v4214_v13  ;;  %1495 = vmatpush.bf16.msrb.mxu1 %v3974_v14  ;;  %v4762_v13 = vor.u32 %v5550_v63, %v4761_v61  ;;  %v3766_v14 = vor.u32 %v5553_v0, %v3763_v1  ;;  %v4618_v23 = vor.u32 %v5514_v9, %v4617_v7  ;;  %v4457_v56 = vld [vmem:[%s8502_s3 + $0x180] sm:$0xf]  ;;  %v5438_v59 = vld [vmem:[%s8502_s3 + $0x6c] sm:$0xf0] }
  0x86   : > { %1483 = vmatpush.bf16.msrb.mxu0 %v3830_v18  ;;  %350 = vst.msk [vmem:[#allocation2] ss:$8 sm:$0xf] %vm6834_vm0, %v5913_v29  ;;  %v4313_v57 = vld [vmem:[%s8502_s3 + $0x60] sm:$0xf] }
  0x87   : > { %353 = vst.msk [vmem:[#allocation2 + $0x21] ss:$8 sm:$0xf] %vm6834_vm0, %v5913_v29  ;;  %v5498_v61 = vld [vmem:[%s8502_s3 + $0x24c] sm:$0xf0] }
  0x88   : > { %1510 = vmatpush.bf16.msrb.mxu2 %v4070_v22  ;;  %v4361_v22 = vld [vmem:[%s8502_s3 + $0xc0] sm:$0xf]  ;;  %v5530_v2 = vld [vmem:[%s8502_s3 + $0x34c] sm:$0xf0] }
  0x89   : > { %1523 = vmatpush.bf16.msrb.mxu3 %v4198_v26  ;;  %1496 = vmatpush.bf16.msrb.mxu1 %v3958_v27  ;;  %v5510_v26 = vld [vmem:[%s8502_s3 + $0x2ac] sm:$0xf0]  ;;  %v3894_v27 = vor.u32 %v5585_v11, %v3891_v12  ;;  %v4362_v33 = vor.u32 %v5450_v24, %v4361_v22  ;;  %v4681_v1 = vld [vmem:[%s8502_s3 + $0x340] sm:$0xf] }
  0x8a   : > { %1484 = vmatpush.bf16.msrb.mxu0 %v3814_v30  ;;  %v4506_v30 = vor.u32 %v5486_v21, %v4505_v20  ;;  %v4602_v37 = vor.u32 %v5510_v26, %v4601_v25  ;;  %v4441_v4 = vld [vmem:[%s8502_s3 + $0x160] sm:$0xf]  ;;  %v5434_v9 = vld [vmem:[%s8502_s3 + $0x4c] sm:$0xf0]  ;;  %v4682_v12 = vor.u32 %v5530_v2, %v4681_v1  ;;  %v5508_v1 = vld [vmem:[%s8502_s3 + $0x2a4] sm:$0xf] }
  0x8b   : > { %v4297_v6 = vld [vmem:[%s8502_s3 + $0x40] sm:$0xf]  ;;  %v5494_v11 = vld [vmem:[%s8502_s3 + $0x22c] sm:$0xf0]  ;;  %v4603_v2 = vld [vmem:[%s8502_s3 + $0x2b0] sm:$0xf0] }
  0x8c   : > { %1511 = vmatpush.bf16.msrb.mxu2 %v4054_v34  ;;  %v4489_v34 = vld [vmem:[%s8502_s3 + $0x1c0] sm:$0xf]  ;;  %v5526_v15 = vld [vmem:[%s8502_s3 + $0x32c] sm:$0xf0]  ;;  %v4298_v16 = vor.u32 %v5434_v9, %v4297_v6  ;;  %v5540_v9 = vld [vmem:[%s8502_s3 + $0x3a4] sm:$0xf] }
  0x8d   : > { %1524 = vmatpush.bf16.msrb.mxu3 %v4182_v38  ;;  %1497 = vmatpush.bf16.msrb.mxu1 %v3942_v39  ;;  %v4585_v38 = vld [vmem:[%s8502_s3 + $0x280] sm:$0xf]  ;;  %v5506_v39 = vld [vmem:[%s8502_s3 + $0x28c] sm:$0xf0] }
  0x8e   : > { %1485 = vmatpush.bf16.msrb.mxu0 %v3798_v42  ;;  %v4490_v42 = vor.u32 %v5482_v35, %v4489_v34  ;;  %v4586_v47 = vor.u32 %v5506_v39, %v4585_v38  ;;  %v5466_v20 = vld [vmem:[%s8502_s3 + $0x14c] sm:$0xf0]  ;;  %v4281_v21 = vld [vmem:[%s8502_s3 + $0x20] sm:$0xf] }
  0x8f   : > { %v4521_v24 = vld [vmem:[%s8502_s3 + $0x200] sm:$0xf]  ;;  %v5490_v25 = vld [vmem:[%s8502_s3 + $0x20c] sm:$0xf0] }
  0x90   : > { %1512 = vmatpush.bf16.msrb.mxu2 %v4038_v46  ;;  %v4329_v46 = vld [vmem:[%s8502_s3 + $0x80] sm:$0xf]  ;;  %v5522_v32 = vld [vmem:[%s8502_s3 + $0x30c] sm:$0xf0]  ;;  %v4522_v35 = vor.u32 %v5490_v25, %v4521_v24  ;;  %v5536_v24 = vld [vmem:[%s8502_s3 + $0x384] sm:$0xf] }
  0x91   : > { %1525 = vmatpush.bf16.msrb.mxu3 %v4166_v50  ;;  %1498 = vmatpush.bf16.msrb.mxu1 %v3926_v53  ;;  %v4714_v50 = vor.u32 %v5538_v43, %v4713_v41  ;;  %v5534_v53 = vld [vmem:[%s8502_s3 + $0x36c] sm:$0xf0]  ;;  %v4649_v31 = vld [vmem:[%s8502_s3 + $0x300] sm:$0xf]  ;;  %v4379_v43 = vld [vmem:[%s8502_s3 + $0xf0] sm:$0xf0] }
  0x92   : > { %1486 = vmatpush.bf16.msrb.mxu0 %v3782_v58  ;;  %v4570_v58 = vor.u32 %v5502_v49, %v4569_v48  ;;  %v4698_v63 = vor.u32 %v5534_v53, %v4697_v52  ;;  %v5462_v34 = vld [vmem:[%s8502_s3 + $0x12c] sm:$0xf0]  ;;  %v4650_v41 = vor.u32 %v5522_v32, %v4649_v31  ;;  %v4393_v45 = vld [vmem:[%s8502_s3 + $0x100] sm:$0xf]  ;;  %v4715_v25 = vld [vmem:[%s8502_s3 + $0x390] sm:$0xf0] }
  0x93   : > { %v5426_v38 = vld [vmem:[%s8502_s3 + $0xc] sm:$0xf0]  ;;  %v5472_v32 = vld [vmem:[%s8502_s3 + $0x184] sm:$0xf] }
  0x94   : > { %1513 = vmatpush.bf16.msrb.mxu2 %v4022_v60  ;;  %v4553_v60 = vld [vmem:[%s8502_s3 + $0x240] sm:$0xf]  ;;  %v5458_v49 = vld [vmem:[%s8502_s3 + $0x10c] sm:$0xf0] }
  0x95   : > { %1526 = vmatpush.bf16.msrb.mxu3 %v4150_v5  ;;  %1499 = vmatpush.bf16.msrb.mxu1 %v3910_v10  ;;  %v5470_v5 = vld [vmem:[%s8502_s3 + $0x16c] sm:$0xf0]  ;;  %v4554_v7 = vor.u32 %v5498_v61, %v4553_v60  ;;  %v4537_v10 = vld [vmem:[%s8502_s3 + $0x220] sm:$0xf]  ;;  %v4394_v61 = vor.u32 %v5458_v49, %v4393_v45  ;;  %v4443_v45 = vld [vmem:[%s8502_s3 + $0x170] sm:$0xf0] }
  0x96   : > { %1487 = vmatpush.bf16.msrb.mxu0 %v3766_v14  ;;  %v4665_v14 = vld [vmem:[%s8502_s3 + $0x320] sm:$0xf]  ;;  %v4538_v22 = vor.u32 %v5494_v11, %v4537_v10  ;;  %v4731_v10 = vld [vmem:[%s8502_s3 + $0x3b0] sm:$0xf0] }
  0x97   : > { %1514 = vmatmul.bf16.vlgmr.msrb.gmra.mxu2 %v6421_v54  ;;  %v5446_v54 = vld [vmem:[%s8502_s3 + $0xac] sm:$0xf0]  ;;  %v4666_v26 = vor.u32 %v5526_v15, %v4665_v14  ;;  %v4606_v14 = vor.u32 %v5508_v1, %v4603_v2  ;;  %v5504_v15 = vld [vmem:[%s8502_s3 + $0x284] sm:$0xf] }
  0x98   : > { %2198 = vmatpush.bf16.msra.mxu2 %v4634_v3  ;;  %1527 = vmatmul.bf16.vlgmr.msrb.gmra.mxu3 %v6430_v62  ;;  %v4346_v62 = vor.u32 %v5446_v54, %v4345_v36  ;;  %v4314_v3 = vor.u32 %v5438_v59, %v4313_v57  ;;  %v5548_v36 = vld [vmem:[%s8502_s3 + $0x3e4] sm:$0xf]  ;;  %v4265_v54 = vld [vmem:[%s8502_s3] sm:$0xf]  ;;  %v4747_v57 = vld [vmem:[%s8502_s3 + $0x3d0] sm:$0xf0] }
  0x99   : > { %2211 = vmatpush.bf16.msra.mxu3 %v4762_v13  ;;  %1500 = vmatpush.bf16.msrb.mxu1 %v3894_v27  ;;  %v4442_v13 = vor.u32 %v5470_v5, %v4441_v4  ;;  %v5516_v27 = vld [vmem:[%s8502_s3 + $0x2e4] sm:$0xf]  ;;  %v4266_v48 = vor.u32 %v5426_v38, %v4265_v54  ;;  %v4363_v59 = vld [vmem:[%s8502_s3 + $0xd0] sm:$0xf0] }
  0x9a   : > { %2172 = vmatpush.bf16.msra.mxu0 %v4378_v19  ;;  %v4425_v19 = vld [vmem:[%s8502_s3 + $0x140] sm:$0xf]  ;;  %v5480_v4 = vld [vmem:[%s8502_s3 + $0x1c4] sm:$0xf]  ;;  %v4315_v38 = vld [vmem:[%s8502_s3 + $0x70] sm:$0xf0] }
  0x9b   : > { %1488 = vmatmul.bf16.vlgmr.msrb.gmra.mxu0 %v6445_v8  ;;  %v5442_v8 = vld [vmem:[%s8502_s3 + $0x8c] sm:$0xf0]  ;;  %v4426_v29 = vor.u32 %v5466_v20, %v4425_v19  ;;  %v5476_v20 = vld [vmem:[%s8502_s3 + $0x1a4] sm:$0xf] }
  0x9c   : > { %2199 = vmatpush.bf16.msra.mxu2 %v4618_v23  ;;  %1501 = vmatmul.bf16.vlgmr.msrb.gmra.mxu1 %v6463_v17  ;;  %v4330_v55 = vor.u32 %v5442_v8, %v4329_v46  ;;  %v5474_v17 = vld [vmem:[%s8502_s3 + $0x18c] sm:$0xf0]  ;;  %v4619_v8 = vld [vmem:[%s8502_s3 + $0x2d0] sm:$0xf0]  ;;  %v5436_v54 = vld [vmem:[%s8502_s3 + $0x64] sm:$0xf] }
  0x9d   : > { %2212 = vmatpush.bf16.msra.mxu3 %v4746_v28  ;;  %2185 = vmatpush.bf16.msra.mxu1 %v4506_v30  ;;  %v4458_v0 = vor.u32 %v5474_v17, %v4457_v56  ;;  %v5430_v23 = vld [vmem:[%s8502_s3 + $0x2c] sm:$0xf0]  ;;  %v4635_v28 = vld [vmem:[%s8502_s3 + $0x2f0] sm:$0xf0]  ;;  %v4409_v30 = vld [vmem:[%s8502_s3 + $0x120] sm:$0xf] }
  0x9e   : > { %2173 = vmatpush.bf16.msra.mxu0 %v4362_v33  ;;  %v4282_v33 = vor.u32 %v5430_v23, %v4281_v21  ;;  %v4638_v39 = vor.u32 %v5516_v27, %v4635_v28  ;;  %v4410_v44 = vor.u32 %v5462_v34, %v4409_v30  ;;  %v5544_v17 = vld [vmem:[%s8502_s3 + $0x3c4] sm:$0xf]  ;;  %v4734_v21 = vor.u32 %v5540_v9, %v4731_v10  ;;  %v4475_v23 = vld [vmem:[%s8502_s3 + $0x1b0] sm:$0xf0]  ;;  %v4641_v9 = vld [vmem:[%s8502_s3 + $0x2e8] sm:$0xf] }
  0x9f   : > { %v4750_v5 = vor.u32 %v5544_v17, %v4747_v57  ;;  %v4331_v27 = vld [vmem:[%s8502_s3 + $0x90] sm:$0xf0]  ;;  %v4478_v31 = vor.u32 %v5476_v20, %v4475_v23  ;;  %v5460_v2 = vld [vmem:[%s8502_s3 + $0x124] sm:$0xf]  ;;  %v5519_v10 = vld [vmem:[%s8502_s3 + $0x2f4] sm:$0xf0] }
  0xa0   : > { %2200 = vmatpush.bf16.msra.mxu2 %v4602_v37  ;;  %v4763_v37 = vld [vmem:[%s8502_s3 + $0x3f0] sm:$0xf0]  ;;  %v4769_v20 = vld [vmem:[%s8502_s3 + $0x3e8] sm:$0xf]  ;;  %v5455_v23 = vld [vmem:[%s8502_s3 + $0xf4] sm:$0xf0] }
  0xa1   : > { %2213 = vmatpush.bf16.msra.mxu3 %v4730_v40  ;;  %2186 = vmatpush.bf16.msra.mxu1 %v4490_v42  ;;  %v377_v40 = vld [vmem:[#allocation2 + $0x10] sm:$0xff]  ;;  %v5452_v42 = vld [vmem:[%s8502_s3 + $0xe4] sm:$0xf]  ;;  %v4766_v46 = vor.u32 %v5548_v36, %v4763_v37 }
  0xa2   : > { %2174 = vmatpush.bf16.msra.mxu0 %v4346_v62  ;;  %v378_v62 = vld [vmem:[#allocation2 + $0x18] sm:$0xff]  ;;  %v7035_v52 = vpack.c.bf16 %v377_v40, %v377_v40  ;;  %v4382_v53 = vor.u32 %v5452_v42, %v4379_v43  ;;  %v4571_v30 = vld [vmem:[%s8502_s3 + $0x270] sm:$0xf0]  ;;  %v5532_v36 = vld [vmem:[%s8502_s3 + $0x364] sm:$0xf] }
  0xa3   : > { %v7040_v56 = vpack.c.bf16 %v378_v62, %v378_v62  ;;  %v4699_v37 = vld [vmem:[%s8502_s3 + $0x370] sm:$0xf0]  ;;  %v5496_v40 = vld [vmem:[%s8502_s3 + $0x244] sm:$0xf] }
  0xa4   : > { %2201 = vmatpush.bf16.msra.mxu2 %v4586_v47  ;;  %v5512_v47 = vld [vmem:[%s8502_s3 + $0x2c4] sm:$0xf]  ;;  %v4702_v62 = vor.u32 %v5532_v36, %v4699_v37  ;;  %v4753_v36 = vld [vmem:[%s8502_s3 + $0x3c8] sm:$0xf]  ;;  %v5547_v37 = vld [vmem:[%s8502_s3 + $0x3d4] sm:$0xf0] }
  0xa5   : > { %2214 = vmatpush.bf16.msra.mxu3 %v4714_v50  ;;  %2187 = vmatpush.bf16.msra.mxu1 %v4474_v51  ;;  %v5484_v50 = vld [vmem:[%s8502_s3 + $0x1e4] sm:$0xf]  ;;  %v4622_v60 = vor.u32 %v5512_v47, %v4619_v8  ;;  %v4683_v47 = vld [vmem:[%s8502_s3 + $0x350] sm:$0xf0] }
  0xa6   : > { %2175 = vmatpush.bf16.msra.mxu0 %v4330_v55  ;;  %v375_v51 = vld [vmem:[#allocation2] sm:$0xff]  ;;  %v4507_v55 = vld [vmem:[%s8502_s3 + $0x1f0] sm:$0xf0] }
  0xa7   : > { %v5468_v43 = vld [vmem:[%s8502_s3 + $0x164] sm:$0xf] }
  0xa8   : > { %2202 = vmatpush.bf16.msra.mxu2 %v4570_v58  ;;  %v5448_v58 = vld [vmem:[%s8502_s3 + $0xc4] sm:$0xf] }
  0xa9   : > { %2215 = vmatpush.bf16.msra.mxu3 %v4698_v63  ;;  %2188 = vmatpush.bf16.msra.mxu1 %v4458_v0  ;;  %v7054_v63 = vpack.c.bf16 %v375_v51, %v375_v51  ;;  %v376_v0 = vld [vmem:[#allocation2 + $0x8] sm:$0xff]  ;;  %v4366_v6 = vor.u32 %v5448_v58, %v4363_v59  ;;  %v5432_v8 = vld [vmem:[%s8502_s3 + $0x44] sm:$0xf]  ;;  %v4539_v51 = vld [vmem:[%s8502_s3 + $0x230] sm:$0xf0] }
  0xaa   : > { %2176 = vmatpush.bf16.msra.mxu0 %v4314_v3  ;;  %v4510_v3 = vor.u32 %v5484_v50, %v4507_v55  ;;  %v7076_v11 = vpack.c.bf16 %v376_v0, %v376_v0  ;;  %v5492_v50 = vld [vmem:[%s8502_s3 + $0x224] sm:$0xf]  ;;  %v4427_v58 = vld [vmem:[%s8502_s3 + $0x150] sm:$0xf0] }
  0xab   : > { %v5464_v55 = vld [vmem:[%s8502_s3 + $0x144] sm:$0xf]  ;;  %v4283_v0 = vld [vmem:[%s8502_s3 + $0x30] sm:$0xf0]  ;;  %v4542_v1 = vor.u32 %v5492_v50, %v4539_v51  ;;  %v4593_v51 = vld [vmem:[%s8502_s3 + $0x288] sm:$0xf] }
  0xac   : > { %2203 = vmatpush.bf16.msra.mxu2 %v4554_v7  ;;  %v4491_v7 = vld [vmem:[%s8502_s3 + $0x1d0] sm:$0xf0]  ;;  %v5524_v59 = vld [vmem:[%s8502_s3 + $0x324] sm:$0xf] }
  0xad   : > { %2216 = vmatpush.bf16.msra.mxu3 %v4682_v12  ;;  %2189 = vmatpush.bf16.msra.mxu1 %v4442_v13  ;;  %v5444_v12 = vld [vmem:[%s8502_s3 + $0xa4] sm:$0xf]  ;;  %v4347_v13 = vld [vmem:[%s8502_s3 + $0xb0] sm:$0xf0]  ;;  %v4494_v19 = vor.u32 %v5480_v4, %v4491_v7 }
  0xae   : > { %2177 = vmatpush.bf16.msra.mxu0 %v4298_v16  ;;  %v4587_v16 = vld [vmem:[%s8502_s3 + $0x290] sm:$0xf0] }
  0xaf   : > { %v4590_v28 = vor.u32 %v5504_v15, %v4587_v16  ;;  %v4523_v4 = vld [vmem:[%s8502_s3 + $0x210] sm:$0xf0] }
  0xb0   : > { %2204 = vmatpush.bf16.msra.mxu2 %v4538_v22  ;;  %v4350_v22 = vor.u32 %v5444_v12, %v4347_v13  ;;  %v5424_v13 = vld [vmem:[%s8502_s3 + $0x4] sm:$0xf]  ;;  %v4651_v15 = vld [vmem:[%s8502_s3 + $0x310] sm:$0xf0] }
  0xb1   : > { %2217 = vmatpush.bf16.msra.mxu3 %v4666_v26  ;;  %2190 = vmatpush.bf16.msra.mxu1 %v4426_v29  ;;  %v5440_v26 = vld [vmem:[%s8502_s3 + $0x84] sm:$0xf]  ;;  %v4267_v16 = vld [vmem:[%s8502_s3 + $0x10] sm:$0xf0] }
  0xb2   : > { %2178 = vmatpush.bf16.msra.mxu0 %v4282_v33  ;;  %v5500_v29 = vld [vmem:[%s8502_s3 + $0x264] sm:$0xf]  ;;  %v4718_v33 = vor.u32 %v5536_v24, %v4715_v25  ;;  %v4334_v34 = vor.u32 %v5440_v26, %v4331_v27  ;;  %v4642_v24 = vor.u32 %v5519_v10, %v4641_v9  ;;  %v4625_v27 = vld [vmem:[%s8502_s3 + $0x2c8] sm:$0xf] }
  0xb4   : > { %2205 = vmatpush.bf16.msra.mxu2 %v4522_v35  ;;  %v4459_v35 = vld [vmem:[%s8502_s3 + $0x190] sm:$0xf0] }
  0xb5   : > { %2218 = vmatpush.bf16.msra.mxu3 %v4650_v41  ;;  %2191 = vmatpush.bf16.msra.mxu1 %v4410_v44  ;;  %v4555_v41 = vld [vmem:[%s8502_s3 + $0x250] sm:$0xf0]  ;;  %v4462_v42 = vor.u32 %v5472_v32, %v4459_v35  ;;  %v4318_v44 = vor.u32 %v5436_v54, %v4315_v38  ;;  %v4513_v32 = vld [vmem:[%s8502_s3 + $0x1e8] sm:$0xf]  ;;  %v5487_v35 = vld [vmem:[%s8502_s3 + $0x1f4] sm:$0xf0] }
  0xb6   : > { %2179 = vmatpush.bf16.msra.mxu0 %v4266_v48  ;;  %v4299_v48 = vld [vmem:[%s8502_s3 + $0x50] sm:$0xf0]  ;;  %v4558_v49 = vor.u32 %v5496_v40, %v4555_v41  ;;  %v4369_v54 = vld [vmem:[%s8502_s3 + $0xc8] sm:$0xf]  ;;  %v5451_v38 = vld [vmem:[%s8502_s3 + $0xd4] sm:$0xf0] }
  0xb7   : > { %2206 = vmatmul.bf16.vlgmr.msra.gmra.mxu2 %v7035_v52  ;;  %v4302_v57 = vor.u32 %v5432_v8, %v4299_v48  ;;  %v4609_v41 = vld [vmem:[%s8502_s3 + $0x2a8] sm:$0xf]  ;;  %v5543_v8 = vld [vmem:[%s8502_s3 + $0x3b4] sm:$0xf0] }
  0xb8   : > { %2250 = vmatpush.bf16.msrb.mxu2 %v4638_v39  ;;  %2219 = vmatmul.bf16.vlgmr.msra.gmra.mxu3 %v7040_v56  ;;  %v4574_v39 = vor.u32 %v5500_v29, %v4571_v30  ;;  %v4270_v29 = vor.u32 %v5424_v13, %v4267_v16  ;;  %v5456_v30 = vld [vmem:[%s8502_s3 + $0x104] sm:$0xf]  ;;  %v4353_v48 = vld [vmem:[%s8502_s3 + $0xa8] sm:$0xf]  ;;  %v5439_v16 = vld [vmem:[%s8502_s3 + $0x74] sm:$0xf0] }
  0xb9   : > { %2263 = vmatpush.bf16.msrb.mxu3 %v4766_v46  ;;  %2192 = vmatpush.bf16.msra.mxu1 %v4394_v61  ;;  %v5528_v46 = vld [vmem:[%s8502_s3 + $0x344] sm:$0xf]  ;;  %v4705_v13 = vld [vmem:[%s8502_s3 + $0x368] sm:$0xf] }
  0xba   : > { %2224 = vmatpush.bf16.msrb.mxu0 %v4382_v53  ;;  %v4446_v53 = vor.u32 %v5468_v43, %v4443_v45  ;;  %v4686_v17 = vor.u32 %v5528_v46, %v4683_v47  ;;  %v5428_v61 = vld [vmem:[%s8502_s3 + $0x24] sm:$0xf]  ;;  %v4514_v43 = vor.u32 %v5487_v35, %v4513_v32  ;;  %v4370_v45 = vor.u32 %v5451_v38, %v4369_v54  ;;  %v5483_v46 = vld [vmem:[%s8502_s3 + $0x1d4] sm:$0xf0]  ;;  %v4737_v47 = vld [vmem:[%s8502_s3 + $0x3a8] sm:$0xf] }
  0xbb   : > { %2180 = vmatmul.bf16.vlgmr.msra.gmra.mxu0 %v7054_v63  ;;  %v4286_v12 = vor.u32 %v5428_v61, %v4283_v0  ;;  %v5539_v61 = vld [vmem:[%s8502_s3 + $0x394] sm:$0xf0]  ;;  %v4337_v0 = vld [vmem:[%s8502_s3 + $0x88] sm:$0xf] }
  0xbc   : > { %2251 = vmatpush.bf16.msrb.mxu2 %v4622_v60  ;;  %2193 = vmatmul.bf16.vlgmr.msra.gmra.mxu1 %v7076_v11  ;;  %v4667_v60 = vld [vmem:[%s8502_s3 + $0x330] sm:$0xf0]  ;;  %v5531_v32 = vld [vmem:[%s8502_s3 + $0x354] sm:$0xf0] }
  0xbd   : > { %2237 = vmatpush.bf16.msrb.mxu1 %v4510_v3  ;;  %2264 = vmatpush.bf16.msrb.mxu3 %v4750_v5  ;;  %v5488_v3 = vld [vmem:[%s8502_s3 + $0x204] sm:$0xf]  ;;  %v4430_v5 = vor.u32 %v5464_v55, %v4427_v58  ;;  %v4670_v7 = vor.u32 %v5524_v59, %v4667_v60  ;;  %v5479_v59 = vld [vmem:[%s8502_s3 + $0x1b4] sm:$0xf0]  ;;  %v4721_v60 = vld [vmem:[%s8502_s3 + $0x388] sm:$0xf] }
  0xbe   : > { %2225 = vmatpush.bf16.msrb.mxu0 %v4366_v6  ;;  %v4411_v6 = vld [vmem:[%s8502_s3 + $0x130] sm:$0xf0]  ;;  %v5495_v54 = vld [vmem:[%s8502_s3 + $0x234] sm:$0xf0] }
  0xbf   : > { %v4414_v25 = vor.u32 %v5460_v2, %v4411_v6  ;;  %v4465_v6 = vld [vmem:[%s8502_s3 + $0x188] sm:$0xf] }
  0xc0   : > { %2252 = vmatpush.bf16.msrb.mxu2 %v4606_v14  ;;  %v5520_v14 = vld [vmem:[%s8502_s3 + $0x304] sm:$0xf] }
  0xc1   : > { %2238 = vmatpush.bf16.msrb.mxu1 %v4494_v19  ;;  %2265 = vmatpush.bf16.msrb.mxu3 %v4734_v21  ;;  %v4526_v19 = vor.u32 %v5488_v3, %v4523_v4  ;;  %v5551_v21 = vld [vmem:[%s8502_s3 + $0x3f4] sm:$0xf0]  ;;  %v4654_v26 = vor.u32 %v5520_v14, %v4651_v15  ;;  %v4577_v3 = vld [vmem:[%s8502_s3 + $0x268] sm:$0xf] }
  0xc2   : > { %2226 = vmatpush.bf16.msrb.mxu0 %v4350_v22  ;;  %v4385_v22 = vld [vmem:[%s8502_s3 + $0xe8] sm:$0xf]  ;;  %v5503_v4 = vld [vmem:[%s8502_s3 + $0x274] sm:$0xf0] }
  0xc3   : > { %v5535_v14 = vld [vmem:[%s8502_s3 + $0x374] sm:$0xf0]  ;;  %v4321_v15 = vld [vmem:[%s8502_s3 + $0x68] sm:$0xf] }
  0xc4   : > { %2253 = vmatpush.bf16.msrb.mxu2 %v4590_v28  ;;  %v5515_v28 = vld [vmem:[%s8502_s3 + $0x2d4] sm:$0xf0] }
  0xc5   : > { %2239 = vmatpush.bf16.msrb.mxu1 %v4478_v31  ;;  %2266 = vmatpush.bf16.msrb.mxu3 %v4718_v33  ;;  %v4395_v31 = vld [vmem:[%s8502_s3 + $0x110] sm:$0xf0]  ;;  %v4770_v33 = vor.u32 %v5551_v21, %v4769_v20  ;;  %v4561_v21 = vld [vmem:[%s8502_s3 + $0x248] sm:$0xf] }
  0xc6   : > { %2227 = vmatpush.bf16.msrb.mxu0 %v4334_v34  ;;  %v4386_v34 = vor.u32 %v5455_v23, %v4385_v22  ;;  %v4398_v40 = vor.u32 %v5456_v30, %v4395_v31  ;;  %v5499_v22 = vld [vmem:[%s8502_s3 + $0x254] sm:$0xf0]  ;;  %v4689_v31 = vld [vmem:[%s8502_s3 + $0x348] sm:$0xf] }
  0xc7   : > { %v5471_v30 = vld [vmem:[%s8502_s3 + $0x174] sm:$0xf0]  ;;  %v4562_v35 = vor.u32 %v5499_v22, %v4561_v21  ;;  %v5485_v21 = vld [vmem:[%s8502_s3 + $0x1ec] sm:$0xf] }
  0xc8   : > { %2254 = vmatpush.bf16.msrb.mxu2 %v4574_v39  ;;  %v4626_v39 = vor.u32 %v5515_v28, %v4625_v27 }
  0xc9   : > { %2240 = vmatpush.bf16.msrb.mxu1 %v4462_v42  ;;  %2267 = vmatpush.bf16.msrb.mxu3 %v4702_v62  ;;  %v5511_v42 = vld [vmem:[%s8502_s3 + $0x2b4] sm:$0xf0]  ;;  %v4497_v62 = vld [vmem:[%s8502_s3 + $0x1c8] sm:$0xf] }
  0xca   : > { %2228 = vmatpush.bf16.msrb.mxu0 %v4318_v44  ;;  %v4754_v44 = vor.u32 %v5547_v37, %v4753_v36  ;;  %v4610_v50 = vor.u32 %v5511_v42, %v4609_v41  ;;  %v4498_v55 = vor.u32 %v5483_v46, %v4497_v62  ;;  %v4545_v37 = vld [vmem:[%s8502_s3 + $0x228] sm:$0xf]  ;;  %v5467_v62 = vld [vmem:[%s8502_s3 + $0x154] sm:$0xf0] }
  0xcb   : > { %v4289_v46 = vld [vmem:[%s8502_s3 + $0x28] sm:$0xf] }
  0xcc   : > { %2255 = vmatpush.bf16.msrb.mxu2 %v4558_v49  ;;  %v5447_v49 = vld [vmem:[%s8502_s3 + $0xb4] sm:$0xf0] }
  0xcd   : > { %2241 = vmatpush.bf16.msrb.mxu1 %v4446_v53  ;;  %2268 = vmatpush.bf16.msrb.mxu3 %v4686_v17  ;;  %v5507_v53 = vld [vmem:[%s8502_s3 + $0x294] sm:$0xf0]  ;;  %v4481_v17 = vld [vmem:[%s8502_s3 + $0x1a8] sm:$0xf]  ;;  %v4354_v58 = vor.u32 %v5447_v49, %v4353_v48 }
  0xce   : > { %2229 = vmatpush.bf16.msrb.mxu0 %v4302_v57  ;;  %v4738_v57 = vor.u32 %v5543_v8, %v4737_v47  ;;  %v4594_v2 = vor.u32 %v5507_v53, %v4593_v51  ;;  %v5431_v47 = vld [vmem:[%s8502_s3 + $0x34] sm:$0xf0]  ;;  %v4546_v8 = vor.u32 %v5495_v54, %v4545_v37  ;;  %v4417_v49 = vld [vmem:[%s8502_s3 + $0x128] sm:$0xf]  ;;  %v5481_v37 = vld [vmem:[%s8502_s3 + $0x1cc] sm:$0xf] }
  0xcf   : > { %v5491_v51 = vld [vmem:[%s8502_s3 + $0x214] sm:$0xf0] }
  0xd0   : > { %2256 = vmatpush.bf16.msrb.mxu2 %v4542_v1  ;;  %v5443_v1 = vld [vmem:[%s8502_s3 + $0x94] sm:$0xf0] }
  0xd1   : > { %2242 = vmatpush.bf16.msrb.mxu1 %v4430_v5  ;;  %2269 = vmatpush.bf16.msrb.mxu3 %v4670_v7  ;;  %v4482_v5 = vor.u32 %v5479_v59, %v4481_v17  ;;  %v4722_v7 = vor.u32 %v5539_v61, %v4721_v60  ;;  %v4338_v10 = vor.u32 %v5443_v1, %v4337_v0  ;;  %v5463_v17 = vld [vmem:[%s8502_s3 + $0x134] sm:$0xf0]  ;;  %v4643_v59 = vld [vmem:[%s8502_s3 + $0x2f8] sm:$0xf0]  ;;  %v4273_v0 = vld [vmem:[%s8502_s3 + $0x8] sm:$0xf] }
  0xd2   : > { %2230 = vmatpush.bf16.msrb.mxu0 %v4286_v12  ;;  %v5475_v12 = vld [vmem:[%s8502_s3 + $0x194] sm:$0xf0]  ;;  %v4290_v61 = vor.u32 %v5431_v47, %v4289_v46  ;;  %v4657_v1 = vld [vmem:[%s8502_s3 + $0x308] sm:$0xf]  ;;  %v4355_v46 = vld [vmem:[%s8502_s3 + $0xb8] sm:$0xf0] }
  0xd4   : > { %2257 = vmatpush.bf16.msrb.mxu2 %v4526_v19  ;;  %v4578_v19 = vor.u32 %v5503_v4, %v4577_v3  ;;  %v5427_v3 = vld [vmem:[%s8502_s3 + $0x14] sm:$0xf0] }
  0xd5   : > { %2243 = vmatpush.bf16.msrb.mxu1 %v4414_v25  ;;  %2270 = vmatpush.bf16.msrb.mxu3 %v4654_v26  ;;  %v4449_v25 = vld [vmem:[%s8502_s3 + $0x168] sm:$0xf]  ;;  %v4706_v26 = vor.u32 %v5535_v14, %v4705_v13  ;;  %v5513_v14 = vld [vmem:[%s8502_s3 + $0x2cc] sm:$0xf] }
  0xd6   : > { %2231 = vmatpush.bf16.msrb.mxu0 %v4270_v29  ;;  %v1333_v9 = vpop.f32.mrf.mxu0  ;;  %v4322_v29 = vor.u32 %v5439_v16, %v4321_v15  ;;  %v4450_v38 = vor.u32 %v5471_v30, %v4449_v25  ;;  %v4627_v15 = vld [vmem:[%s8502_s3 + $0x2d8] sm:$0xf0]  ;;  %v4274_v16 = vor.u32 %v5427_v3, %v4273_v0  ;;  %v5501_v3 = vld [vmem:[%s8502_s3 + $0x26c] sm:$0xf] }
  0xd7   : > { %2258 = vmatmul.bf16.vlgmr.msrb.gmra.mxu2 %v7035_v52  ;;  %v4515_v25 = vld [vmem:[%s8502_s3 + $0x1f8] sm:$0xf0]  ;;  %v4630_v30 = vor.u32 %v5513_v14, %v4627_v15  ;;  %v5437_v15 = vld [vmem:[%s8502_s3 + $0x6c] sm:$0xf] }
  0xd8   : > { %2302 = vmatpush.bf16.msra.mxu2 %v4642_v24  ;;  %2271 = vmatmul.bf16.vlgmr.msrb.gmra.mxu3 %v7040_v56  ;;  %v1346_v23 = vpop.f32.mrf.mxu1  ;;  %v4466_v24 = vor.u32 %v5475_v12, %v4465_v6  ;;  %v4771_v6 = vld [vmem:[%s8502_s3 + $0x3f8] sm:$0xf0]  ;;  %v4418_v12 = vor.u32 %v5463_v17, %v4417_v49 }
  0xd9   : > { %2315 = vmatpush.bf16.msra.mxu3 %v4770_v33  ;;  %2244 = vmatpush.bf16.msrb.mxu1 %v4398_v40  ;;  %v1359_v20 = vpop.f32.mrf.mxu2  ;;  %v1347_v27 = vadd.f32 %v1346_v23, %v1333_v9  ;;  %v4305_v33 = vld [vmem:[%s8502_s3 + $0x48] sm:$0xf]  ;;  %v4690_v40 = vor.u32 %v5531_v32, %v4689_v31  ;;  %v4387_v9 = vld [vmem:[%s8502_s3 + $0xf8] sm:$0xf0] }
  0xda   : > { %2276 = vmatpush.bf16.msra.mxu0 %v4386_v34  ;;  %v1372_v28 = vpop.f32.mrf.mxu3  ;;  %v5435_v34 = vld [vmem:[%s8502_s3 + $0x54] sm:$0xf0]  ;;  %v4707_v14 = vld [vmem:[%s8502_s3 + $0x378] sm:$0xf0] }
  0xdb   : > { %2232 = vmatmul.bf16.vlgmr.msrb.gmra.mxu0 %v7054_v63  ;;  %v1360_v36 = vadd.f32 %v1359_v20, %v1347_v27  ;;  %v5459_v20 = vld [vmem:[%s8502_s3 + $0x114] sm:$0xf0]  ;;  %v4755_v27 = vld [vmem:[%s8502_s3 + $0x3d8] sm:$0xf0] }
  0xdc   : > { %2303 = vmatpush.bf16.msra.mxu2 %v4626_v39  ;;  %2245 = vmatmul.bf16.vlgmr.msrb.gmra.mxu1 %v7076_v11  ;;  %v4433_v39 = vld [vmem:[%s8502_s3 + $0x148] sm:$0xf] }
  0xdd   : > { %2289 = vmatpush.bf16.msra.mxu1 %v4514_v43  ;;  %2316 = vmatpush.bf16.msra.mxu3 %v4754_v44  ;;  %v7363_v41 = vadd.f32 %v1372_v28, %v1360_v36  ;;  %v4306_v43 = vor.u32 %v5435_v34, %v4305_v33  ;;  %v4673_v44 = vld [vmem:[%s8502_s3 + $0x328] sm:$0xf]  ;;  %v5449_v28 = vld [vmem:[%s8502_s3 + $0xcc] sm:$0xf]  ;;  %v4518_v36 = vor.u32 %v5485_v21, %v4515_v25  ;;  %v4563_v21 = vld [vmem:[%s8502_s3 + $0x258] sm:$0xf0] }
  0xde   : > { %2277 = vmatpush.bf16.msra.mxu0 %v4370_v45  ;;  %v1335_v42 = vpop.f32.mrf.mxu0  ;;  %v5527_v45 = vld [vmem:[%s8502_s3 + $0x334] sm:$0xf0]  ;;  %v5509_v34 = vld [vmem:[%s8502_s3 + $0x2ac] sm:$0xf] }
  0xdf   : > { %v4499_v42 = vld [vmem:[%s8502_s3 + $0x1d8] sm:$0xf0] }
  0xe0   : > { %2304 = vmatpush.bf16.msra.mxu2 %v4610_v50  ;;  %v4529_v50 = vld [vmem:[%s8502_s3 + $0x208] sm:$0xf]  ;;  %v1348_v53 = vpop.f32.mrf.mxu1  ;;  %v4502_v49 = vor.u32 %v5481_v37, %v4499_v42  ;;  %v4435_v42 = vld [vmem:[%s8502_s3 + $0x158] sm:$0xf0] }
  0xe1   : > { %2290 = vmatpush.bf16.msra.mxu1 %v4498_v55  ;;  %2317 = vmatpush.bf16.msra.mxu3 %v4738_v57  ;;  %v1361_v48 = vpop.f32.mrf.mxu2  ;;  %v4434_v55 = vor.u32 %v5467_v62, %v4433_v39  ;;  %v4674_v57 = vor.u32 %v5527_v45, %v4673_v44  ;;  %v4530_v4 = vor.u32 %v5491_v51, %v4529_v50  ;;  %v4739_v62 = vld [vmem:[%s8502_s3 + $0x3b8] sm:$0xf0]  ;;  %v5445_v45 = vld [vmem:[%s8502_s3 + $0xac] sm:$0xf] }
  0xe2   : > { %2278 = vmatpush.bf16.msra.mxu0 %v4354_v58  ;;  %v5517_v58 = vld [vmem:[%s8502_s3 + $0x2ec] sm:$0xf]  ;;  %v1374_v60 = vpop.f32.mrf.mxu3  ;;  %v4595_v48 = vld [vmem:[%s8502_s3 + $0x298] sm:$0xf0]  ;;  %v4358_v17 = vor.u32 %v5445_v45, %v4355_v46 }
  0xe3   : > { %v5477_v50 = vld [vmem:[%s8502_s3 + $0x1ac] sm:$0xf]  ;;  %v4291_v46 = vld [vmem:[%s8502_s3 + $0x38] sm:$0xf0] }
  0xe4   : > { %2305 = vmatpush.bf16.msra.mxu2 %v4594_v2  ;;  %v5523_v2 = vld [vmem:[%s8502_s3 + $0x314] sm:$0xf0]  ;;  %v5441_v60 = vld [vmem:[%s8502_s3 + $0x8c] sm:$0xf] }
  0xe5   : > { %2291 = vmatpush.bf16.msra.mxu1 %v4482_v5  ;;  %2318 = vmatpush.bf16.msra.mxu3 %v4722_v7  ;;  %v5549_v5 = vld [vmem:[%s8502_s3 + $0x3ec] sm:$0xf]  ;;  %v4658_v13 = vor.u32 %v5523_v2, %v4657_v1 }
  0xe6   : > { %2279 = vmatpush.bf16.msra.mxu0 %v4338_v10  ;;  %v5453_v7 = vld [vmem:[%s8502_s3 + $0xec] sm:$0xf]  ;;  %v4646_v10 = vor.u32 %v5517_v58, %v4643_v59  ;;  %v4774_v22 = vor.u32 %v5549_v5, %v4771_v6  ;;  %v1385_v23 = vpop.f32.mrf.mxu0  ;;  %v4723_v59 = vld [vmem:[%s8502_s3 + $0x398] sm:$0xf0] }
  0xe7   : > { %v5537_v58 = vld [vmem:[%s8502_s3 + $0x38c] sm:$0xf] }
  0xe8   : > { %2306 = vmatpush.bf16.msra.mxu2 %v4578_v19  ;;  %v4401_v19 = vld [vmem:[%s8502_s3 + $0x108] sm:$0xf]  ;;  %v1398_v33 = vpop.f32.mrf.mxu1  ;;  %v5473_v6 = vld [vmem:[%s8502_s3 + $0x18c] sm:$0xf] }
  0xe9   : > { %2292 = vmatpush.bf16.msra.mxu1 %v4466_v24  ;;  %2319 = vmatpush.bf16.msra.mxu3 %v4706_v26  ;;  %v4390_v24 = vor.u32 %v5453_v7, %v4387_v9  ;;  %v5545_v26 = vld [vmem:[%s8502_s3 + $0x3cc] sm:$0xf]  ;;  %v1411_v31 = vpop.f32.mrf.mxu2  ;;  %v4402_v32 = vor.u32 %v5459_v20, %v4401_v19  ;;  %v4726_v7 = vor.u32 %v5537_v58, %v4723_v59  ;;  %v5774_v58 = vld [vmem:[%s8502_s3 + $0xaec] sm:$0xf0] }
  0xea   : > { %2280 = vmatpush.bf16.msra.mxu0 %v4322_v29  ;;  %v4371_v29 = vld [vmem:[%s8502_s3 + $0xd8] sm:$0xf0]  ;;  %v4758_v54 = vor.u32 %v5545_v26, %v4755_v27  ;;  %v1424_v39 = vpop.f32.mrf.mxu3  ;;  %v5497_v20 = vld [vmem:[%s8502_s3 + $0x24c] sm:$0xf] }
  0xeb   : > { %v4451_v26 = vld [vmem:[%s8502_s3 + $0x178] sm:$0xf0]  ;;  %v5529_v27 = vld [vmem:[%s8502_s3 + $0x34c] sm:$0xf] }
  0xec   : > { %2307 = vmatpush.bf16.msra.mxu2 %v4562_v35  ;;  %v4611_v35 = vld [vmem:[%s8502_s3 + $0x2b8] sm:$0xf0]  ;;  %v5429_v45 = vld [vmem:[%s8502_s3 + $0x2c] sm:$0xf] }
  0xed   : > { %2293 = vmatpush.bf16.msra.mxu1 %v4450_v38  ;;  %2320 = vmatpush.bf16.msra.mxu3 %v4690_v40  ;;  %v1399_v38 = vadd.f32 %v1398_v33, %v1385_v23  ;;  %v4374_v40 = vor.u32 %v5449_v28, %v4371_v29  ;;  %v4614_v47 = vor.u32 %v5509_v34, %v4611_v35  ;;  %v5469_v23 = vld [vmem:[%s8502_s3 + $0x16c] sm:$0xf]  ;;  %v4691_v28 = vld [vmem:[%s8502_s3 + $0x358] sm:$0xf0] }
  0xee   : > { %2281 = vmatpush.bf16.msra.mxu0 %v4306_v43  ;;  %v5541_v43 = vld [vmem:[%s8502_s3 + $0x3ac] sm:$0xf]  ;;  %v4547_v34 = vld [vmem:[%s8502_s3 + $0x238] sm:$0xf0]  ;;  %v4454_v37 = vor.u32 %v5469_v23, %v4451_v26  ;;  %v5145_v23 = vld [vmem:[%s8502_s3 + $0x9e0] sm:$0xf] }
  0xef   : > { %v1412_v44 = vadd.f32 %v1411_v31, %v1399_v38  ;;  %v4742_v51 = vor.u32 %v5541_v43, %v4739_v62  ;;  %v4307_v31 = vld [vmem:[%s8502_s3 + $0x58] sm:$0xf0]  ;;  %v5493_v33 = vld [vmem:[%s8502_s3 + $0x22c] sm:$0xf]  ;;  %v4694_v38 = vor.u32 %v5529_v27, %v4691_v28  ;;  %v5742_v27 = vld [vmem:[%s8502_s3 + $0x9ec] sm:$0xf0] }
  0xf0   : > { %2308 = vmatpush.bf16.msra.mxu2 %v4546_v8  ;;  %v5505_v8 = vld [vmem:[%s8502_s3 + $0x28c] sm:$0xf]  ;;  %v1400_v2 = vpop.f32.mrf.mxu1  ;;  %v4675_v62 = vld [vmem:[%s8502_s3 + $0x338] sm:$0xf0]  ;;  %v5385_v28 = vld [vmem:[%s8502_s3 + $0xbc0] sm:$0xf] }
  0xf1   : > { %2294 = vmatpush.bf16.msra.mxu1 %v4434_v55  ;;  %2321 = vmatpush.bf16.msra.mxu3 %v4674_v57  ;;  %v7488_v53 = vadd.f32 %v1424_v39, %v1412_v44  ;;  %v1387_v55 = vpop.f32.mrf.mxu0  ;;  %v4483_v57 = vld [vmem:[%s8502_s3 + $0x1b8] sm:$0xf0]  ;;  %v4598_v0 = vor.u32 %v5505_v8, %v4595_v48  ;;  %v1413_v1 = vpop.f32.mrf.mxu2  ;;  %v5525_v43 = vld [vmem:[%s8502_s3 + $0x32c] sm:$0xf] }
  0xf2   : > { %2282 = vmatpush.bf16.msra.mxu0 %v4290_v61  ;;  %v4339_v61 = vld [vmem:[%s8502_s3 + $0x98] sm:$0xf0]  ;;  %v4486_v5 = vor.u32 %v5477_v50, %v4483_v57  ;;  %v1426_v9 = vpop.f32.mrf.mxu3  ;;  %v5461_v48 = vld [vmem:[%s8502_s3 + $0x12c] sm:$0xf]  ;;  %v5273_v57 = vld [vmem:[%s8502_s3 + $0xae0] sm:$0xf] }
  0xf3   : > { %v4531_v50 = vld [vmem:[%s8502_s3 + $0x218] sm:$0xf0]  ;;  %v5710_v9 = vld [vmem:[%s8502_s3 + $0x8ec] sm:$0xf0] }
  0xf4   : > { %2309 = vmatpush.bf16.msra.mxu2 %v4530_v4  ;;  %v4579_v4 = vld [vmem:[%s8502_s3 + $0x278] sm:$0xf0] }
  0xf5   : > { %2295 = vmatpush.bf16.msra.mxu1 %v4418_v12  ;;  %2322 = vmatpush.bf16.msra.mxu3 %v4658_v13  ;;  %v4467_v12 = vld [vmem:[%s8502_s3 + $0x198] sm:$0xf0]  ;;  %v5533_v13 = vld [vmem:[%s8502_s3 + $0x36c] sm:$0xf]  ;;  %v4582_v19 = vor.u32 %v5501_v3, %v4579_v4 }
  0xf6   : > { %2283 = vmatpush.bf16.msra.mxu0 %v4274_v16  ;;  %v4323_v16 = vld [vmem:[%s8502_s3 + $0x78] sm:$0xf0] }
  0xf7   : > { %2310 = vmatmul.bf16.vlgmr.msra.gmra.mxu2 %v7035_v52  ;;  %v4326_v25 = vor.u32 %v5437_v15, %v4323_v16  ;;  %v4419_v55 = vld [vmem:[%s8502_s3 + $0x138] sm:$0xf0]  ;;  %v5257_v16 = vld [vmem:[%s8502_s3 + $0xac0] sm:$0xf] }
  0xf8   : > { %2354 = vmatpush.bf16.msrb.mxu2 %v4646_v10  ;;  %2323 = vmatmul.bf16.vlgmr.msra.gmra.mxu3 %v7040_v56  ;;  %v4342_v10 = vor.u32 %v5441_v60, %v4339_v61  ;;  %v4294_v60 = vor.u32 %v5429_v45, %v4291_v46  ;;  %v5425_v61 = vld [vmem:[%s8502_s3 + $0xc] sm:$0xf]  ;;  %v4659_v1 = vld [vmem:[%s8502_s3 + $0x318] sm:$0xf0]  ;;  %v5113_v46 = vld [vmem:[%s8502_s3 + $0x9a0] sm:$0xf] }
  0xf9   : > { %2367 = vmatpush.bf16.msrb.mxu3 %v4774_v22  ;;  %2296 = vmatpush.bf16.msra.mxu1 %v4402_v32  ;;  %v4470_v22 = vor.u32 %v5473_v6, %v4467_v12  ;;  %v1437_v29 = vpop.f32.mrf.mxu0  ;;  %v4566_v32 = vor.u32 %v5497_v20, %v4563_v21  ;;  %v1450_v35 = vpop.f32.mrf.mxu1  ;;  %v4275_v3 = vld [vmem:[%s8502_s3 + $0x18] sm:$0xf0]  ;;  %v5806_v6 = vld [vmem:[%s8502_s3 + $0xbec] sm:$0xf0]  ;;  %v5457_v21 = vld [vmem:[%s8502_s3 + $0x10c] sm:$0xf] }
  0xfa   : > { %2328 = vmatpush.bf16.msrb.mxu0 %v4390_v24  ;;  %v4710_v24 = vor.u32 %v5533_v13, %v4707_v14  ;;  %v1451_v39 = vadd.f32 %v1450_v35, %v1437_v29  ;;  %v4422_v14 = vor.u32 %v5461_v48, %v4419_v55  ;;  %v4278_v20 = vor.u32 %v5425_v61, %v4275_v3  ;;  %v5802_v29 = vld [vmem:[%s8502_s3 + $0xbcc] sm:$0xf0]  ;;  %v5353_v48 = vld [vmem:[%s8502_s3 + $0xb80] sm:$0xf] }
  0xfb   : > { %2284 = vmatmul.bf16.vlgmr.msra.gmra.mxu0 %v7054_v63  ;;  %v1476_v44 = vpop.f32.mrf.mxu3  ;;  %v5766_v35 = vld [vmem:[%s8502_s3 + $0xaac] sm:$0xf0]  ;;  %v4953_v3 = vld [vmem:[%s8502_s3 + $0x860] sm:$0xf] }
  0xfc   : > { %2355 = vmatpush.bf16.msrb.mxu2 %v4630_v30  ;;  %2297 = vmatmul.bf16.vlgmr.msra.gmra.mxu1 %v7076_v11  ;;  %v5433_v30 = vld [vmem:[%s8502_s3 + $0x4c] sm:$0xf] }
  0xfd   : > { %2341 = vmatpush.bf16.msrb.mxu1 %v4518_v36  ;;  %2368 = vmatpush.bf16.msrb.mxu3 %v4758_v54  ;;  %v1463_v36 = vpop.f32.mrf.mxu2  ;;  %v5465_v54 = vld [vmem:[%s8502_s3 + $0x14c] sm:$0xf] }
  0xfe   : > { %2329 = vmatpush.bf16.msrb.mxu0 %v4374_v40  ;;  %v4310_v40 = vor.u32 %v5433_v30, %v4307_v31  ;;  %v1464_v8 = vadd.f32 %v1463_v36, %v1451_v39  ;;  %v5001_v30 = vld [vmem:[%s8502_s3 + $0x8c0] sm:$0xf]  ;;  %v5706_v31 = vld [vmem:[%s8502_s3 + $0x8cc] sm:$0xf0]  ;;  %v5146_v36 = vor.u32 %v5742_v27, %v5145_v23 }
  0xff   : > { %v5738_v39 = vld [vmem:[%s8502_s3 + $0x9cc] sm:$0xf0]  ;;  %v5177_v23 = vld [vmem:[%s8502_s3 + $0xa20] sm:$0xf] }
 0x100   : > { %2356 = vmatpush.bf16.msrb.mxu2 %v4614_v47  ;;  %v4550_v47 = vor.u32 %v5493_v33, %v4547_v34  ;;  %v7596_v59 = vadd.f32 %v1476_v44, %v1464_v8  ;;  %v5241_v34 = vld [vmem:[%s8502_s3 + $0xaa0] sm:$0xf] }
 0x101   : > { %2342 = vmatpush.bf16.msrb.mxu1 %v4502_v49  ;;  %2369 = vmatpush.bf16.msrb.mxu3 %v4742_v51  ;;  %v5489_v49 = vld [vmem:[%s8502_s3 + $0x20c] sm:$0xf]  ;;  %v4438_v51 = vor.u32 %v5465_v54, %v4435_v42  ;;  %v1439_v2 = vpop.f32.mrf.mxu0  ;;  %v1452_v12 = vpop.f32.mrf.mxu1  ;;  %v5386_v54 = vor.u32 %v5802_v29, %v5385_v28  ;;  %v5798_v42 = vld [vmem:[%s8502_s3 + $0xbac] sm:$0xf0]  ;;  %v5225_v44 = vld [vmem:[%s8502_s3 + $0xa80] sm:$0xf] }
 0x102   : > { %2330 = vmatpush.bf16.msrb.mxu0 %v4358_v17  ;;  %v4678_v17 = vor.u32 %v5525_v43, %v4675_v62  ;;  %v4534_v4 = vor.u32 %v5489_v49, %v4531_v50  ;;  %v5702_v43 = vld [vmem:[%s8502_s3 + $0x8ac] sm:$0xf0]  ;;  %v5242_v62 = vor.u32 %v5766_v35, %v5241_v34  ;;  %v4969_v50 = vld [vmem:[%s8502_s3 + $0x880] sm:$0xf] }
 0x103   : > { %v5794_v49 = vld [vmem:[%s8502_s3 + $0xb8c] sm:$0xf0]  ;;  %v5065_v28 = vld [vmem:[%s8502_s3 + $0x940] sm:$0xf] }
 0x104   : > { %2357 = vmatpush.bf16.msrb.mxu2 %v4598_v0  ;;  %v5521_v0 = vld [vmem:[%s8502_s3 + $0x30c] sm:$0xf]  ;;  %v5790_v2 = vld [vmem:[%s8502_s3 + $0xb6c] sm:$0xf0]  ;;  %v5305_v34 = vld [vmem:[%s8502_s3 + $0xb20] sm:$0xf] }
 0x105   : > { %2343 = vmatpush.bf16.msrb.mxu1 %v4486_v5  ;;  %2370 = vmatpush.bf16.msrb.mxu3 %v4726_v7  ;;  %v5401_v5 = vld [vmem:[%s8502_s3 + $0xbe0] sm:$0xf]  ;;  %v1465_v13 = vpop.f32.mrf.mxu2  ;;  %v4662_v15 = vor.u32 %v5521_v0, %v4659_v1  ;;  %v5730_v0 = vld [vmem:[%s8502_s3 + $0x98c] sm:$0xf0] }
 0x106   : > { %2331 = vmatpush.bf16.msrb.mxu0 %v4342_v10  ;;  %v5017_v7 = vld [vmem:[%s8502_s3 + $0x8e0] sm:$0xf]  ;;  %v5274_v10 = vor.u32 %v5774_v58, %v5273_v57  ;;  %v5758_v57 = vld [vmem:[%s8502_s3 + $0xa6c] sm:$0xf0] }
 0x107   : > { %v5018_v26 = vor.u32 %v5710_v9, %v5017_v7  ;;  %v5097_v58 = vld [vmem:[%s8502_s3 + $0x980] sm:$0xf]  ;;  %v5754_v7 = vld [vmem:[%s8502_s3 + $0xa4c] sm:$0xf0] }
 0x108   : > { %2358 = vmatpush.bf16.msrb.mxu2 %v4582_v19  ;;  %v5770_v19 = vld [vmem:[%s8502_s3 + $0xacc] sm:$0xf0]  ;;  %v5337_v1 = vld [vmem:[%s8502_s3 + $0xb60] sm:$0xf]  ;;  %v5098_v9 = vor.u32 %v5730_v0, %v5097_v58 }
 0x109   : > { %2344 = vmatpush.bf16.msrb.mxu1 %v4470_v22  ;;  %2371 = vmatpush.bf16.msrb.mxu3 %v4710_v24  ;;  %v4403_v22 = vld [vmem:[%s8502_s3 + $0x118] sm:$0xf0]  ;;  %v5402_v24 = vor.u32 %v5806_v6, %v5401_v5  ;;  %v5193_v6 = vld [vmem:[%s8502_s3 + $0xa40] sm:$0xf]  ;;  %v5338_v12 = vor.u32 %v5790_v2, %v5337_v1  ;;  %v5722_v29 = vld [vmem:[%s8502_s3 + $0x94c] sm:$0xf0] }
 0x10a   : > { %2332 = vmatpush.bf16.msrb.mxu0 %v4326_v25  ;;  %v1478_v25 = vpop.f32.mrf.mxu3  ;;  %v4406_v33 = vor.u32 %v5457_v21, %v4403_v22  ;;  %v5690_v21 = vld [vmem:[%s8502_s3 + $0x84c] sm:$0xf0]  ;;  %v5194_v22 = vor.u32 %v5754_v7, %v5193_v6  ;;  %v5033_v1 = vld [vmem:[%s8502_s3 + $0x900] sm:$0xf]  ;;  %v5708_v2 = vld [vmem:[%s8502_s3 + $0x8e4] sm:$0xf] }
 0x10b   : > { %v5782_v35 = vld [vmem:[%s8502_s3 + $0xb2c] sm:$0xf0]  ;;  %v5768_v6 = vld [vmem:[%s8502_s3 + $0xac4] sm:$0xf] }
 0x10c   : > { %2359 = vmatpush.bf16.msrb.mxu2 %v4566_v32  ;;  %v5258_v32 = vor.u32 %v5770_v19, %v5257_v16  ;;  %v5786_v16 = vld [vmem:[%s8502_s3 + $0xb4c] sm:$0xf0] }
 0x10d   : > { %2345 = vmatpush.bf16.msrb.mxu1 %v4454_v37  ;;  %2372 = vmatpush.bf16.msrb.mxu3 %v4694_v38  ;;  %v5129_v37 = vld [vmem:[%s8502_s3 + $0x9c0] sm:$0xf]  ;;  %v5002_v38 = vor.u32 %v5706_v31, %v5001_v30 }
 0x10e   : > { %2333 = vmatpush.bf16.msrb.mxu0 %v4310_v40  ;;  %v5369_v40 = vld [vmem:[%s8502_s3 + $0xba0] sm:$0xf]  ;;  %v5130_v45 = vor.u32 %v5738_v39, %v5129_v37  ;;  %v5686_v37 = vld [vmem:[%s8502_s3 + $0x82c] sm:$0xf0] }
 0x10f   : > { %v5746_v39 = vld [vmem:[%s8502_s3 + $0xa0c] sm:$0xf0] }
 0x110   : > { %2360 = vmatpush.bf16.msrb.mxu2 %v4550_v47  ;;  %v5370_v47 = vor.u32 %v5798_v42, %v5369_v40  ;;  %v5049_v42 = vld [vmem:[%s8502_s3 + $0x920] sm:$0xf] }
 0x111   : > { %2346 = vmatpush.bf16.msrb.mxu1 %v4438_v51  ;;  %2373 = vmatpush.bf16.msrb.mxu3 %v4678_v17  ;;  %v5698_v51 = vld [vmem:[%s8502_s3 + $0x88c] sm:$0xf0]  ;;  %v5209_v17 = vld [vmem:[%s8502_s3 + $0xa60] sm:$0xf] }
 0x112   : > { %2334 = vmatpush.bf16.msrb.mxu0 %v4294_v60  ;;  %v5354_v60 = vor.u32 %v5794_v49, %v5353_v48  ;;  %v4970_v61 = vor.u32 %v5698_v51, %v4969_v50  ;;  %v5210_v5 = vor.u32 %v5758_v57, %v5209_v17  ;;  %v2383_v48 = vld [vmem:[#allocation2 + $0x18] sm:$0xfc]  ;;  %v2387_v49 = vld [vmem:[#allocation2 + $0x38] sm:$0x3]  ;;  %v5778_v51 = vld [vmem:[%s8502_s3 + $0xb0c] sm:$0xf0] }
 0x113   : > { %v2380_v17 = vld [vmem:[#allocation2] sm:$0xfc]  ;;  %v2384_v57 = vld [vmem:[#allocation2 + $0x20] sm:$0x3] }
 0x114   : > { %2361 = vmatpush.bf16.msrb.mxu2 %v4534_v4  ;;  %v5694_v4 = vld [vmem:[%s8502_s3 + $0x86c] sm:$0xf0] }
 0x115   : > { %2347 = vmatpush.bf16.msrb.mxu1 %v4422_v14  ;;  %2374 = vmatpush.bf16.msrb.mxu3 %v4662_v15  ;;  %v4954_v13 = vor.u32 %v5694_v4, %v4953_v3  ;;  %v5726_v14 = vld [vmem:[%s8502_s3 + $0x96c] sm:$0xf0]  ;;  %v5321_v15 = vld [vmem:[%s8502_s3 + $0xb40] sm:$0xf]  ;;  %v5019_v3 = vld [vmem:[%s8502_s3 + $0x8f0] sm:$0xf0] }
 0x116   : > { %2335 = vmatpush.bf16.msrb.mxu0 %v4278_v20  ;;  %v4937_v20 = vld [vmem:[%s8502_s3 + $0x840] sm:$0xf]  ;;  %v5322_v30 = vor.u32 %v5786_v16, %v5321_v15  ;;  %v2381_v15 = vld [vmem:[#allocation2 + $0x8] sm:$0xfc]  ;;  %v2385_v16 = vld [vmem:[#allocation2 + $0x28] sm:$0x3] }
 0x117   : > { %2362 = vmatmul.bf16.vlgmr.msrb.gmra.mxu2 %v7035_v52  ;;  %v4985_v52 = vld [vmem:[%s8502_s3 + $0x8a0] sm:$0xf] }
 0x118   : > { %3199 = vmatpush.bf16.msra.mxu2 %v5274_v10  ;;  %2375 = vmatmul.bf16.vlgmr.msrb.gmra.mxu3 %v7040_v56  ;;  %v5762_v56 = vld [vmem:[%s8502_s3 + $0xa8c] sm:$0xf0]  ;;  %v4986_v8 = vor.u32 %v5702_v43, %v4985_v52  ;;  %v5081_v10 = vld [vmem:[%s8502_s3 + $0x960] sm:$0xf]  ;;  %v1489_v19 = vpop.f32.mrf.mxu0 }
 0x119   : > { %3212 = vmatpush.bf16.msra.mxu3 %v5402_v24  ;;  %2348 = vmatpush.bf16.msrb.mxu1 %v4406_v33  ;;  %v5226_v55 = vor.u32 %v5762_v56, %v5225_v44  ;;  %v5750_v24 = vld [vmem:[%s8502_s3 + $0xa2c] sm:$0xf0]  ;;  %v1502_v25 = vpop.f32.mrf.mxu1  ;;  %v5082_v27 = vor.u32 %v5726_v14, %v5081_v10  ;;  %v4921_v33 = vld [vmem:[%s8502_s3 + $0x820] sm:$0xf]  ;;  %v2388_v14 = vpack.c.bf16 %v2384_v57, %v2380_v17  ;;  %v5355_v17 = vld [vmem:[%s8502_s3 + $0xb90] sm:$0xf0] }
 0x11a   : > { %3173 = vmatpush.bf16.msra.mxu0 %v5018_v26  ;;  %v1515_v26 = vpop.f32.mrf.mxu2  ;;  %v1503_v31 = vadd.f32 %v1502_v25, %v1489_v19  ;;  %v5718_v52 = vld [vmem:[%s8502_s3 + $0x92c] sm:$0xf0]  ;;  %v5289_v43 = vld [vmem:[%s8502_s3 + $0xb00] sm:$0xf]  ;;  %v4922_v50 = vor.u32 %v5686_v37, %v4921_v33  ;;  %v5022_v25 = vor.u32 %v5708_v2, %v5019_v3  ;;  %v2389_v33 = vpack.c.bf16 %v2385_v16, %v2381_v15  ;;  %v5243_v37 = vld [vmem:[%s8502_s3 + $0xab0] sm:$0xf0] }
 0x11b   : > { %2336 = vmatmul.bf16.vlgmr.msrb.gmra.mxu0 %v7054_v63  ;;  %v5734_v63 = vld [vmem:[%s8502_s3 + $0x9ac] sm:$0xf0]  ;;  %v5050_v10 = vor.u32 %v5718_v52, %v5049_v42  ;;  %v5131_v42 = vld [vmem:[%s8502_s3 + $0x9d0] sm:$0xf0]  ;;  %v5796_v52 = vld [vmem:[%s8502_s3 + $0xba4] sm:$0xf] }
 0x11c   : > { %3200 = vmatpush.bf16.msra.mxu2 %v5258_v32  ;;  %2349 = vmatmul.bf16.vlgmr.msrb.gmra.mxu1 %v7076_v11  ;;  %v5114_v11 = vor.u32 %v5734_v63, %v5113_v46  ;;  %v4938_v32 = vor.u32 %v5690_v21, %v4937_v20  ;;  %v1516_v40 = vadd.f32 %v1515_v26, %v1503_v31  ;;  %v2382_v44 = vld [vmem:[#allocation2 + $0x10] sm:$0xfc]  ;;  %v2386_v56 = vld [vmem:[#allocation2 + $0x30] sm:$0x3]  ;;  %v5740_v21 = vld [vmem:[%s8502_s3 + $0x9e4] sm:$0xf] }
 0x11d   : > { %3186 = vmatpush.bf16.msra.mxu1 %v5146_v36  ;;  %3213 = vmatpush.bf16.msra.mxu3 %v5386_v54  ;;  %v1528_v36 = vpop.f32.mrf.mxu3  ;;  %v5178_v54 = vor.u32 %v5750_v24, %v5177_v23  ;;  %v5306_v46 = vor.u32 %v5782_v35, %v5305_v34  ;;  %v2390_v0 = vpack.c.bf16 %v2386_v56, %v2382_v44  ;;  %v5714_v20 = vld [vmem:[%s8502_s3 + $0x90c] sm:$0xf0]  ;;  %v5003_v31 = vld [vmem:[%s8502_s3 + $0x8d0] sm:$0xf0]  ;;  %v7854_v35 = vrot.slane %v2388_v14, 1 }
 0x11e   : > { %3174 = vmatpush.bf16.msra.mxu0 %v5002_v38  ;;  %v5161_v38 = vld [vmem:[%s8502_s3 + $0xa00] sm:$0xf]  ;;  %v7800_v63 = vadd.f32 %v1528_v36, %v1516_v40  ;;  %v5034_v34 = vor.u32 %v5714_v20, %v5033_v1  ;;  %v5764_v36 = vld [vmem:[%s8502_s3 + $0xaa4] sm:$0xf]  ;;  %v4987_v56 = vld [vmem:[%s8502_s3 + $0x8b0] sm:$0xf0] }
 0x11f   : > { %v5162_v58 = vor.u32 %v5746_v39, %v5161_v38  ;;  %v7838_v26 = vrot.slane %v2390_v0, 1  ;;  %v5736_v38 = vld [vmem:[%s8502_s3 + $0x9c4] sm:$0xf] }
 0x120   : > { %3201 = vmatpush.bf16.msra.mxu2 %v5242_v62  ;;  %v5772_v62 = vld [vmem:[%s8502_s3 + $0xae4] sm:$0xf] }
 0x121   : > { %3187 = vmatpush.bf16.msra.mxu1 %v5130_v45  ;;  %3214 = vmatpush.bf16.msra.mxu3 %v5370_v47  ;;  %v5066_v45 = vor.u32 %v5722_v29, %v5065_v28  ;;  %v4905_v47 = vld [vmem:[%s8502_s3 + $0x800] sm:$0xf]  ;;  %v1504_v7 = vpop.f32.mrf.mxu1  ;;  %v5387_v28 = vld [vmem:[%s8502_s3 + $0xbd0] sm:$0xf0]  ;;  %v5700_v44 = vld [vmem:[%s8502_s3 + $0x8a4] sm:$0xf] }
 0x122   : > { %3175 = vmatpush.bf16.msra.mxu0 %v4986_v8  ;;  %v5275_v8 = vld [vmem:[%s8502_s3 + $0xaf0] sm:$0xf0]  ;;  %v5696_v57 = vld [vmem:[%s8502_s3 + $0x884] sm:$0xf] }
 0x123   : > { %v5278_v4 = vor.u32 %v5772_v62, %v5275_v8  ;;  %v7876_v62 = vrot.slane %v2389_v33, 1  ;;  %v5134_v8 = vor.u32 %v5736_v38, %v5131_v42  ;;  %v5728_v1 = vld [vmem:[%s8502_s3 + $0x984] sm:$0xf]  ;;  %v5307_v42 = vld [vmem:[%s8502_s3 + $0xb30] sm:$0xf0] }
 0x124   : > { %3202 = vmatpush.bf16.msra.mxu2 %v5226_v55  ;;  %v1491_v55 = vpop.f32.mrf.mxu0  ;;  %v5692_v7 = vld [vmem:[%s8502_s3 + $0x864] sm:$0xf] }
 0x125   : > { %3188 = vmatpush.bf16.msra.mxu1 %v5114_v11  ;;  %3215 = vmatpush.bf16.msra.mxu3 %v5354_v60  ;;  %v5682_v11 = vld [vmem:[%s8502_s3 + $0x80c] sm:$0xf0]  ;;  %v5804_v60 = vld [vmem:[%s8502_s3 + $0xbe4] sm:$0xf]  ;;  %v1530_v24 = vpop.f32.mrf.mxu3 }
 0x126   : > { %3176 = vmatpush.bf16.msra.mxu0 %v4970_v61  ;;  %v5403_v61 = vld [vmem:[%s8502_s3 + $0xbf0] sm:$0xf0]  ;;  %v4906_v19 = vor.u32 %v5682_v11, %v4905_v47  ;;  %v5792_v55 = vld [vmem:[%s8502_s3 + $0xb84] sm:$0xf] }
 0x127   : > { %v5406_v23 = vor.u32 %v5804_v60, %v5403_v61  ;;  %v5227_v47 = vld [vmem:[%s8502_s3 + $0xa90] sm:$0xf0]  ;;  %v5756_v60 = vld [vmem:[%s8502_s3 + $0xa64] sm:$0xf]  ;;  %v5358_v2 = vor.u32 %v5792_v55, %v5355_v17  ;;  %v5775_v55 = vld [vmem:[%s8502_s3 + $0xaf4] sm:$0xf0] }
 0x128   : > { %3203 = vmatpush.bf16.msra.mxu2 %v5210_v5  ;;  %v2391_v5 = vpack.c.bf16 %v2387_v49, %v2383_v48  ;;  %v5732_v48 = vld [vmem:[%s8502_s3 + $0x9a4] sm:$0xf]  ;;  %v4971_v11 = vld [vmem:[%s8502_s3 + $0x890] sm:$0xf0] }
 0x129   : > { %3189 = vmatpush.bf16.msra.mxu1 %v5098_v9  ;;  %3216 = vmatpush.bf16.msra.mxu3 %v5338_v12  ;;  %v1517_v9 = vpop.f32.mrf.mxu2  ;;  %v5290_v12 = vor.u32 %v5778_v51, %v5289_v43  ;;  %v5371_v43 = vld [vmem:[%s8502_s3 + $0xbb0] sm:$0xf0]  ;;  %v4974_v3 = vor.u32 %v5696_v57, %v4971_v11  ;;  %v5724_v16 = vld [vmem:[%s8502_s3 + $0x964] sm:$0xf] }
 0x12a   : > { %3177 = vmatpush.bf16.msra.mxu0 %v4954_v13  ;;  %v5259_v13 = vld [vmem:[%s8502_s3 + $0xad0] sm:$0xf0]  ;;  %v7846_v29 = vrot.slane %v2391_v5, 1  ;;  %v5374_v49 = vor.u32 %v5796_v52, %v5371_v43  ;;  %v5788_v5 = vld [vmem:[%s8502_s3 + $0xb64] sm:$0xf] }
 0x12b   : > { %v5115_v51 = vld [vmem:[%s8502_s3 + $0x9b0] sm:$0xf0]  ;;  %v5684_v43 = vld [vmem:[%s8502_s3 + $0x824] sm:$0xf] }
 0x12c   : > { %3204 = vmatpush.bf16.msra.mxu2 %v5194_v22  ;;  %v5147_v22 = vld [vmem:[%s8502_s3 + $0x9f0] sm:$0xf0]  ;;  %v5118_v0 = vor.u32 %v5732_v48, %v5115_v51  ;;  %v5281_v51 = vld [vmem:[%s8502_s3 + $0xae8] sm:$0xf]  ;;  %v5680_v11 = vld [vmem:[%s8502_s3 + $0x804] sm:$0xf] }
 0x12d   : > { %3190 = vmatpush.bf16.msra.mxu1 %v5082_v27  ;;  %3217 = vmatpush.bf16.msra.mxu3 %v5322_v30  ;;  %v5800_v27 = vld [vmem:[%s8502_s3 + $0xbc4] sm:$0xf]  ;;  %v5211_v61 = vld [vmem:[%s8502_s3 + $0xa70] sm:$0xf0] }
 0x12e   : > { %3178 = vmatpush.bf16.msra.mxu0 %v4938_v32  ;;  %v5704_v30 = vld [vmem:[%s8502_s3 + $0x8c4] sm:$0xf]  ;;  %v5262_v32 = vor.u32 %v5768_v6, %v5259_v13  ;;  %v5390_v39 = vor.u32 %v5800_v27, %v5387_v28  ;;  %v5339_v6 = vld [vmem:[%s8502_s3 + $0xb70] sm:$0xf0] }
 0x12f   : > { %v5006_v40 = vor.u32 %v5704_v30, %v5003_v31  ;;  %v4955_v9 = vld [vmem:[%s8502_s3 + $0x870] sm:$0xf0]  ;;  %v5748_v31 = vld [vmem:[%s8502_s3 + $0xa24] sm:$0xf] }
 0x130   : > { %3205 = vmatpush.bf16.msra.mxu2 %v5178_v54  ;;  %v5150_v54 = vor.u32 %v5740_v21, %v5147_v22  ;;  %v5195_v13 = vld [vmem:[%s8502_s3 + $0xa50] sm:$0xf0]  ;;  %v4958_v21 = vor.u32 %v5692_v7, %v4955_v9 }
 0x131   : > { %3191 = vmatpush.bf16.msra.mxu1 %v5066_v45  ;;  %3218 = vmatpush.bf16.msra.mxu3 %v5306_v46  ;;  %v5246_v45 = vor.u32 %v5764_v36, %v5243_v37  ;;  %v5760_v46 = vld [vmem:[%s8502_s3 + $0xa84] sm:$0xf]  ;;  %v5083_v22 = vld [vmem:[%s8502_s3 + $0x970] sm:$0xf0] }
 0x132   : > { %3179 = vmatpush.bf16.msra.mxu0 %v4922_v50  ;;  %v4990_v50 = vor.u32 %v5700_v44, %v4987_v56  ;;  %v5323_v24 = vld [vmem:[%s8502_s3 + $0xb50] sm:$0xf0]  ;;  %v5720_v37 = vld [vmem:[%s8502_s3 + $0x944] sm:$0xf] }
 0x133   : > { %v4923_v44 = vld [vmem:[%s8502_s3 + $0x830] sm:$0xf0] }
 0x134   : > { %3206 = vmatpush.bf16.msra.mxu2 %v5162_v58  ;;  %v5230_v58 = vor.u32 %v5760_v46, %v5227_v47  ;;  %v5744_v46 = vld [vmem:[%s8502_s3 + $0xa04] sm:$0xf]  ;;  %v5163_v47 = vld [vmem:[%s8502_s3 + $0xa10] sm:$0xf0]  ;;  %v4926_v57 = vor.u32 %v5684_v43, %v4923_v44  ;;  %v5233_v43 = vld [vmem:[%s8502_s3 + $0xa88] sm:$0xf] }
 0x135   : > { %3192 = vmatpush.bf16.msra.mxu1 %v5050_v10  ;;  %3219 = vmatpush.bf16.msra.mxu3 %v5290_v12  ;;  %v5214_v10 = vor.u32 %v5756_v60, %v5211_v61  ;;  %v5752_v12 = vld [vmem:[%s8502_s3 + $0xa44] sm:$0xf]  ;;  %v5291_v60 = vld [vmem:[%s8502_s3 + $0xb10] sm:$0xf0]  ;;  %v5763_v44 = vld [vmem:[%s8502_s3 + $0xa94] sm:$0xf0] }
 0x136   : > { %3180 = vmatpush.bf16.msra.mxu0 %v4906_v19  ;;  %v5342_v19 = vor.u32 %v5788_v5, %v5339_v6  ;;  %v5198_v27 = vor.u32 %v5752_v12, %v5195_v13  ;;  %v4907_v61 = vld [vmem:[%s8502_s3 + $0x810] sm:$0xf0]  ;;  %v5282_v5 = vor.u32 %v5775_v55, %v5281_v51  ;;  %v5265_v12 = vld [vmem:[%s8502_s3 + $0xac8] sm:$0xf]  ;;  %v5771_v13 = vld [vmem:[%s8502_s3 + $0xad4] sm:$0xf0] }
 0x137   : > { %3207 = vmatmul.bf16.vlgmr.msra.gmra.mxu2 %v7838_v26  ;;  %v4977_v51 = vld [vmem:[%s8502_s3 + $0x888] sm:$0xf]  ;;  %v5699_v55 = vld [vmem:[%s8502_s3 + $0x894] sm:$0xf0] }
 0x138   : > { %3251 = vmatpush.bf16.msrb.mxu2 %v5278_v4  ;;  %3220 = vmatmul.bf16.vlgmr.msra.gmra.mxu3 %v7846_v29  ;;  %v5099_v4 = vld [vmem:[%s8502_s3 + $0x990] sm:$0xf0]  ;;  %v2181_v14 = vpop.f32.mrf.mxu0 }
 0x139   : > { %3264 = vmatpush.bf16.msrb.mxu3 %v5406_v23  ;;  %3193 = vmatpush.bf16.msra.mxu1 %v5034_v34  ;;  %v5102_v15 = vor.u32 %v5728_v1, %v5099_v4  ;;  %v2182_v20 = vadd.f32 %v2181_v14, %v7363_v41  ;;  %v5784_v23 = vld [vmem:[%s8502_s3 + $0xb44] sm:$0xf]  ;;  %v4939_v41 = vld [vmem:[%s8502_s3 + $0x850] sm:$0xf0]  ;;  %v2194_v28 = vpop.f32.mrf.mxu1  ;;  %v5086_v34 = vor.u32 %v5724_v16, %v5083_v22  ;;  %v5409_v1 = vld [vmem:[%s8502_s3 + $0xbe8] sm:$0xf] }
 0x13a   : > { %3225 = vmatpush.bf16.msrb.mxu0 %v5022_v25  ;;  %v5688_v25 = vld [vmem:[%s8502_s3 + $0x844] sm:$0xf]  ;;  %v2207_v30 = vpop.f32.mrf.mxu2  ;;  %v5711_v4 = vld [vmem:[%s8502_s3 + $0x8f4] sm:$0xf0] }
 0x13b   : > { %3181 = vmatmul.bf16.vlgmr.msra.gmra.mxu0 %v7854_v35  ;;  %v2195_v33 = vadd.f32 %v2194_v28, %v2182_v20  ;;  %v2220_v36 = vpop.f32.mrf.mxu3  ;;  %v4942_v38 = vor.u32 %v5688_v25, %v4939_v41  ;;  %v5712_v16 = vld [vmem:[%s8502_s3 + $0x904] sm:$0xf]  ;;  %v5153_v20 = vld [vmem:[%s8502_s3 + $0x9e8] sm:$0xf]  ;;  %v5803_v25 = vld [vmem:[%s8502_s3 + $0xbd4] sm:$0xf0]  ;;  %v5266_v28 = vor.u32 %v5771_v13, %v5265_v12 }
 0x13c   : > { %3252 = vmatpush.bf16.msrb.mxu2 %v5262_v32  ;;  %3194 = vmatmul.bf16.vlgmr.msra.gmra.mxu1 %v7876_v62  ;;  %v5179_v32 = vld [vmem:[%s8502_s3 + $0xa30] sm:$0xf0]  ;;  %v5009_v41 = vld [vmem:[%s8502_s3 + $0x8c8] sm:$0xf] }
 0x13d   : > { %3238 = vmatpush.bf16.msrb.mxu1 %v5150_v54  ;;  %3265 = vmatpush.bf16.msrb.mxu3 %v5390_v39  ;;  %v5326_v54 = vor.u32 %v5784_v23, %v5323_v24  ;;  %v5067_v39 = vld [vmem:[%s8502_s3 + $0x950] sm:$0xf0]  ;;  %v2208_v52 = vadd.f32 %v2207_v30, %v2195_v33  ;;  %v5182_v56 = vor.u32 %v5748_v31, %v5179_v32  ;;  %v5743_v23 = vld [vmem:[%s8502_s3 + $0x9f4] sm:$0xf0]  ;;  %v5393_v24 = vld [vmem:[%s8502_s3 + $0xbc8] sm:$0xf] }
 0x13e   : > { %3226 = vmatpush.bf16.msrb.mxu0 %v5006_v40  ;;  %v5780_v40 = vld [vmem:[%s8502_s3 + $0xb24] sm:$0xf]  ;;  %v5070_v48 = vor.u32 %v5720_v37, %v5067_v39  ;;  %v5249_v31 = vld [vmem:[%s8502_s3 + $0xaa8] sm:$0xf]  ;;  %v5767_v32 = vld [vmem:[%s8502_s3 + $0xab4] sm:$0xf0]  ;;  %v5154_v33 = vor.u32 %v5743_v23, %v5153_v20 }
 0x13f   : > { %v5799_v39 = vld [vmem:[%s8502_s3 + $0xbb4] sm:$0xf0]  ;;  %v5089_v13 = vld [vmem:[%s8502_s3 + $0x968] sm:$0xf] }
 0x140   : > { %3253 = vmatpush.bf16.msrb.mxu2 %v5246_v45  ;;  %v5716_v45 = vld [vmem:[%s8502_s3 + $0x924] sm:$0xf]  ;;  %v2183_v17 = vpop.f32.mrf.mxu0  ;;  %v5329_v20 = vld [vmem:[%s8502_s3 + $0xb48] sm:$0xf] }
 0x141   : > { %3239 = vmatpush.bf16.msrb.mxu1 %v5134_v8  ;;  %3266 = vmatpush.bf16.msrb.mxu3 %v5374_v49  ;;  %v7992_v8 = vadd.f32 %v2220_v36, %v2208_v52  ;;  %v5051_v49 = vld [vmem:[%s8502_s3 + $0x930] sm:$0xf0]  ;;  %v2196_v6 = vpop.f32.mrf.mxu1  ;;  %v5394_v36 = vor.u32 %v5803_v25, %v5393_v24  ;;  %v5250_v52 = vor.u32 %v5767_v32, %v5249_v31  ;;  %v5185_v25 = vld [vmem:[%s8502_s3 + $0xa28] sm:$0xf] }
 0x142   : > { %3227 = vmatpush.bf16.msrb.mxu0 %v4990_v50  ;;  %v5310_v50 = vor.u32 %v5780_v40, %v5307_v42  ;;  %v2209_v7 = vpop.f32.mrf.mxu2  ;;  %v5054_v9 = vor.u32 %v5716_v45, %v5051_v49  ;;  %v4993_v40 = vld [vmem:[%s8502_s3 + $0x8a8] sm:$0xf]  ;;  %v5703_v42 = vld [vmem:[%s8502_s3 + $0x8b4] sm:$0xf0]  ;;  %v5234_v17 = vor.u32 %v5763_v44, %v5233_v43 }
 0x143   : > { %v2222_v14 = vpop.f32.mrf.mxu3  ;;  %v5121_v45 = vld [vmem:[%s8502_s3 + $0x9a8] sm:$0xf]  ;;  %v5747_v44 = vld [vmem:[%s8502_s3 + $0xa14] sm:$0xf0] }
 0x144   : > { %3254 = vmatpush.bf16.msrb.mxu2 %v5230_v58  ;;  %v5776_v58 = vld [vmem:[%s8502_s3 + $0xb04] sm:$0xf]  ;;  %v5361_v49 = vld [vmem:[%s8502_s3 + $0xb88] sm:$0xf] }
 0x145   : > { %3240 = vmatpush.bf16.msrb.mxu1 %v5118_v0  ;;  %3267 = vmatpush.bf16.msrb.mxu3 %v5358_v2  ;;  %v5166_v0 = vor.u32 %v5744_v46, %v5163_v47  ;;  %v5807_v2 = vld [vmem:[%s8502_s3 + $0xbf4] sm:$0xf0]  ;;  %v4994_v47 = vor.u32 %v5703_v42, %v4993_v40  ;;  %v5201_v7 = vld [vmem:[%s8502_s3 + $0xa48] sm:$0xf] }
 0x146   : > { %3228 = vmatpush.bf16.msrb.mxu0 %v4974_v3  ;;  %v5025_v3 = vld [vmem:[%s8502_s3 + $0x8e8] sm:$0xf]  ;;  %v5687_v40 = vld [vmem:[%s8502_s3 + $0x834] sm:$0xf0] }
 0x147   : > { %v5026_v22 = vor.u32 %v5711_v4, %v5025_v3  ;;  %v5791_v3 = vld [vmem:[%s8502_s3 + $0xb74] sm:$0xf0]  ;;  %v4961_v4 = vld [vmem:[%s8502_s3 + $0x868] sm:$0xf] }
 0x148   : > { %3255 = vmatpush.bf16.msrb.mxu2 %v5214_v10  ;;  %v5294_v10 = vor.u32 %v5776_v58, %v5291_v60  ;;  %v5105_v60 = vld [vmem:[%s8502_s3 + $0x988] sm:$0xf] }
 0x149   : > { %3241 = vmatpush.bf16.msrb.mxu1 %v5102_v15  ;;  %3268 = vmatpush.bf16.msrb.mxu3 %v5342_v19  ;;  %v4910_v15 = vor.u32 %v5680_v11, %v4907_v61  ;;  %v5035_v19 = vld [vmem:[%s8502_s3 + $0x910] sm:$0xf0]  ;;  %v5759_v11 = vld [vmem:[%s8502_s3 + $0xa74] sm:$0xf0]  ;;  %v5073_v31 = vld [vmem:[%s8502_s3 + $0x948] sm:$0xf] }
 0x14a   : > { %3229 = vmatpush.bf16.msrb.mxu0 %v4958_v21  ;;  %v5410_v21 = vor.u32 %v5807_v2, %v5409_v1  ;;  %v5038_v30 = vor.u32 %v5712_v16, %v5035_v19  ;;  %v5731_v1 = vld [vmem:[%s8502_s3 + $0x994] sm:$0xf0]  ;;  %v5345_v2 = vld [vmem:[%s8502_s3 + $0xb68] sm:$0xf] }
 0x14b   : > { %v5106_v12 = vor.u32 %v5731_v1, %v5105_v60  ;;  %v5346_v14 = vor.u32 %v5791_v3, %v5345_v2  ;;  %v5727_v19 = vld [vmem:[%s8502_s3 + $0x974] sm:$0xf0]  ;;  %v5169_v43 = vld [vmem:[%s8502_s3 + $0xa08] sm:$0xf]  ;;  %v5805_v60 = vld [vmem:[%s8502_s3 + $0xbec] sm:$0xf] }
 0x14c   : > { %3256 = vmatpush.bf16.msrb.mxu2 %v5198_v27  ;;  %v5707_v27 = vld [vmem:[%s8502_s3 + $0x8d4] sm:$0xf0]  ;;  %v5027_v1 = vld [vmem:[%s8502_s3 + $0x8f8] sm:$0xf0] }
 0x14d   : > { %3242 = vmatpush.bf16.msrb.mxu1 %v5086_v34  ;;  %3269 = vmatpush.bf16.msrb.mxu3 %v5326_v54  ;;  %v5137_v34 = vld [vmem:[%s8502_s3 + $0x9c8] sm:$0xf]  ;;  %v5010_v37 = vor.u32 %v5707_v27, %v5009_v41  ;;  %v5739_v54 = vld [vmem:[%s8502_s3 + $0x9d4] sm:$0xf0] }
 0x14e   : > { %3230 = vmatpush.bf16.msrb.mxu0 %v4942_v38  ;;  %v5377_v38 = vld [vmem:[%s8502_s3 + $0xba8] sm:$0xf]  ;;  %v5751_v41 = vld [vmem:[%s8502_s3 + $0xa34] sm:$0xf0] }
 0x14f   : > { %v5378_v46 = vor.u32 %v5799_v39, %v5377_v38  ;;  %v4929_v39 = vld [vmem:[%s8502_s3 + $0x828] sm:$0xf]  ;;  %v5186_v42 = vor.u32 %v5751_v41, %v5185_v25  ;;  %v5765_v41 = vld [vmem:[%s8502_s3 + $0xaac] sm:$0xf] }
 0x150   : > { %3257 = vmatpush.bf16.msrb.mxu2 %v5182_v56  ;;  %v5138_v56 = vor.u32 %v5739_v54, %v5137_v34  ;;  %v5783_v54 = vld [vmem:[%s8502_s3 + $0xb34] sm:$0xf0] }
 0x151   : > { %3243 = vmatpush.bf16.msrb.mxu1 %v5070_v48  ;;  %3270 = vmatpush.bf16.msrb.mxu3 %v5310_v50  ;;  %v5735_v48 = vld [vmem:[%s8502_s3 + $0x9b4] sm:$0xf0] }
 0x152   : > { %3231 = vmatpush.bf16.msrb.mxu0 %v4926_v57  ;;  %v5795_v50 = vld [vmem:[%s8502_s3 + $0xb94] sm:$0xf0]  ;;  %v5217_v57 = vld [vmem:[%s8502_s3 + $0xa68] sm:$0xf]  ;;  %v5122_v58 = vor.u32 %v5735_v48, %v5121_v45  ;;  %v5773_v48 = vld [vmem:[%s8502_s3 + $0xaec] sm:$0xf] }
 0x153   : > { %v5362_v61 = vor.u32 %v5795_v50, %v5361_v49  ;;  %v5218_v6 = vor.u32 %v5759_v11, %v5217_v57  ;;  %v5283_v49 = vld [vmem:[%s8502_s3 + $0xaf8] sm:$0xf0]  ;;  %v5779_v57 = vld [vmem:[%s8502_s3 + $0xb14] sm:$0xf0] }
 0x154   : > { %3258 = vmatpush.bf16.msrb.mxu2 %v5166_v0  ;;  %v4978_v0 = vor.u32 %v5699_v55, %v4977_v51  ;;  %v4930_v51 = vor.u32 %v5687_v40, %v4929_v39  ;;  %v4913_v55 = vld [vmem:[%s8502_s3 + $0x808] sm:$0xf]  ;;  %v5683_v11 = vld [vmem:[%s8502_s3 + $0x814] sm:$0xf0]  ;;  %v5286_v2 = vor.u32 %v5773_v48, %v5283_v49  ;;  %v5761_v39 = vld [vmem:[%s8502_s3 + $0xa8c] sm:$0xf] }
 0x155   : > { %3244 = vmatpush.bf16.msrb.mxu1 %v5054_v9  ;;  %3271 = vmatpush.bf16.msrb.mxu3 %v5294_v10  ;;  %v5755_v9 = vld [vmem:[%s8502_s3 + $0xa54] sm:$0xf0]  ;;  %v5235_v40 = vld [vmem:[%s8502_s3 + $0xa98] sm:$0xf0]  ;;  %v5697_v48 = vld [vmem:[%s8502_s3 + $0x88c] sm:$0xf] }
 0x156   : > { %3232 = vmatpush.bf16.msrb.mxu0 %v4910_v15  ;;  %v5202_v23 = vor.u32 %v5755_v9, %v5201_v7  ;;  %v5267_v7 = vld [vmem:[%s8502_s3 + $0xad8] sm:$0xf0] }
 0x157   : > { %3259 = vmatmul.bf16.vlgmr.msrb.gmra.mxu2 %v7838_v26  ;;  %v4979_v49 = vld [vmem:[%s8502_s3 + $0x898] sm:$0xf0] }
 0x158   : > { %3303 = vmatpush.bf16.msra.mxu2 %v5282_v5  ;;  %3272 = vmatmul.bf16.vlgmr.msrb.gmra.mxu3 %v7846_v29  ;;  %v5695_v5 = vld [vmem:[%s8502_s3 + $0x874] sm:$0xf0]  ;;  %v2233_v10 = vpop.f32.mrf.mxu0 }
 0x159   : > { %3316 = vmatpush.bf16.msra.mxu3 %v5410_v21  ;;  %3245 = vmatpush.bf16.msrb.mxu1 %v5038_v30  ;;  %v2234_v15 = vadd.f32 %v2233_v10, %v7488_v53  ;;  %v4962_v16 = vor.u32 %v5695_v5, %v4961_v4  ;;  %v5787_v21 = vld [vmem:[%s8502_s3 + $0xb54] sm:$0xf0]  ;;  %v2246_v24 = vpop.f32.mrf.mxu1  ;;  %v4914_v10 = vor.u32 %v5683_v11, %v4913_v55  ;;  %v5219_v55 = vld [vmem:[%s8502_s3 + $0xa78] sm:$0xf0] }
 0x15a   : > { %3277 = vmatpush.bf16.msra.mxu0 %v5026_v22  ;;  %v4945_v22 = vld [vmem:[%s8502_s3 + $0x848] sm:$0xf]  ;;  %v5691_v53 = vld [vmem:[%s8502_s3 + $0x854] sm:$0xf0]  ;;  %v2259_v30 = vpop.f32.mrf.mxu2  ;;  %v5330_v32 = vor.u32 %v5787_v21, %v5329_v20  ;;  %v5155_v20 = vld [vmem:[%s8502_s3 + $0x9f8] sm:$0xf0] }
 0x15b   : > { %3233 = vmatmul.bf16.vlgmr.msrb.gmra.mxu0 %v7854_v35  ;;  %v2247_v27 = vadd.f32 %v2246_v24, %v2234_v15  ;;  %v4946_v34 = vor.u32 %v5691_v53, %v4945_v22  ;;  %v5801_v21 = vld [vmem:[%s8502_s3 + $0xbcc] sm:$0xf]  ;;  %v5395_v22 = vld [vmem:[%s8502_s3 + $0xbd8] sm:$0xf0] }
 0x15c   : > { %3304 = vmatpush.bf16.msra.mxu2 %v5266_v28  ;;  %3246 = vmatmul.bf16.vlgmr.msrb.gmra.mxu1 %v7876_v62  ;;  %v5090_v28 = vor.u32 %v5727_v19, %v5089_v13  ;;  %v5715_v13 = vld [vmem:[%s8502_s3 + $0x914] sm:$0xf0]  ;;  %v5705_v53 = vld [vmem:[%s8502_s3 + $0x8cc] sm:$0xf] }
 0x15d   : > { %3290 = vmatpush.bf16.msra.mxu1 %v5154_v33  ;;  %3317 = vmatpush.bf16.msra.mxu3 %v5394_v36  ;;  %v2272_v33 = vpop.f32.mrf.mxu3  ;;  %v5723_v36 = vld [vmem:[%s8502_s3 + $0x954] sm:$0xf0]  ;;  %v2260_v38 = vadd.f32 %v2259_v30, %v2247_v27  ;;  %v5251_v27 = vld [vmem:[%s8502_s3 + $0xab8] sm:$0xf0]  ;;  %v5737_v30 = vld [vmem:[%s8502_s3 + $0x9cc] sm:$0xf] }
 0x15e   : > { %3278 = vmatpush.bf16.msra.mxu0 %v5010_v37  ;;  %v5313_v37 = vld [vmem:[%s8502_s3 + $0xb28] sm:$0xf]  ;;  %v5074_v45 = vor.u32 %v5723_v36, %v5073_v31  ;;  %v5398_v31 = vor.u32 %v5801_v21, %v5395_v22  ;;  %v5379_v36 = vld [vmem:[%s8502_s3 + $0xbb8] sm:$0xf0]  ;;  %v5749_v22 = vld [vmem:[%s8502_s3 + $0xa2c] sm:$0xf] }
 0x160   : > { %3305 = vmatpush.bf16.msra.mxu2 %v5250_v52  ;;  %v5057_v52 = vld [vmem:[%s8502_s3 + $0x928] sm:$0xf]  ;;  %v2235_v50 = vpop.f32.mrf.mxu0 }
 0x161   : > { %3291 = vmatpush.bf16.msra.mxu1 %v5138_v56  ;;  %3318 = vmatpush.bf16.msra.mxu3 %v5378_v46  ;;  %v8191_v56 = vadd.f32 %v2272_v33, %v2260_v38  ;;  %v5719_v46 = vld [vmem:[%s8502_s3 + $0x934] sm:$0xf0]  ;;  %v2248_v3 = vpop.f32.mrf.mxu1  ;;  %v5139_v33 = vld [vmem:[%s8502_s3 + $0x9d8] sm:$0xf0]  ;;  %v5254_v38 = vor.u32 %v5765_v41, %v5251_v27  ;;  %v5238_v50 = vor.u32 %v5761_v39, %v5235_v40  ;;  %v5721_v41 = vld [vmem:[%s8502_s3 + $0x94c] sm:$0xf] }
 0x162   : > { %3279 = vmatpush.bf16.msra.mxu0 %v4994_v47  ;;  %v5314_v47 = vor.u32 %v5783_v54, %v5313_v37  ;;  %v5058_v4 = vor.u32 %v5719_v46, %v5057_v52  ;;  %v2261_v9 = vpop.f32.mrf.mxu2  ;;  %v5701_v37 = vld [vmem:[%s8502_s3 + $0x8ac] sm:$0xf]  ;;  %v4995_v54 = vld [vmem:[%s8502_s3 + $0x8b8] sm:$0xf0] }
 0x163   : > { %v5733_v52 = vld [vmem:[%s8502_s3 + $0x9ac] sm:$0xf]  ;;  %v5171_v39 = vld [vmem:[%s8502_s3 + $0xa18] sm:$0xf0] }
 0x164   : > { %3306 = vmatpush.bf16.msra.mxu2 %v5234_v17  ;;  %v5297_v17 = vld [vmem:[%s8502_s3 + $0xb08] sm:$0xf]  ;;  %v5793_v46 = vld [vmem:[%s8502_s3 + $0xb8c] sm:$0xf] }
 0x165   : > { %3292 = vmatpush.bf16.msra.mxu1 %v5122_v58  ;;  %3319 = vmatpush.bf16.msra.mxu3 %v5362_v61  ;;  %v5170_v58 = vor.u32 %v5747_v44, %v5169_v43  ;;  %v5411_v61 = vld [vmem:[%s8502_s3 + $0xbf8] sm:$0xf0]  ;;  %v5298_v5 = vor.u32 %v5779_v57, %v5297_v17  ;;  %v4998_v44 = vor.u32 %v5701_v37, %v4995_v54  ;;  %v5729_v57 = vld [vmem:[%s8502_s3 + $0x98c] sm:$0xf] }
 0x166   : > { %3280 = vmatpush.bf16.msra.mxu0 %v4978_v0  ;;  %v5709_v0 = vld [vmem:[%s8502_s3 + $0x8ec] sm:$0xf]  ;;  %v5414_v15 = vor.u32 %v5805_v60, %v5411_v61  ;;  %v5107_v60 = vld [vmem:[%s8502_s3 + $0x998] sm:$0xf0] }
 0x167   : > { %v5030_v19 = vor.u32 %v5709_v0, %v5027_v1  ;;  %v5789_v61 = vld [vmem:[%s8502_s3 + $0xb6c] sm:$0xf]  ;;  %v5347_v0 = vld [vmem:[%s8502_s3 + $0xb78] sm:$0xf0] }
 0x168   : > { %3307 = vmatpush.bf16.msra.mxu2 %v5218_v6  ;;  %v5769_v6 = vld [vmem:[%s8502_s3 + $0xacc] sm:$0xf]  ;;  %v4931_v37 = vld [vmem:[%s8502_s3 + $0x838] sm:$0xf0] }
 0x169   : > { %3293 = vmatpush.bf16.msra.mxu1 %v5106_v12  ;;  %3320 = vmatpush.bf16.msra.mxu3 %v5346_v14  ;;  %v5041_v12 = vld [vmem:[%s8502_s3 + $0x908] sm:$0xf]  ;;  %v5741_v14 = vld [vmem:[%s8502_s3 + $0x9ec] sm:$0xf]  ;;  %v5270_v24 = vor.u32 %v5769_v6, %v5267_v7  ;;  %v5110_v7 = vor.u32 %v5729_v57, %v5107_v60 }
 0x16a   : > { %3281 = vmatpush.bf16.msra.mxu0 %v4962_v16  ;;  %v2274_v16 = vpop.f32.mrf.mxu3  ;;  %v5042_v25 = vor.u32 %v5715_v13, %v5041_v12  ;;  %v5693_v1 = vld [vmem:[%s8502_s3 + $0x86c] sm:$0xf] }
 0x16b   : > { %v5725_v9 = vld [vmem:[%s8502_s3 + $0x96c] sm:$0xf]  ;;  %v5331_v16 = vld [vmem:[%s8502_s3 + $0xb58] sm:$0xf0] }
 0x16c   : > { %3308 = vmatpush.bf16.msra.mxu2 %v5202_v23  ;;  %v5011_v23 = vld [vmem:[%s8502_s3 + $0x8d8] sm:$0xf0]  ;;  %v5713_v60 = vld [vmem:[%s8502_s3 + $0x90c] sm:$0xf] }
 0x16d   : > { %3294 = vmatpush.bf16.msra.mxu1 %v5090_v28  ;;  %3321 = vmatpush.bf16.msra.mxu3 %v5330_v32  ;;  %v5158_v28 = vor.u32 %v5741_v14, %v5155_v20  ;;  %v5014_v32 = vor.u32 %v5705_v53, %v5011_v23  ;;  %v5091_v14 = vld [vmem:[%s8502_s3 + $0x978] sm:$0xf0] }
 0x16e   : > { %3282 = vmatpush.bf16.msra.mxu0 %v4946_v34  ;;  %v5797_v34 = vld [vmem:[%s8502_s3 + $0xbac] sm:$0xf]  ;;  %v5187_v53 = vld [vmem:[%s8502_s3 + $0xa38] sm:$0xf0] }
 0x16f   : > { %v5382_v43 = vor.u32 %v5797_v34, %v5379_v36  ;;  %v5685_v36 = vld [vmem:[%s8502_s3 + $0x82c] sm:$0xf]  ;;  %v5190_v54 = vor.u32 %v5749_v22, %v5187_v53  ;;  %v3399_v53 = vld [vmem:[%s8429_s14] sm:$0xff] }
 0x170   : > { %3309 = vmatpush.bf16.msra.mxu2 %v5186_v42  ;;  %v5142_v42 = vor.u32 %v5737_v30, %v5139_v33  ;;  %v5315_v33 = vld [vmem:[%s8502_s3 + $0xb38] sm:$0xf0] }
 0x171   : > { %3295 = vmatpush.bf16.msra.mxu1 %v5074_v45  ;;  %3322 = vmatpush.bf16.msra.mxu3 %v5314_v47  ;;  %v5123_v45 = vld [vmem:[%s8502_s3 + $0x9b8] sm:$0xf0] }
 0x172   : > { %3283 = vmatpush.bf16.msra.mxu0 %v4930_v51  ;;  %v5363_v47 = vld [vmem:[%s8502_s3 + $0xb98] sm:$0xf0]  ;;  %v5757_v51 = vld [vmem:[%s8502_s3 + $0xa6c] sm:$0xf]  ;;  %v5126_v17 = vor.u32 %v5733_v52, %v5123_v45  ;;  %v4934_v45 = vor.u32 %v5685_v36, %v4931_v37 }
 0x173   : > { %v5366_v11 = vor.u32 %v5793_v46, %v5363_v47  ;;  %v5222_v3 = vor.u32 %v5757_v51, %v5219_v55  ;;  %v5717_v52 = vld [vmem:[%s8502_s3 + $0x92c] sm:$0xf]  ;;  %v5059_v46 = vld [vmem:[%s8502_s3 + $0x938] sm:$0xf0] }
 0x174   : > { %3310 = vmatpush.bf16.msra.mxu2 %v5170_v58  ;;  %v4982_v58 = vor.u32 %v5697_v48, %v4979_v49  ;;  %v5777_v47 = vld [vmem:[%s8502_s3 + $0xb0c] sm:$0xf]  ;;  %v5299_v48 = vld [vmem:[%s8502_s3 + $0xb18] sm:$0xf0] }
 0x175   : > { %3296 = vmatpush.bf16.msra.mxu1 %v5058_v4  ;;  %3323 = vmatpush.bf16.msra.mxu3 %v5298_v5  ;;  %v5753_v4 = vld [vmem:[%s8502_s3 + $0xa4c] sm:$0xf]  ;;  %v5203_v5 = vld [vmem:[%s8502_s3 + $0xa58] sm:$0xf0]  ;;  %v5302_v57 = vor.u32 %v5777_v47, %v5299_v48 }
 0x176   : > { %3284 = vmatpush.bf16.msra.mxu0 %v4914_v10  ;;  %v5350_v10 = vor.u32 %v5789_v61, %v5347_v0  ;;  %v5206_v20 = vor.u32 %v5753_v4, %v5203_v5  ;;  %v5681_v49 = vld [vmem:[%s8502_s3 + $0x80c] sm:$0xf]  ;;  %v5043_v61 = vld [vmem:[%s8502_s3 + $0x918] sm:$0xf0] }
 0x177   : > { %3311 = vmatmul.bf16.vlgmr.msra.gmra.mxu2 %v7838_v26 }
 0x178   : > { %3355 = vmatpush.bf16.msrb.mxu2 %v5286_v2  ;;  %3324 = vmatmul.bf16.vlgmr.msra.gmra.mxu3 %v7846_v29  ;;  %v4963_v2 = vld [vmem:[%s8502_s3 + $0x878] sm:$0xf0]  ;;  %v2285_v6 = vpop.f32.mrf.mxu0 }
 0x179   : > { %3368 = vmatpush.bf16.msrb.mxu3 %v5414_v15  ;;  %3297 = vmatpush.bf16.msra.mxu1 %v5042_v25  ;;  %v2286_v12 = vadd.f32 %v2285_v6, %v7596_v59  ;;  %v4966_v13 = vor.u32 %v5693_v1, %v4963_v2  ;;  %v5785_v15 = vld [vmem:[%s8502_s3 + $0xb4c] sm:$0xf]  ;;  %v4947_v59 = vld [vmem:[%s8502_s3 + $0x858] sm:$0xf0]  ;;  %v2298_v21 = vpop.f32.mrf.mxu1  ;;  %v5046_v1 = vor.u32 %v5713_v60, %v5043_v61 }
 0x17a   : > { %3329 = vmatpush.bf16.msrb.mxu0 %v5030_v19  ;;  %v5689_v19 = vld [vmem:[%s8502_s3 + $0x84c] sm:$0xf]  ;;  %v2311_v25 = vpop.f32.mrf.mxu2  ;;  %v5334_v27 = vor.u32 %v5785_v15, %v5331_v16 }
 0x17b   : > { %3285 = vmatmul.bf16.vlgmr.msra.gmra.mxu0 %v7854_v35  ;;  %v2299_v23 = vadd.f32 %v2298_v21, %v2286_v12  ;;  %v4950_v30 = vor.u32 %v5689_v19, %v4947_v59 }
 0x17c   : > { %3356 = vmatpush.bf16.msrb.mxu2 %v5270_v24  ;;  %3298 = vmatmul.bf16.vlgmr.msra.gmra.mxu1 %v7876_v62  ;;  %v5094_v24 = vor.u32 %v5725_v9, %v5091_v14 }
 0x17d   : > { %3342 = vmatpush.bf16.msrb.mxu1 %v5158_v28  ;;  %3369 = vmatpush.bf16.msrb.mxu3 %v5398_v31  ;;  %v2324_v28 = vpop.f32.mrf.mxu3  ;;  %v5075_v31 = vld [vmem:[%s8502_s3 + $0x958] sm:$0xf0]  ;;  %v2312_v34 = vadd.f32 %v2311_v25, %v2299_v23 }
 0x17e   : > { %3330 = vmatpush.bf16.msrb.mxu0 %v5014_v32  ;;  %v5781_v32 = vld [vmem:[%s8502_s3 + $0xb2c] sm:$0xf] }
 0x17f   : > { %v8387_v40 = vadd.f32 %v2324_v28, %v2312_v34 }
 0x180   : > { %3357 = vmatpush.bf16.msrb.mxu2 %v5254_v38  ;;  %v5745_v38 = vld [vmem:[%s8502_s3 + $0xa0c] sm:$0xf] }
 0x181   : > { %3343 = vmatpush.bf16.msrb.mxu1 %v5142_v42  ;;  %3370 = vmatpush.bf16.msrb.mxu3 %v5382_v43  ;;  %v5078_v42 = vor.u32 %v5721_v41, %v5075_v31  ;;  %v5318_v43 = vor.u32 %v5781_v32, %v5315_v33  ;;  %v5174_v51 = vor.u32 %v5745_v38, %v5171_v39  ;;  %v2300_v55 = vpop.f32.mrf.mxu1 }
 0x182   : > { %3331 = vmatpush.bf16.msrb.mxu0 %v4998_v44  ;;  %v2287_v44 = vpop.f32.mrf.mxu0 }
 0x184   : > { %3358 = vmatpush.bf16.msrb.mxu2 %v5238_v50  ;;  %v4915_v50 = vld [vmem:[%s8502_s3 + $0x818] sm:$0xf0] }
 0x185   : > { %3344 = vmatpush.bf16.msrb.mxu1 %v5126_v17  ;;  %3371 = vmatpush.bf16.msrb.mxu3 %v5366_v11  ;;  %v5062_v17 = vor.u32 %v5717_v52, %v5059_v46  ;;  %v2313_v11 = vpop.f32.mrf.mxu2  ;;  %v2326_v0 = vpop.f32.mrf.mxu3  ;;  %v3400_v52 = vld [vmem:[%s8429_s14 + $0x8] sm:$0xff] }
 0x186   : > { %3332 = vmatpush.bf16.msrb.mxu0 %v4982_v58  ;;  %v4918_v58 = vor.u32 %v5681_v49, %v4915_v50 }
 0x188   : > { %3359 = vmatpush.bf16.msrb.mxu2 %v5222_v3 }
 0x189   : > { %3345 = vmatpush.bf16.msrb.mxu1 %v5110_v7  ;;  %3372 = vmatpush.bf16.msrb.mxu3 %v5350_v10 }
 0x18a   : > { %3333 = vmatpush.bf16.msrb.mxu0 %v4966_v13 }
 0x18c   : > { %3360 = vmatpush.bf16.msrb.mxu2 %v5206_v20 }
 0x18d   : > { %3346 = vmatpush.bf16.msrb.mxu1 %v5094_v24  ;;  %3373 = vmatpush.bf16.msrb.mxu3 %v5334_v27 }
 0x18e   : > { %3334 = vmatpush.bf16.msrb.mxu0 %v4950_v30 }
 0x190   : > { %3361 = vmatpush.bf16.msrb.mxu2 %v5190_v54 }
 0x191   : > { %3347 = vmatpush.bf16.msrb.mxu1 %v5078_v42  ;;  %3374 = vmatpush.bf16.msrb.mxu3 %v5318_v43 }
 0x192   : > { %3335 = vmatpush.bf16.msrb.mxu0 %v4934_v45 }
 0x194   : > { %3362 = vmatpush.bf16.msrb.mxu2 %v5174_v51 }
 0x195   : > { %3348 = vmatpush.bf16.msrb.mxu1 %v5062_v17  ;;  %3375 = vmatpush.bf16.msrb.mxu3 %v5302_v57 }
 0x196   : > { %3336 = vmatpush.bf16.msrb.mxu0 %v4918_v58 }
 0x197   : > { %3363 = vmatmul.bf16.vlgmr.msrb.gmra.mxu2 %v7838_v26 }
 0x198   : > { %3376 = vmatmul.bf16.vlgmr.msrb.gmra.mxu3 %v7846_v29  ;;  %v2337_v2 = vpop.f32.mrf.mxu0 }
 0x199   : > { %3349 = vmatpush.bf16.msrb.mxu1 %v5046_v1  ;;  %3337 = vmatmul.bf16.vlgmr.msrb.gmra.mxu0 %v7854_v35  ;;  %v2338_v3 = vadd.f32 %v2337_v2, %v7800_v63  ;;  %v2350_v4 = vpop.f32.mrf.mxu1  ;;  %v8423_v63 = vld [vmem:[%s8503_s4] sm:$0xf] }
 0x19a   : > { %v2363_v6 = vpop.f32.mrf.mxu2  ;;  %v3387_v20 = vperm.slane %v8423_v63, 0  ;;  %v3388_v54 = vperm.slane %v8423_v63, 1 }
 0x19b   : > { %v2351_v5 = vadd.f32 %v2350_v4, %v2338_v3  ;;  %v2376_v7 = vpop.f32.mrf.mxu3 }
 0x19c   : > { %3350 = vmatmul.bf16.vlgmr.msrb.gmra.mxu1 %v7876_v62 }
 0x19d   : > { %v2364_v9 = vadd.f32 %v2363_v6, %v2351_v5 }
 0x19f   : > { %v8418_v10 = vadd.f32 %v2376_v7, %v2364_v9 }
 0x1a0   : > { %v2339_v12 = vpop.f32.mrf.mxu0 }
 0x1a1   : > { %v2352_v26 = vpop.f32.mrf.mxu1 }
 0x1a2   : > { %v2365_v13 = vpop.f32.mrf.mxu2 }
 0x1a3   : > { %v2378_v29 = vpop.f32.mrf.mxu3 }
 0x1b8   : > { %v3182_v14 = vpop.f32.mrf.mxu0 }
 0x1b9   : > { %v3195_v35 = vpop.f32.mrf.mxu1 }
 0x1ba   : > { %v3196_v15 = vadd.f32 %v3195_v35, %v3182_v14  ;;  %v3208_v62 = vpop.f32.mrf.mxu2 }
 0x1bb   : > { %v3221_v16 = vpop.f32.mrf.mxu3 }
 0x1bc   : > { %v3209_v19 = vadd.f32 %v3208_v62, %v3196_v15 }
 0x1be   : > { %v3222_v59 = vadd.f32 %v3221_v16, %v3209_v19 }
 0x1c0   : > { %v3184_v21 = vpop.f32.mrf.mxu0  ;;  %v3381_v22 = vadd.f32 %v3222_v59, %v7992_v8 }
 0x1c1   : > { %v3197_v23 = vpop.f32.mrf.mxu1 }
 0x1c2   : > { %v3395_v24 = vadd.f32 %v3387_v20, %v3381_v22  ;;  %v3210_v25 = vpop.f32.mrf.mxu2  ;;  %v3389_v22 = vperm.slane %v8423_v63, 2 }
 0x1c3   : > { %v3223_v41 = vpop.f32.mrf.mxu3 }
 0x1c4   : > { %v3403_v27 = vadd.f32 %v3399_v53, %v3395_v24  ;;  %v3401_v24 = vld [vmem:[%s8429_s14 + $0x10] sm:$0xff] }
 0x1c6   : > { %3407 = vst [vmem:[%s8438_s8] sm:$0xff] %v3403_v27  ;;  %v3450_v8 = vmul.f32 %v3403_v27, %v3403_v27  ;;  %v3411_v36 = vrot.slane %v3403_v27, 4 }
 0x1c8   : > { %v3454_v39 = vrot.slane %v3450_v8, 4  ;;  %v3412_v44 = vadd.f32 %v3411_v36, %v3403_v27 }
 0x1ca   : > { %v3455_v48 = vadd.f32 %v3454_v39, %v3450_v8  ;;  %v3413_v50 = vrot.slane %v3412_v44, 2 }
 0x1cc   : > { %v3456_v17 = vrot.slane %v3455_v48, 2  ;;  %v3414_v58 = vadd.f32 %v3413_v50, %v3412_v44 }
 0x1ce   : > { %v3457_v1 = vadd.f32 %v3456_v17, %v3455_v48  ;;  %v3415_v2 = vrot.slane %v3414_v58, 1 }
 0x1d0   : > { %v3458_v6 = vrot.slane %v3457_v1, 1  ;;  %v3416_v9 = vadd.f32 %v3415_v2, %v3414_v58 }
 0x1d2   : > { %v3459_v14 = vadd.f32 %v3458_v6, %v3457_v1 }
 0x1d8   : > { %v3234_v28 = vpop.f32.mrf.mxu0 }
 0x1d9   : > { %v3247_v30 = vpop.f32.mrf.mxu1 }
 0x1da   : > { %v3248_v31 = vadd.f32 %v3247_v30, %v3234_v28  ;;  %v3260_v32 = vpop.f32.mrf.mxu2 }
 0x1db   : > { %v3273_v33 = vpop.f32.mrf.mxu3 }
 0x1dc   : > { %v3261_v34 = vadd.f32 %v3260_v32, %v3248_v31 }
 0x1de   : > { %v3274_v37 = vadd.f32 %v3273_v33, %v3261_v34 }
 0x1e0   : > { %v3236_v38 = vpop.f32.mrf.mxu0  ;;  %v3382_v42 = vadd.f32 %v3274_v37, %v8191_v56 }
 0x1e1   : > { %v3249_v43 = vpop.f32.mrf.mxu1 }
 0x1e2   : > { %v3396_v45 = vadd.f32 %v3388_v54, %v3382_v42  ;;  %v3262_v46 = vpop.f32.mrf.mxu2  ;;  %v3390_v42 = vperm.slane %v8423_v63, 3 }
 0x1e3   : > { %v3275_v47 = vpop.f32.mrf.mxu3 }
 0x1e4   : > { %v3404_v49 = vadd.f32 %v3400_v52, %v3396_v45  ;;  %v3402_v45 = vld [vmem:[%s8429_s14 + $0x18] sm:$0xff]  ;;  %s5865_s14 = scalar_lea.hbm %s5864_s13, 8 }
 0x1e5   : > { %p5866_p11 = scmp.ne.s32.totalorder %s5864_s13, %s5865_s14 }
 0x1e6   : > { %3408 = vst [vmem:[%s8438_s8 + $0x8] sm:$0xff] %v3404_v49  ;;  %v3417_v51 = vrot.slane %v3404_v49, 4  ;;  %v3451_v55 = vmul.f32 %v3404_v49, %v3404_v49 }
 0x1e7   : > { %p5867_p12 = pnand %p5866_p11, %p5992_p5 }
 0x1e8   : > { %v3418_v57 = vadd.f32 %v3417_v51, %v3404_v49  ;;  %v3460_v11 = vrot.slane %v3451_v55, 4 }
 0x1e9   : > { %p5868_p13 = pneg %p5867_p12 }
 0x1ea   : > { %v3419_v60 = vrot.slane %v3418_v57, 2  ;;  %v3461_v61 = vadd.f32 %v3460_v11, %v3451_v55 }
 0x1ec   : > { %v3420_v0 = vadd.f32 %v3419_v60, %v3418_v57  ;;  %v3462_v56 = vrot.slane %v3461_v61, 2 }
 0x1ee   : > { %v3421_v3 = vrot.slane %v3420_v0, 1  ;;  %v3463_v4 = vadd.f32 %v3462_v56, %v3461_v61 }
 0x1f0   : > { %v3422_v5 = vadd.f32 %v3421_v3, %v3420_v0  ;;  %v3464_v7 = vrot.slane %v3463_v4, 1 }
 0x1f2   : > { %v3439_v12 = vrot.slane %v3422_v5, 7  ;;  %v3465_v26 = vadd.f32 %v3464_v7, %v3463_v4 }
 0x1f4   : > { %v8445_v29 = vsel %vm3442_vm1, %v3416_v9, %v3439_v12  ;;  %v3482_v35 = vrot.slane %v3465_v26, 7 }
 0x1f6   : > { %v8447_v62 = vsel %vm3442_vm1, %v3459_v14, %v3482_v35 }
 0x1f8   : > { %v3286_v13 = vpop.f32.mrf.mxu0 }
 0x1f9   : > { %v3299_v15 = vpop.f32.mrf.mxu1 }
 0x1fa   : > { %v3300_v16 = vadd.f32 %v3299_v15, %v3286_v13  ;;  %v3312_v19 = vpop.f32.mrf.mxu2 }
 0x1fb   : > { %v3325_v59 = vpop.f32.mrf.mxu3 }
 0x1fc   : > { %v3313_v20 = vadd.f32 %v3312_v19, %v3300_v16 }
 0x1fe   : > { %v3326_v21 = vadd.f32 %v3325_v59, %v3313_v20 }
 0x200   : > { %v3288_v53 = vpop.f32.mrf.mxu0  ;;  %v3383_v23 = vadd.f32 %v3326_v21, %v8387_v40 }
 0x201   : > { %v3301_v25 = vpop.f32.mrf.mxu1 }
 0x202   : > { %v3397_v41 = vadd.f32 %v3389_v22, %v3383_v23  ;;  %v3314_v27 = vpop.f32.mrf.mxu2 }
 0x203   : > { %v3327_v28 = vpop.f32.mrf.mxu3 }
 0x204   : > { %v3405_v30 = vadd.f32 %v3401_v24, %v3397_v41 }
 0x206   : > { %3409 = vst [vmem:[%s8438_s8 + $0x10] sm:$0xff] %v3405_v30  ;;  %v3452_v32 = vmul.f32 %v3405_v30, %v3405_v30  ;;  %v3423_v34 = vrot.slane %v3405_v30, 4 }
 0x208   : > { %v3466_v54 = vrot.slane %v3452_v32, 4  ;;  %v3424_v39 = vadd.f32 %v3423_v34, %v3405_v30 }
 0x20a   : > { %v3467_v43 = vadd.f32 %v3466_v54, %v3452_v32  ;;  %v3425_v48 = vrot.slane %v3424_v39, 2 }
 0x20c   : > { %v3468_v51 = vrot.slane %v3467_v43, 2  ;;  %v3426_v17 = vadd.f32 %v3425_v48, %v3424_v39 }
 0x20e   : > { %v3469_v60 = vadd.f32 %v3468_v51, %v3467_v43  ;;  %v3427_v0 = vrot.slane %v3426_v17, 1 }
 0x210   : > { %v3470_v2 = vrot.slane %v3469_v60, 1  ;;  %v3428_v3 = vadd.f32 %v3427_v0, %v3426_v17 }
 0x212   : > { %v3471_v7 = vadd.f32 %v3470_v2, %v3469_v60  ;;  %v3440_v12 = vrot.slane %v3428_v3, 6 }
 0x214   : > { %v3483_v35 = vrot.slane %v3471_v7, 6 }
 0x216   : > { %v3338_v31 = vpop.f32.mrf.mxu0 }
 0x219   : > { %v3351_v33 = vpop.f32.mrf.mxu1 }
 0x21a   : > { %v3364_v8 = vpop.f32.mrf.mxu2  ;;  %v3352_v36 = vadd.f32 %v3351_v33, %v3338_v31 }
 0x21b   : > { %v3377_v37 = vpop.f32.mrf.mxu3 }
 0x21c   : > { %v3365_v38 = vadd.f32 %v3364_v8, %v3352_v36 }
 0x21e   : > { %v3378_v40 = vadd.f32 %v3377_v37, %v3365_v38  ;;  %v3340_v52 = vpop.f32.mrf.mxu0 }
 0x220   : > { %v3384_v44 = vadd.f32 %v3378_v40, %v8418_v10 }
 0x221   : > { %v3353_v46 = vpop.f32.mrf.mxu1 }
 0x222   : > { %v3366_v47 = vpop.f32.mrf.mxu2  ;;  %v3398_v49 = vadd.f32 %v3390_v42, %v3384_v44 }
 0x223   : > { %v3379_v50 = vpop.f32.mrf.mxu3 }
 0x224   : > { %v3406_v55 = vadd.f32 %v3402_v45, %v3398_v49 }
 0x226   : > { %3410 = vst [vmem:[%s8438_s8 + $0x18] sm:$0xff] %v3406_v55  ;;  %v3429_v57 = vrot.slane %v3406_v55, 4  ;;  %v3453_v11 = vmul.f32 %v3406_v55, %v3406_v55  ;;  %s5869_s8 = scalar_lea.hbm %s8506_s7, 16 }
 0x227   : > { %p5871_p1 = scmp.lt.s32.totalorder %s5869_s8, %s5865_s14 }
 0x228   : > { %v3430_v63 = vadd.f32 %v3429_v57, %v3406_v55  ;;  %v3472_v58 = vrot.slane %v3453_v11, 4 }
 0x229   : > { %p5872_p2 = por %p5871_p1, %p5870_p0 }
 0x22a   : > { %v3431_v61 = vrot.slane %v3430_v63, 2  ;;  %v3473_v10 = vadd.f32 %v3472_v58, %v3453_v11 }
 0x22b   : > { %p5873_p3 = pnand %p5872_p2, %p5868_p13 }
 0x22c   : > { %v3432_v56 = vadd.f32 %v3431_v61, %v3430_v63  ;;  %v3474_v1 = vrot.slane %v3473_v10, 2 }
 0x22e   : > { %v3433_v4 = vrot.slane %v3432_v56, 1  ;;  %v3475_v5 = vadd.f32 %v3474_v1, %v3473_v10 }
 0x230   : > { %v3434_v6 = vadd.f32 %v3433_v4, %v3432_v56  ;;  %v3476_v9 = vrot.slane %v3475_v5, 1 }
 0x232   : > { %v3441_v26 = vrot.slane %v3434_v6, 5  ;;  %v3477_v13 = vadd.f32 %v3476_v9, %v3475_v5 }
 0x234   : > { %v3445_v14 = vsel %vm3444_vm2, %v3440_v12, %v3441_v26  ;;  %v3484_v15 = vrot.slane %v3477_v13, 5 }
 0x235   : > { %v3447_v16 = vsel %vm3446_vm3, %v8445_v29, %v3445_v14 }
 0x236   : > { %3449 = vst.msk [vmem:[%s294_s22] ss:$2 sm:$0xf] %vm6834_vm0, %v3447_v16  ;;  %v3486_v19 = vsel %vm3444_vm2, %v3483_v35, %v3484_v15 }
 0x237   : > { %v3487_v59 = vsel %vm3446_vm3, %v8447_v62, %v3486_v19 }
 0x238   : > { %5415 = vst.msk [vmem:[%s294_s22 + $0x1] ss:$2 sm:$0xf] %vm6834_vm0, %v3487_v59 }
 0x239   : > { %5876 = shalt.err (!%p5873_p3)
}
 0x23a   : > { %5809 = dma.vmem_to_hbm [thread:$0]  (%p5992_p5), %s3514_s23, 128, %s3516_s9, %s3497_s28  }
 0x23b PF: > { %p5815_p4 = scmp.ge.s32.totalorder %s5911_s27, 2  ;;  %s3535_s29 = sand.u32 1, %s5899_s24  }
 0x23c   : > { %s3536_s19 = scalar_lea.sflag [#allocation4], %s3535_s29 }
 0x23d   : > { %p5812_p7 = pnand %p5815_p4, %p5996_p6 }
 0x23f   : > { %p5813_p8 = pneg %p5812_p7 }
 0x241   : > { %5894 = dma.done.wait (%p5813_p8), %s3536_s19, 128  }
 0x242   : > { %5896 = vsyncadd (%p5813_p8), %s3536_s19, 4294967168  ;;  %p18_p9 = scmp.ge.s32.totalorder %s5979_s30, 4   ;;  %s8511_s24 = smov %s5903_s25 }
 0x243   : > { %s8512_s25 = smov %s5907_s26  ;;  %s8513_s26 = smov %s5990_s10 }
 0x244   : > { %s8514_s27 = smov %s5979_s30  ;;  %20 = sbr.rel (!%p18_p9) target bundleno = 3 (0x3), region = 98 }
 0x249   :  { %3542 = vsyncpa [#allocation4], 1 }
 0x24a   :  { %3544 = vsyncpa [#allocation4 + $0x1], 1 }

</bundles_post_ra>
